<compile_context>
chip_gen: v7x
topology: tpu7x:2x2x1
jax: 0.10.0
libtpu: 0.0.40
codegen_flags: <defaults>
</compile_context>

<pallas_src>
import jax
import jax.numpy as jnp
from jax import lax
from jax.experimental import pallas as pl
from jax.experimental.pallas import tpu as pltpu


F_RAW = 49 * 64     # 3136 = FC output features
F_PAD = 3328        # 26 * 128: enables a 2-way 'parallel' split of the F axis


# ----------------------------------------------------------------------------
# Kernel 1: K-tiled matmul (bf16 weight stream, f32 accumulate) with fused
#           BatchNorm1d + ReLU epilogue on the last reduction step.
# ----------------------------------------------------------------------------
def linear_bn_relu(x, w_t, gamma, beta, *, eps=1e-5, tk=256, tf=None):
    """relu(batchnorm1d(x @ w_t)) with training-mode batch statistics.

    x: (B, K) f32;  w_t: (K, F) bf16;  gamma/beta: (F,) f32.  Returns (B, F) f32.
    """
    B, K = x.shape
    K2, F = w_t.shape
    assert K == K2
    if K % tk != 0:
        tk = 128 if K % 128 == 0 else K
    if tf is None:
        tf = F // 2 if (F % 2 == 0 and (F // 2) % 128 == 0) else F
    assert F % tf == 0 and K % tk == 0
    nf, nk = F // tf, K // tk

    def kernel(x_ref, w_ref, g_ref, b_ref, o_ref):
        k = pl.program_id(1)

        @pl.when(k == 0)
        def _():
            o_ref[...] = jnp.zeros_like(o_ref)

        # Accumulate directly into the resident f32 output block (no scratch).
        o_ref[...] += jnp.dot(x_ref[...], w_ref[...].astype(jnp.float32),
                              preferred_element_type=jnp.float32)

        @pl.when(k == pl.num_programs(1) - 1)
        def _():
            h = o_ref[...]                                    # (B, tf), resident
            mean = jnp.mean(h, axis=0, keepdims=True)
            hc = h - mean
            var = jnp.mean(hc * hc, axis=0, keepdims=True)    # biased, as PyTorch
            scale = g_ref[...] * lax.rsqrt(var + eps)
            o_ref[...] = jnp.maximum(hc * scale + b_ref[...], 0.0)

    return pl.pallas_call(
        kernel,
        out_shape=jax.ShapeDtypeStruct((B, F), jnp.float32),
        grid_spec=pltpu.PrefetchScalarGridSpec(
            num_scalar_prefetch=0,
            grid=(nf, nk),                       # reduction axis last
            in_specs=[pl.BlockSpec((B, tk), lambda f, k: (0, k)),
                      pl.BlockSpec((tk, tf), lambda f, k: (k, f)),
                      pl.BlockSpec((1, tf), lambda f, k: (0, f)),
                      pl.BlockSpec((1, tf), lambda f, k: (0, f))],
            out_specs=pl.BlockSpec((B, tf), lambda f, k: (0, f)),
        ),
        compiler_params=pltpu.CompilerParams(
            dimension_semantics=("parallel", "arbitrary"),
            vmem_limit_bytes=32 << 20),
    )(x, w_t, gamma.reshape(1, F), beta.reshape(1, F))


# ----------------------------------------------------------------------------
# Kernel 2: fused relu(x * scale + shift) per-column affine (VPU).
# ----------------------------------------------------------------------------
def _affine_relu_kernel(x_ref, s_ref, b_ref, o_ref):
    o_ref[...] = jnp.maximum(
        x_ref[...] * s_ref[...] + b_ref[...], 0.0).astype(o_ref.dtype)


def affine_relu_cols(x2d, scale, shift, *, target_block_bytes=2 << 20):
    """relu(x2d * scale[None, :] + shift[None, :]) with per-column scale/shift."""
    rows, C = x2d.shape
    row_bytes = C * x2d.dtype.itemsize
    # Largest power-of-two row split whose block is <= ~2 MiB: big enough to
    # amortize the ~0.35 us/step pipeline overhead, small enough that the
    # double-buffered in+out footprint (~4x block) fits v5e's 16 MiB default
    # scoped VMEM without an override.  Also force >= 2 'parallel' grid steps
    # (v7x megacore) whenever the array is big enough for that to be free.
    tile = rows
    while tile % 16 == 0 and tile * row_bytes > target_block_bytes:
        tile //= 2
    if tile == rows and rows % 16 == 0 and rows * row_bytes > (256 << 10):
        tile = rows // 2
    grid = (rows // tile,)
    return pl.pallas_call(
        _affine_relu_kernel,
        out_shape=jax.ShapeDtypeStruct((rows, C), x2d.dtype),
        grid_spec=pltpu.PrefetchScalarGridSpec(
            num_scalar_prefetch=0,
            grid=grid,
            in_specs=[pl.BlockSpec((tile, C), lambda i: (i, 0)),
                      pl.BlockSpec((1, C), lambda i: (0, 0)),
                      pl.BlockSpec((1, C), lambda i: (0, 0))],
            out_specs=pl.BlockSpec((tile, C), lambda i: (i, 0)),
        ),
        compiler_params=pltpu.CompilerParams(
            dimension_semantics=("parallel",),
            vmem_limit_bytes=32 << 20),
    )(x2d, scale.reshape(1, C), shift.reshape(1, C))


# ----------------------------------------------------------------------------
# BatchNorm2d + ReLU (training-mode batch stats) on an NHWC tensor.
# ----------------------------------------------------------------------------
def bn2d_relu_nhwc(x, gamma, beta, *, eps=1e-5):
    N, H, W, C = x.shape
    rows = N * H * W
    x2d = x.reshape(rows, C)                        # free view (C is minor)
    # Single fused pass for the batch stats: sum and sum-of-squares share one
    # read of the activation (jnp.mean + jnp.var would read it twice).
    s1 = jnp.sum(x2d, axis=0)
    s2 = jnp.sum(x2d * x2d, axis=0)
    mean = s1 / rows
    var = jnp.maximum(s2 / rows - mean * mean, 0.0)
    scale = gamma * lax.rsqrt(var + eps)            # (C,)
    shift = beta - mean * scale                     # (C,)
    # Fold narrow channel counts into a full 128-lane view so the Pallas affine
    # stores stay lane-dense (C=64 -> (rows/2, 128) with tiled scale/shift).
    fold = 1
    if C < 128 and 128 % C == 0 and rows % (128 // C) == 0:
        fold = 128 // C
    y2d = affine_relu_cols(x2d.reshape(rows // fold, C * fold),
                           jnp.tile(scale, fold), jnp.tile(shift, fold))
    return y2d.reshape(N, H, W, C)


# ----------------------------------------------------------------------------
# ConvTranspose2d (PyTorch semantics) via lhs-dilated convolution (XLA, NHWC).
# ----------------------------------------------------------------------------
def deconv_nhwc(x, w_hwio, b=None, *, stride=2, padding=1, output_padding=1):
    """x: (N, H, W, Cin); w_hwio: (kh, kw, Cin, Cout) (already flipped)."""
    kh, kw = w_hwio.shape[0], w_hwio.shape[1]
    pad_h = (kh - 1 - padding, kh - 1 - padding + output_padding)
    pad_w = (kw - 1 - padding, kw - 1 - padding + output_padding)
    y = lax.conv_general_dilated(
        x, w_hwio,
        window_strides=(1, 1),
        padding=(pad_h, pad_w),
        lhs_dilation=(stride, stride),
        rhs_dilation=(1, 1),
        dimension_numbers=("NHWC", "HWIO", "NHWC"))
    if b is not None:
        y = y + b[None, None, None, :]
    return y


def conv_transpose2d_nchw(x, w, b=None, *, stride=2, padding=1, output_padding=1):
    """Reference-path NCHW transposed conv.  w: (Cin, Cout, kh, kw)."""
    kh, kw = w.shape[2], w.shape[3]
    w_oihw = jnp.transpose(w[:, :, ::-1, ::-1], (1, 0, 2, 3))
    pad_h = (kh - 1 - padding, kh - 1 - padding + output_padding)
    pad_w = (kw - 1 - padding, kw - 1 - padding + output_padding)
    y = lax.conv_general_dilated(
        x, w_oihw,
        window_strides=(1, 1),
        padding=(pad_h, pad_w),
        lhs_dilation=(stride, stride),
        rhs_dilation=(1, 1),
        dimension_numbers=("NCHW", "OIHW", "NCHW"))
    if b is not None:
        y = y + b[None, :, None, None]
    return y


# ----------------------------------------------------------------------------
# Full ReCon224 forward (Pallas path, NHWC decoder) and a plain-XLA reference.
# ----------------------------------------------------------------------------
def recon224_forward(kp, x, *, eps=1e-5):
    N = x.shape[0]
    h = linear_bn_relu(x, kp["fc_w_t_bf16"], kp["bn0_gamma"], kp["bn0_beta"],
                       eps=eps)                         # (N, F_PAD) f32
    h = h[:, :F_RAW].reshape(N, 64, 7, 7)               # Lambda(reshape), NCHW
    h = jnp.transpose(h, (0, 2, 3, 1))                  # -> NHWC (tiny, ~25 KB)
    for i in range(4):
        h = deconv_nhwc(h, kp[f"deconv{i}_w_hwio"])
        h = bn2d_relu_nhwc(h, kp[f"bn{i + 1}_gamma"], kp[f"bn{i + 1}_beta"],
                           eps=eps)
    h = deconv_nhwc(h, kp["deconv4_w_hwio"], kp["deconv4_b"])
    return jnp.transpose(h, (0, 3, 1, 2))               # NCHW, matches PyTorch


def recon224_reference(params, x, *, eps=1e-5):
    """Plain-XLA NCHW reference.  The fc weight is rounded through bf16 so the
    check isolates kernel correctness from the deliberate bf16 weight
    streaming used on the Pallas path."""
    w = params["fc_w_t"].astype(jnp.bfloat16).astype(jnp.float32)
    h = jnp.dot(x, w)
    mean, var = jnp.mean(h, axis=0), jnp.var(h, axis=0)
    sc = params["bn0_gamma"] * lax.rsqrt(var + eps)
    sh = params["bn0_beta"] - mean * sc
    h = jnp.maximum(h * sc + sh, 0.0)
    h = h.reshape(-1, 64, 7, 7)
    for i in range(4):
        h = conv_transpose2d_nchw(h, params[f"deconv{i}_w"])
        mean = jnp.mean(h, axis=(0, 2, 3))
        var = jnp.var(h, axis=(0, 2, 3))
        sc = params[f"bn{i + 1}_gamma"] * lax.rsqrt(var + eps)
        sh = params[f"bn{i + 1}_beta"] - mean * sc
        h = jnp.maximum(h * sc[None, :, None, None] + sh[None, :, None, None], 0.0)
    h = conv_transpose2d_nchw(h, params["deconv4_w"], params["deconv4_b"])
    return h


# ----------------------------------------------------------------------------
# Deterministic parameter init (PyTorch-style uniform fan-in bounds) and
# one-time kernel-side parameter preparation (bf16 cast, padding, HWIO layout).
# ----------------------------------------------------------------------------
def init_params(key, indim=2048):
    ks = jax.random.split(key, 20)

    def uni(k, shape, fan_in):
        bound = fan_in ** -0.5
        return jax.random.uniform(k, shape, jnp.float32, -bound, bound)

    p = {}
    p["fc_w_t"] = uni(ks[0], (indim, F_RAW), indim)          # Linear weight^T
    p["bn0_gamma"] = 1.0 + 0.1 * jax.random.normal(ks[1], (F_RAW,), jnp.float32)
    p["bn0_beta"] = 0.1 * jax.random.normal(ks[2], (F_RAW,), jnp.float32)

    chans = [(64, 128), (128, 128), (128, 128), (128, 64), (64, 3)]
    for i, (cin, cout) in enumerate(chans):
        p[f"deconv{i}_w"] = uni(ks[3 + 3 * i], (cin, cout, 3, 3), cin * 9)
        if i < 4:
            p[f"bn{i + 1}_gamma"] = 1.0 + 0.1 * jax.random.normal(
                ks[4 + 3 * i], (cout,), jnp.float32)
            p[f"bn{i + 1}_beta"] = 0.1 * jax.random.normal(
                ks[5 + 3 * i], (cout,), jnp.float32)
    p["deconv4_b"] = 0.1 * jax.random.normal(ks[19], (3,), jnp.float32)
    return p


def prepare_kernel_params(p):
    """One-time (outside jit) prep: bf16 + F-padding for the FC weight, padded
    bn0 affine params, and pre-flipped HWIO deconv weights for NHWC convs."""
    kp = {}
    w = p["fc_w_t"]
    K = w.shape[0]
    w_pad = jnp.zeros((K, F_PAD), jnp.float32).at[:, :F_RAW].set(w)
    kp["fc_w_t_bf16"] = w_pad.astype(jnp.bfloat16)
    kp["bn0_gamma"] = jnp.zeros((F_PAD,), jnp.float32).at[:F_RAW].set(p["bn0_gamma"])
    kp["bn0_beta"] = jnp.zeros((F_PAD,), jnp.float32).at[:F_RAW].set(p["bn0_beta"])
    for i in range(5):
        w_pt = p[f"deconv{i}_w"]                              # (Cin, Cout, kh, kw)
        kp[f"deconv{i}_w_hwio"] = jnp.transpose(w_pt[:, :, ::-1, ::-1],
                                                (2, 3, 0, 1))  # (kh, kw, Cin, Cout)
        if i < 4:
            kp[f"bn{i + 1}_gamma"] = p[f"bn{i + 1}_gamma"]
            kp[f"bn{i + 1}_beta"] = p[f"bn{i + 1}_beta"]
    kp["deconv4_b"] = p["deconv4_b"]
    return kp


if __name__ == "__main__":
    key = jax.random.PRNGKey(0)
    pkey, xkey = jax.random.split(key)

    indim = 2048
    params = init_params(pkey, indim=indim)
    kparams = prepare_kernel_params(params)
    x = jax.random.normal(xkey, (2, indim), dtype=jnp.float32)   # batch = 2

    y = jax.block_until_ready(jax.jit(recon224_forward)(kparams, x))
    assert y.shape == (2, 3, 224, 224) and y.dtype == jnp.float32

    y_ref = jax.block_until_ready(jax.jit(recon224_reference)(params, x))
    # Tolerance absorbs MXU-vs-XLA accumulation order and single-pass-vs-two-pass
    # batch-variance differences (both paths use the same bf16-rounded FC weight).
    err = jnp.max(jnp.abs(y - y_ref)) / (jnp.max(jnp.abs(y_ref)) + 1e-6)
    assert float(err) < 2e-2, f"max relative error {float(err)}"

    print("KERNEL_OK")
</pallas_src>

<mosaic_0001>
module attributes {stable_mosaic.version = 11 : i64} {
  func.func @kernel(%arg0: i32, %arg1: i32, %arg2: memref<2x256xf32, #tpu.memory_space<vmem>>, %arg3: memref<256x1664xbf16, #tpu.memory_space<vmem>>, %arg4: memref<1x1664xf32, #tpu.memory_space<vmem>>, %arg5: memref<1x1664xf32, #tpu.memory_space<vmem>>, %arg6: memref<2x1664xf32, #tpu.memory_space<vmem>>) attributes {dimension_semantics = [#tpu.dimension_semantics<parallel>, #tpu.dimension_semantics<arbitrary>], iteration_bounds = array<i64: 2, 8>, scalar_prefetch = 0 : i64, scratch_operands = 0 : i64, tpu.core_type = #tpu.core_type<tc>, window_params = [{transform_indices = @transform_0, window_bounds = array<i64: 2, 256>}, {transform_indices = @transform_1, window_bounds = array<i64: 256, 1664>}, {transform_indices = @transform_2, window_bounds = array<i64: 1, 1664>}, {transform_indices = @transform_3, window_bounds = array<i64: 1, 1664>}, {transform_indices = @transform_4, window_bounds = array<i64: 2, 1664>}]} {
    %c0_i32 = arith.constant 0 : i32
    %0 = arith.cmpi eq, %arg1, %c0_i32 : i32
    %1 = arith.extui %0 : i1 to i32
    %c0_i32_0 = arith.constant 0 : i32
    %2 = arith.cmpi ne, %1, %c0_i32_0 : i32
    scf.if %2 {
      %cst_9 = arith.constant 0.000000e+00 : f32
      %13 = vector.broadcast %cst_9 : f32 to vector<2x1664xf32>
      %c0_10 = arith.constant 0 : index
      %c0_11 = arith.constant 0 : index
      %14 = vector.load %arg6[%c0_10, %c0_11] : memref<2x1664xf32, #tpu.memory_space<vmem>>, vector<2x1664xf32>
      tpu.vector_store %arg6[%c0_10, %c0_11], %13 {strides = array<i32>} : memref<2x1664xf32, #tpu.memory_space<vmem>>, vector<2x1664xf32>,
    } else {
    }
    %c0 = arith.constant 0 : index
    %c0_1 = arith.constant 0 : index
    %3 = vector.load %arg6[%c0, %c0_1] : memref<2x1664xf32, #tpu.memory_space<vmem>>, vector<2x1664xf32>
    %c0_2 = arith.constant 0 : index
    %c0_3 = arith.constant 0 : index
    %4 = vector.load %arg2[%c0_2, %c0_3] : memref<2x256xf32, #tpu.memory_space<vmem>>, vector<2x256xf32>
    %c0_4 = arith.constant 0 : index
    %c0_5 = arith.constant 0 : index
    %5 = vector.load %arg3[%c0_4, %c0_5] : memref<256x1664xbf16, #tpu.memory_space<vmem>>, vector<256x1664xbf16>
    %6 = arith.extf %5 : vector<256x1664xbf16> to vector<256x1664xf32>
    %cst = arith.constant dense<0.000000e+00> : vector<2x1664xf32>
    %7 = tpu.matmul %4, %6, %cst {dimension_numbers = #tpu.dot_dimension_numbers<[1], [0], [0], [1], [0, 0, 1, 1], [], []>} : vector<2x256xf32>, vector<256x1664xf32>, vector<2x1664xf32> -> vector<2x1664xf32>
    %8 = arith.addf %3, %7 : vector<2x1664xf32>
    %c0_6 = arith.constant 0 : index
    %c0_7 = arith.constant 0 : index
    %9 = vector.load %arg6[%c0_6, %c0_7] : memref<2x1664xf32, #tpu.memory_space<vmem>>, vector<2x1664xf32>
    tpu.vector_store %arg6[%c0_6, %c0_7], %8 {strides = array<i32>} : memref<2x1664xf32, #tpu.memory_space<vmem>>, vector<2x1664xf32>,
    %c7_i32 = arith.constant 7 : i32
    %10 = arith.cmpi eq, %arg1, %c7_i32 : i32
    %11 = arith.extui %10 : i1 to i32
    %c0_i32_8 = arith.constant 0 : i32
    %12 = arith.cmpi ne, %11, %c0_i32_8 : i32
    scf.if %12 {
      %c0_9 = arith.constant 0 : index
      %c0_10 = arith.constant 0 : index
      %13 = vector.load %arg6[%c0_9, %c0_10] : memref<2x1664xf32, #tpu.memory_space<vmem>>, vector<2x1664xf32>
      %cst_11 = arith.constant dense<0.000000e+00> : vector<1664xf32>
      %14 = vector.multi_reduction <add>, %13, %cst_11 [0] : vector<2x1664xf32> to vector<1664xf32>
      %15 = vector.shape_cast %14 : vector<1664xf32> to vector<1x1664xf32>
      %cst_12 = arith.constant 2.000000e+00 : f32
      %16 = vector.broadcast %cst_12 : f32 to vector<1x1664xf32>
      %17 = arith.divf %15, %16 : vector<1x1664xf32>
      %18 = vector.broadcast %17 : vector<1x1664xf32> to vector<2x1664xf32>
      %19 = arith.subf %13, %18 : vector<2x1664xf32>
      %20 = arith.mulf %19, %19 : vector<2x1664xf32>
      %cst_13 = arith.constant dense<0.000000e+00> : vector<1664xf32>
      %21 = vector.multi_reduction <add>, %20, %cst_13 [0] : vector<2x1664xf32> to vector<1664xf32>
      %22 = vector.shape_cast %21 : vector<1664xf32> to vector<1x1664xf32>
      %cst_14 = arith.constant 2.000000e+00 : f32
      %23 = vector.broadcast %cst_14 : f32 to vector<1x1664xf32>
      %24 = arith.divf %22, %23 : vector<1x1664xf32>
      %c0_15 = arith.constant 0 : index
      %c0_16 = arith.constant 0 : index
      %25 = vector.load %arg4[%c0_15, %c0_16] : memref<1x1664xf32, #tpu.memory_space<vmem>>, vector<1x1664xf32>
      %cst_17 = arith.constant 9.99999974E-6 : f32
      %26 = vector.broadcast %cst_17 : f32 to vector<1x1664xf32>
      %27 = arith.addf %24, %26 : vector<1x1664xf32>
      %28 = math.rsqrt %27 : vector<1x1664xf32>
      %29 = arith.mulf %25, %28 : vector<1x1664xf32>
      %30 = vector.broadcast %29 : vector<1x1664xf32> to vector<2x1664xf32>
      %31 = arith.mulf %19, %30 : vector<2x1664xf32>
      %c0_18 = arith.constant 0 : index
      %c0_19 = arith.constant 0 : index
      %32 = vector.load %arg5[%c0_18, %c0_19] : memref<1x1664xf32, #tpu.memory_space<vmem>>, vector<1x1664xf32>
      %33 = vector.broadcast %32 : vector<1x1664xf32> to vector<2x1664xf32>
      %34 = arith.addf %31, %33 : vector<2x1664xf32>
      %cst_20 = arith.constant 0.000000e+00 : f32
      %35 = vector.broadcast %cst_20 : f32 to vector<2x1664xf32>
      %36 = arith.maximumf %34, %35 : vector<2x1664xf32>
      %c0_21 = arith.constant 0 : index
      %c0_22 = arith.constant 0 : index
      %37 = vector.load %arg6[%c0_21, %c0_22] : memref<2x1664xf32, #tpu.memory_space<vmem>>, vector<2x1664xf32>
      tpu.vector_store %arg6[%c0_21, %c0_22], %36 {strides = array<i32>} : memref<2x1664xf32, #tpu.memory_space<vmem>>, vector<2x1664xf32>,
    } else {
    }
    return
  }
  func.func @transform_0(%arg0: i32, %arg1: i32) -> (i32, i32) {
    %c0_i32 = arith.constant 0 : i32
    %c0_i32_0 = arith.constant 0 : i32
    return %c0_i32, %arg1 : i32, i32
  }
  func.func @transform_1(%arg0: i32, %arg1: i32) -> (i32, i32) {
    %c0_i32 = arith.constant 0 : i32
    return %arg1, %arg0 : i32, i32
  }
  func.func @transform_2(%arg0: i32, %arg1: i32) -> (i32, i32) {
    %c0_i32 = arith.constant 0 : i32
    %c0_i32_0 = arith.constant 0 : i32
    return %c0_i32, %arg0 : i32, i32
  }
  func.func @transform_3(%arg0: i32, %arg1: i32) -> (i32, i32) {
    %c0_i32 = arith.constant 0 : i32
    %c0_i32_0 = arith.constant 0 : i32
    return %c0_i32, %arg0 : i32, i32
  }
  func.func @transform_4(%arg0: i32, %arg1: i32) -> (i32, i32) {
    %c0_i32 = arith.constant 0 : i32
    %c0_i32_0 = arith.constant 0 : i32
    return %c0_i32, %arg0 : i32, i32
  }
}

module attributes {stable_mosaic.version = 11 : i64} {
  func.func @_affine_relu_kernel(%arg0: i32, %arg1: memref<392x128xf32, #tpu.memory_space<vmem>>, %arg2: memref<1x128xf32, #tpu.memory_space<vmem>>, %arg3: memref<1x128xf32, #tpu.memory_space<vmem>>, %arg4: memref<392x128xf32, #tpu.memory_space<vmem>>) attributes {dimension_semantics = [#tpu.dimension_semantics<parallel>], iteration_bounds = array<i64: 1>, scalar_prefetch = 0 : i64, scratch_operands = 0 : i64, tpu.core_type = #tpu.core_type<tc>, window_params = [{transform_indices = @transform_0, window_bounds = array<i64: 392, 128>}, {pipeline_mode = #tpu.pipeline_mode<synchronous>, transform_indices = @transform_1, window_bounds = array<i64: 1, 128>}, {pipeline_mode = #tpu.pipeline_mode<synchronous>, transform_indices = @transform_2, window_bounds = array<i64: 1, 128>}, {transform_indices = @transform_3, window_bounds = array<i64: 392, 128>}]} {
    %c0 = arith.constant 0 : index
    %c0_0 = arith.constant 0 : index
    %0 = vector.load %arg1[%c0, %c0_0] : memref<392x128xf32, #tpu.memory_space<vmem>>, vector<392x128xf32>
    %c0_1 = arith.constant 0 : index
    %c0_2 = arith.constant 0 : index
    %1 = vector.load %arg2[%c0_1, %c0_2] : memref<1x128xf32, #tpu.memory_space<vmem>>, vector<1x128xf32>
    %2 = vector.broadcast %1 : vector<1x128xf32> to vector<392x128xf32>
    %3 = arith.mulf %0, %2 : vector<392x128xf32>
    %c0_3 = arith.constant 0 : index
    %c0_4 = arith.constant 0 : index
    %4 = vector.load %arg3[%c0_3, %c0_4] : memref<1x128xf32, #tpu.memory_space<vmem>>, vector<1x128xf32>
    %5 = vector.broadcast %4 : vector<1x128xf32> to vector<392x128xf32>
    %6 = arith.addf %3, %5 : vector<392x128xf32>
    %cst = arith.constant 0.000000e+00 : f32
    %7 = vector.broadcast %cst : f32 to vector<392x128xf32>
    %8 = arith.maximumf %6, %7 : vector<392x128xf32>
    %c0_5 = arith.constant 0 : index
    %c0_6 = arith.constant 0 : index
    %9 = vector.load %arg4[%c0_5, %c0_6] : memref<392x128xf32, #tpu.memory_space<vmem>>, vector<392x128xf32>
    tpu.vector_store %arg4[%c0_5, %c0_6], %8 {strides = array<i32>} : memref<392x128xf32, #tpu.memory_space<vmem>>, vector<392x128xf32>,
    return
  }
  func.func @transform_0(%arg0: i32) -> (i32, i32) {
    %c0_i32 = arith.constant 0 : i32
    %c0_i32_0 = arith.constant 0 : i32
    return %arg0, %c0_i32 : i32, i32
  }
  func.func @transform_1(%arg0: i32) -> (i32, i32) {
    %c0_i32 = arith.constant 0 : i32
    %c0_i32_0 = arith.constant 0 : i32
    %c0_i32_1 = arith.constant 0 : i32
    return %c0_i32, %c0_i32_0 : i32, i32
  }
  func.func @transform_2(%arg0: i32) -> (i32, i32) {
    %c0_i32 = arith.constant 0 : i32
    %c0_i32_0 = arith.constant 0 : i32
    %c0_i32_1 = arith.constant 0 : i32
    return %c0_i32, %c0_i32_0 : i32, i32
  }
  func.func @transform_3(%arg0: i32) -> (i32, i32) {
    %c0_i32 = arith.constant 0 : i32
    %c0_i32_0 = arith.constant 0 : i32
    return %arg0, %c0_i32 : i32, i32
  }
}

module attributes {stable_mosaic.version = 11 : i64} {
  func.func @_affine_relu_kernel(%arg0: i32, %arg1: memref<784x128xf32, #tpu.memory_space<vmem>>, %arg2: memref<1x128xf32, #tpu.memory_space<vmem>>, %arg3: memref<1x128xf32, #tpu.memory_space<vmem>>, %arg4: memref<784x128xf32, #tpu.memory_space<vmem>>) attributes {dimension_semantics = [#tpu.dimension_semantics<parallel>], iteration_bounds = array<i64: 2>, scalar_prefetch = 0 : i64, scratch_operands = 0 : i64, tpu.core_type = #tpu.core_type<tc>, window_params = [{transform_indices = @transform_0, window_bounds = array<i64: 784, 128>}, {pipeline_mode = #tpu.pipeline_mode<synchronous>, transform_indices = @transform_1, window_bounds = array<i64: 1, 128>}, {pipeline_mode = #tpu.pipeline_mode<synchronous>, transform_indices = @transform_2, window_bounds = array<i64: 1, 128>}, {transform_indices = @transform_3, window_bounds = array<i64: 784, 128>}]} {
    %c0 = arith.constant 0 : index
    %c0_0 = arith.constant 0 : index
    %0 = vector.load %arg1[%c0, %c0_0] : memref<784x128xf32, #tpu.memory_space<vmem>>, vector<784x128xf32>
    %c0_1 = arith.constant 0 : index
    %c0_2 = arith.constant 0 : index
    %1 = vector.load %arg2[%c0_1, %c0_2] : memref<1x128xf32, #tpu.memory_space<vmem>>, vector<1x128xf32>
    %2 = vector.broadcast %1 : vector<1x128xf32> to vector<784x128xf32>
    %3 = arith.mulf %0, %2 : vector<784x128xf32>
    %c0_3 = arith.constant 0 : index
    %c0_4 = arith.constant 0 : index
    %4 = vector.load %arg3[%c0_3, %c0_4] : memref<1x128xf32, #tpu.memory_space<vmem>>, vector<1x128xf32>
    %5 = vector.broadcast %4 : vector<1x128xf32> to vector<784x128xf32>
    %6 = arith.addf %3, %5 : vector<784x128xf32>
    %cst = arith.constant 0.000000e+00 : f32
    %7 = vector.broadcast %cst : f32 to vector<784x128xf32>
    %8 = arith.maximumf %6, %7 : vector<784x128xf32>
    %c0_5 = arith.constant 0 : index
    %c0_6 = arith.constant 0 : index
    %9 = vector.load %arg4[%c0_5, %c0_6] : memref<784x128xf32, #tpu.memory_space<vmem>>, vector<784x128xf32>
    tpu.vector_store %arg4[%c0_5, %c0_6], %8 {strides = array<i32>} : memref<784x128xf32, #tpu.memory_space<vmem>>, vector<784x128xf32>,
    return
  }
  func.func @transform_0(%arg0: i32) -> (i32, i32) {
    %c0_i32 = arith.constant 0 : i32
    %c0_i32_0 = arith.constant 0 : i32
    return %arg0, %c0_i32 : i32, i32
  }
  func.func @transform_1(%arg0: i32) -> (i32, i32) {
    %c0_i32 = arith.constant 0 : i32
    %c0_i32_0 = arith.constant 0 : i32
    %c0_i32_1 = arith.constant 0 : i32
    return %c0_i32, %c0_i32_0 : i32, i32
  }
  func.func @transform_2(%arg0: i32) -> (i32, i32) {
    %c0_i32 = arith.constant 0 : i32
    %c0_i32_0 = arith.constant 0 : i32
    %c0_i32_1 = arith.constant 0 : i32
    return %c0_i32, %c0_i32_0 : i32, i32
  }
  func.func @transform_3(%arg0: i32) -> (i32, i32) {
    %c0_i32 = arith.constant 0 : i32
    %c0_i32_0 = arith.constant 0 : i32
    return %arg0, %c0_i32 : i32, i32
  }
}

module attributes {stable_mosaic.version = 11 : i64} {
  func.func @_affine_relu_kernel(%arg0: i32, %arg1: memref<3136x128xf32, #tpu.memory_space<vmem>>, %arg2: memref<1x128xf32, #tpu.memory_space<vmem>>, %arg3: memref<1x128xf32, #tpu.memory_space<vmem>>, %arg4: memref<3136x128xf32, #tpu.memory_space<vmem>>) attributes {dimension_semantics = [#tpu.dimension_semantics<parallel>], iteration_bounds = array<i64: 2>, scalar_prefetch = 0 : i64, scratch_operands = 0 : i64, tpu.core_type = #tpu.core_type<tc>, window_params = [{transform_indices = @transform_0, window_bounds = array<i64: 3136, 128>}, {pipeline_mode = #tpu.pipeline_mode<synchronous>, transform_indices = @transform_1, window_bounds = array<i64: 1, 128>}, {pipeline_mode = #tpu.pipeline_mode<synchronous>, transform_indices = @transform_2, window_bounds = array<i64: 1, 128>}, {transform_indices = @transform_3, window_bounds = array<i64: 3136, 128>}]} {
    %c0 = arith.constant 0 : index
    %c0_0 = arith.constant 0 : index
    %0 = vector.load %arg1[%c0, %c0_0] : memref<3136x128xf32, #tpu.memory_space<vmem>>, vector<3136x128xf32>
    %c0_1 = arith.constant 0 : index
    %c0_2 = arith.constant 0 : index
    %1 = vector.load %arg2[%c0_1, %c0_2] : memref<1x128xf32, #tpu.memory_space<vmem>>, vector<1x128xf32>
    %2 = vector.broadcast %1 : vector<1x128xf32> to vector<3136x128xf32>
    %3 = arith.mulf %0, %2 : vector<3136x128xf32>
    %c0_3 = arith.constant 0 : index
    %c0_4 = arith.constant 0 : index
    %4 = vector.load %arg3[%c0_3, %c0_4] : memref<1x128xf32, #tpu.memory_space<vmem>>, vector<1x128xf32>
    %5 = vector.broadcast %4 : vector<1x128xf32> to vector<3136x128xf32>
    %6 = arith.addf %3, %5 : vector<3136x128xf32>
    %cst = arith.constant 0.000000e+00 : f32
    %7 = vector.broadcast %cst : f32 to vector<3136x128xf32>
    %8 = arith.maximumf %6, %7 : vector<3136x128xf32>
    %c0_5 = arith.constant 0 : index
    %c0_6 = arith.constant 0 : index
    %9 = vector.load %arg4[%c0_5, %c0_6] : memref<3136x128xf32, #tpu.memory_space<vmem>>, vector<3136x128xf32>
    tpu.vector_store %arg4[%c0_5, %c0_6], %8 {strides = array<i32>} : memref<3136x128xf32, #tpu.memory_space<vmem>>, vector<3136x128xf32>,
    return
  }
  func.func @transform_0(%arg0: i32) -> (i32, i32) {
    %c0_i32 = arith.constant 0 : i32
    %c0_i32_0 = arith.constant 0 : i32
    return %arg0, %c0_i32 : i32, i32
  }
  func.func @transform_1(%arg0: i32) -> (i32, i32) {
    %c0_i32 = arith.constant 0 : i32
    %c0_i32_0 = arith.constant 0 : i32
    %c0_i32_1 = arith.constant 0 : i32
    return %c0_i32, %c0_i32_0 : i32, i32
  }
  func.func @transform_2(%arg0: i32) -> (i32, i32) {
    %c0_i32 = arith.constant 0 : i32
    %c0_i32_0 = arith.constant 0 : i32
    %c0_i32_1 = arith.constant 0 : i32
    return %c0_i32, %c0_i32_0 : i32, i32
  }
  func.func @transform_3(%arg0: i32) -> (i32, i32) {
    %c0_i32 = arith.constant 0 : i32
    %c0_i32_0 = arith.constant 0 : i32
    return %arg0, %c0_i32 : i32, i32
  }
}

module attributes {stable_mosaic.version = 11 : i64} {
  func.func @_affine_relu_kernel(%arg0: i32, %arg1: memref<3136x128xf32, #tpu.memory_space<vmem>>, %arg2: memref<1x128xf32, #tpu.memory_space<vmem>>, %arg3: memref<1x128xf32, #tpu.memory_space<vmem>>, %arg4: memref<3136x128xf32, #tpu.memory_space<vmem>>) attributes {dimension_semantics = [#tpu.dimension_semantics<parallel>], iteration_bounds = array<i64: 4>, scalar_prefetch = 0 : i64, scratch_operands = 0 : i64, tpu.core_type = #tpu.core_type<tc>, window_params = [{transform_indices = @transform_0, window_bounds = array<i64: 3136, 128>}, {pipeline_mode = #tpu.pipeline_mode<synchronous>, transform_indices = @transform_1, window_bounds = array<i64: 1, 128>}, {pipeline_mode = #tpu.pipeline_mode<synchronous>, transform_indices = @transform_2, window_bounds = array<i64: 1, 128>}, {transform_indices = @transform_3, window_bounds = array<i64: 3136, 128>}]} {
    %c0 = arith.constant 0 : index
    %c0_0 = arith.constant 0 : index
    %0 = vector.load %arg1[%c0, %c0_0] : memref<3136x128xf32, #tpu.memory_space<vmem>>, vector<3136x128xf32>
    %c0_1 = arith.constant 0 : index
    %c0_2 = arith.constant 0 : index
    %1 = vector.load %arg2[%c0_1, %c0_2] : memref<1x128xf32, #tpu.memory_space<vmem>>, vector<1x128xf32>
    %2 = vector.broadcast %1 : vector<1x128xf32> to vector<3136x128xf32>
    %3 = arith.mulf %0, %2 : vector<3136x128xf32>
    %c0_3 = arith.constant 0 : index
    %c0_4 = arith.constant 0 : index
    %4 = vector.load %arg3[%c0_3, %c0_4] : memref<1x128xf32, #tpu.memory_space<vmem>>, vector<1x128xf32>
    %5 = vector.broadcast %4 : vector<1x128xf32> to vector<3136x128xf32>
    %6 = arith.addf %3, %5 : vector<3136x128xf32>
    %cst = arith.constant 0.000000e+00 : f32
    %7 = vector.broadcast %cst : f32 to vector<3136x128xf32>
    %8 = arith.maximumf %6, %7 : vector<3136x128xf32>
    %c0_5 = arith.constant 0 : index
    %c0_6 = arith.constant 0 : index
    %9 = vector.load %arg4[%c0_5, %c0_6] : memref<3136x128xf32, #tpu.memory_space<vmem>>, vector<3136x128xf32>
    tpu.vector_store %arg4[%c0_5, %c0_6], %8 {strides = array<i32>} : memref<3136x128xf32, #tpu.memory_space<vmem>>, vector<3136x128xf32>,
    return
  }
  func.func @transform_0(%arg0: i32) -> (i32, i32) {
    %c0_i32 = arith.constant 0 : i32
    %c0_i32_0 = arith.constant 0 : i32
    return %arg0, %c0_i32 : i32, i32
  }
  func.func @transform_1(%arg0: i32) -> (i32, i32) {
    %c0_i32 = arith.constant 0 : i32
    %c0_i32_0 = arith.constant 0 : i32
    %c0_i32_1 = arith.constant 0 : i32
    return %c0_i32, %c0_i32_0 : i32, i32
  }
  func.func @transform_2(%arg0: i32) -> (i32, i32) {
    %c0_i32 = arith.constant 0 : i32
    %c0_i32_0 = arith.constant 0 : i32
    %c0_i32_1 = arith.constant 0 : i32
    return %c0_i32, %c0_i32_0 : i32, i32
  }
  func.func @transform_3(%arg0: i32) -> (i32, i32) {
    %c0_i32 = arith.constant 0 : i32
    %c0_i32_0 = arith.constant 0 : i32
    return %arg0, %c0_i32 : i32, i32
  }
}

</mosaic_0001>

<bundles_post_ra>
// kernel: recon224_forward.5
= control target key start
LH: loop header
LB: loop body
LE: loop exit
PB: predicated region body
PF: predicated region fallthrough
CT: control target
= control target key end

     0   :  { %s4508_s0 = inlined_call_operand.hbm [shape: f32[2,2048], index: 0, kind: input, shape index: {}]   ;;  %s4509_s1 = inlined_call_operand.hbm [shape: bf16[2048,3328], index: 1, kind: input, shape index: {}]   ;;  %s4510_s2 = inlined_call_operand.vmem [shape: f32[1,3328], index: 2, kind: input, shape index: {}]   ;;  %s4511_s3 = inlined_call_operand.vmem [shape: f32[1,3328], index: 3, kind: input, shape index: {}]   ;;  %s4512_s4 = inlined_call_operand.vmem [shape: f32[2,3328], index: 4, kind: output, shape index: {}]  }
   0x1   :  { %4517 = sst [smem:[#allocation11_spill]] %s4508_s0 }
   0x2   :  { %9 = vsyncpa [#allocation3], 0 }
   0x3   :  { %11 = vsyncpa [#allocation3 + $0x1], 0 }
   0x4   :  { %12 = vsyncpa [#allocation5], 0 }
   0x5   :  { %14 = vsyncpa [#allocation5 + $0x1], 0  ;;  %s3824_s15 = smov 0   ;;  %s3826_s16 = smov 0  }
   0x6   :  { %s3828_s17 = smov 0   ;;  %s3830_s18 = smov 0  }
   0x7   :  { %s3832_s19 = smov 0   ;;  %s3834_s20 = smov 0  }
   0x8   :  { %s3836_s21 = smov 0   ;;  %s3838_s22 = smov 0  }
   0x9   :  { %s3840_s23 = smov 0   ;;  %s3842_s24 = smov 0  }
   0xa   :  { %s3844_s25 = smov 0  }
   0xb LB: > { %s2515_s26 = sadd.s32 4294967295, %s3789_s25   ;;  %s29_s27 = sadd.s32 1, %s3781_s23  ;;  %s3789_s25 = sphi %s3844_s25, %s20_s25   ;;  %s3785_s24 = sphi %s3842_s24, %s4542_s24   ;;  %s3781_s23 = sphi %s3840_s23, %s4541_s23   ;;  %s3777_s22 = sphi %s3838_s22, %s4540_s22   ;;  %s3773_s21 = sphi %s3836_s21, %s4539_s21   ;;  %s3769_s20 = sphi %s3834_s20, %s4538_s20   ;;  %s3765_s19 = sphi %s3832_s19, %s4537_s19   ;;  %s3761_s18 = sphi %s3830_s18, %s4536_s18   ;;  %s3757_s17 = sphi %s3828_s17, %s4535_s17   ;;  %s3753_s16 = sphi %s3826_s16, %s4534_s16   ;;  %s3749_s15 = sphi %s3824_s15, %s4533_s15  }
   0xc   : > { %p30_p0 = scmp.ge.s32.totalorder %s29_s27, 8  ;;  %s32_s28 = sadd.s32 1, %s3785_s24 }
   0xd   : > { %s39_s29 = sadd.s32 1, %s3769_s20  ;;  %p46_p1 = scmp.ne.s32.totalorder %s3769_s20, %s3765_s19 }
   0xe   : > { %s4544_s27 = smov (%p30_p0, %s29_s27), 0  ;;  %s4546_s28 = smov (!%p30_p0, %s32_s28), %s3785_s24 }
   0xf   : > { %4518 = sst [smem:[#allocation8_spill]] %s4544_s27  ;;  %s36_s30 = ssub.s32 %s3781_s23, %s4544_s27 }
  0x10   : > { %p47_p2 = scmp.eq.s32.totalorder %s3789_s25, 0  ;;  %p34_p3 = scmp.ge.s32.totalorder %s4546_s28, 2 }
  0x11   : > { %p37_p4 = scmp.eq.s32.totalorder %s36_s30, 0  ;;  %p52_p6 = scmp.ne.s32.totalorder %s3765_s19, %s3761_s18 }
  0x12   : > { %p3891_p5 = por %p47_p2, %p46_p1  ;;  %s4548_s28 = smov (%p34_p3, %s4546_s28), 0 }
  0x13   : > { %4520 = sst [smem:[#allocation9_spill]] %s4548_s28  ;;  %p53_p7 = scmp.eq.s32.totalorder %s2515_s26, 0 }
  0x14   : > { %s3899_s6 = scalar_select %p37_p4, %s3769_s20, %s39_s29  }
  0x15   : > { %s63_s7 = ssub.s32 %s3785_s24, %s4548_s28  ;;  %s67_s9 = sadd.s32 1, %s3757_s17 }
  0x16   : > { %4521 = sst [smem:[#allocation10_spill]] %s3899_s6  ;;  %s64_s8 = sor.u32 %s63_s7, %s36_s30 }
  0x17   : > { %p3904_p8 = por %p53_p7, %p52_p6  ;;  %p65_p9 = scmp.eq.s32.totalorder %s64_s8, 0 }
  0x18   : > { %p74_p10 = scmp.ne.s32.totalorder %s3757_s17, %s3753_s16  ;;  %p80_p11 = scmp.ne.s32.totalorder %s3753_s16, %s3749_s15 }
  0x19   : > { %s4522_s10 = scalar_select %p3904_p8, 1, 0 }
  0x1a   : > { %s3913_s11 = scalar_select %p65_p9, %s3757_s17, %s67_s9  }
  0x1b   : > { %p76_p12 = por %p74_p10, %p47_p2  ;;  %p3917_p13 = por %p80_p11, %p53_p7 }
  0x1c   : > { %p3207_p0 = scmp.lt.s32.totalorder %s3789_s25, 16  ;;  %s182_s13 = sand.u32 1, %s3769_s20  }
  0x1d   : > { %s4523_s12 = scalar_select %p3917_p13, 1, 0 }
  0x1e   : > { %s2533_s14 = sshll.u32 %s3781_s23, 6  ;;  %s2519_s18 = sshll.u32 %s182_s13, 2 }
  0x1f   : > { %s4524_s0 = sld [smem:[#allocation11_spill]]  ;;  %s186_s15 = scalar_lea.vmem [#allocation2], %s2519_s18 }
  0x20   : > { %s194_s7 = sshll.u32 %s186_s15, 4  ;;  %p3931_p1 = pnand %p3207_p0, %p3891_p5  ;;  %s3935_s7 = int_to_ptr.vmem [resolvable:$true] %s194_s7 }
  0x21   : > { %s3194_s9 = smul.u32 832, %s3781_s23  ;;  %p3938_p2 = pnand %p3207_p0, %p76_p12 }
  0x22   : > { %p3637_p4 = pneg %p3931_p1 }
  0x25   : > { %s3927_s30 = scalar_lea.hbm %s4524_s0, %s2533_s14  ;;  %s183_s14 = scalar_lea.sflag [#allocation3], %s182_s13 }
  0x26   : > { %s3635_s29 = scalar_lea.hbm %s3927_s30, 64  ;;  %s3640_s15 = scalar_lea.hbm %s4524_s0, 512 }
  0x27   : > { %p3636_p3 = scmp.ne.s32.totalorder %s3927_s30, %s3635_s29  ;;  %p3641_p7 = scmp.lt.u32.totalorder %s3927_s30, %s4524_s0 }
  0x28   : > { %p3642_p9 = scmp.lt.u32.totalorder %s3640_s15, %s3635_s29  ;;  %p3644_p11 = scmp.lt.u32.totalorder %s3635_s29, %s3927_s30 }
  0x29   : > { %p3638_p5 = pnand %p3637_p4, %p3636_p3 }
  0x2a   : > { %p3643_p10 = por %p3642_p9, %p3641_p7 }
  0x2b   : > { %p3639_p6 = pneg %p3638_p5 }
  0x2c   : > { %p3645_p12 = por %p3644_p11, %p3643_p10 }
  0x2e   : > { %p3646_p0 = pnand %p3645_p12, %p3639_p6 }
  0x30   : > { %3649 = shalt.err (!%p3646_p0)
}
  0x31   : > { %s3650_s13 = scalar_lea.vmem %s3935_s7, 64  ;;  %s3791_s5 = smov [#allocation2]  }
  0x32   : > { %p3651_p3 = scmp.ne.s32.totalorder %s3935_s7, %s3650_s13  ;;  %s3655_s18 = sshll.u32 %s3791_s5, 4  ;;  %s3656_s18 = int_to_ptr.vmem [resolvable:$false] %s3655_s18 }
  0x33   : > { %s3657_s27 = scalar_lea.vmem %s3656_s18, 128  ;;  %p3658_p8 = scmp.lt.s32.totalorder %s3935_s7, %s3656_s18 }
  0x34   : > { %p3653_p5 = pnand %p3651_p3, %p3637_p4  ;;  %p3659_p7 = scmp.lt.s32.totalorder %s3657_s27, %s3650_s13 }
  0x36   : > { %p3654_p13 = pneg %p3653_p5  ;;  %p3660_p9 = por %p3659_p7, %p3658_p8 }
  0x38   : > { %p3661_p10 = pnand %p3660_p9, %p3654_p13 }
  0x3a   : > { %3664 = shalt.err (!%p3661_p10)
}
  0x3b   : > { %3203 = dma.hbm_to_vmem [thread:$0]  (!%p3931_p1), %s3927_s30, 64, %s3935_s7, %s183_s14  }
  0x3c   : > { %p2525_p4 = scmp.ge.s32.totalorder %s3789_s25, 1  ;;  %p239_p6 = scmp.lt.s32.totalorder %s3789_s25, 17 }
  0x3d   : > { %s201_s28 = sand.u32 1, %s3757_s17   ;;  %s207_s13 = smul.u32 13, %s3785_s24 }
  0x3e   : > { %s3193_s29 = smul.u32 1664, %s201_s28  ;;  %p3970_p11 = pnand %p2525_p4, %p239_p6 }
  0x3f   : > { %s212_s8 = sadd.s32 %s3194_s9, %s207_s13  ;;  %s3984_s14 = scalar_lea.sflag [#allocation5], %s201_s28 }
  0x40   : > { %s205_s5 = scalar_lea.vmem [#allocation4], %s3193_s29  ;;  %s2524_s27 = sshll.u32 %s212_s8, 6 }
  0x41   : > { %s215_s18 = sshll.u32 %s205_s5, 4  ;;  %s3982_s7 = scalar_lea.hbm %s4509_s1, %s2524_s27  ;;  %s3977_s18 = int_to_ptr.vmem [resolvable:$true] %s215_s18 }
  0x42   : > { %s3665_s6 = scalar_lea.hbm %s3982_s7, 26624  ;;  %p3667_p13 = pneg %p3938_p2 }
  0x43   : > { %p3666_p8 = scmp.ne.s32.totalorder %s3982_s7, %s3665_s6  ;;  %s3670_s0 = scalar_lea.hbm %s4509_s1, 425984 }
  0x44   : > { %p3671_p0 = scmp.lt.u32.totalorder %s3982_s7, %s4509_s1  ;;  %p3672_p3 = scmp.lt.u32.totalorder %s3670_s0, %s3665_s6 }
  0x45   : > { %p3668_p1 = pnand %p3667_p13, %p3666_p8  ;;  %p3674_p7 = scmp.lt.u32.totalorder %s3665_s6, %s3982_s7 }
  0x46   : > { %p3673_p5 = por %p3672_p3, %p3671_p0 }
  0x47   : > { %p3669_p12 = pneg %p3668_p1 }
  0x48   : > { %p3675_p9 = por %p3674_p7, %p3673_p5 }
  0x4a   : > { %p3676_p10 = pnand %p3675_p9, %p3669_p12 }
  0x4c   : > { %3679 = shalt.err (!%p3676_p10)
}
  0x4d   : > { %s3680_s28 = scalar_lea.vmem %s3977_s18, 26624  ;;  %s3792_s5 = smov [#allocation4]  }
  0x4e   : > { %p3681_p4 = scmp.ne.s32.totalorder %s3977_s18, %s3680_s28  ;;  %s3685_s27 = sshll.u32 %s3792_s5, 4  ;;  %s3686_s27 = int_to_ptr.vmem [resolvable:$false] %s3685_s27 }
  0x4f   : > { %s3687_s30 = scalar_lea.vmem %s3686_s27, 53248  ;;  %p3688_p1 = scmp.lt.s32.totalorder %s3977_s18, %s3686_s27 }
  0x50   : > { %p3683_p6 = pnand %p3681_p4, %p3667_p13  ;;  %p3689_p0 = scmp.lt.s32.totalorder %s3687_s30, %s3680_s28 }
  0x52   : > { %p3684_p8 = pneg %p3683_p6  ;;  %p3690_p3 = por %p3689_p0, %p3688_p1 }
  0x54   : > { %p3691_p5 = pnand %p3690_p3, %p3684_p8 }
  0x56   : > { %3694 = shalt.err (!%p3691_p5)
}
  0x57   : > { %s3793_s6 = smov 1664   ;;  %s3794_s9 = smov 832  }
  0x58   : > { %s3795_s29 = smov 52   ;;  %243 = sbr.rel (%p3970_p11) target bundleno = 654 (0x28e), region = 36 }
  0x59   : > { %3206 = dma.hbm_to_vmem [thread:$0]  (!%p3938_p2), %s3982_s7, 26624, %s3977_s18, %s3984_s14, %s3793_s6, %s3794_s9, %s3795_s29  }
  0x5a   : > { %s245_s0 = sand.u32 (!%p3970_p11), 1, %s3765_s19   ;;  %p4528_p13 = scmp.ne.s32.totalorder (!%p3970_p11), %s4522_s10, 0 }
  0x5b   : > { %s4015_s13 = sshll.u32 (!%p3970_p11), %s245_s0, 2  ;;  %s246_s8 = scalar_lea.sflag (!%p3970_p11), [#allocation3], %s245_s0 }
  0x5c   : > { %s249_s28 = scalar_lea.vmem (!%p3970_p11), [#allocation2], %s4015_s13 }
  0x5f   : > { %3740 = dma.done.wait (%p4528_p13), %s246_s8, 64  }
  0x60   : > { %3742 = vsyncadd (%p4528_p13), %s246_s8, 4294967232  ;;  %s254_s26 = sand.u32 1, %s3753_s16   ;;  %p4529_p2 = scmp.ne.s32.totalorder %s4523_s12, 0 }
  0x61   : > { %s3195_s18 = smul.u32 1664, %s254_s26  ;;  %s255_s7 = scalar_lea.sflag [#allocation5], %s254_s26 }
  0x63   : > { %s4023_s15 = scalar_lea.vmem [#allocation4], %s3195_s18 }
  0x64   : > { %3744 = dma.done.wait (%p4529_p2), %s255_s7, 26624  }
  0x65   : > { %3746 = vsyncadd (%p4529_p2), %s255_s7, 4294940672  ;;  %s299_s14 = smul.u32 13, %s3777_s22  ;;  %p2528_p12 = scmp.ne.s32.totalorder %s3773_s21, 0 }
  0x66   : > { %v3796_v0 = vmov (!%p2528_p12), 0.0  }
  0x67   : > { %p300_p11 = scmp.lt.s32.totalorder %s299_s14, 25  ;;  %318 = sbr.rel (%p2528_p12) target bundleno = 111 (0x6f), region = 48 }
  0x69   : > { %s4550_s14 = smov (!%p300_p11, %s299_s14), 25 }
  0x6a   : > { %s4033_s10 = scalar_lea.vmem %s4510_s2, %s4550_s14  ;;  %s4038_s9 = scalar_lea.vmem %s4511_s3, %s4550_s14 }
  0x6b   : > { %s2527_s29 = sshll.u32 %s4550_s14, 1 }
  0x6c   : > { %s4043_s12 = scalar_lea.vmem %s4512_s4, %s2527_s29 }
  0x6d   : > { %319 = vst [vmem:[%s4043_s12] sm:$0xff] (!%p2528_p12), %v3796_v0  ;;  %320 = vst [vmem:[%s4043_s12 + $0x8] sm:$0xff] (!%p2528_p12), %v3796_v0 }
  0x6e   : > { %321 = vst [vmem:[%s4043_s12 + $0x10] sm:$0xff] %v3796_v0  ;;  %322 = vst [vmem:[%s4043_s12 + $0x18] sm:$0x3] %v3796_v0 }
  0x6f PF: > { %v3302_v1 = vld [vmem:[%s4023_s15 + $0x4] ss:$52 sps:$4 sm:$0xff]   ;;  %v3304_v2 = vld [vmem:[%s4023_s15 + $0xc] ss:$52 sps:$4 sm:$0xff]   ;;  %v3307_v4 = vld [vmem:[%s4023_s15 + $0x8] ss:$52 sps:$4 sm:$0xff]  }
  0x70   : > { %2570 = vmatprep.subr.bf16.mxu0 %v3302_v1  ;;  %v3306_v3 = vld [vmem:[%s4023_s15] ss:$52 sps:$4 sm:$0xff]   ;;  %2634 = vmatprep.subr.bf16.mxu1 %v3304_v2  ;;  %v3312_v7 = vld [vmem:[%s4023_s15 + $0x68] ss:$52 sps:$4 sm:$0xff]   ;;  %v3313_v8 = vld [vmem:[%s4023_s15 + $0x70] ss:$52 sps:$4 sm:$0xff]  }
  0x71   : > { %v3308_v5 = vld [vmem:[%s4023_s15 + $0x6c] ss:$52 sps:$4 sm:$0xff]   ;;  %2572 = vmatpush1.bf16.msra.mxu0 %v3306_v3  ;;  %2636 = vmatpush1.bf16.msra.mxu1 %v3307_v4  ;;  %v3310_v6 = vld [vmem:[%s4023_s15 + $0x74] ss:$52 sps:$4 sm:$0xff]   ;;  %v3316_v10 = vld [vmem:[%s4023_s15 + $0xdc] ss:$52 sps:$4 sm:$0xff]  }
  0x72   : > { %2574 = vmatprep.subr.bf16.mxu0 %v3308_v5  ;;  %2638 = vmatprep.subr.bf16.mxu1 %v3310_v6  ;;  %v3314_v9 = vld [vmem:[%s4023_s15 + $0xd4] ss:$52 sps:$4 sm:$0xff]   ;;  %v3318_v11 = vld [vmem:[%s4023_s15 + $0xd0] ss:$52 sps:$4 sm:$0xff]   ;;  %v3319_v12 = vld [vmem:[%s4023_s15 + $0xd8] ss:$52 sps:$4 sm:$0xff]  }
  0x73   : > { %v3320_v13 = vld [vmem:[%s4023_s15 + $0x13c] ss:$52 sps:$4 sm:$0xff]   ;;  %v3322_v14 = vld [vmem:[%s4023_s15 + $0x144] ss:$52 sps:$4 sm:$0xff]   ;;  %v3325_v16 = vld [vmem:[%s4023_s15 + $0x140] ss:$52 sps:$4 sm:$0xff]  }
  0x74   : > { %v3324_v15 = vld [vmem:[%s4023_s15 + $0x138] ss:$52 sps:$4 sm:$0xff]   ;;  %v3330_v19 = vld [vmem:[%s4023_s15 + $0x1a0] ss:$52 sps:$4 sm:$0xff]   ;;  %v3331_v20 = vld [vmem:[%s4023_s15 + $0x1a8] ss:$52 sps:$4 sm:$0xff]  }
  0x75   : > { %2576 = vmatpush1.bf16.msra.mxu0 %v3312_v7  ;;  %2640 = vmatpush1.bf16.msra.mxu1 %v3313_v8  ;;  %v3326_v17 = vld [vmem:[%s4023_s15 + $0x1a4] ss:$52 sps:$4 sm:$0xff]   ;;  %v3328_v18 = vld [vmem:[%s4023_s15 + $0x1ac] ss:$52 sps:$4 sm:$0xff]   ;;  %v3334_v22 = vld [vmem:[%s4023_s15 + $0x214] ss:$52 sps:$4 sm:$0xff]  }
  0x76   : > { %2578 = vmatprep.subr.bf16.mxu0 %v3314_v9  ;;  %2642 = vmatprep.subr.bf16.mxu1 %v3316_v10  ;;  %v3332_v21 = vld [vmem:[%s4023_s15 + $0x20c] ss:$52 sps:$4 sm:$0xff]   ;;  %v3336_v23 = vld [vmem:[%s4023_s15 + $0x208] ss:$52 sps:$4 sm:$0xff]   ;;  %v3337_v24 = vld [vmem:[%s4023_s15 + $0x210] ss:$52 sps:$4 sm:$0xff]  }
  0x77   : > { %v3338_v25 = vld [vmem:[%s4023_s15 + $0x274] ss:$52 sps:$4 sm:$0xff]   ;;  %v3340_v26 = vld [vmem:[%s4023_s15 + $0x27c] ss:$52 sps:$4 sm:$0xff]   ;;  %v3343_v28 = vld [vmem:[%s4023_s15 + $0x278] ss:$52 sps:$4 sm:$0xff]  }
  0x78   : > { %v3342_v27 = vld [vmem:[%s4023_s15 + $0x270] ss:$52 sps:$4 sm:$0xff]   ;;  %v3348_v31 = vld [vmem:[%s4023_s15 + $0x2d8] ss:$52 sps:$4 sm:$0xff]   ;;  %v3349_v32 = vld [vmem:[%s4023_s15 + $0x2e0] ss:$52 sps:$4 sm:$0xff]  }
  0x79   : > { %2580 = vmatpush1.bf16.msra.mxu0 %v3318_v11  ;;  %2644 = vmatpush1.bf16.msra.mxu1 %v3319_v12  ;;  %v3344_v29 = vld [vmem:[%s4023_s15 + $0x2dc] ss:$52 sps:$4 sm:$0xff]   ;;  %v3346_v30 = vld [vmem:[%s4023_s15 + $0x2e4] ss:$52 sps:$4 sm:$0xff]   ;;  %v3352_v34 = vld [vmem:[%s4023_s15 + $0x34c] ss:$52 sps:$4 sm:$0xff]  }
  0x7a   : > { %2582 = vmatprep.subr.bf16.mxu0 %v3320_v13  ;;  %2646 = vmatprep.subr.bf16.mxu1 %v3322_v14  ;;  %v3350_v33 = vld [vmem:[%s4023_s15 + $0x344] ss:$52 sps:$4 sm:$0xff]   ;;  %v3354_v35 = vld [vmem:[%s4023_s15 + $0x340] ss:$52 sps:$4 sm:$0xff]   ;;  %v3355_v36 = vld [vmem:[%s4023_s15 + $0x348] ss:$52 sps:$4 sm:$0xff]  }
  0x7b   : > { %v3356_v37 = vld [vmem:[%s4023_s15 + $0x3ac] ss:$52 sps:$4 sm:$0xff]   ;;  %v3358_v38 = vld [vmem:[%s4023_s15 + $0x3b4] ss:$52 sps:$4 sm:$0xff]   ;;  %v3361_v40 = vld [vmem:[%s4023_s15 + $0x3b0] ss:$52 sps:$4 sm:$0xff]  }
  0x7c   : > { %v3360_v39 = vld [vmem:[%s4023_s15 + $0x3a8] ss:$52 sps:$4 sm:$0xff]   ;;  %v3366_v43 = vld [vmem:[%s4023_s15 + $0x410] ss:$52 sps:$4 sm:$0xff]   ;;  %v3367_v44 = vld [vmem:[%s4023_s15 + $0x418] ss:$52 sps:$4 sm:$0xff]  }
  0x7d   : > { %2584 = vmatpush1.bf16.msra.mxu0 %v3324_v15  ;;  %2648 = vmatpush1.bf16.msra.mxu1 %v3325_v16  ;;  %v3362_v41 = vld [vmem:[%s4023_s15 + $0x414] ss:$52 sps:$4 sm:$0xff]   ;;  %v3364_v42 = vld [vmem:[%s4023_s15 + $0x41c] ss:$52 sps:$4 sm:$0xff]   ;;  %v3370_v46 = vld [vmem:[%s4023_s15 + $0x484] ss:$52 sps:$4 sm:$0xff]  }
  0x7e   : > { %2586 = vmatprep.subr.bf16.mxu0 %v3326_v17  ;;  %2650 = vmatprep.subr.bf16.mxu1 %v3328_v18  ;;  %v3368_v45 = vld [vmem:[%s4023_s15 + $0x47c] ss:$52 sps:$4 sm:$0xff]   ;;  %v3372_v48 = vld [vmem:[%s4023_s15 + $0x478] ss:$52 sps:$4 sm:$0xff]   ;;  %v3373_v49 = vld [vmem:[%s4023_s15 + $0x480] ss:$52 sps:$4 sm:$0xff]  }
  0x7f   : > { %v4098_v47 = vld.sshfl [vmem:[%s249_s28] sm:$0x33 pattern:$0x76325410]  ;;  %v3376_v52 = vld [vmem:[%s4023_s15 + $0x4ec] ss:$52 sps:$4 sm:$0xff]  }
  0x80   : > { %v4104_v50 = vcombine.high %v4098_v47, %v4098_v47  ;;  %v3374_v51 = vld [vmem:[%s4023_s15 + $0x4e4] ss:$52 sps:$4 sm:$0xff]   ;;  %v3378_v53 = vld [vmem:[%s4023_s15 + $0x4e0] ss:$52 sps:$4 sm:$0xff]   ;;  %v3379_v54 = vld [vmem:[%s4023_s15 + $0x4e8] ss:$52 sps:$4 sm:$0xff]  }
  0x81   : > { %2588 = vmatpush1.bf16.msra.mxu0 %v3330_v19  ;;  %2652 = vmatpush1.bf16.msra.mxu1 %v3331_v20  ;;  %v3380_v55 = vld [vmem:[%s4023_s15 + $0x54c] ss:$52 sps:$4 sm:$0xff]   ;;  %v3382_v56 = vld [vmem:[%s4023_s15 + $0x554] ss:$52 sps:$4 sm:$0xff]   ;;  %v3385_v58 = vld [vmem:[%s4023_s15 + $0x550] ss:$52 sps:$4 sm:$0xff]  }
  0x82   : > { %2590 = vmatprep.subr.bf16.mxu0 %v3332_v21  ;;  %2654 = vmatprep.subr.bf16.mxu1 %v3334_v22  ;;  %v3384_v57 = vld [vmem:[%s4023_s15 + $0x548] ss:$52 sps:$4 sm:$0xff]   ;;  %v3390_v61 = vld [vmem:[%s4023_s15 + $0x5b0] ss:$52 sps:$4 sm:$0xff]   ;;  %v3391_v62 = vld [vmem:[%s4023_s15 + $0x5b8] ss:$52 sps:$4 sm:$0xff]  }
  0x83   : > { %1043 = vmatprep.mubr.f32.mxu0 %v4104_v50  ;;  %1114 = vmatprep.mubr.f32.mxu1 %v4104_v50  ;;  %v3386_v59 = vld [vmem:[%s4023_s15 + $0x5b4] ss:$52 sps:$4 sm:$0xff]   ;;  %v3388_v60 = vld [vmem:[%s4023_s15 + $0x5bc] ss:$52 sps:$4 sm:$0xff]   ;;  %v3394_v0 = vld [vmem:[%s4023_s15 + $0x624] ss:$52 sps:$4 sm:$0xff]  }
  0x84   : > { %v3392_v63 = vld [vmem:[%s4023_s15 + $0x61c] ss:$52 sps:$4 sm:$0xff]   ;;  %v3396_v1 = vld [vmem:[%s4023_s15 + $0x618] ss:$52 sps:$4 sm:$0xff]   ;;  %v3397_v2 = vld [vmem:[%s4023_s15 + $0x620] ss:$52 sps:$4 sm:$0xff]  }
  0x85   : > { %2592 = vmatpush1.bf16.msra.mxu0 %v3336_v23  ;;  %2656 = vmatpush1.bf16.msra.mxu1 %v3337_v24  ;;  %v3398_v3 = vld [vmem:[%s4023_s15 + $0x14] ss:$52 sps:$4 sm:$0xff]   ;;  %v3401_v4 = vld [vmem:[%s4023_s15 + $0x1c] ss:$52 sps:$4 sm:$0xff]   ;;  %v3403_v6 = vld [vmem:[%s4023_s15 + $0x18] ss:$52 sps:$4 sm:$0xff]  }
  0x86   : > { %2594 = vmatprep.subr.bf16.mxu0 %v3338_v25  ;;  %2658 = vmatprep.subr.bf16.mxu1 %v3340_v26  ;;  %v3400_v5 = vld [vmem:[%s4023_s15 + $0x10] ss:$52 sps:$4 sm:$0xff]   ;;  %v3406_v9 = vld [vmem:[%s4023_s15 + $0x78] ss:$52 sps:$4 sm:$0xff]   ;;  %v3409_v10 = vld [vmem:[%s4023_s15 + $0x80] ss:$52 sps:$4 sm:$0xff]  }
  0x87   : > { %v3404_v7 = vld [vmem:[%s4023_s15 + $0x7c] ss:$52 sps:$4 sm:$0xff]   ;;  %v3407_v8 = vld [vmem:[%s4023_s15 + $0x84] ss:$52 sps:$4 sm:$0xff]   ;;  %v3413_v12 = vld [vmem:[%s4023_s15 + $0xec] ss:$52 sps:$4 sm:$0xff]  }
  0x88   : > { %v3410_v11 = vld [vmem:[%s4023_s15 + $0xe4] ss:$52 sps:$4 sm:$0xff]   ;;  %v3412_v13 = vld [vmem:[%s4023_s15 + $0xe0] ss:$52 sps:$4 sm:$0xff]   ;;  %v3415_v14 = vld [vmem:[%s4023_s15 + $0xe8] ss:$52 sps:$4 sm:$0xff]  }
  0x89   : > { %2596 = vmatpush1.bf16.msra.mxu0 %v3342_v27  ;;  %2660 = vmatpush1.bf16.msra.mxu1 %v3343_v28  ;;  %v3416_v15 = vld [vmem:[%s4023_s15 + $0x14c] ss:$52 sps:$4 sm:$0xff]   ;;  %v3419_v16 = vld [vmem:[%s4023_s15 + $0x154] ss:$52 sps:$4 sm:$0xff]   ;;  %v3421_v18 = vld [vmem:[%s4023_s15 + $0x150] ss:$52 sps:$4 sm:$0xff]  }
  0x8a   : > { %2598 = vmatprep.subr.bf16.mxu0 %v3344_v29  ;;  %2662 = vmatprep.subr.bf16.mxu1 %v3346_v30  ;;  %v3418_v17 = vld [vmem:[%s4023_s15 + $0x148] ss:$52 sps:$4 sm:$0xff]   ;;  %v3424_v21 = vld [vmem:[%s4023_s15 + $0x1b0] ss:$52 sps:$4 sm:$0xff]   ;;  %v3427_v22 = vld [vmem:[%s4023_s15 + $0x1b8] ss:$52 sps:$4 sm:$0xff]  }
  0x8b   : > { %v3422_v19 = vld [vmem:[%s4023_s15 + $0x1b4] ss:$52 sps:$4 sm:$0xff]   ;;  %v3425_v20 = vld [vmem:[%s4023_s15 + $0x1bc] ss:$52 sps:$4 sm:$0xff]   ;;  %v3431_v24 = vld [vmem:[%s4023_s15 + $0x224] ss:$52 sps:$4 sm:$0xff]  }
  0x8c   : > { %v3428_v23 = vld [vmem:[%s4023_s15 + $0x21c] ss:$52 sps:$4 sm:$0xff]   ;;  %v3430_v25 = vld [vmem:[%s4023_s15 + $0x218] ss:$52 sps:$4 sm:$0xff]   ;;  %v3433_v26 = vld [vmem:[%s4023_s15 + $0x220] ss:$52 sps:$4 sm:$0xff]  }
  0x8d   : > { %2600 = vmatpush1.bf16.msra.mxu0 %v3348_v31  ;;  %2664 = vmatpush1.bf16.msra.mxu1 %v3349_v32  ;;  %v3434_v27 = vld [vmem:[%s4023_s15 + $0x284] ss:$52 sps:$4 sm:$0xff]   ;;  %v3437_v28 = vld [vmem:[%s4023_s15 + $0x28c] ss:$52 sps:$4 sm:$0xff]   ;;  %v3439_v30 = vld [vmem:[%s4023_s15 + $0x288] ss:$52 sps:$4 sm:$0xff]  }
  0x8e   : > { %2602 = vmatprep.subr.bf16.mxu0 %v3350_v33  ;;  %2666 = vmatprep.subr.bf16.mxu1 %v3352_v34  ;;  %v3436_v29 = vld [vmem:[%s4023_s15 + $0x280] ss:$52 sps:$4 sm:$0xff]   ;;  %v3442_v33 = vld [vmem:[%s4023_s15 + $0x2e8] ss:$52 sps:$4 sm:$0xff]   ;;  %v3445_v34 = vld [vmem:[%s4023_s15 + $0x2f0] ss:$52 sps:$4 sm:$0xff]  }
  0x8f   : > { %v3440_v31 = vld [vmem:[%s4023_s15 + $0x2ec] ss:$52 sps:$4 sm:$0xff]   ;;  %v3443_v32 = vld [vmem:[%s4023_s15 + $0x2f4] ss:$52 sps:$4 sm:$0xff]   ;;  %p2530_p7 = scmp.ne.s32.totalorder %s3773_s21, 7 }
  0x90   : > { %vm1641_vm0 = vcmask (!%p2530_p7), 1041408  }
  0x91   : > { %2604 = vmatpush1.bf16.msra.mxu0 %v3354_v35  ;;  %2668 = vmatpush1.bf16.msra.mxu1 %v3355_v36  ;;  %v3446_v35 = vld [vmem:[%s4023_s15 + $0x354] ss:$52 sps:$4 sm:$0xff]   ;;  %v3449_v36 = vld [vmem:[%s4023_s15 + $0x35c] ss:$52 sps:$4 sm:$0xff]  }
  0x92   : > { %2606 = vmatprep.subr.bf16.mxu0 %v3356_v37  ;;  %2670 = vmatprep.subr.bf16.mxu1 %v3358_v38  ;;  %v3448_v37 = vld [vmem:[%s4023_s15 + $0x350] ss:$52 sps:$4 sm:$0xff]   ;;  %v3451_v38 = vld [vmem:[%s4023_s15 + $0x358] ss:$52 sps:$4 sm:$0xff]  }
  0x95   : > { %2608 = vmatpush1.bf16.msra.mxu0 %v3360_v39  ;;  %2672 = vmatpush1.bf16.msra.mxu1 %v3361_v40  ;;  %v3452_v39 = vld [vmem:[%s4023_s15 + $0x3bc] ss:$52 sps:$4 sm:$0xff]   ;;  %v3455_v40 = vld [vmem:[%s4023_s15 + $0x3c4] ss:$52 sps:$4 sm:$0xff]  }
  0x96   : > { %2610 = vmatprep.subr.bf16.mxu0 %v3362_v41  ;;  %2674 = vmatprep.subr.bf16.mxu1 %v3364_v42  ;;  %v3454_v41 = vld [vmem:[%s4023_s15 + $0x3b8] ss:$52 sps:$4 sm:$0xff]   ;;  %v3457_v42 = vld [vmem:[%s4023_s15 + $0x3c0] ss:$52 sps:$4 sm:$0xff]  }
  0x99   : > { %2612 = vmatpush1.bf16.msra.mxu0 %v3366_v43  ;;  %2676 = vmatpush1.bf16.msra.mxu1 %v3367_v44  ;;  %v3458_v43 = vld [vmem:[%s4023_s15 + $0x424] ss:$52 sps:$4 sm:$0xff]   ;;  %v3461_v44 = vld [vmem:[%s4023_s15 + $0x42c] ss:$52 sps:$4 sm:$0xff]  }
  0x9a   : > { %2614 = vmatprep.subr.bf16.mxu0 %v3368_v45  ;;  %2678 = vmatprep.subr.bf16.mxu1 %v3370_v46  ;;  %v3460_v45 = vld [vmem:[%s4023_s15 + $0x420] ss:$52 sps:$4 sm:$0xff]   ;;  %v3463_v46 = vld [vmem:[%s4023_s15 + $0x428] ss:$52 sps:$4 sm:$0xff]  }
  0x9d   : > { %2616 = vmatpush1.bf16.msra.mxu0 %v3372_v48  ;;  %2680 = vmatpush1.bf16.msra.mxu1 %v3373_v49  ;;  %v3464_v48 = vld [vmem:[%s4023_s15 + $0x48c] ss:$52 sps:$4 sm:$0xff]   ;;  %v3467_v49 = vld [vmem:[%s4023_s15 + $0x494] ss:$52 sps:$4 sm:$0xff]  }
  0x9e   : > { %2618 = vmatprep.subr.bf16.mxu0 %v3374_v51  ;;  %2682 = vmatprep.subr.bf16.mxu1 %v3376_v52  ;;  %v3466_v51 = vld [vmem:[%s4023_s15 + $0x488] ss:$52 sps:$4 sm:$0xff]   ;;  %v3469_v52 = vld [vmem:[%s4023_s15 + $0x490] ss:$52 sps:$4 sm:$0xff]  }
  0xa1   : > { %2620 = vmatpush1.bf16.msra.mxu0 %v3378_v53  ;;  %2684 = vmatpush1.bf16.msra.mxu1 %v3379_v54  ;;  %v3470_v53 = vld [vmem:[%s4023_s15 + $0x4f4] ss:$52 sps:$4 sm:$0xff]   ;;  %v3473_v54 = vld [vmem:[%s4023_s15 + $0x4fc] ss:$52 sps:$4 sm:$0xff]  }
  0xa2   : > { %2622 = vmatprep.subr.bf16.mxu0 %v3380_v55  ;;  %2686 = vmatprep.subr.bf16.mxu1 %v3382_v56  ;;  %v3472_v55 = vld [vmem:[%s4023_s15 + $0x4f0] ss:$52 sps:$4 sm:$0xff]   ;;  %v3475_v56 = vld [vmem:[%s4023_s15 + $0x4f8] ss:$52 sps:$4 sm:$0xff]  }
  0xa5   : > { %2624 = vmatpush1.bf16.msra.mxu0 %v3384_v57  ;;  %2688 = vmatpush1.bf16.msra.mxu1 %v3385_v58  ;;  %v3476_v57 = vld [vmem:[%s4023_s15 + $0x55c] ss:$52 sps:$4 sm:$0xff]   ;;  %v3479_v58 = vld [vmem:[%s4023_s15 + $0x564] ss:$52 sps:$4 sm:$0xff]  }
  0xa6   : > { %2626 = vmatprep.subr.bf16.mxu0 %v3386_v59  ;;  %2690 = vmatprep.subr.bf16.mxu1 %v3388_v60  ;;  %v3478_v59 = vld [vmem:[%s4023_s15 + $0x558] ss:$52 sps:$4 sm:$0xff]   ;;  %v3481_v60 = vld [vmem:[%s4023_s15 + $0x560] ss:$52 sps:$4 sm:$0xff]  }
  0xa9   : > { %2628 = vmatpush1.bf16.msra.mxu0 %v3390_v61  ;;  %2692 = vmatpush1.bf16.msra.mxu1 %v3391_v62  ;;  %v3482_v61 = vld [vmem:[%s4023_s15 + $0x5c4] ss:$52 sps:$4 sm:$0xff]   ;;  %v3485_v62 = vld [vmem:[%s4023_s15 + $0x5cc] ss:$52 sps:$4 sm:$0xff]  }
  0xaa   : > { %2630 = vmatprep.subr.bf16.mxu0 %v3392_v63  ;;  %2694 = vmatprep.subr.bf16.mxu1 %v3394_v0  ;;  %v3484_v63 = vld [vmem:[%s4023_s15 + $0x5c0] ss:$52 sps:$4 sm:$0xff]   ;;  %v3487_v0 = vld [vmem:[%s4023_s15 + $0x5c8] ss:$52 sps:$4 sm:$0xff]  }
  0xad   : > { %2632 = vmatpush1.bf16.msra.mxu0 %v3396_v1  ;;  %2696 = vmatpush1.bf16.msra.mxu1 %v3397_v2  ;;  %v3488_v1 = vld [vmem:[%s4023_s15 + $0x62c] ss:$52 sps:$4 sm:$0xff]   ;;  %v3491_v2 = vld [vmem:[%s4023_s15 + $0x634] ss:$52 sps:$4 sm:$0xff]  }
  0xae   : > { %2698 = vmatprep.subr.bf16.mxu0 %v3398_v3  ;;  %2762 = vmatprep.subr.bf16.mxu1 %v3401_v4  ;;  %v3490_v3 = vld [vmem:[%s4023_s15 + $0x628] ss:$52 sps:$4 sm:$0xff]   ;;  %v3493_v4 = vld [vmem:[%s4023_s15 + $0x630] ss:$52 sps:$4 sm:$0xff]  }
  0xb0   : > { %1044 = vmatmul.mubr.f32.vlgmr.msra.gmra.mrb[0].mxu0 %v4098_v47  ;;  %1115 = vmatmul.mubr.f32.vlgmr.msra.gmra.mrb[0].mxu1 %v4098_v47 }
  0xb1   : > { %2700 = vmatpush1.bf16.msra.mxu0 %v3400_v5  ;;  %2764 = vmatpush1.bf16.msra.mxu1 %v3403_v6  ;;  %v3494_v5 = vld [vmem:[%s4023_s15 + $0x24] ss:$52 sps:$4 sm:$0xff]   ;;  %v3497_v6 = vld [vmem:[%s4023_s15 + $0x2c] ss:$52 sps:$4 sm:$0xff]  }
  0xb2   : > { %2702 = vmatprep.subr.bf16.mxu0 %v3404_v7  ;;  %2766 = vmatprep.subr.bf16.mxu1 %v3407_v8  ;;  %v3496_v7 = vld [vmem:[%s4023_s15 + $0x20] ss:$52 sps:$4 sm:$0xff]   ;;  %v3499_v8 = vld [vmem:[%s4023_s15 + $0x28] ss:$52 sps:$4 sm:$0xff]  }
  0xb3   : > { %1185 = vmatprep.mubr.f32.mxu0 %v4104_v50  ;;  %1256 = vmatprep.mubr.f32.mxu1 %v4104_v50 }
  0xb5   : > { %2704 = vmatpush1.bf16.msra.mxu0 %v3406_v9  ;;  %2768 = vmatpush1.bf16.msra.mxu1 %v3409_v10  ;;  %v3500_v9 = vld [vmem:[%s4023_s15 + $0x8c] ss:$52 sps:$4 sm:$0xff]   ;;  %v3503_v10 = vld [vmem:[%s4023_s15 + $0x94] ss:$52 sps:$4 sm:$0xff]  }
  0xb6   : > { %2706 = vmatprep.subr.bf16.mxu0 %v3410_v11  ;;  %2770 = vmatprep.subr.bf16.mxu1 %v3413_v12  ;;  %v3502_v11 = vld [vmem:[%s4023_s15 + $0x88] ss:$52 sps:$4 sm:$0xff]   ;;  %v3505_v12 = vld [vmem:[%s4023_s15 + $0x90] ss:$52 sps:$4 sm:$0xff]  }
  0xb9   : > { %2708 = vmatpush1.bf16.msra.mxu0 %v3412_v13  ;;  %2772 = vmatpush1.bf16.msra.mxu1 %v3415_v14  ;;  %v3506_v13 = vld [vmem:[%s4023_s15 + $0xf4] ss:$52 sps:$4 sm:$0xff]   ;;  %v3509_v14 = vld [vmem:[%s4023_s15 + $0xfc] ss:$52 sps:$4 sm:$0xff]  }
  0xba   : > { %2710 = vmatprep.subr.bf16.mxu0 %v3416_v15  ;;  %2774 = vmatprep.subr.bf16.mxu1 %v3419_v16  ;;  %v3508_v15 = vld [vmem:[%s4023_s15 + $0xf0] ss:$52 sps:$4 sm:$0xff]   ;;  %v3511_v16 = vld [vmem:[%s4023_s15 + $0xf8] ss:$52 sps:$4 sm:$0xff]  }
  0xbd   : > { %2712 = vmatpush1.bf16.msra.mxu0 %v3418_v17  ;;  %2776 = vmatpush1.bf16.msra.mxu1 %v3421_v18  ;;  %v3512_v17 = vld [vmem:[%s4023_s15 + $0x15c] ss:$52 sps:$4 sm:$0xff]   ;;  %v3515_v18 = vld [vmem:[%s4023_s15 + $0x164] ss:$52 sps:$4 sm:$0xff]  }
  0xbe   : > { %2714 = vmatprep.subr.bf16.mxu0 %v3422_v19  ;;  %2778 = vmatprep.subr.bf16.mxu1 %v3425_v20  ;;  %v3514_v19 = vld [vmem:[%s4023_s15 + $0x158] ss:$52 sps:$4 sm:$0xff]   ;;  %v3517_v20 = vld [vmem:[%s4023_s15 + $0x160] ss:$52 sps:$4 sm:$0xff]  }
  0xc1   : > { %2716 = vmatpush1.bf16.msra.mxu0 %v3424_v21  ;;  %2780 = vmatpush1.bf16.msra.mxu1 %v3427_v22  ;;  %v3518_v21 = vld [vmem:[%s4023_s15 + $0x1c4] ss:$52 sps:$4 sm:$0xff]   ;;  %v3521_v22 = vld [vmem:[%s4023_s15 + $0x1cc] ss:$52 sps:$4 sm:$0xff]  }
  0xc2   : > { %2718 = vmatprep.subr.bf16.mxu0 %v3428_v23  ;;  %2782 = vmatprep.subr.bf16.mxu1 %v3431_v24  ;;  %v3520_v23 = vld [vmem:[%s4023_s15 + $0x1c0] ss:$52 sps:$4 sm:$0xff]   ;;  %v3523_v24 = vld [vmem:[%s4023_s15 + $0x1c8] ss:$52 sps:$4 sm:$0xff]  }
  0xc5   : > { %2720 = vmatpush1.bf16.msra.mxu0 %v3430_v25  ;;  %2784 = vmatpush1.bf16.msra.mxu1 %v3433_v26  ;;  %v3524_v25 = vld [vmem:[%s4023_s15 + $0x22c] ss:$52 sps:$4 sm:$0xff]   ;;  %v3527_v26 = vld [vmem:[%s4023_s15 + $0x234] ss:$52 sps:$4 sm:$0xff]  }
  0xc6   : > { %2722 = vmatprep.subr.bf16.mxu0 %v3434_v27  ;;  %2786 = vmatprep.subr.bf16.mxu1 %v3437_v28  ;;  %v3526_v27 = vld [vmem:[%s4023_s15 + $0x228] ss:$52 sps:$4 sm:$0xff]   ;;  %v3529_v28 = vld [vmem:[%s4023_s15 + $0x230] ss:$52 sps:$4 sm:$0xff]  }
  0xc9   : > { %2724 = vmatpush1.bf16.msra.mxu0 %v3436_v29  ;;  %2788 = vmatpush1.bf16.msra.mxu1 %v3439_v30  ;;  %v3530_v29 = vld [vmem:[%s4023_s15 + $0x294] ss:$52 sps:$4 sm:$0xff]   ;;  %v3533_v30 = vld [vmem:[%s4023_s15 + $0x29c] ss:$52 sps:$4 sm:$0xff]  }
  0xca   : > { %2726 = vmatprep.subr.bf16.mxu0 %v3440_v31  ;;  %2790 = vmatprep.subr.bf16.mxu1 %v3443_v32  ;;  %v3532_v31 = vld [vmem:[%s4023_s15 + $0x290] ss:$52 sps:$4 sm:$0xff]   ;;  %v3535_v32 = vld [vmem:[%s4023_s15 + $0x298] ss:$52 sps:$4 sm:$0xff]  }
  0xcd   : > { %2728 = vmatpush1.bf16.msra.mxu0 %v3442_v33  ;;  %2792 = vmatpush1.bf16.msra.mxu1 %v3445_v34  ;;  %v3536_v33 = vld [vmem:[%s4023_s15 + $0x2fc] ss:$52 sps:$4 sm:$0xff]   ;;  %v3539_v34 = vld [vmem:[%s4023_s15 + $0x304] ss:$52 sps:$4 sm:$0xff]  }
  0xce   : > { %2730 = vmatprep.subr.bf16.mxu0 %v3446_v35  ;;  %2794 = vmatprep.subr.bf16.mxu1 %v3449_v36  ;;  %v3538_v35 = vld [vmem:[%s4023_s15 + $0x2f8] ss:$52 sps:$4 sm:$0xff]   ;;  %v3541_v36 = vld [vmem:[%s4023_s15 + $0x300] ss:$52 sps:$4 sm:$0xff]  }
  0xd1   : > { %2732 = vmatpush1.bf16.msra.mxu0 %v3448_v37  ;;  %2796 = vmatpush1.bf16.msra.mxu1 %v3451_v38  ;;  %v3542_v37 = vld [vmem:[%s4023_s15 + $0x364] ss:$52 sps:$4 sm:$0xff]   ;;  %v3545_v38 = vld [vmem:[%s4023_s15 + $0x36c] ss:$52 sps:$4 sm:$0xff]  }
  0xd2   : > { %2734 = vmatprep.subr.bf16.mxu0 %v3452_v39  ;;  %2798 = vmatprep.subr.bf16.mxu1 %v3455_v40  ;;  %v3544_v39 = vld [vmem:[%s4023_s15 + $0x360] ss:$52 sps:$4 sm:$0xff]   ;;  %v3547_v40 = vld [vmem:[%s4023_s15 + $0x368] ss:$52 sps:$4 sm:$0xff]  }
  0xd5   : > { %2736 = vmatpush1.bf16.msra.mxu0 %v3454_v41  ;;  %2800 = vmatpush1.bf16.msra.mxu1 %v3457_v42  ;;  %v3548_v41 = vld [vmem:[%s4023_s15 + $0x3cc] ss:$52 sps:$4 sm:$0xff]   ;;  %v3551_v42 = vld [vmem:[%s4023_s15 + $0x3d4] ss:$52 sps:$4 sm:$0xff]  }
  0xd6   : > { %2738 = vmatprep.subr.bf16.mxu0 %v3458_v43  ;;  %2802 = vmatprep.subr.bf16.mxu1 %v3461_v44  ;;  %v3550_v43 = vld [vmem:[%s4023_s15 + $0x3c8] ss:$52 sps:$4 sm:$0xff]   ;;  %v3553_v44 = vld [vmem:[%s4023_s15 + $0x3d0] ss:$52 sps:$4 sm:$0xff]  }
  0xd9   : > { %2740 = vmatpush1.bf16.msra.mxu0 %v3460_v45  ;;  %2804 = vmatpush1.bf16.msra.mxu1 %v3463_v46  ;;  %v3554_v45 = vld [vmem:[%s4023_s15 + $0x434] ss:$52 sps:$4 sm:$0xff]   ;;  %v3557_v46 = vld [vmem:[%s4023_s15 + $0x43c] ss:$52 sps:$4 sm:$0xff]  }
  0xda   : > { %2742 = vmatprep.subr.bf16.mxu0 %v3464_v48  ;;  %2806 = vmatprep.subr.bf16.mxu1 %v3467_v49  ;;  %v3556_v48 = vld [vmem:[%s4023_s15 + $0x430] ss:$52 sps:$4 sm:$0xff]   ;;  %v3559_v49 = vld [vmem:[%s4023_s15 + $0x438] ss:$52 sps:$4 sm:$0xff]  }
  0xdd   : > { %2744 = vmatpush1.bf16.msra.mxu0 %v3466_v51  ;;  %2808 = vmatpush1.bf16.msra.mxu1 %v3469_v52  ;;  %v3560_v51 = vld [vmem:[%s4023_s15 + $0x49c] ss:$52 sps:$4 sm:$0xff]   ;;  %v3563_v52 = vld [vmem:[%s4023_s15 + $0x4a4] ss:$52 sps:$4 sm:$0xff]  }
  0xde   : > { %2746 = vmatprep.subr.bf16.mxu0 %v3470_v53  ;;  %2810 = vmatprep.subr.bf16.mxu1 %v3473_v54  ;;  %v3562_v53 = vld [vmem:[%s4023_s15 + $0x498] ss:$52 sps:$4 sm:$0xff]   ;;  %v3565_v54 = vld [vmem:[%s4023_s15 + $0x4a0] ss:$52 sps:$4 sm:$0xff]  }
  0xe1   : > { %2748 = vmatpush1.bf16.msra.mxu0 %v3472_v55  ;;  %2812 = vmatpush1.bf16.msra.mxu1 %v3475_v56  ;;  %v3566_v55 = vld [vmem:[%s4023_s15 + $0x504] ss:$52 sps:$4 sm:$0xff]   ;;  %v3569_v56 = vld [vmem:[%s4023_s15 + $0x50c] ss:$52 sps:$4 sm:$0xff]  }
  0xe2   : > { %2750 = vmatprep.subr.bf16.mxu0 %v3476_v57  ;;  %2814 = vmatprep.subr.bf16.mxu1 %v3479_v58  ;;  %v3568_v57 = vld [vmem:[%s4023_s15 + $0x500] ss:$52 sps:$4 sm:$0xff]   ;;  %v3571_v58 = vld [vmem:[%s4023_s15 + $0x508] ss:$52 sps:$4 sm:$0xff]  }
  0xe5   : > { %2752 = vmatpush1.bf16.msra.mxu0 %v3478_v59  ;;  %2816 = vmatpush1.bf16.msra.mxu1 %v3481_v60  ;;  %v3572_v59 = vld [vmem:[%s4023_s15 + $0x56c] ss:$52 sps:$4 sm:$0xff]   ;;  %v3575_v60 = vld [vmem:[%s4023_s15 + $0x574] ss:$52 sps:$4 sm:$0xff]  }
  0xe6   : > { %2754 = vmatprep.subr.bf16.mxu0 %v3482_v61  ;;  %2818 = vmatprep.subr.bf16.mxu1 %v3485_v62  ;;  %v3574_v61 = vld [vmem:[%s4023_s15 + $0x568] ss:$52 sps:$4 sm:$0xff]   ;;  %v3577_v62 = vld [vmem:[%s4023_s15 + $0x570] ss:$52 sps:$4 sm:$0xff]  }
  0xe9   : > { %2756 = vmatpush1.bf16.msra.mxu0 %v3484_v63  ;;  %2820 = vmatpush1.bf16.msra.mxu1 %v3487_v0  ;;  %v3578_v63 = vld [vmem:[%s4023_s15 + $0x5d4] ss:$52 sps:$4 sm:$0xff]   ;;  %v3581_v0 = vld [vmem:[%s4023_s15 + $0x5dc] ss:$52 sps:$4 sm:$0xff]  }
  0xea   : > { %2758 = vmatprep.subr.bf16.mxu0 %v3488_v1  ;;  %2822 = vmatprep.subr.bf16.mxu1 %v3491_v2  ;;  %v3580_v1 = vld [vmem:[%s4023_s15 + $0x5d0] ss:$52 sps:$4 sm:$0xff]   ;;  %v3583_v2 = vld [vmem:[%s4023_s15 + $0x5d8] ss:$52 sps:$4 sm:$0xff]  }
  0xed   : > { %2760 = vmatpush1.bf16.msra.mxu0 %v3490_v3  ;;  %2824 = vmatpush1.bf16.msra.mxu1 %v3493_v4  ;;  %v3584_v3 = vld [vmem:[%s4023_s15 + $0x63c] ss:$52 sps:$4 sm:$0xff]   ;;  %v3587_v4 = vld [vmem:[%s4023_s15 + $0x644] ss:$52 sps:$4 sm:$0xff]  }
  0xee   : > { %2826 = vmatprep.subr.bf16.mxu0 %v3494_v5  ;;  %2890 = vmatprep.subr.bf16.mxu1 %v3497_v6  ;;  %v3586_v5 = vld [vmem:[%s4023_s15 + $0x638] ss:$52 sps:$4 sm:$0xff]   ;;  %v3589_v6 = vld [vmem:[%s4023_s15 + $0x640] ss:$52 sps:$4 sm:$0xff]  }
  0xf0   : > { %1186 = vmatmul.mubr.f32.vlgmr.msra.gmra.mrb[2].mxu0 %v4098_v47  ;;  %1257 = vmatmul.mubr.f32.vlgmr.msra.gmra.mrb[2].mxu1 %v4098_v47 }
  0xf1   : > { %2828 = vmatpush1.bf16.msra.mxu0 %v3496_v7  ;;  %2892 = vmatpush1.bf16.msra.mxu1 %v3499_v8  ;;  %v3590_v7 = vld [vmem:[%s4023_s15 + $0x370] ss:$52 sps:$4 sm:$0xff]  }
  0xf2   : > { %2830 = vmatprep.subr.bf16.mxu0 %v3500_v9  ;;  %2894 = vmatprep.subr.bf16.mxu1 %v3503_v10  ;;  %v3591_v8 = vld [vmem:[%s4023_s15 + $0x30] ss:$52 sps:$4 sm:$0xff]   ;;  %v3592_v9 = vld [vmem:[%s4023_s15 + $0x3d8] ss:$52 sps:$4 sm:$0xff]  }
  0xf3   : > { %1327 = vmatprep.mubr.f32.mxu0 %v4104_v50  ;;  %1398 = vmatprep.mubr.f32.mxu1 %v4104_v50  ;;  %v3593_v10 = vld [vmem:[%s4023_s15 + $0x98] ss:$52 sps:$4 sm:$0xff]  }
  0xf5   : > { %2832 = vmatpush1.bf16.msra.mxu0 %v3502_v11  ;;  %2896 = vmatpush1.bf16.msra.mxu1 %v3505_v12  ;;  %v3594_v11 = vld [vmem:[%s4023_s15 + $0x440] ss:$52 sps:$4 sm:$0xff]  }
  0xf6   : > { %2834 = vmatprep.subr.bf16.mxu0 %v3506_v13  ;;  %2898 = vmatprep.subr.bf16.mxu1 %v3509_v14  ;;  %v3595_v12 = vld [vmem:[%s4023_s15 + $0x100] ss:$52 sps:$4 sm:$0xff]   ;;  %v3596_v13 = vld [vmem:[%s4023_s15 + $0x4a8] ss:$52 sps:$4 sm:$0xff]  }
  0xf7   : > { %v3597_v14 = vld [vmem:[%s4023_s15 + $0x168] ss:$52 sps:$4 sm:$0xff]  }
  0xf9   : > { %2836 = vmatpush1.bf16.msra.mxu0 %v3508_v15  ;;  %2900 = vmatpush1.bf16.msra.mxu1 %v3511_v16  ;;  %v3598_v15 = vld [vmem:[%s4023_s15 + $0x510] ss:$52 sps:$4 sm:$0xff]  }
  0xfa   : > { %2838 = vmatprep.subr.bf16.mxu0 %v3512_v17  ;;  %2902 = vmatprep.subr.bf16.mxu1 %v3515_v18  ;;  %v3599_v16 = vld [vmem:[%s4023_s15 + $0x1d0] ss:$52 sps:$4 sm:$0xff]   ;;  %v3600_v17 = vld [vmem:[%s4023_s15 + $0x578] ss:$52 sps:$4 sm:$0xff]   ;;  %v3602_v18 = vld [vmem:[%s4023_s15 + $0x5e0] ss:$52 sps:$4 sm:$0xff]  }
  0xfd   : > { %2840 = vmatpush1.bf16.msra.mxu0 %v3514_v19  ;;  %2904 = vmatpush1.bf16.msra.mxu1 %v3517_v20  ;;  %v3603_v19 = vld [vmem:[%s4023_s15 + $0x2a0] ss:$52 sps:$4 sm:$0xff]   ;;  %v3604_v20 = vld [vmem:[%s4023_s15 + $0x648] ss:$52 sps:$4 sm:$0xff]  }
  0xfe   : > { %2842 = vmatprep.subr.bf16.mxu0 %v3518_v21  ;;  %2906 = vmatprep.subr.bf16.mxu1 %v3521_v22  ;;  %v3605_v21 = vld [vmem:[%s4023_s15 + $0x308] ss:$52 sps:$4 sm:$0xff]   ;;  %v3797_v22 = vmov 1983009808  }
 0x101   : > { %2844 = vmatpush1.bf16.msra.mxu0 %v3520_v23  ;;  %2908 = vmatpush1.bf16.msra.mxu1 %v3523_v24  ;;  %v1491_v23 = vunpack.c.l.s4 %v3797_v22  ;;  %v1493_v24 = vlaneseq }
 0x102   : > { %2846 = vmatprep.subr.bf16.mxu0 %v3524_v25  ;;  %2910 = vmatprep.subr.bf16.mxu1 %v3527_v26 }
 0x103   : > { %v1492_v25 = vunpack.c.0.s8 %v1491_v23  ;;  %v4280_v26 = vshrl.u32 %v1493_v24, 7 }
 0x105   : > { %2848 = vmatpush1.bf16.msra.mxu0 %v3526_v27  ;;  %2912 = vmatpush1.bf16.msra.mxu1 %v3529_v28 }
 0x106   : > { %2850 = vmatprep.subr.bf16.mxu0 %v3530_v29  ;;  %2914 = vmatprep.subr.bf16.mxu1 %v3533_v30  ;;  %v4283_v29 = vsub.s32 %v1492_v25, %v4280_v26 }
 0x109   : > { %2852 = vmatpush1.bf16.msra.mxu0 %v3532_v31  ;;  %2916 = vmatpush1.bf16.msra.mxu1 %v3535_v32 }
 0x10a   : > { %2854 = vmatprep.subr.bf16.mxu0 %v3536_v33  ;;  %2918 = vmatprep.subr.bf16.mxu1 %v3539_v34 }
 0x10d   : > { %2856 = vmatpush1.bf16.msra.mxu0 %v3538_v35  ;;  %2920 = vmatpush1.bf16.msra.mxu1 %v3541_v36  ;;  %v323_v35 = vld [vmem:[%s4043_s12] sm:$0xff] }
 0x10e   : > { %2858 = vmatprep.subr.bf16.mxu0 %v3542_v37  ;;  %2922 = vmatprep.subr.bf16.mxu1 %v3545_v38 }
 0x111   : > { %2860 = vmatpush1.bf16.msra.mxu0 %v3544_v39  ;;  %2924 = vmatpush1.bf16.msra.mxu1 %v3547_v40 }
 0x112   : > { %2862 = vmatprep.subr.bf16.mxu0 %v3548_v41  ;;  %2926 = vmatprep.subr.bf16.mxu1 %v3551_v42 }
 0x115   : > { %2864 = vmatpush1.bf16.msra.mxu0 %v3550_v43  ;;  %2928 = vmatpush1.bf16.msra.mxu1 %v3553_v44 }
 0x116   : > { %2866 = vmatprep.subr.bf16.mxu0 %v3554_v45  ;;  %2930 = vmatprep.subr.bf16.mxu1 %v3557_v46  ;;  %v324_v46 = vld [vmem:[%s4043_s12 + $0x8] sm:$0xff] }
 0x119   : > { %2868 = vmatpush1.bf16.msra.mxu0 %v3556_v48  ;;  %2932 = vmatpush1.bf16.msra.mxu1 %v3559_v49 }
 0x11a   : > { %2870 = vmatprep.subr.bf16.mxu0 %v3560_v51  ;;  %2934 = vmatprep.subr.bf16.mxu1 %v3563_v52 }
 0x11d   : > { %2872 = vmatpush1.bf16.msra.mxu0 %v3562_v53  ;;  %2936 = vmatpush1.bf16.msra.mxu1 %v3565_v54 }
 0x11e   : > { %2874 = vmatprep.subr.bf16.mxu0 %v3566_v55  ;;  %2938 = vmatprep.subr.bf16.mxu1 %v3569_v56 }
 0x121   : > { %2876 = vmatpush1.bf16.msra.mxu0 %v3568_v57  ;;  %2940 = vmatpush1.bf16.msra.mxu1 %v3571_v58 }
 0x122   : > { %2878 = vmatprep.subr.bf16.mxu0 %v3572_v59  ;;  %2942 = vmatprep.subr.bf16.mxu1 %v3575_v60  ;;  %v325_v59 = vld [vmem:[%s4043_s12 + $0x10] sm:$0xff] }
 0x125   : > { %2880 = vmatpush1.bf16.msra.mxu0 %v3574_v61  ;;  %2944 = vmatpush1.bf16.msra.mxu1 %v3577_v62 }
 0x126   : > { %2882 = vmatprep.subr.bf16.mxu0 %v3578_v63  ;;  %2946 = vmatprep.subr.bf16.mxu1 %v3581_v0 }
 0x129   : > { %2884 = vmatpush1.bf16.msra.mxu0 %v3580_v1  ;;  %2948 = vmatpush1.bf16.msra.mxu1 %v3583_v2  ;;  %v326_v1 = vld [vmem:[%s4043_s12 + $0x18] sm:$0x3] }
 0x12a   : > { %2886 = vmatprep.subr.bf16.mxu0 %v3584_v3  ;;  %2950 = vmatprep.subr.bf16.mxu1 %v3587_v4 }
 0x12d   : > { %2888 = vmatpush1.bf16.msra.mxu0 %v3586_v5  ;;  %2952 = vmatpush1.bf16.msra.mxu1 %v3589_v6 }
 0x12e   : > { %2954 = vmatprep.subr.bf16.mxu0 %v3590_v7 }
 0x130   : > { %1328 = vmatmul.mubr.f32.vlgmr.msra.gmra.mrb[4].mxu0 %v4098_v47  ;;  %1399 = vmatmul.mubr.f32.vlgmr.msra.gmra.mrb[4].mxu1 %v4098_v47 }
 0x131   : > { %2956 = vmatpush3.bf16.msra.mxu0 %v3591_v8  ;;  %1469 = vmatprep.mubr.f32.mxu0 %v4104_v50  ;;  %v3601_v50 = vld [vmem:[%s4023_s15 + $0x238] ss:$52 sps:$4 sm:$0xff]  }
 0x132   : > { %2958 = vmatprep.subr.bf16.mxu0 %v3592_v9 }
 0x135   : > { %2960 = vmatpush3.bf16.msra.mxu0 %v3593_v10 }
 0x136   : > { %2962 = vmatprep.subr.bf16.mxu0 %v3594_v11 }
 0x139   : > { %2964 = vmatpush3.bf16.msra.mxu0 %v3595_v12 }
 0x13a   : > { %2966 = vmatprep.subr.bf16.mxu0 %v3596_v13 }
 0x13d   : > { %2968 = vmatpush3.bf16.msra.mxu0 %v3597_v14 }
 0x13e   : > { %2970 = vmatprep.subr.bf16.mxu0 %v3598_v15 }
 0x141   : > { %2972 = vmatpush3.bf16.msra.mxu0 %v3599_v16 }
 0x142   : > { %2974 = vmatprep.subr.bf16.mxu0 %v3600_v17 }
 0x145   : > { %2976 = vmatpush3.bf16.msra.mxu0 %v3601_v50 }
 0x146   : > { %2978 = vmatprep.subr.bf16.mxu0 %v3602_v18 }
 0x149   : > { %2980 = vmatpush3.bf16.msra.mxu0 %v3603_v19 }
 0x14a   : > { %2982 = vmatprep.subr.bf16.mxu0 %v3604_v20 }
 0x14d   : > { %2984 = vmatpush3.bf16.msra.mxu0 %v3605_v21 }
 0x150   : > { %1470 = vmatmul.mubr.f32.vlgmr.msra.gmra.mrb[6].mxu0 %v4098_v47 }
 0x183   : > { %v1045_v27 = vpop.f32.mrb[0].mxu0  ;;  %v1116_v28 = vpop.f32.mrb[0].mxu1 }
 0x184   : > { %v1047_v30 = vpop.f32.mrb[1].mxu0  ;;  %v1118_v31 = vpop.f32.mrb[1].mxu1 }
 0x185   : > { %v1488_v32 = vcombine.low %v1045_v27, %v1047_v30  ;;  %v1489_v33 = vcombine.low %v1116_v28, %v1118_v31 }
 0x187   : > { %v1496_v34 = vrot.slane %v1488_v32, %v4283_v29  ;;  %v1503_v47 = vrot.slane %v1489_v33, %v4283_v29 }
 0x189   : > { %v1504_v36 = vcombine.low %v1496_v34, %v1503_v47 }
 0x18b   : > { %v1550_v37 = vadd.f32 %v1504_v36, %v323_v35 }
 0x18d   : > { %1554 = vst [vmem:[%s4043_s12] sm:$0xff] %v1550_v37 }
 0x194   : > { %v4302_v4 = vld [vmem:[%s4043_s12] sm:$0xff] (!%p2530_p7) }
 0x195   : > { %v1570_v8 = vcombine.high (!%p2530_p7), %v4302_v4, %v4302_v4  ;;  %v1577_v9 = vrot.slane (!%p2530_p7), %v4302_v4, %v4283_v29 }
 0x197   : > { %v1584_v15 = vrot.slane (!%p2530_p7), %v1570_v8, %v4283_v29  ;;  %v1585_v16 = vcombine.high (!%p2530_p7), %v1577_v9, %v1577_v9  ;;  %v1642_v20 = vsel (!%p2530_p7), %vm1641_vm0, %v1577_v9, 0.0 }
 0x198   : > { %v1643_v24 = vrot.slane (!%p2530_p7), %v1642_v20, 4 }
 0x199   : > { %v1586_v22 = vcombine.high (!%p2530_p7), %v1584_v15, %v1584_v15  ;;  %v1649_v25 = vsel (!%p2530_p7), %vm1641_vm0, %v1585_v16, 0.0  ;;  %v1656_v30 = vsel (!%p2530_p7), %vm1641_vm0, %v1584_v15, 0.0 }
 0x19a   : > { %v1650_v28 = vrot.slane (!%p2530_p7), %v1649_v25, 4  ;;  %v1644_v32 = vadd.f32 (!%p2530_p7), %v1643_v24, %v1642_v20  ;;  %v1657_v33 = vrot.slane (!%p2530_p7), %v1656_v30, 4 }
 0x19b   : > { %v1663_v34 = vsel (!%p2530_p7), %vm1641_vm0, %v1586_v22, 0.0 }
 0x19c   : > { %v1651_v35 = vadd.f32 (!%p2530_p7), %v1650_v28, %v1649_v25  ;;  %v1664_v36 = vrot.slane (!%p2530_p7), %v1663_v34, 4 }
 0x1c3   : > { %v1187_v38 = vpop.f32.mrb[2].mxu0  ;;  %v1258_v39 = vpop.f32.mrb[2].mxu1 }
 0x1c4   : > { %v1189_v40 = vpop.f32.mrb[3].mxu0  ;;  %v1260_v41 = vpop.f32.mrb[3].mxu1 }
 0x1c5   : > { %v1505_v42 = vcombine.low %v1187_v38, %v1189_v40  ;;  %v1506_v43 = vcombine.low %v1258_v39, %v1260_v41  ;;  %v1645_v39 = vrot.slane (!%p2530_p7), %v1644_v32, 2  ;;  %v1658_v40 = vadd.f32 (!%p2530_p7), %v1657_v33, %v1656_v30 }
 0x1c7   : > { %v1513_v44 = vrot.slane %v1505_v42, %v4283_v29  ;;  %v1520_v45 = vrot.slane %v1506_v43, %v4283_v29  ;;  %v1652_v43 = vrot.slane (!%p2530_p7), %v1651_v35, 2 }
 0x1c9   : > { %v1521_v48 = vcombine.low %v1513_v44, %v1520_v45  ;;  %v1665_v44 = vadd.f32 (!%p2530_p7), %v1664_v36, %v1663_v34 }
 0x1cb   : > { %v1551_v49 = vadd.f32 %v1521_v48, %v324_v46  ;;  %v1646_v48 = vadd.f32 (!%p2530_p7), %v1645_v39, %v1644_v32 }
 0x1cd   : > { %1555 = vst [vmem:[%s4043_s12 + $0x8] sm:$0xff] %v1551_v49  ;;  %v1659_v49 = vrot.slane (!%p2530_p7), %v1658_v40, 2 }
 0x1d4   : > { %v4305_v5 = vld [vmem:[%s4043_s12 + $0x8] sm:$0xff] (!%p2530_p7) }
 0x1d5   : > { %v1587_v10 = vcombine.high (!%p2530_p7), %v4305_v5, %v4305_v5  ;;  %v1594_v11 = vrot.slane (!%p2530_p7), %v4305_v5, %v4283_v29 }
 0x1d7   : > { %v1601_v17 = vrot.slane (!%p2530_p7), %v1587_v10, %v4283_v29  ;;  %v1602_v50 = vcombine.high (!%p2530_p7), %v1594_v11, %v1594_v11  ;;  %v1670_v21 = vsel (!%p2530_p7), %vm1641_vm0, %v1594_v11, 0.0 }
 0x1d8   : > { %v1671_v31 = vrot.slane (!%p2530_p7), %v1670_v21, 4 }
 0x1d9   : > { %v1603_v23 = vcombine.high (!%p2530_p7), %v1601_v17, %v1601_v17  ;;  %v1677_v47 = vsel (!%p2530_p7), %vm1641_vm0, %v1602_v50, 0.0  ;;  %v1684_v41 = vsel (!%p2530_p7), %vm1641_vm0, %v1601_v17, 0.0 }
 0x1da   : > { %v1672_v37 = vadd.f32 (!%p2530_p7), %v1671_v31, %v1670_v21  ;;  %v1678_v38 = vrot.slane (!%p2530_p7), %v1677_v47, 4 }
 0x1db   : > { %v1691_v42 = vsel (!%p2530_p7), %vm1641_vm0, %v1603_v23, 0.0 }
 0x1dc   : > { %v1673_v45 = vrot.slane (!%p2530_p7), %v1672_v37, 2  ;;  %v1679_v46 = vadd.f32 (!%p2530_p7), %v1678_v38, %v1677_v47 }
 0x203   : > { %v1329_v51 = vpop.f32.mrb[4].mxu0  ;;  %v1400_v52 = vpop.f32.mrb[4].mxu1 }
 0x204   : > { %v1331_v53 = vpop.f32.mrb[5].mxu0  ;;  %v1402_v54 = vpop.f32.mrb[5].mxu1 }
 0x205   : > { %v1522_v55 = vcombine.low %v1329_v51, %v1331_v53  ;;  %v1523_v56 = vcombine.low %v1400_v52, %v1402_v54  ;;  %v1685_v51 = vrot.slane (!%p2530_p7), %v1684_v41, 4  ;;  %v1692_v52 = vrot.slane (!%p2530_p7), %v1691_v42, 4 }
 0x206   : > { %v1653_v53 = vadd.f32 (!%p2530_p7), %v1652_v43, %v1651_v35  ;;  %v1666_v54 = vrot.slane (!%p2530_p7), %v1665_v44, 2 }
 0x207   : > { %v1530_v57 = vrot.slane %v1522_v55, %v4283_v29  ;;  %v1537_v58 = vrot.slane %v1523_v56, %v4283_v29  ;;  %v1674_v55 = vadd.f32 (!%p2530_p7), %v1673_v45, %v1672_v37  ;;  %v1680_v56 = vrot.slane (!%p2530_p7), %v1679_v46, 2 }
 0x209   : > { %v1538_v60 = vcombine.low %v1530_v57, %v1537_v58  ;;  %v1647_v57 = vrot.slane (!%p2530_p7), %v1646_v48, 1  ;;  %v1660_v58 = vadd.f32 (!%p2530_p7), %v1659_v49, %v1658_v40 }
 0x20b   : > { %v1552_v61 = vadd.f32 %v1538_v60, %v325_v59  ;;  %v1686_v59 = vadd.f32 (!%p2530_p7), %v1685_v51, %v1684_v41  ;;  %v1693_v60 = vadd.f32 (!%p2530_p7), %v1692_v52, %v1691_v42 }
 0x20d   : > { %1556 = vst [vmem:[%s4043_s12 + $0x10] sm:$0xff] %v1552_v61  ;;  %v1654_v61 = vrot.slane (!%p2530_p7), %v1653_v53, 1  ;;  %v1694_v8 = vrot.slane (!%p2530_p7), %v1693_v60, 2 }
 0x20f   : > { %v1655_v9 = vadd.f32 (!%p2530_p7), %v1654_v61, %v1653_v53  ;;  %v1695_v17 = vadd.f32 (!%p2530_p7), %v1694_v8, %v1693_v60 }
 0x211   : > { %v1696_v25 = vrot.slane (!%p2530_p7), %v1695_v17, 1 }
 0x213   : > { %v1697_v47 = vadd.f32 (!%p2530_p7), %v1696_v25, %v1695_v17 }
 0x214   : > { %v4308_v6 = vld [vmem:[%s4043_s12 + $0x10] sm:$0xff] (!%p2530_p7) }
 0x215   : > { %v1604_v12 = vcombine.high (!%p2530_p7), %v4308_v6, %v4308_v6  ;;  %v4325_v13 = vrot.slane (!%p2530_p7), %v4308_v6, %v4283_v29 }
 0x217   : > { %v4332_v18 = vrot.slane (!%p2530_p7), %v1604_v12, %v4283_v29  ;;  %v1619_v19 = vcombine.high (!%p2530_p7), %v4325_v13, %v4325_v13  ;;  %v1698_v50 = vsel (!%p2530_p7), %vm1641_vm0, %v4325_v13, 0.0 }
 0x218   : > { %v1699_v22 = vrot.slane (!%p2530_p7), %v1698_v50, 4 }
 0x219   : > { %v1620_v27 = vcombine.high (!%p2530_p7), %v4332_v18, %v4332_v18  ;;  %v1705_v23 = vsel (!%p2530_p7), %vm1641_vm0, %v1619_v19, 0.0  ;;  %v1712_v30 = vsel (!%p2530_p7), %vm1641_vm0, %v4332_v18, 0.0  ;;  %v1735_v18 = vmul.f32 (!%p2530_p7), 0.5, %v1655_v9 }
 0x21a   : > { %v1706_v28 = vrot.slane (!%p2530_p7), %v1705_v23, 4  ;;  %v1700_v31 = vadd.f32 (!%p2530_p7), %v1699_v22, %v1698_v50  ;;  %v1713_v32 = vrot.slane (!%p2530_p7), %v1712_v30, 4 }
 0x21b   : > { %v1719_v33 = vsel (!%p2530_p7), %vm1641_vm0, %v1620_v27, 0.0 }
 0x21c   : > { %v1707_v35 = vadd.f32 (!%p2530_p7), %v1706_v28, %v1705_v23  ;;  %v1720_v36 = vrot.slane (!%p2530_p7), %v1719_v33, 4  ;;  %v1701_v19 = vrot.slane (!%p2530_p7), %v1700_v31, 2  ;;  %v1714_v37 = vadd.f32 (!%p2530_p7), %v1713_v32, %v1712_v30 }
 0x21e   : > { %v1708_v40 = vrot.slane (!%p2530_p7), %v1707_v35, 2  ;;  %v1721_v41 = vadd.f32 (!%p2530_p7), %v1720_v36, %v1719_v33  ;;  %v1702_v43 = vadd.f32 (!%p2530_p7), %v1701_v19, %v1700_v31 }
 0x220   : > { %v1703_v51 = vrot.slane (!%p2530_p7), %v1702_v43, 1 }
 0x223   : > { %v2566_v62 = vpop.f32.mrb[6].mxu0 }
 0x224   : > { %v2567_v63 = vpop.f32.mrb[7].mxu0 }
 0x225   : > { %v2568_v0 = vadd.f32 %v2567_v63, %v2566_v62  ;;  %1561 = sbr.rel (%p2530_p7) target bundleno = 654 (0x28e), region = 52  ;;  %v1667_v62 = vadd.f32 (!%p2530_p7), %v1666_v54, %v1665_v44  ;;  %v1675_v63 = vrot.slane (!%p2530_p7), %v1674_v55, 1  ;;  %v1715_v44 = vrot.slane (!%p2530_p7), %v1714_v37, 2 }
 0x227   : > { %v1545_v2 = vrot.slane %v2568_v0, %v4283_v29  ;;  %v1681_v0 = vadd.f32 (!%p2530_p7), %v1680_v56, %v1679_v46  ;;  %v1668_v10 = vrot.slane (!%p2530_p7), %v1667_v62, 1  ;;  %v1676_v11 = vadd.f32 (!%p2530_p7), %v1675_v63, %v1674_v55 }
 0x228   : > { %v1709_v46 = vadd.f32 (!%p2530_p7), %v1708_v40, %v1707_v35  ;;  %v1716_v52 = vadd.f32 (!%p2530_p7), %v1715_v44, %v1714_v37 }
 0x229   : > { %v1553_v3 = vadd.f32 %v1545_v2, %v326_v1  ;;  %v1648_v1 = vadd.f32 (!%p2530_p7), %v1647_v57, %v1646_v48  ;;  %v1661_v2 = vrot.slane (!%p2530_p7), %v1660_v58, 1  ;;  %v1682_v12 = vrot.slane (!%p2530_p7), %v1681_v0, 1 }
 0x22a   : > { %v1669_v20 = vadd.f32 (!%p2530_p7), %v1668_v10, %v1667_v62  ;;  %v1722_v48 = vrot.slane (!%p2530_p7), %v1721_v41, 2  ;;  %v1738_v49 = vmul.f32 (!%p2530_p7), 0.5, %v1676_v11  ;;  %v1710_v55 = vrot.slane (!%p2530_p7), %v1709_v46, 1 }
 0x22b   : > { %1557 = vst [vmem:[%s4043_s12 + $0x18] sm:$0x3] %v1553_v3  ;;  %v1687_v3 = vrot.slane (!%p2530_p7), %v1686_v59, 2  ;;  %v1662_v15 = vadd.f32 (!%p2530_p7), %v1661_v2, %v1660_v58  ;;  %v1683_v21 = vadd.f32 (!%p2530_p7), %v1682_v12, %v1681_v0  ;;  %v1734_v39 = vmul.f32 (!%p2530_p7), 0.5, %v1648_v1 }
 0x22c   : > { %v1737_v45 = vmul.f32 0.5, %v1669_v20  ;;  %v1723_v56 = vadd.f32 %v1722_v48, %v1721_v41  ;;  %v1741_v57 = vmul.f32 0.5, %v1697_v47  ;;  %v1717_v60 = vrot.slane %v1716_v52, 1 }
 0x22d   : > { %v1688_v16 = vadd.f32 %v1687_v3, %v1686_v59  ;;  %v1736_v42 = vmul.f32 0.5, %v1662_v15  ;;  %v1760_v58 = vcombine.low %v1734_v39, %v1735_v18  ;;  %v1704_v59 = vadd.f32 %v1703_v51, %v1702_v43 }
 0x22e   : > { %v1711_v63 = vadd.f32 %v1710_v55, %v1709_v46  ;;  %v1724_v0 = vrot.slane %v1723_v56, 1  ;;  %v1718_v3 = vadd.f32 %v1717_v60, %v1716_v52 }
 0x22f   : > { %v1689_v24 = vrot.slane %v1688_v16, 1  ;;  %v1761_v62 = vcombine.low %v1736_v42, %v1737_v45  ;;  %v1768_v1 = vrot.slane %v1760_v58, %v4283_v29  ;;  %v1742_v9 = vmul.f32 0.5, %v1704_v59 }
 0x230   : > { %v1725_v11 = vadd.f32 %v1724_v0, %v1723_v56  ;;  %v1743_v12 = vmul.f32 0.5, %v1711_v63  ;;  %v1744_v50 = vmul.f32 0.5, %v1718_v3 }
 0x231   : > { %v1690_v34 = vadd.f32 %v1689_v24, %v1688_v16  ;;  %v1775_v10 = vrot.slane %v1761_v62, %v4283_v29 }
 0x232   : > { %v4311_v7 = vld [vmem:[%s4043_s12 + $0x18] sm:$0x3]  ;;  %v1794_v23 = vcombine.low %v1742_v9, %v1743_v12 }
 0x233   : > { %v1627_v14 = vrot.slane %v4311_v7, %v4283_v29  ;;  %v1740_v54 = vmul.f32 0.5, %v1690_v34  ;;  %v1776_v20 = vcombine.low %v1768_v1, %v1775_v10 }
 0x234   : > { %v1802_v31 = vrot.slane %v1794_v23, %v4283_v29 }
 0x235   : > { %v1726_v13 = vsel %vm1641_vm0, %v1627_v14, 0.0  ;;  %v1739_v14 = vmul.f32 0.5, %v1683_v21  ;;  %v1778_v15 = vcombine.low %v1740_v54, %v1741_v57  ;;  %v1745_v21 = vmul.f32 0.5, %v1725_v11 }
 0x236   : > { %v1727_v38 = vrot.slane %v1726_v13, 4  ;;  %v4361_v25 = vsub.f32 %v4302_v4, %v1776_v20 }
 0x237   : > { %v1777_v2 = vcombine.low %v1738_v49, %v1739_v14  ;;  %v1792_v22 = vrot.slane %v1778_v15, %v4283_v29  ;;  %v1795_v30 = vcombine.low %v1744_v50, %v1745_v21 }
 0x238   : > { %v1728_v27 = vadd.f32 %v1727_v38, %v1726_v13  ;;  %v1826_v33 = vmul.f32 %v4361_v25, %v4361_v25 }
 0x239   : > { %v1785_v16 = vrot.slane %v1777_v2, %v4283_v29  ;;  %v1809_v13 = vrot.slane %v1795_v30, %v4283_v29 }
 0x23a   : > { %v1729_v53 = vrot.slane %v1728_v27, 2  ;;  %v1834_v47 = vcombine.high %v1826_v33, %v1826_v33  ;;  %v1841_v35 = vrot.slane %v1826_v33, %v4283_v29 }
 0x23b   : > { %v1793_v28 = vcombine.low %v1785_v16, %v1792_v22  ;;  %v1810_v36 = vcombine.low %v1802_v31, %v1809_v13 }
 0x23c   : > { %v1730_v61 = vadd.f32 %v1729_v53, %v1728_v27  ;;  %v1848_v37 = vrot.slane %v1834_v47, %v4283_v29  ;;  %v1849_v38 = vcombine.high %v1841_v35, %v1841_v35  ;;  %v1905_v39 = vsel %vm1641_vm0, %v1841_v35, 0.0 }
 0x23d   : > { %v4369_v34 = vsub.f32 %v4305_v5, %v1793_v28  ;;  %v4380_v40 = vsub.f32 %v4308_v6, %v1810_v36  ;;  %v1906_v18 = vrot.slane %v1905_v39, 4 }
 0x23e   : > { %v1731_v8 = vrot.slane %v1730_v61, 1  ;;  %v1850_v42 = vcombine.high %v1848_v37, %v1848_v37  ;;  %v1912_v43 = vsel %vm1641_vm0, %v1849_v38, 0.0  ;;  %v1919_v44 = vsel %vm1641_vm0, %v1848_v37, 0.0 }
 0x23f   : > { %v1827_v4 = vmul.f32 %v4369_v34, %v4369_v34  ;;  %v1907_v46 = vadd.f32 %v1906_v18, %v1905_v39  ;;  %v1913_v48 = vrot.slane %v1912_v43, 4  ;;  %v1920_v49 = vrot.slane %v1919_v44, 4 }
 0x240   : > { %v1732_v17 = vadd.f32 %v1731_v8, %v1730_v61  ;;  %v1926_v6 = vsel %vm1641_vm0, %v1850_v42, 0.0 }
 0x241   : > { %v1851_v5 = vcombine.high %v1827_v4, %v1827_v4  ;;  %v1858_v41 = vrot.slane %v1827_v4, %v4283_v29  ;;  %v1908_v53 = vrot.slane %v1907_v46, 2  ;;  %v1914_v54 = vadd.f32 %v1913_v48, %v1912_v43 }
 0x242   : > { %v1746_v24 = vmul.f32 0.5, %v1732_v17  ;;  %v1921_v55 = vadd.f32 %v1920_v49, %v1919_v44  ;;  %v1927_v56 = vrot.slane %v1926_v6, 4 }
 0x243   : > { %v1865_v27 = vrot.slane %v1851_v5, %v4283_v29  ;;  %v1866_v45 = vcombine.high %v1858_v41, %v1858_v41  ;;  %v1933_v14 = vsel %vm1641_vm0, %v1858_v41, 0.0  ;;  %v1909_v60 = vadd.f32 %v1908_v53, %v1907_v46 }
 0x244   : > { %v1817_v32 = vrot.slane %v1746_v24, %v4283_v29  ;;  %v1934_v57 = vrot.slane %v1933_v14, 4  ;;  %v1915_v62 = vrot.slane %v1914_v54, 2  ;;  %v1922_v63 = vrot.slane %v1921_v55, 2 }
 0x245   : > { %v1867_v58 = vcombine.high %v1865_v27, %v1865_v27  ;;  %v1940_v61 = vsel %vm1641_vm0, %v1866_v45, 0.0  ;;  %v1928_v0 = vadd.f32 %v1927_v56, %v1926_v6  ;;  %v1910_v3 = vrot.slane %v1909_v60, 1 }
 0x246   : > { %v4375_v19 = vsub.f32 %v4311_v7, %v1817_v32  ;;  %v1828_v7 = vmul.f32 %v4380_v40, %v4380_v40  ;;  %v1935_v1 = vadd.f32 %v1934_v57, %v1933_v14  ;;  %v1941_v8 = vrot.slane %v1940_v61, 4 }
 0x247   : > { %v1947_v9 = vsel %vm1641_vm0, %v1865_v27, 0.0  ;;  %v1916_v10 = vadd.f32 %v1915_v62, %v1914_v54  ;;  %v1923_v11 = vadd.f32 %v1922_v63, %v1921_v55  ;;  %v1929_v12 = vrot.slane %v1928_v0, 2 }
 0x248   : > { %v1829_v51 = vmul.f32 %v4375_v19, %v4375_v19  ;;  %v1868_v52 = vcombine.high %v1828_v7, %v1828_v7  ;;  %v1875_v59 = vrot.slane %v1828_v7, %v4283_v29  ;;  %v1936_v15 = vrot.slane %v1935_v1, 2 }
 0x249   : > { %v1942_v17 = vadd.f32 %v1941_v8, %v1940_v61  ;;  %v1948_v50 = vrot.slane %v1947_v9, 4  ;;  %v1954_v20 = vsel %vm1641_vm0, %v1867_v58, 0.0  ;;  %v1917_v21 = vrot.slane %v1916_v10, 1 }
 0x24a   : > { %v1882_v2 = vrot.slane %v1868_v52, %v4283_v29  ;;  %v1883_v16 = vcombine.high %v1875_v59, %v1875_v59  ;;  %v1924_v22 = vrot.slane %v1923_v11, 1  ;;  %v1930_v23 = vadd.f32 %v1929_v12, %v1928_v0 }
 0x24b   : > { %v1937_v24 = vadd.f32 %v1936_v15, %v1935_v1  ;;  %v1943_v28 = vrot.slane %v1942_v17, 2  ;;  %v1949_v30 = vadd.f32 %v1948_v50, %v1947_v9  ;;  %v1955_v31 = vrot.slane %v1954_v20, 4 }
 0x24c   : > { %v1961_v32 = vsel %vm1641_vm0, %v1875_v59, 0.0  ;;  %v1884_v33 = vcombine.high %v1882_v2, %v1882_v2  ;;  %v1891_v13 = vrot.slane %v1829_v51, %v4283_v29  ;;  %v1911_v47 = vadd.f32 %v1910_v3, %v1909_v60 }
 0x24d   : > { %v1918_v35 = vadd.f32 %v1917_v21, %v1916_v10  ;;  %v1944_v36 = vadd.f32 %v1943_v28, %v1942_v17  ;;  %v1950_v4 = vrot.slane %v1949_v30, 2  ;;  %v1956_v37 = vadd.f32 %v1955_v31, %v1954_v20 }
 0x24e   : > { %v1962_v38 = vrot.slane %v1961_v32, 4  ;;  %v1925_v39 = vadd.f32 %v1924_v22, %v1923_v11  ;;  %v1931_v5 = vrot.slane %v1930_v23, 1  ;;  %v1968_v41 = vsel %vm1641_vm0, %v1883_v16, 0.0 }
 0x24f   : > { %v1975_v18 = vsel %vm1641_vm0, %v1882_v2, 0.0  ;;  %v1938_v42 = vrot.slane %v1937_v24, 1  ;;  %v1951_v43 = vadd.f32 %v1950_v4, %v1949_v30  ;;  %v1957_v44 = vrot.slane %v1956_v37, 2 }
 0x250   : > { %v1963_v7 = vadd.f32 %v1962_v38, %v1961_v32  ;;  %v1969_v27 = vrot.slane %v1968_v41, 4  ;;  %v1976_v45 = vrot.slane %v1975_v18, 4  ;;  %v1982_v46 = vsel %vm1641_vm0, %v1884_v33, 0.0 }
 0x251   : > { %v1989_v48 = vsel %vm1641_vm0, %v1891_v13, 0.0  ;;  %v1945_v49 = vrot.slane %v1944_v36, 1  ;;  %v1952_v6 = vrot.slane %v1951_v43, 1  ;;  %v1958_v14 = vadd.f32 %v1957_v44, %v1956_v37 }
 0x252   : > { %v1964_v51 = vrot.slane %v1963_v7, 2  ;;  %v1970_v52 = vadd.f32 %v1969_v27, %v1968_v41  ;;  %v1977_v53 = vadd.f32 %v1976_v45, %v1975_v18  ;;  %v1983_v54 = vrot.slane %v1982_v46, 4 }
 0x253   : > { %v1990_v55 = vrot.slane %v1989_v48, 4  ;;  %v1932_v56 = vadd.f32 %v1931_v5, %v1930_v23  ;;  %v1939_v57 = vadd.f32 %v1938_v42, %v1937_v24  ;;  %v1959_v58 = vrot.slane %v1958_v14, 1 }
 0x254   : > { %v1965_v59 = vadd.f32 %v1964_v51, %v1963_v7  ;;  %v1971_v60 = vrot.slane %v1970_v52, 2  ;;  %v1978_v61 = vrot.slane %v1977_v53, 2  ;;  %v1984_v62 = vadd.f32 %v1983_v54, %v1982_v46 }
 0x255   : > { %v1991_v63 = vadd.f32 %v1990_v55, %v1989_v48  ;;  %v1946_v0 = vadd.f32 %v1945_v49, %v1944_v36  ;;  %v1953_v1 = vadd.f32 %v1952_v6, %v1951_v43  ;;  %v1996_v3 = vmul.f32 0.5, %v1911_v47 }
 0x256   : > { %v1966_v2 = vrot.slane %v1965_v59, 1  ;;  %v1972_v8 = vadd.f32 %v1971_v60, %v1970_v52  ;;  %v1979_v9 = vadd.f32 %v1978_v61, %v1977_v53  ;;  %v1985_v10 = vrot.slane %v1984_v62, 2 }
 0x257   : > { %v1992_v11 = vrot.slane %v1991_v63, 2  ;;  %v1960_v12 = vadd.f32 %v1959_v58, %v1958_v14  ;;  %v1997_v15 = vmul.f32 0.5, %v1918_v35  ;;  %v1998_v16 = vmul.f32 0.5, %v1925_v39 }
 0x258   : > { %v1999_v17 = vmul.f32 0.5, %v1932_v56  ;;  %v1973_v50 = vrot.slane %v1972_v8, 1  ;;  %v1980_v20 = vrot.slane %v1979_v9, 1  ;;  %v1986_v21 = vadd.f32 %v1985_v10, %v1984_v62 }
 0x259   : > { %v1993_v22 = vadd.f32 %v1992_v11, %v1991_v63  ;;  %v1967_v23 = vadd.f32 %v1966_v2, %v1965_v59  ;;  %v2000_v24 = vmul.f32 0.5, %v1939_v57  ;;  %v2001_v28 = vmul.f32 0.5, %v1946_v0  ;;  %v2262_v11 = vld [vmem:[%s4038_s9] sm:$0xff] }
 0x25a   : > { %v2011_v30 = vadd.f32 1e-05, %v1996_v3  ;;  %v1974_v31 = vadd.f32 %v1973_v50, %v1972_v8  ;;  %v1987_v32 = vrot.slane %v1986_v21, 1  ;;  %v2002_v13 = vmul.f32 0.5, %v1953_v1 }
 0x25b   : > { %v1994_v33 = vrot.slane %v1993_v22, 1  ;;  %v1981_v47 = vadd.f32 %v1980_v20, %v1979_v9  ;;  %v2012_v36 = vadd.f32 1e-05, %v1997_v15  ;;  %v2013_v4 = vadd.f32 1e-05, %v1998_v16 }
 0x25c   : > { %3609 = vrsqrt.f32 %v2011_v30  ;;  %v1988_v37 = vadd.f32 %v1987_v32, %v1986_v21  ;;  %v2003_v35 = vmul.f32 0.5, %v1960_v12  ;;  %v2014_v38 = vadd.f32 1e-05, %v1999_v17  ;;  %v4424_v32 = vld [vmem:[%s4038_s9 + $0x8] sm:$0x1f] }
 0x25d   : > { %v1995_v39 = vadd.f32 %v1994_v33, %v1993_v22  ;;  %v2004_v5 = vmul.f32 0.5, %v1967_v23  ;;  %v2015_v41 = vadd.f32 1e-05, %v2000_v24  ;;  %3611 = vrsqrt.f32 %v2012_v36 }
 0x25e   : > { %v2005_v18 = vmul.f32 0.5, %v1974_v31  ;;  %v2016_v42 = vadd.f32 1e-05, %v2001_v28  ;;  %v2006_v43 = vmul.f32 0.5, %v1981_v47  ;;  %v2017_v44 = vadd.f32 1e-05, %v2002_v13 }
 0x25f   : > { %3613 = vrsqrt.f32 %v2013_v4  ;;  %v3798_v7 = vmov 1966171168   ;;  %v2007_v45 = vmul.f32 0.5, %v1988_v37  ;;  %v2018_v46 = vadd.f32 1e-05, %v2003_v35 }
 0x260   : > { %v2055_v27 = vunpack.c.l.s4 %v3798_v7  ;;  %3615 = vrsqrt.f32 %v2014_v38  ;;  %v2008_v48 = vmul.f32 0.5, %v1995_v39  ;;  %v2019_v49 = vadd.f32 1e-05, %v2004_v5 }
 0x261   : > { %3617 = vrsqrt.f32 %v2015_v41  ;;  %v2020_v6 = vadd.f32 1e-05, %v2005_v18  ;;  %v2021_v14 = vadd.f32 1e-05, %v2006_v43  ;;  %v2022_v52 = vadd.f32 1e-05, %v2007_v45 }
 0x262   : > { %3619 = vrsqrt.f32 %v2016_v42  ;;  %v2056_v51 = vunpack.c.0.s8 %v2055_v27  ;;  %v2023_v54 = vadd.f32 1e-05, %v2008_v48  ;;  %v4405_v8 = vsub.s32 0, %v4280_v26  ;;  %v2009_v48 = vld [vmem:[%s4033_s10] sm:$0xff] }
 0x263   : > { %3621 = vrsqrt.f32 %v2017_v44  ;;  %v4408_v9 = vsub.s32 1, %v4280_v26  ;;  %v4411_v10 = vsub.s32 2, %v4280_v26  ;;  %v4415_v50 = vsub.s32 3, %v4280_v26 }
 0x264   : > { %3623 = vrsqrt.f32 %v2018_v46  ;;  %v2059_v56 = vsub.s32 %v2056_v51, %v4280_v26  ;;  %v4418_v21 = vsub.s32 4, %v4280_v26  ;;  %v2166_v22 = vsub.s32 5, %v4280_v26 }
 0x265   : > { %3625 = vrsqrt.f32 %v2019_v49  ;;  %v2170_v23 = vsub.s32 6, %v4280_v26  ;;  %v2174_v24 = vsub.s32 7, %v4280_v26  ;;  %v2269_v33 = vrot.slane %v2262_v11, %v4405_v8 }
 0x266   : > { %v3610_v53 = vpop.eup %3609  ;;  %3627 = vrsqrt.f32 %v2020_v6  ;;  %v2273_v13 = vrot.slane %v2262_v11, %v4408_v9  ;;  %v2277_v36 = vrot.slane %v2262_v11, %v4411_v10  ;;  %v2281_v4 = vrot.slane %v2262_v11, %v4415_v50 }
 0x267   : > { %v3612_v55 = vpop.eup %3611  ;;  %3629 = vrsqrt.f32 %v2021_v14  ;;  %v2285_v37 = vrot.slane %v2262_v11, %v4418_v21  ;;  %v2289_v35 = vrot.slane %v2262_v11, %v2166_v22  ;;  %v2293_v42 = vrot.slane %v2262_v11, %v2170_v23 }
 0x268   : > { %3631 = vrsqrt.f32 %v2022_v52  ;;  %v2050_v57 = vcombine.low %v3610_v53, %v3612_v55  ;;  %v2297_v43 = vrot.slane %v2262_v11, %v2174_v24  ;;  %v2301_v44 = vrot.slane %v4424_v32, %v4405_v8 }
 0x269   : > { %v3614_v58 = vpop.eup %3613  ;;  %3633 = vrsqrt.f32 %v2023_v54  ;;  %v2305_v45 = vrot.slane %v4424_v32, %v4408_v9  ;;  %v2309_v46 = vrot.slane %v4424_v32, %v4411_v10  ;;  %v2313_v49 = vrot.slane %v4424_v32, %v4415_v50 }
 0x26a   : > { %v3616_v59 = vpop.eup %3615  ;;  %v2060_v62 = vrot.slane %v2050_v57, %v2059_v56  ;;  %v2318_v6 = vcombine.low %v2269_v33, %v2273_v13  ;;  %v2319_v14 = vcombine.low %v2277_v36, %v2281_v4  ;;  %v2335_v51 = vcombine.low %v2285_v37, %v2289_v35 }
 0x26b   : > { %v3618_v60 = vpop.eup %3617  ;;  %v2051_v61 = vcombine.low %v3614_v58, %v3616_v59  ;;  %v2317_v55 = vrot.slane %v4424_v32, %v4418_v21  ;;  %v2336_v59 = vcombine.low %v2293_v42, %v2297_v43 }
 0x26c   : > { %v3620_v63 = vpop.eup %3619 }
 0x26d   : > { %v3622_v0 = vpop.eup %3621  ;;  %v2052_v1 = vcombine.low %v3618_v60, %v3620_v63  ;;  %v2067_v2 = vrot.slane %v2051_v61, %v2059_v56  ;;  %v2352_v60 = vcombine.low %v2301_v44, %v2305_v45  ;;  %v2010_v61 = vld [vmem:[%s4033_s10 + $0x8] sm:$0x1f]  ;;  %v2333_v63 = vrot.slane %v2319_v14, %v4283_v29 }
 0x26e   : > { %v3624_v3 = vpop.eup %3623 }
 0x26f   : > { %v3626_v12 = vpop.eup %3625  ;;  %v2053_v15 = vcombine.low %v3622_v0, %v3624_v3  ;;  %v2074_v16 = vrot.slane %v2052_v1, %v2059_v56  ;;  %v2082_v17 = vcombine.low %v2060_v62, %v2067_v2  ;;  %v2326_v62 = vrot.slane %v2318_v6, %v4283_v29 }
 0x270   : > { %v3628_v20 = vpop.eup %3627  ;;  %v2343_v0 = vrot.slane %v2335_v51, %v4283_v29  ;;  %v2353_v1 = vcombine.low %v2309_v46, %v2313_v49  ;;  %v2360_v13 = vrot.slane %v2352_v60, %v4283_v29 }
 0x271   : > { %v3630_v28 = vpop.eup %3629  ;;  %v2081_v30 = vrot.slane %v2053_v15, %v2059_v56  ;;  %v2099_v31 = vcombine.low %v3626_v12, %v3628_v20  ;;  %v2090_v39 = vrot.slane %v2082_v17, %v2059_v56 }
 0x272   : > { %v3632_v47 = vpop.eup %3631 }
 0x273   : > { %v3634_v38 = vpop.eup %3633  ;;  %v2083_v26 = vcombine.low %v2074_v16, %v2081_v30  ;;  %v2100_v5 = vcombine.low %v3630_v28, %v3632_v47  ;;  %v2107_v41 = vrot.slane %v2099_v31, %v2059_v56  ;;  %v2350_v31 = vrot.slane %v2336_v59, %v4283_v29 }
 0x274   : > { %v2121_v18 = vrot.slane %v3634_v38, %v2059_v56  ;;  %v2367_v47 = vrot.slane %v2353_v1, %v4283_v29 }
 0x275   : > { %v2097_v7 = vrot.slane %v2083_v26, %v2059_v56  ;;  %v2114_v27 = vrot.slane %v2100_v5, %v2059_v56 }
 0x276   : > { %v2136_v54 = vrot.slane %v2121_v18, %v2059_v56  ;;  %v2368_v45 = vcombine.low %v2360_v13, %v2367_v47 }
 0x277   : > { %v2098_v52 = vcombine.low %v2090_v39, %v2097_v7  ;;  %v2122_v53 = vcombine.low %v2107_v41, %v2114_v27  ;;  %v2334_v41 = vcombine.low %v2326_v62, %v2333_v63  ;;  %v2351_v7 = vcombine.low %v2343_v0, %v2350_v31 }
 0x279   : > { %v2129_v57 = vrot.slane %v2122_v53, %v2059_v56  ;;  %v2140_v58 = vmul.f32 %v2098_v52, %v2009_v48 }
 0x27b   : > { %v2137_v2 = vcombine.low %v2129_v57, %v2136_v54  ;;  %v2147_v3 = vrot.slane %v2140_v58, %v4405_v8  ;;  %v2151_v11 = vrot.slane %v2140_v58, %v4408_v9  ;;  %v2155_v12 = vrot.slane %v2140_v58, %v4411_v10 }
 0x27c   : > { %v2159_v56 = vrot.slane %v2140_v58, %v4415_v50  ;;  %v2163_v15 = vrot.slane %v2140_v58, %v4418_v21  ;;  %v2167_v16 = vrot.slane %v2140_v58, %v2166_v22  ;;  %v2171_v17 = vrot.slane %v2140_v58, %v2170_v23 }
 0x27d   : > { %v2141_v20 = vmul.f32 %v2137_v2, %v2010_v61  ;;  %v2175_v28 = vrot.slane %v2140_v58, %v2174_v24  ;;  %v2196_v30 = vcombine.low %v2147_v3, %v2151_v11 }
 0x27e   : > { %v2197_v32 = vcombine.low %v2155_v12, %v2159_v56  ;;  %v2213_v33 = vcombine.low %v2163_v15, %v2167_v16 }
 0x27f   : > { %v2179_v36 = vrot.slane %v2141_v20, %v4405_v8  ;;  %v2183_v4 = vrot.slane %v2141_v20, %v4408_v9  ;;  %v2187_v37 = vrot.slane %v2141_v20, %v4411_v10  ;;  %v2191_v22 = vrot.slane %v2141_v20, %v4415_v50 }
 0x280   : > { %v2195_v23 = vrot.slane %v2141_v20, %v4418_v21  ;;  %v2204_v24 = vrot.slane %v2196_v30, %v4283_v29  ;;  %v2211_v35 = vrot.slane %v2197_v32, %v4283_v29  ;;  %v2214_v38 = vcombine.low %v2171_v17, %v2175_v28 }
 0x281   : > { %v2221_v26 = vrot.slane %v2213_v33, %v4283_v29  ;;  %v2230_v39 = vcombine.low %v2179_v36, %v2183_v4  ;;  %v2231_v5 = vcombine.low %v2187_v37, %v2191_v22  ;;  %v2375_v10 = vrot.slane %v2317_v55, %v4283_v29 }
 0x282   : > { %v2212_v18 = vcombine.low %v2204_v24, %v2211_v35  ;;  %v2228_v8 = vrot.slane %v2214_v38, %v4283_v29  ;;  %v2253_v9 = vrot.slane %v2195_v23, %v4283_v29 }
 0x283   : > { %v2238_v50 = vrot.slane %v2230_v39, %v4283_v29  ;;  %v2245_v21 = vrot.slane %v2231_v5, %v4283_v29 }
 0x284   : > { %v2229_v42 = vcombine.low %v2221_v26, %v2228_v8  ;;  %v2258_v43 = vmul.f32 %v2212_v18, %v4361_v25  ;;  %v2261_v44 = vmul.f32 %v2253_v9, %v4375_v19 }
 0x285   : > { %v2246_v27 = vcombine.low %v2238_v50, %v2245_v21 }
 0x286   : > { %v2259_v46 = vmul.f32 %v2229_v42, %v4369_v34  ;;  %v2380_v48 = vadd.f32 %v2334_v41, %v2258_v43  ;;  %v2383_v49 = vadd.f32 %v2375_v10, %v2261_v44 }
 0x287   : > { %v2260_v6 = vmul.f32 %v2246_v27, %v4380_v40 }
 0x288   : > { %v2381_v14 = vadd.f32 %v2351_v7, %v2259_v46  ;;  %v2384_v29 = vmax.f32 %v2380_v48, 0.0  ;;  %v2387_v51 = vmax.f32 %v2383_v49, 0.0 }
 0x289   : > { %v2382_v52 = vadd.f32 %v2368_v45, %v2260_v6 }
 0x28a   : > { %v2385_v53 = vmax.f32 %v2381_v14, 0.0  ;;  %2388 = vst [vmem:[%s4043_s12] sm:$0xff] %v2384_v29  ;;  %2391 = vst [vmem:[%s4043_s12 + $0x18] sm:$0x3] %v2387_v51 }
 0x28b   : > { %v2386_v25 = vmax.f32 %v2382_v52, 0.0 }
 0x28c   : > { %2389 = vst [vmem:[%s4043_s12 + $0x8] sm:$0xff] %v2385_v53 }
 0x28d   : > { %2390 = vst [vmem:[%s4043_s12 + $0x10] sm:$0xff] %v2386_v25 }
 0x28e PF: > { %s20_s25 = sadd.s32 1, %s3789_s25   ;;  %s4530_s21 = sld [smem:[#allocation10_spill]] }
 0x28f   : > { %p17_p9 = scmp.ge.s32.totalorder %s20_s25, 18   ;;  %s4531_s13 = sld [smem:[#allocation8_spill]] }
 0x290   : > { %s4532_s28 = sld [smem:[#allocation9_spill]]  ;;  %s4533_s15 = smov %s3753_s16 }
 0x291   : > { %s4534_s16 = smov %s3757_s17  ;;  %s4535_s17 = smov %s3913_s11 }
 0x292   : > { %s4536_s18 = smov %s3765_s19  ;;  %s4537_s19 = smov %s3769_s20 }
 0x293   : > { %s4540_s22 = smov %s3785_s24  ;;  %19 = sbr.rel (!%p17_p9) target bundleno = 11 (0xb), region = 103 }
 0x294   : > { %s4538_s20 = smov %s4530_s21  ;;  %s4539_s21 = smov %s3781_s23 }
 0x295   : > { %s4541_s23 = smov %s4531_s13 }
 0x296   : > { %s4542_s24 = smov %s4532_s28 }
 0x29a   :  { %2414 = vsyncpa [#allocation3], 1 }
 0x29b   :  { %2416 = vsyncpa [#allocation3 + $0x1], 1 }
 0x29c   :  { %2417 = vsyncpa [#allocation5], 1 }
 0x29d   :  { %2419 = vsyncpa [#allocation5 + $0x1], 1 }

// kernel: recon224_forward.6
= control target key start
LH: loop header
LB: loop body
LE: loop exit
PB: predicated region body
PF: predicated region fallthrough
CT: control target
= control target key end

     0   :  { %s701_s0 = inlined_call_operand.vmem [shape: f32[392,128], index: 0, kind: input, shape index: {}]   ;;  %s702_s1 = inlined_call_operand.vmem [shape: f32[1,128], index: 1, kind: input, shape index: {}]   ;;  %s703_s2 = inlined_call_operand.vmem [shape: f32[1,128], index: 2, kind: input, shape index: {}]   ;;  %s704_s3 = inlined_call_operand.vmem [shape: f32[392,128], index: 3, kind: output, shape index: {}]  }
   0x1   :  { %v14_v0 = vld [vmem:[%s701_s0] sm:$0xff]  ;;  %v15_v4 = vld [vmem:[%s701_s0 + $0x8] sm:$0xff]  ;;  %v16_v5 = vld [vmem:[%s701_s0 + $0x10] sm:$0xff] }
   0x2   :  { %v305_v1 = vld [vmem:[%s702_s1] ss:$0 sm:$0xff]  ;;  %v17_v6 = vld [vmem:[%s701_s0 + $0x18] sm:$0xff]  ;;  %v19_v11 = vld [vmem:[%s701_s0 + $0x28] sm:$0xff] }
   0x3   :  { %v310_v2 = vld [vmem:[%s703_s2] ss:$0 sm:$0xff]  ;;  %v70_v3 = vmul.f32 %v305_v1, %v14_v0  ;;  %v71_v7 = vmul.f32 %v305_v1, %v15_v4  ;;  %v72_v8 = vmul.f32 %v305_v1, %v16_v5  ;;  %v73_v9 = vmul.f32 %v305_v1, %v17_v6  ;;  %v20_v12 = vld [vmem:[%s701_s0 + $0x30] sm:$0xff]  ;;  %v21_v17 = vld [vmem:[%s701_s0 + $0x38] sm:$0xff] }
   0x4   :  { %v18_v10 = vld [vmem:[%s701_s0 + $0x20] sm:$0xff]  ;;  %v75_v15 = vmul.f32 %v305_v1, %v19_v11  ;;  %v76_v16 = vmul.f32 %v305_v1, %v20_v12  ;;  %v77_v21 = vmul.f32 %v305_v1, %v21_v17  ;;  %v23_v27 = vld [vmem:[%s701_s0 + $0x48] sm:$0xff]  ;;  %v24_v28 = vld [vmem:[%s701_s0 + $0x50] sm:$0xff] }
   0x5   :  { %v126_v13 = vadd.f32 %v310_v2, %v70_v3  ;;  %v74_v14 = vmul.f32 %v305_v1, %v18_v10  ;;  %v127_v18 = vadd.f32 %v310_v2, %v71_v7  ;;  %v128_v19 = vadd.f32 %v310_v2, %v72_v8  ;;  %v22_v22 = vld [vmem:[%s701_s0 + $0x40] sm:$0xff]  ;;  %v25_v29 = vld [vmem:[%s701_s0 + $0x58] sm:$0xff]  ;;  %v27_v35 = vld [vmem:[%s701_s0 + $0x68] sm:$0xff] }
   0x6   :  { %v129_v20 = vadd.f32 %v310_v2, %v73_v9  ;;  %v131_v25 = vadd.f32 %v310_v2, %v75_v15  ;;  %v132_v26 = vadd.f32 %v310_v2, %v76_v16  ;;  %v133_v33 = vadd.f32 %v310_v2, %v77_v21  ;;  %v26_v34 = vld [vmem:[%s701_s0 + $0x60] sm:$0xff]  ;;  %v28_v36 = vld [vmem:[%s701_s0 + $0x70] sm:$0xff]  ;;  %v29_v41 = vld [vmem:[%s701_s0 + $0x78] sm:$0xff] }
   0x7   :  { %v175_v23 = vmax.f32 %v126_v13, 0.0  ;;  %v130_v24 = vadd.f32 %v310_v2, %v74_v14  ;;  %v176_v30 = vmax.f32 %v127_v18, 0.0  ;;  %v177_v31 = vmax.f32 %v128_v19, 0.0  ;;  %v30_v54 = vld [vmem:[%s701_s0 + $0x80] sm:$0xff]  ;;  %v31_v59 = vld [vmem:[%s701_s0 + $0x88] sm:$0xff]  ;;  %v32_v60 = vld [vmem:[%s701_s0 + $0x90] sm:$0xff] }
   0x8   :  { %v178_v32 = vmax.f32 %v129_v20, 0.0  ;;  %v180_v38 = vmax.f32 %v131_v25, 0.0  ;;  %v181_v39 = vmax.f32 %v132_v26, 0.0  ;;  %v78_v40 = vmul.f32 %v305_v1, %v22_v22  ;;  %v33_v61 = vld [vmem:[%s701_s0 + $0x98] sm:$0xff]  ;;  %v34_v4 = vld [vmem:[%s701_s0 + $0xa0] sm:$0xff]  ;;  %v35_v5 = vld [vmem:[%s701_s0 + $0xa8] sm:$0xff] }
   0x9   :  { %224 = vst [vmem:[%s704_s3] sm:$0xff] %v175_v23  ;;  %v179_v37 = vmax.f32 %v130_v24, 0.0  ;;  %225 = vst [vmem:[%s704_s3 + $0x8] sm:$0xff] %v176_v30  ;;  %v182_v42 = vmax.f32 %v133_v33, 0.0  ;;  %v79_v43 = vmul.f32 %v305_v1, %v23_v27  ;;  %v80_v44 = vmul.f32 %v305_v1, %v24_v28  ;;  %v36_v6 = vld [vmem:[%s701_s0 + $0xb0] sm:$0xff]  ;;  %v37_v11 = vld [vmem:[%s701_s0 + $0xb8] sm:$0xff] }
   0xa   :  { %226 = vst [vmem:[%s704_s3 + $0x10] sm:$0xff] %v177_v31  ;;  %227 = vst [vmem:[%s704_s3 + $0x18] sm:$0xff] %v178_v32  ;;  %v81_v45 = vmul.f32 %v305_v1, %v25_v29  ;;  %v134_v46 = vadd.f32 %v310_v2, %v78_v40  ;;  %v82_v47 = vmul.f32 %v305_v1, %v26_v34  ;;  %v38_v24 = vld [vmem:[%s701_s0 + $0xc0] sm:$0xff]  ;;  %v39_v29 = vld [vmem:[%s701_s0 + $0xc8] sm:$0xff] }
   0xb   :  { %228 = vst [vmem:[%s704_s3 + $0x20] sm:$0xff] %v179_v37  ;;  %229 = vst [vmem:[%s704_s3 + $0x28] sm:$0xff] %v180_v38  ;;  %v83_v48 = vmul.f32 %v305_v1, %v27_v35  ;;  %v84_v49 = vmul.f32 %v305_v1, %v28_v36  ;;  %v135_v50 = vadd.f32 %v310_v2, %v79_v43  ;;  %v40_v30 = vld [vmem:[%s701_s0 + $0xd0] sm:$0xff]  ;;  %v41_v31 = vld [vmem:[%s701_s0 + $0xd8] sm:$0xff] }
   0xc   :  { %230 = vst [vmem:[%s704_s3 + $0x30] sm:$0xff] %v181_v39  ;;  %231 = vst [vmem:[%s704_s3 + $0x38] sm:$0xff] %v182_v42  ;;  %v136_v51 = vadd.f32 %v310_v2, %v80_v44  ;;  %v137_v52 = vadd.f32 %v310_v2, %v81_v45  ;;  %v85_v53 = vmul.f32 %v305_v1, %v29_v41  ;;  %v183_v55 = vmax.f32 %v134_v46, 0.0  ;;  %v42_v36 = vld [vmem:[%s701_s0 + $0xe0] sm:$0xff]  ;;  %v43_v37 = vld [vmem:[%s701_s0 + $0xe8] sm:$0xff] }
   0xd   :  { %v138_v56 = vadd.f32 %v310_v2, %v82_v47  ;;  %v139_v57 = vadd.f32 %v310_v2, %v83_v48  ;;  %v140_v58 = vadd.f32 %v310_v2, %v84_v49  ;;  %v184_v62 = vmax.f32 %v135_v50, 0.0  ;;  %v44_v38 = vld [vmem:[%s701_s0 + $0xf0] sm:$0xff]  ;;  %v45_v43 = vld [vmem:[%s701_s0 + $0xf8] sm:$0xff] }
   0xe   :  { %v185_v63 = vmax.f32 %v136_v51, 0.0  ;;  %v186_v0 = vmax.f32 %v137_v52, 0.0  ;;  %v141_v3 = vadd.f32 %v310_v2, %v85_v53  ;;  %232 = vst [vmem:[%s704_s3 + $0x40] sm:$0xff] %v183_v55  ;;  %v86_v10 = vmul.f32 %v305_v1, %v30_v54 }
   0xf   :  { %v187_v7 = vmax.f32 %v138_v56, 0.0  ;;  %v188_v8 = vmax.f32 %v139_v57, 0.0  ;;  %v189_v9 = vmax.f32 %v140_v58, 0.0  ;;  %233 = vst [vmem:[%s704_s3 + $0x48] sm:$0xff] %v184_v62  ;;  %v87_v13 = vmul.f32 %v305_v1, %v31_v59  ;;  %v46_v56 = vld [vmem:[%s701_s0 + $0x100] sm:$0xff]  ;;  %v48_v62 = vld [vmem:[%s701_s0 + $0x110] sm:$0xff] }
  0x10   :  { %234 = vst [vmem:[%s704_s3 + $0x50] sm:$0xff] %v185_v63  ;;  %235 = vst [vmem:[%s704_s3 + $0x58] sm:$0xff] %v186_v0  ;;  %v190_v12 = vmax.f32 %v141_v3, 0.0  ;;  %v88_v14 = vmul.f32 %v305_v1, %v32_v60  ;;  %v89_v15 = vmul.f32 %v305_v1, %v33_v61  ;;  %v142_v16 = vadd.f32 %v310_v2, %v86_v10  ;;  %v47_v61 = vld [vmem:[%s701_s0 + $0x108] sm:$0xff]  ;;  %v49_v63 = vld [vmem:[%s701_s0 + $0x118] sm:$0xff] }
  0x11   :  { %236 = vst [vmem:[%s704_s3 + $0x60] sm:$0xff] %v187_v7  ;;  %237 = vst [vmem:[%s704_s3 + $0x68] sm:$0xff] %v188_v8  ;;  %v90_v17 = vmul.f32 %v305_v1, %v34_v4  ;;  %v91_v18 = vmul.f32 %v305_v1, %v35_v5  ;;  %v92_v19 = vmul.f32 %v305_v1, %v36_v6  ;;  %v50_v6 = vld [vmem:[%s701_s0 + $0x120] sm:$0xff]  ;;  %v51_v7 = vld [vmem:[%s701_s0 + $0x128] sm:$0xff] }
  0x12   :  { %238 = vst [vmem:[%s704_s3 + $0x70] sm:$0xff] %v189_v9  ;;  %239 = vst [vmem:[%s704_s3 + $0x78] sm:$0xff] %v190_v12  ;;  %v143_v20 = vadd.f32 %v310_v2, %v87_v13  ;;  %v144_v21 = vadd.f32 %v310_v2, %v88_v14  ;;  %v145_v22 = vadd.f32 %v310_v2, %v89_v15  ;;  %v191_v25 = vmax.f32 %v142_v16, 0.0  ;;  %v52_v8 = vld [vmem:[%s701_s0 + $0x130] sm:$0xff]  ;;  %v53_v13 = vld [vmem:[%s701_s0 + $0x138] sm:$0xff] }
  0x13   :  { %v93_v23 = vmul.f32 %v305_v1, %v37_v11  ;;  %v146_v26 = vadd.f32 %v310_v2, %v90_v17  ;;  %v147_v27 = vadd.f32 %v310_v2, %v91_v18  ;;  %v148_v28 = vadd.f32 %v310_v2, %v92_v19 }
  0x14   :  { %v192_v32 = vmax.f32 %v143_v20, 0.0  ;;  %v193_v33 = vmax.f32 %v144_v21, 0.0  ;;  %v194_v34 = vmax.f32 %v145_v22, 0.0  ;;  %240 = vst [vmem:[%s704_s3 + $0x80] sm:$0xff] %v191_v25  ;;  %v94_v42 = vmul.f32 %v305_v1, %v38_v24 }
  0x15   :  { %v149_v35 = vadd.f32 %v310_v2, %v93_v23  ;;  %v195_v39 = vmax.f32 %v146_v26, 0.0  ;;  %v196_v40 = vmax.f32 %v147_v27, 0.0  ;;  %v197_v41 = vmax.f32 %v148_v28, 0.0  ;;  %v54_v26 = vld [vmem:[%s701_s0 + $0x140] sm:$0xff] }
  0x16   :  { %241 = vst [vmem:[%s704_s3 + $0x88] sm:$0xff] %v192_v32  ;;  %242 = vst [vmem:[%s704_s3 + $0x90] sm:$0xff] %v193_v33  ;;  %v95_v45 = vmul.f32 %v305_v1, %v39_v29  ;;  %v96_v46 = vmul.f32 %v305_v1, %v40_v30  ;;  %v97_v47 = vmul.f32 %v305_v1, %v41_v31  ;;  %v55_v31 = vld [vmem:[%s701_s0 + $0x148] sm:$0xff]  ;;  %v56_v32 = vld [vmem:[%s701_s0 + $0x150] sm:$0xff] }
  0x17   :  { %243 = vst [vmem:[%s704_s3 + $0x98] sm:$0xff] %v194_v34  ;;  %v198_v44 = vmax.f32 %v149_v35, 0.0  ;;  %244 = vst [vmem:[%s704_s3 + $0xa0] sm:$0xff] %v195_v39  ;;  %v150_v48 = vadd.f32 %v310_v2, %v94_v42  ;;  %v98_v49 = vmul.f32 %v305_v1, %v42_v36  ;;  %v99_v50 = vmul.f32 %v305_v1, %v43_v37  ;;  %v57_v33 = vld [vmem:[%s701_s0 + $0x158] sm:$0xff]  ;;  %v59_v39 = vld [vmem:[%s701_s0 + $0x168] sm:$0xff] }
  0x18   :  { %245 = vst [vmem:[%s704_s3 + $0xa8] sm:$0xff] %v196_v40  ;;  %246 = vst [vmem:[%s704_s3 + $0xb0] sm:$0xff] %v197_v41  ;;  %v100_v51 = vmul.f32 %v305_v1, %v44_v38  ;;  %v151_v52 = vadd.f32 %v310_v2, %v95_v45  ;;  %v152_v53 = vadd.f32 %v310_v2, %v96_v46  ;;  %v58_v38 = vld [vmem:[%s701_s0 + $0x160] sm:$0xff]  ;;  %v60_v40 = vld [vmem:[%s701_s0 + $0x170] sm:$0xff] }
  0x19   :  { %247 = vst [vmem:[%s704_s3 + $0xb8] sm:$0xff] %v198_v44  ;;  %v153_v54 = vadd.f32 %v310_v2, %v97_v47  ;;  %v101_v55 = vmul.f32 %v305_v1, %v45_v43  ;;  %v199_v57 = vmax.f32 %v150_v48, 0.0  ;;  %v154_v58 = vadd.f32 %v310_v2, %v98_v49  ;;  %v61_v45 = vld [vmem:[%s701_s0 + $0x178] sm:$0xff] }
  0x1a   :  { %v155_v59 = vadd.f32 %v310_v2, %v99_v50  ;;  %v156_v60 = vadd.f32 %v310_v2, %v100_v51  ;;  %v200_v0 = vmax.f32 %v151_v52, 0.0  ;;  %v201_v3 = vmax.f32 %v152_v53, 0.0 }
  0x1b   :  { %v202_v4 = vmax.f32 %v153_v54, 0.0  ;;  %v157_v5 = vadd.f32 %v310_v2, %v101_v55  ;;  %248 = vst [vmem:[%s704_s3 + $0xc0] sm:$0xff] %v199_v57  ;;  %v203_v9 = vmax.f32 %v154_v58, 0.0  ;;  %v102_v12 = vmul.f32 %v305_v1, %v46_v56  ;;  %v62_v58 = vld [vmem:[%s701_s0 + $0x180] sm:$0xff] }
  0x1c   :  { %v204_v10 = vmax.f32 %v155_v59, 0.0  ;;  %v205_v11 = vmax.f32 %v156_v60, 0.0  ;;  %249 = vst [vmem:[%s704_s3 + $0xc8] sm:$0xff] %v200_v0  ;;  %250 = vst [vmem:[%s704_s3 + $0xd0] sm:$0xff] %v201_v3  ;;  %v103_v15 = vmul.f32 %v305_v1, %v47_v61  ;;  %v104_v16 = vmul.f32 %v305_v1, %v48_v62 }
  0x1d   :  { %251 = vst [vmem:[%s704_s3 + $0xd8] sm:$0xff] %v202_v4  ;;  %v206_v14 = vmax.f32 %v157_v5, 0.0  ;;  %v105_v17 = vmul.f32 %v305_v1, %v49_v63  ;;  %252 = vst [vmem:[%s704_s3 + $0xe0] sm:$0xff] %v203_v9  ;;  %v158_v18 = vadd.f32 %v310_v2, %v102_v12  ;;  %v106_v19 = vmul.f32 %v305_v1, %v50_v6 }
  0x1e   :  { %253 = vst [vmem:[%s704_s3 + $0xe8] sm:$0xff] %v204_v10  ;;  %254 = vst [vmem:[%s704_s3 + $0xf0] sm:$0xff] %v205_v11  ;;  %v107_v20 = vmul.f32 %v305_v1, %v51_v7  ;;  %v108_v21 = vmul.f32 %v305_v1, %v52_v8  ;;  %v159_v22 = vadd.f32 %v310_v2, %v103_v15 }
  0x1f   :  { %255 = vst [vmem:[%s704_s3 + $0xf8] sm:$0xff] %v206_v14  ;;  %v160_v23 = vadd.f32 %v310_v2, %v104_v16  ;;  %v161_v24 = vadd.f32 %v310_v2, %v105_v17  ;;  %v109_v25 = vmul.f32 %v305_v1, %v53_v13  ;;  %v207_v27 = vmax.f32 %v158_v18, 0.0 }
  0x20   :  { %v162_v28 = vadd.f32 %v310_v2, %v106_v19  ;;  %v163_v29 = vadd.f32 %v310_v2, %v107_v20  ;;  %v164_v30 = vadd.f32 %v310_v2, %v108_v21  ;;  %v208_v34 = vmax.f32 %v159_v22, 0.0 }
  0x21   :  { %v209_v35 = vmax.f32 %v160_v23, 0.0  ;;  %v210_v36 = vmax.f32 %v161_v24, 0.0  ;;  %v165_v37 = vadd.f32 %v310_v2, %v109_v25  ;;  %256 = vst [vmem:[%s704_s3 + $0x100] sm:$0xff] %v207_v27  ;;  %v110_v44 = vmul.f32 %v305_v1, %v54_v26 }
  0x22   :  { %v211_v41 = vmax.f32 %v162_v28, 0.0  ;;  %v212_v42 = vmax.f32 %v163_v29, 0.0  ;;  %v213_v43 = vmax.f32 %v164_v30, 0.0  ;;  %257 = vst [vmem:[%s704_s3 + $0x108] sm:$0xff] %v208_v34  ;;  %v111_v47 = vmul.f32 %v305_v1, %v55_v31 }
  0x23   :  { %258 = vst [vmem:[%s704_s3 + $0x110] sm:$0xff] %v209_v35  ;;  %259 = vst [vmem:[%s704_s3 + $0x118] sm:$0xff] %v210_v36  ;;  %v214_v46 = vmax.f32 %v165_v37, 0.0  ;;  %v112_v48 = vmul.f32 %v305_v1, %v56_v32  ;;  %v113_v49 = vmul.f32 %v305_v1, %v57_v33  ;;  %v166_v50 = vadd.f32 %v310_v2, %v110_v44 }
  0x24   :  { %260 = vst [vmem:[%s704_s3 + $0x120] sm:$0xff] %v211_v41  ;;  %261 = vst [vmem:[%s704_s3 + $0x128] sm:$0xff] %v212_v42  ;;  %v114_v51 = vmul.f32 %v305_v1, %v58_v38  ;;  %v115_v52 = vmul.f32 %v305_v1, %v59_v39  ;;  %v116_v53 = vmul.f32 %v305_v1, %v60_v40 }
  0x25   :  { %262 = vst [vmem:[%s704_s3 + $0x130] sm:$0xff] %v213_v43  ;;  %263 = vst [vmem:[%s704_s3 + $0x138] sm:$0xff] %v214_v46  ;;  %v167_v54 = vadd.f32 %v310_v2, %v111_v47  ;;  %v168_v55 = vadd.f32 %v310_v2, %v112_v48  ;;  %v169_v56 = vadd.f32 %v310_v2, %v113_v49  ;;  %v215_v59 = vmax.f32 %v166_v50, 0.0 }
  0x26   :  { %v117_v57 = vmul.f32 %v305_v1, %v61_v45  ;;  %v170_v60 = vadd.f32 %v310_v2, %v114_v51  ;;  %v171_v61 = vadd.f32 %v310_v2, %v115_v52  ;;  %v172_v62 = vadd.f32 %v310_v2, %v116_v53 }
  0x27   :  { %v216_v63 = vmax.f32 %v167_v54, 0.0  ;;  %v217_v0 = vmax.f32 %v168_v55, 0.0  ;;  %v218_v3 = vmax.f32 %v169_v56, 0.0  ;;  %264 = vst [vmem:[%s704_s3 + $0x140] sm:$0xff] %v215_v59  ;;  %v118_v8 = vmul.f32 %v305_v1, %v62_v58 }
  0x28   :  { %v173_v4 = vadd.f32 %v310_v2, %v117_v57  ;;  %v219_v5 = vmax.f32 %v170_v60, 0.0  ;;  %v220_v6 = vmax.f32 %v171_v61, 0.0  ;;  %v221_v7 = vmax.f32 %v172_v62, 0.0 }
  0x29   :  { %265 = vst [vmem:[%s704_s3 + $0x148] sm:$0xff] %v216_v63  ;;  %266 = vst [vmem:[%s704_s3 + $0x150] sm:$0xff] %v217_v0  ;;  %v174_v1 = vadd.f32 %v310_v2, %v118_v8 }
  0x2a   :  { %267 = vst [vmem:[%s704_s3 + $0x158] sm:$0xff] %v218_v3  ;;  %v222_v9 = vmax.f32 %v173_v4, 0.0  ;;  %268 = vst [vmem:[%s704_s3 + $0x160] sm:$0xff] %v219_v5 }
  0x2b   :  { %269 = vst [vmem:[%s704_s3 + $0x168] sm:$0xff] %v220_v6  ;;  %270 = vst [vmem:[%s704_s3 + $0x170] sm:$0xff] %v221_v7  ;;  %v223_v10 = vmax.f32 %v174_v1, 0.0 }
  0x2c   :  { %271 = vst [vmem:[%s704_s3 + $0x178] sm:$0xff] %v222_v9 }
  0x2d   :  { %272 = vst [vmem:[%s704_s3 + $0x180] sm:$0xff] %v223_v10 }

// kernel: recon224_forward.7
= control target key start
LH: loop header
LB: loop body
LE: loop exit
PB: predicated region body
PF: predicated region fallthrough
CT: control target
= control target key end

     0   :  { %s781_s12 = smov 0   ;;  %s1204_s0 = inlined_call_operand.vmem [shape: f32[1568,128], index: 0, kind: input, shape index: {}]   ;;  %s1205_s1 = inlined_call_operand.vmem [shape: f32[1,128], index: 1, kind: input, shape index: {}]   ;;  %s1206_s2 = inlined_call_operand.vmem [shape: f32[1,128], index: 2, kind: input, shape index: {}]   ;;  %s1207_s3 = inlined_call_operand.vmem [shape: f32[1568,128], index: 3, kind: output, shape index: {}]  }
   0x1 LB: > { %s734_s13 = sadd.s32 4294967295, %s759_s12   ;;  %p738_p0 = scmp.ge.s32.totalorder %s759_s12, 1  ;;  %s759_s12 = sphi %s781_s12, %s13_s12  }
   0x2   : > { %p138_p1 = scmp.lt.s32.totalorder %s759_s12, 3 }
   0x4   : > { %p139_p2 = pnand %p738_p0, %p138_p1 }
   0x5   : > { %s162_s14 = smul.u32 (!%p139_p2), 98, %s734_s13  ;;  %v792_v0 = vld [vmem:[%s1205_s1] ss:$0 sm:$0xff] (!%p139_p2) }
   0x6   : > { %142 = sbr.rel (%p139_p2) target bundleno = 96 (0x60), region = 32  ;;  %v802_v1 = vld [vmem:[%s1206_s2] ss:$0 sm:$0xff] (!%p139_p2) }
   0x7   : > { %p163_p3 = scmp.lt.s32.totalorder (!%p139_p2), %s162_s14, 195 }
   0xd   : > { %s1209_s14 = smov (!%p163_p3, %s162_s14), 195 }
   0xe   : > { %s739_s15 = sshll.u32 %s1209_s14, 3 }
   0xf   : > { %s797_s20 = scalar_lea.vmem %s1204_s0, %s739_s15  ;;  %s825_s25 = scalar_lea.vmem %s1207_s3, %s739_s15 }
  0x10   : > { %v174_v2 = vld [vmem:[%s797_s20] sm:$0xff]  ;;  %v175_v3 = vld [vmem:[%s797_s20 + $0x8] sm:$0xff]  ;;  %v176_v4 = vld [vmem:[%s797_s20 + $0x10] sm:$0xff] }
  0x11   : > { %v279_v5 = vmul.f32 %v792_v0, %v174_v2  ;;  %v280_v6 = vmul.f32 %v792_v0, %v175_v3  ;;  %v281_v7 = vmul.f32 %v792_v0, %v176_v4  ;;  %v177_v8 = vld [vmem:[%s797_s20 + $0x18] sm:$0xff]  ;;  %v178_v9 = vld [vmem:[%s797_s20 + $0x20] sm:$0xff]  ;;  %v179_v10 = vld [vmem:[%s797_s20 + $0x28] sm:$0xff] }
  0x12   : > { %v282_v11 = vmul.f32 %v792_v0, %v177_v8  ;;  %v283_v12 = vmul.f32 %v792_v0, %v178_v9  ;;  %v284_v13 = vmul.f32 %v792_v0, %v179_v10  ;;  %v180_v14 = vld [vmem:[%s797_s20 + $0x30] sm:$0xff]  ;;  %v181_v15 = vld [vmem:[%s797_s20 + $0x38] sm:$0xff]  ;;  %v182_v24 = vld [vmem:[%s797_s20 + $0x40] sm:$0xff] }
  0x13   : > { %v384_v16 = vadd.f32 %v802_v1, %v279_v5  ;;  %v385_v17 = vadd.f32 %v802_v1, %v280_v6  ;;  %v386_v18 = vadd.f32 %v802_v1, %v281_v7  ;;  %v285_v19 = vmul.f32 %v792_v0, %v180_v14  ;;  %v183_v25 = vld [vmem:[%s797_s20 + $0x48] sm:$0xff]  ;;  %v184_v26 = vld [vmem:[%s797_s20 + $0x50] sm:$0xff]  ;;  %v185_v31 = vld [vmem:[%s797_s20 + $0x58] sm:$0xff] }
  0x14   : > { %v387_v20 = vadd.f32 %v802_v1, %v282_v11  ;;  %v388_v21 = vadd.f32 %v802_v1, %v283_v12  ;;  %v389_v22 = vadd.f32 %v802_v1, %v284_v13  ;;  %v286_v23 = vmul.f32 %v792_v0, %v181_v15  ;;  %v186_v32 = vld [vmem:[%s797_s20 + $0x60] sm:$0xff]  ;;  %v187_v33 = vld [vmem:[%s797_s20 + $0x68] sm:$0xff]  ;;  %v188_v38 = vld [vmem:[%s797_s20 + $0x70] sm:$0xff] }
  0x15   : > { %v482_v27 = vmax.f32 %v384_v16, 0.0  ;;  %v483_v28 = vmax.f32 %v385_v17, 0.0  ;;  %v484_v29 = vmax.f32 %v386_v18, 0.0  ;;  %v390_v30 = vadd.f32 %v802_v1, %v285_v19  ;;  %v189_v43 = vld [vmem:[%s797_s20 + $0x78] sm:$0xff]  ;;  %v190_v56 = vld [vmem:[%s797_s20 + $0x80] sm:$0xff]  ;;  %v191_v57 = vld [vmem:[%s797_s20 + $0x88] sm:$0xff] }
  0x16   : > { %v485_v34 = vmax.f32 %v387_v20, 0.0  ;;  %v486_v35 = vmax.f32 %v388_v21, 0.0  ;;  %v487_v36 = vmax.f32 %v389_v22, 0.0  ;;  %v391_v37 = vadd.f32 %v802_v1, %v286_v23  ;;  %v192_v58 = vld [vmem:[%s797_s20 + $0x90] sm:$0xff]  ;;  %v193_v63 = vld [vmem:[%s797_s20 + $0x98] sm:$0xff]  ;;  %v194_v2 = vld [vmem:[%s797_s20 + $0xa0] sm:$0xff] }
  0x17   : > { %580 = vst [vmem:[%s825_s25] sm:$0xff] %v482_v27  ;;  %581 = vst [vmem:[%s825_s25 + $0x8] sm:$0xff] %v483_v28  ;;  %v488_v39 = vmax.f32 %v390_v30, 0.0  ;;  %v287_v40 = vmul.f32 %v792_v0, %v182_v24  ;;  %v288_v41 = vmul.f32 %v792_v0, %v183_v25  ;;  %v289_v42 = vmul.f32 %v792_v0, %v184_v26  ;;  %v195_v3 = vld [vmem:[%s797_s20 + $0xa8] sm:$0xff]  ;;  %v196_v8 = vld [vmem:[%s797_s20 + $0xb0] sm:$0xff] }
  0x18   : > { %582 = vst [vmem:[%s825_s25 + $0x10] sm:$0xff] %v484_v29  ;;  %583 = vst [vmem:[%s825_s25 + $0x18] sm:$0xff] %v485_v34  ;;  %v489_v44 = vmax.f32 %v391_v37, 0.0  ;;  %v290_v45 = vmul.f32 %v792_v0, %v185_v31  ;;  %v291_v46 = vmul.f32 %v792_v0, %v186_v32  ;;  %v292_v47 = vmul.f32 %v792_v0, %v187_v33  ;;  %v197_v13 = vld [vmem:[%s797_s20 + $0xb8] sm:$0xff]  ;;  %v198_v26 = vld [vmem:[%s797_s20 + $0xc0] sm:$0xff] }
  0x19   : > { %584 = vst [vmem:[%s825_s25 + $0x20] sm:$0xff] %v486_v35  ;;  %585 = vst [vmem:[%s825_s25 + $0x28] sm:$0xff] %v487_v36  ;;  %v392_v48 = vadd.f32 %v802_v1, %v287_v40  ;;  %v393_v49 = vadd.f32 %v802_v1, %v288_v41  ;;  %v394_v50 = vadd.f32 %v802_v1, %v289_v42  ;;  %v199_v27 = vld [vmem:[%s797_s20 + $0xc8] sm:$0xff]  ;;  %v200_v28 = vld [vmem:[%s797_s20 + $0xd0] sm:$0xff] }
  0x1a   : > { %586 = vst [vmem:[%s825_s25 + $0x30] sm:$0xff] %v488_v39  ;;  %v293_v51 = vmul.f32 %v792_v0, %v188_v38  ;;  %587 = vst [vmem:[%s825_s25 + $0x38] sm:$0xff] %v489_v44  ;;  %v395_v52 = vadd.f32 %v802_v1, %v290_v45  ;;  %v396_v53 = vadd.f32 %v802_v1, %v291_v46  ;;  %v201_v33 = vld [vmem:[%s797_s20 + $0xd8] sm:$0xff]  ;;  %v202_v34 = vld [vmem:[%s797_s20 + $0xe0] sm:$0xff] }
  0x1b   : > { %v397_v54 = vadd.f32 %v802_v1, %v292_v47  ;;  %v294_v55 = vmul.f32 %v792_v0, %v189_v43  ;;  %v490_v59 = vmax.f32 %v392_v48, 0.0  ;;  %v491_v60 = vmax.f32 %v393_v49, 0.0  ;;  %v203_v35 = vld [vmem:[%s797_s20 + $0xe8] sm:$0xff]  ;;  %v204_v40 = vld [vmem:[%s797_s20 + $0xf0] sm:$0xff]  ;;  %v205_v45 = vld [vmem:[%s797_s20 + $0xf8] sm:$0xff] }
  0x1c   : > { %v492_v61 = vmax.f32 %v394_v50, 0.0  ;;  %v398_v62 = vadd.f32 %v802_v1, %v293_v51  ;;  %v493_v4 = vmax.f32 %v395_v52, 0.0  ;;  %v494_v5 = vmax.f32 %v396_v53, 0.0 }
  0x1d   : > { %v495_v6 = vmax.f32 %v397_v54, 0.0  ;;  %v399_v7 = vadd.f32 %v802_v1, %v294_v55  ;;  %588 = vst [vmem:[%s825_s25 + $0x40] sm:$0xff] %v490_v59  ;;  %589 = vst [vmem:[%s825_s25 + $0x48] sm:$0xff] %v491_v60  ;;  %v295_v10 = vmul.f32 %v792_v0, %v190_v56  ;;  %v296_v11 = vmul.f32 %v792_v0, %v191_v57  ;;  %v207_v59 = vld [vmem:[%s797_s20 + $0x108] sm:$0xff]  ;;  %v208_v60 = vld [vmem:[%s797_s20 + $0x110] sm:$0xff] }
  0x1e   : > { %590 = vst [vmem:[%s825_s25 + $0x50] sm:$0xff] %v492_v61  ;;  %v496_v9 = vmax.f32 %v398_v62, 0.0  ;;  %v297_v12 = vmul.f32 %v792_v0, %v192_v58  ;;  %591 = vst [vmem:[%s825_s25 + $0x58] sm:$0xff] %v493_v4  ;;  %v298_v15 = vmul.f32 %v792_v0, %v193_v63  ;;  %v299_v16 = vmul.f32 %v792_v0, %v194_v2  ;;  %v206_v58 = vld [vmem:[%s797_s20 + $0x100] sm:$0xff] }
  0x1f   : > { %592 = vst [vmem:[%s825_s25 + $0x60] sm:$0xff] %v494_v5  ;;  %593 = vst [vmem:[%s825_s25 + $0x68] sm:$0xff] %v495_v6  ;;  %v497_v14 = vmax.f32 %v399_v7, 0.0  ;;  %v300_v17 = vmul.f32 %v792_v0, %v195_v3  ;;  %v400_v18 = vadd.f32 %v802_v1, %v295_v10  ;;  %v401_v19 = vadd.f32 %v802_v1, %v296_v11  ;;  %v209_v3 = vld [vmem:[%s797_s20 + $0x118] sm:$0xff]  ;;  %v210_v4 = vld [vmem:[%s797_s20 + $0x120] sm:$0xff] }
  0x20   : > { %594 = vst [vmem:[%s825_s25 + $0x70] sm:$0xff] %v496_v9  ;;  %v402_v20 = vadd.f32 %v802_v1, %v297_v12  ;;  %v301_v21 = vmul.f32 %v792_v0, %v196_v8  ;;  %v403_v22 = vadd.f32 %v802_v1, %v298_v15  ;;  %v404_v23 = vadd.f32 %v802_v1, %v299_v16  ;;  %v211_v5 = vld [vmem:[%s797_s20 + $0x128] sm:$0xff]  ;;  %v212_v10 = vld [vmem:[%s797_s20 + $0x130] sm:$0xff]  ;;  %v213_v15 = vld [vmem:[%s797_s20 + $0x138] sm:$0xff] }
  0x21   : > { %595 = vst [vmem:[%s825_s25 + $0x78] sm:$0xff] %v497_v14  ;;  %v405_v24 = vadd.f32 %v802_v1, %v300_v17  ;;  %v302_v25 = vmul.f32 %v792_v0, %v197_v13  ;;  %v498_v29 = vmax.f32 %v400_v18, 0.0  ;;  %v499_v30 = vmax.f32 %v401_v19, 0.0 }
  0x22   : > { %v500_v31 = vmax.f32 %v402_v20, 0.0  ;;  %v406_v32 = vadd.f32 %v802_v1, %v301_v21  ;;  %v501_v36 = vmax.f32 %v403_v22, 0.0  ;;  %v502_v37 = vmax.f32 %v404_v23, 0.0 }
  0x23   : > { %v503_v38 = vmax.f32 %v405_v24, 0.0  ;;  %v407_v39 = vadd.f32 %v802_v1, %v302_v25  ;;  %596 = vst [vmem:[%s825_s25 + $0x80] sm:$0xff] %v498_v29  ;;  %597 = vst [vmem:[%s825_s25 + $0x88] sm:$0xff] %v499_v30  ;;  %v303_v42 = vmul.f32 %v792_v0, %v198_v26  ;;  %v304_v43 = vmul.f32 %v792_v0, %v199_v27  ;;  %v215_v29 = vld [vmem:[%s797_s20 + $0x148] sm:$0xff]  ;;  %v216_v30 = vld [vmem:[%s797_s20 + $0x150] sm:$0xff] }
  0x24   : > { %598 = vst [vmem:[%s825_s25 + $0x90] sm:$0xff] %v500_v31  ;;  %v504_v41 = vmax.f32 %v406_v32, 0.0  ;;  %v305_v44 = vmul.f32 %v792_v0, %v200_v28  ;;  %599 = vst [vmem:[%s825_s25 + $0x98] sm:$0xff] %v501_v36  ;;  %v306_v47 = vmul.f32 %v792_v0, %v201_v33  ;;  %v307_v48 = vmul.f32 %v792_v0, %v202_v34  ;;  %v214_v28 = vld [vmem:[%s797_s20 + $0x140] sm:$0xff] }
  0x25   : > { %600 = vst [vmem:[%s825_s25 + $0xa0] sm:$0xff] %v502_v37  ;;  %601 = vst [vmem:[%s825_s25 + $0xa8] sm:$0xff] %v503_v38  ;;  %v505_v46 = vmax.f32 %v407_v39, 0.0  ;;  %v308_v49 = vmul.f32 %v792_v0, %v203_v35  ;;  %v408_v50 = vadd.f32 %v802_v1, %v303_v42  ;;  %v409_v51 = vadd.f32 %v802_v1, %v304_v43  ;;  %v217_v35 = vld [vmem:[%s797_s20 + $0x158] sm:$0xff]  ;;  %v218_v36 = vld [vmem:[%s797_s20 + $0x160] sm:$0xff] }
  0x26   : > { %602 = vst [vmem:[%s825_s25 + $0xb0] sm:$0xff] %v504_v41  ;;  %v410_v52 = vadd.f32 %v802_v1, %v305_v44  ;;  %v309_v53 = vmul.f32 %v792_v0, %v204_v40  ;;  %v411_v54 = vadd.f32 %v802_v1, %v306_v47  ;;  %v412_v55 = vadd.f32 %v802_v1, %v307_v48  ;;  %v219_v37 = vld [vmem:[%s797_s20 + $0x168] sm:$0xff]  ;;  %v220_v42 = vld [vmem:[%s797_s20 + $0x170] sm:$0xff]  ;;  %v221_v47 = vld [vmem:[%s797_s20 + $0x178] sm:$0xff] }
  0x27   : > { %603 = vst [vmem:[%s825_s25 + $0xb8] sm:$0xff] %v505_v46  ;;  %v413_v56 = vadd.f32 %v802_v1, %v308_v49  ;;  %v310_v57 = vmul.f32 %v792_v0, %v205_v45  ;;  %v506_v61 = vmax.f32 %v408_v50, 0.0  ;;  %v507_v62 = vmax.f32 %v409_v51, 0.0 }
  0x28   : > { %v508_v63 = vmax.f32 %v410_v52, 0.0  ;;  %v414_v2 = vadd.f32 %v802_v1, %v309_v53  ;;  %v509_v6 = vmax.f32 %v411_v54, 0.0  ;;  %v510_v7 = vmax.f32 %v412_v55, 0.0 }
  0x29   : > { %v511_v8 = vmax.f32 %v413_v56, 0.0  ;;  %v415_v9 = vadd.f32 %v802_v1, %v310_v57  ;;  %604 = vst [vmem:[%s825_s25 + $0xc0] sm:$0xff] %v506_v61  ;;  %605 = vst [vmem:[%s825_s25 + $0xc8] sm:$0xff] %v507_v62  ;;  %v311_v12 = vmul.f32 %v792_v0, %v206_v58  ;;  %v312_v13 = vmul.f32 %v792_v0, %v207_v59  ;;  %v223_v61 = vld [vmem:[%s797_s20 + $0x188] sm:$0xff]  ;;  %v224_v62 = vld [vmem:[%s797_s20 + $0x190] sm:$0xff] }
  0x2a   : > { %606 = vst [vmem:[%s825_s25 + $0xd0] sm:$0xff] %v508_v63  ;;  %v512_v11 = vmax.f32 %v414_v2, 0.0  ;;  %v313_v14 = vmul.f32 %v792_v0, %v208_v60  ;;  %607 = vst [vmem:[%s825_s25 + $0xd8] sm:$0xff] %v509_v6  ;;  %v314_v17 = vmul.f32 %v792_v0, %v209_v3  ;;  %v315_v18 = vmul.f32 %v792_v0, %v210_v4  ;;  %v222_v60 = vld [vmem:[%s797_s20 + $0x180] sm:$0xff] }
  0x2b   : > { %608 = vst [vmem:[%s825_s25 + $0xe0] sm:$0xff] %v510_v7  ;;  %609 = vst [vmem:[%s825_s25 + $0xe8] sm:$0xff] %v511_v8  ;;  %v513_v16 = vmax.f32 %v415_v9, 0.0  ;;  %v316_v19 = vmul.f32 %v792_v0, %v211_v5  ;;  %v416_v20 = vadd.f32 %v802_v1, %v311_v12  ;;  %v417_v21 = vadd.f32 %v802_v1, %v312_v13  ;;  %v225_v5 = vld [vmem:[%s797_s20 + $0x198] sm:$0xff]  ;;  %v226_v6 = vld [vmem:[%s797_s20 + $0x1a0] sm:$0xff] }
  0x2c   : > { %610 = vst [vmem:[%s825_s25 + $0xf0] sm:$0xff] %v512_v11  ;;  %v418_v22 = vadd.f32 %v802_v1, %v313_v14  ;;  %v317_v23 = vmul.f32 %v792_v0, %v212_v10  ;;  %v419_v24 = vadd.f32 %v802_v1, %v314_v17  ;;  %v420_v25 = vadd.f32 %v802_v1, %v315_v18  ;;  %v227_v7 = vld [vmem:[%s797_s20 + $0x1a8] sm:$0xff]  ;;  %v228_v12 = vld [vmem:[%s797_s20 + $0x1b0] sm:$0xff]  ;;  %v229_v17 = vld [vmem:[%s797_s20 + $0x1b8] sm:$0xff] }
  0x2d   : > { %611 = vst [vmem:[%s825_s25 + $0xf8] sm:$0xff] %v513_v16  ;;  %v421_v26 = vadd.f32 %v802_v1, %v316_v19  ;;  %v318_v27 = vmul.f32 %v792_v0, %v213_v15  ;;  %v514_v31 = vmax.f32 %v416_v20, 0.0  ;;  %v515_v32 = vmax.f32 %v417_v21, 0.0 }
  0x2e   : > { %v516_v33 = vmax.f32 %v418_v22, 0.0  ;;  %v422_v34 = vadd.f32 %v802_v1, %v317_v23  ;;  %v517_v38 = vmax.f32 %v419_v24, 0.0  ;;  %v518_v39 = vmax.f32 %v420_v25, 0.0 }
  0x2f   : > { %v519_v40 = vmax.f32 %v421_v26, 0.0  ;;  %v423_v41 = vadd.f32 %v802_v1, %v318_v27  ;;  %612 = vst [vmem:[%s825_s25 + $0x100] sm:$0xff] %v514_v31  ;;  %613 = vst [vmem:[%s825_s25 + $0x108] sm:$0xff] %v515_v32  ;;  %v319_v44 = vmul.f32 %v792_v0, %v214_v28  ;;  %v320_v45 = vmul.f32 %v792_v0, %v215_v29  ;;  %v231_v31 = vld [vmem:[%s797_s20 + $0x1c8] sm:$0xff]  ;;  %v232_v32 = vld [vmem:[%s797_s20 + $0x1d0] sm:$0xff] }
  0x30   : > { %614 = vst [vmem:[%s825_s25 + $0x110] sm:$0xff] %v516_v33  ;;  %v520_v43 = vmax.f32 %v422_v34, 0.0  ;;  %v321_v46 = vmul.f32 %v792_v0, %v216_v30  ;;  %615 = vst [vmem:[%s825_s25 + $0x118] sm:$0xff] %v517_v38  ;;  %v322_v49 = vmul.f32 %v792_v0, %v217_v35  ;;  %v323_v50 = vmul.f32 %v792_v0, %v218_v36  ;;  %v230_v30 = vld [vmem:[%s797_s20 + $0x1c0] sm:$0xff] }
  0x31   : > { %616 = vst [vmem:[%s825_s25 + $0x120] sm:$0xff] %v518_v39  ;;  %617 = vst [vmem:[%s825_s25 + $0x128] sm:$0xff] %v519_v40  ;;  %v521_v48 = vmax.f32 %v423_v41, 0.0  ;;  %v324_v51 = vmul.f32 %v792_v0, %v219_v37  ;;  %v424_v52 = vadd.f32 %v802_v1, %v319_v44  ;;  %v425_v53 = vadd.f32 %v802_v1, %v320_v45  ;;  %v233_v37 = vld [vmem:[%s797_s20 + $0x1d8] sm:$0xff]  ;;  %v234_v38 = vld [vmem:[%s797_s20 + $0x1e0] sm:$0xff] }
  0x32   : > { %618 = vst [vmem:[%s825_s25 + $0x130] sm:$0xff] %v520_v43  ;;  %v426_v54 = vadd.f32 %v802_v1, %v321_v46  ;;  %v325_v55 = vmul.f32 %v792_v0, %v220_v42  ;;  %v427_v56 = vadd.f32 %v802_v1, %v322_v49  ;;  %v428_v57 = vadd.f32 %v802_v1, %v323_v50  ;;  %v235_v39 = vld [vmem:[%s797_s20 + $0x1e8] sm:$0xff]  ;;  %v236_v44 = vld [vmem:[%s797_s20 + $0x1f0] sm:$0xff]  ;;  %v237_v49 = vld [vmem:[%s797_s20 + $0x1f8] sm:$0xff] }
  0x33   : > { %619 = vst [vmem:[%s825_s25 + $0x138] sm:$0xff] %v521_v48  ;;  %v429_v58 = vadd.f32 %v802_v1, %v324_v51  ;;  %v326_v59 = vmul.f32 %v792_v0, %v221_v47  ;;  %v522_v63 = vmax.f32 %v424_v52, 0.0  ;;  %v523_v2 = vmax.f32 %v425_v53, 0.0 }
  0x34   : > { %v524_v3 = vmax.f32 %v426_v54, 0.0  ;;  %v430_v4 = vadd.f32 %v802_v1, %v325_v55  ;;  %v525_v8 = vmax.f32 %v427_v56, 0.0  ;;  %v526_v9 = vmax.f32 %v428_v57, 0.0 }
  0x35   : > { %v527_v10 = vmax.f32 %v429_v58, 0.0  ;;  %v431_v11 = vadd.f32 %v802_v1, %v326_v59  ;;  %620 = vst [vmem:[%s825_s25 + $0x140] sm:$0xff] %v522_v63  ;;  %621 = vst [vmem:[%s825_s25 + $0x148] sm:$0xff] %v523_v2  ;;  %v327_v14 = vmul.f32 %v792_v0, %v222_v60  ;;  %v328_v15 = vmul.f32 %v792_v0, %v223_v61  ;;  %v239_v63 = vld [vmem:[%s797_s20 + $0x208] sm:$0xff]  ;;  %v240_v2 = vld [vmem:[%s797_s20 + $0x210] sm:$0xff] }
  0x36   : > { %622 = vst [vmem:[%s825_s25 + $0x150] sm:$0xff] %v524_v3  ;;  %v528_v13 = vmax.f32 %v430_v4, 0.0  ;;  %v329_v16 = vmul.f32 %v792_v0, %v224_v62  ;;  %623 = vst [vmem:[%s825_s25 + $0x158] sm:$0xff] %v525_v8  ;;  %v330_v19 = vmul.f32 %v792_v0, %v225_v5  ;;  %v331_v20 = vmul.f32 %v792_v0, %v226_v6  ;;  %v238_v62 = vld [vmem:[%s797_s20 + $0x200] sm:$0xff] }
  0x37   : > { %624 = vst [vmem:[%s825_s25 + $0x160] sm:$0xff] %v526_v9  ;;  %625 = vst [vmem:[%s825_s25 + $0x168] sm:$0xff] %v527_v10  ;;  %v529_v18 = vmax.f32 %v431_v11, 0.0  ;;  %v332_v21 = vmul.f32 %v792_v0, %v227_v7  ;;  %v432_v22 = vadd.f32 %v802_v1, %v327_v14  ;;  %v433_v23 = vadd.f32 %v802_v1, %v328_v15  ;;  %v241_v7 = vld [vmem:[%s797_s20 + $0x218] sm:$0xff]  ;;  %v242_v8 = vld [vmem:[%s797_s20 + $0x220] sm:$0xff] }
  0x38   : > { %626 = vst [vmem:[%s825_s25 + $0x170] sm:$0xff] %v528_v13  ;;  %v434_v24 = vadd.f32 %v802_v1, %v329_v16  ;;  %v333_v25 = vmul.f32 %v792_v0, %v228_v12  ;;  %v435_v26 = vadd.f32 %v802_v1, %v330_v19  ;;  %v436_v27 = vadd.f32 %v802_v1, %v331_v20  ;;  %v243_v9 = vld [vmem:[%s797_s20 + $0x228] sm:$0xff]  ;;  %v244_v14 = vld [vmem:[%s797_s20 + $0x230] sm:$0xff]  ;;  %v245_v19 = vld [vmem:[%s797_s20 + $0x238] sm:$0xff] }
  0x39   : > { %627 = vst [vmem:[%s825_s25 + $0x178] sm:$0xff] %v529_v18  ;;  %v437_v28 = vadd.f32 %v802_v1, %v332_v21  ;;  %v334_v29 = vmul.f32 %v792_v0, %v229_v17  ;;  %v530_v33 = vmax.f32 %v432_v22, 0.0  ;;  %v531_v34 = vmax.f32 %v433_v23, 0.0 }
  0x3a   : > { %v532_v35 = vmax.f32 %v434_v24, 0.0  ;;  %v438_v36 = vadd.f32 %v802_v1, %v333_v25  ;;  %v533_v40 = vmax.f32 %v435_v26, 0.0  ;;  %v534_v41 = vmax.f32 %v436_v27, 0.0 }
  0x3b   : > { %v535_v42 = vmax.f32 %v437_v28, 0.0  ;;  %v439_v43 = vadd.f32 %v802_v1, %v334_v29  ;;  %628 = vst [vmem:[%s825_s25 + $0x180] sm:$0xff] %v530_v33  ;;  %629 = vst [vmem:[%s825_s25 + $0x188] sm:$0xff] %v531_v34  ;;  %v335_v46 = vmul.f32 %v792_v0, %v230_v30  ;;  %v336_v47 = vmul.f32 %v792_v0, %v231_v31  ;;  %v247_v33 = vld [vmem:[%s797_s20 + $0x248] sm:$0xff]  ;;  %v248_v34 = vld [vmem:[%s797_s20 + $0x250] sm:$0xff] }
  0x3c   : > { %630 = vst [vmem:[%s825_s25 + $0x190] sm:$0xff] %v532_v35  ;;  %v536_v45 = vmax.f32 %v438_v36, 0.0  ;;  %v337_v48 = vmul.f32 %v792_v0, %v232_v32  ;;  %631 = vst [vmem:[%s825_s25 + $0x198] sm:$0xff] %v533_v40  ;;  %v338_v51 = vmul.f32 %v792_v0, %v233_v37  ;;  %v339_v52 = vmul.f32 %v792_v0, %v234_v38  ;;  %v246_v32 = vld [vmem:[%s797_s20 + $0x240] sm:$0xff] }
  0x3d   : > { %632 = vst [vmem:[%s825_s25 + $0x1a0] sm:$0xff] %v534_v41  ;;  %633 = vst [vmem:[%s825_s25 + $0x1a8] sm:$0xff] %v535_v42  ;;  %v537_v50 = vmax.f32 %v439_v43, 0.0  ;;  %v340_v53 = vmul.f32 %v792_v0, %v235_v39  ;;  %v440_v54 = vadd.f32 %v802_v1, %v335_v46  ;;  %v441_v55 = vadd.f32 %v802_v1, %v336_v47  ;;  %v249_v39 = vld [vmem:[%s797_s20 + $0x258] sm:$0xff]  ;;  %v250_v40 = vld [vmem:[%s797_s20 + $0x260] sm:$0xff] }
  0x3e   : > { %634 = vst [vmem:[%s825_s25 + $0x1b0] sm:$0xff] %v536_v45  ;;  %v442_v56 = vadd.f32 %v802_v1, %v337_v48  ;;  %v341_v57 = vmul.f32 %v792_v0, %v236_v44  ;;  %v443_v58 = vadd.f32 %v802_v1, %v338_v51  ;;  %v444_v59 = vadd.f32 %v802_v1, %v339_v52  ;;  %v251_v41 = vld [vmem:[%s797_s20 + $0x268] sm:$0xff]  ;;  %v252_v46 = vld [vmem:[%s797_s20 + $0x270] sm:$0xff]  ;;  %v253_v51 = vld [vmem:[%s797_s20 + $0x278] sm:$0xff] }
  0x3f   : > { %635 = vst [vmem:[%s825_s25 + $0x1b8] sm:$0xff] %v537_v50  ;;  %v445_v60 = vadd.f32 %v802_v1, %v340_v53  ;;  %v342_v61 = vmul.f32 %v792_v0, %v237_v49  ;;  %v538_v3 = vmax.f32 %v440_v54, 0.0  ;;  %v539_v4 = vmax.f32 %v441_v55, 0.0 }
  0x40   : > { %v540_v5 = vmax.f32 %v442_v56, 0.0  ;;  %v446_v6 = vadd.f32 %v802_v1, %v341_v57  ;;  %v541_v10 = vmax.f32 %v443_v58, 0.0  ;;  %v542_v11 = vmax.f32 %v444_v59, 0.0 }
  0x41   : > { %v543_v12 = vmax.f32 %v445_v60, 0.0  ;;  %v447_v13 = vadd.f32 %v802_v1, %v342_v61  ;;  %636 = vst [vmem:[%s825_s25 + $0x1c0] sm:$0xff] %v538_v3  ;;  %637 = vst [vmem:[%s825_s25 + $0x1c8] sm:$0xff] %v539_v4  ;;  %v343_v16 = vmul.f32 %v792_v0, %v238_v62  ;;  %v344_v17 = vmul.f32 %v792_v0, %v239_v63  ;;  %v255_v3 = vld [vmem:[%s797_s20 + $0x288] sm:$0xff]  ;;  %v256_v4 = vld [vmem:[%s797_s20 + $0x290] sm:$0xff] }
  0x42   : > { %638 = vst [vmem:[%s825_s25 + $0x1d0] sm:$0xff] %v540_v5  ;;  %v544_v15 = vmax.f32 %v446_v6, 0.0  ;;  %v345_v18 = vmul.f32 %v792_v0, %v240_v2  ;;  %639 = vst [vmem:[%s825_s25 + $0x1d8] sm:$0xff] %v541_v10  ;;  %v346_v21 = vmul.f32 %v792_v0, %v241_v7  ;;  %v347_v22 = vmul.f32 %v792_v0, %v242_v8  ;;  %v254_v2 = vld [vmem:[%s797_s20 + $0x280] sm:$0xff] }
  0x43   : > { %640 = vst [vmem:[%s825_s25 + $0x1e0] sm:$0xff] %v542_v11  ;;  %641 = vst [vmem:[%s825_s25 + $0x1e8] sm:$0xff] %v543_v12  ;;  %v545_v20 = vmax.f32 %v447_v13, 0.0  ;;  %v348_v23 = vmul.f32 %v792_v0, %v243_v9  ;;  %v448_v24 = vadd.f32 %v802_v1, %v343_v16  ;;  %v449_v25 = vadd.f32 %v802_v1, %v344_v17  ;;  %v257_v9 = vld [vmem:[%s797_s20 + $0x298] sm:$0xff]  ;;  %v258_v10 = vld [vmem:[%s797_s20 + $0x2a0] sm:$0xff] }
  0x44   : > { %642 = vst [vmem:[%s825_s25 + $0x1f0] sm:$0xff] %v544_v15  ;;  %v450_v26 = vadd.f32 %v802_v1, %v345_v18  ;;  %v349_v27 = vmul.f32 %v792_v0, %v244_v14  ;;  %v451_v28 = vadd.f32 %v802_v1, %v346_v21  ;;  %v452_v29 = vadd.f32 %v802_v1, %v347_v22  ;;  %v259_v11 = vld [vmem:[%s797_s20 + $0x2a8] sm:$0xff]  ;;  %v260_v16 = vld [vmem:[%s797_s20 + $0x2b0] sm:$0xff]  ;;  %v261_v21 = vld [vmem:[%s797_s20 + $0x2b8] sm:$0xff] }
  0x45   : > { %643 = vst [vmem:[%s825_s25 + $0x1f8] sm:$0xff] %v545_v20  ;;  %v453_v30 = vadd.f32 %v802_v1, %v348_v23  ;;  %v350_v31 = vmul.f32 %v792_v0, %v245_v19  ;;  %v546_v35 = vmax.f32 %v448_v24, 0.0  ;;  %v547_v36 = vmax.f32 %v449_v25, 0.0 }
  0x46   : > { %v548_v37 = vmax.f32 %v450_v26, 0.0  ;;  %v454_v38 = vadd.f32 %v802_v1, %v349_v27  ;;  %v549_v42 = vmax.f32 %v451_v28, 0.0  ;;  %v550_v43 = vmax.f32 %v452_v29, 0.0 }
  0x47   : > { %v551_v44 = vmax.f32 %v453_v30, 0.0  ;;  %v455_v45 = vadd.f32 %v802_v1, %v350_v31  ;;  %644 = vst [vmem:[%s825_s25 + $0x200] sm:$0xff] %v546_v35  ;;  %645 = vst [vmem:[%s825_s25 + $0x208] sm:$0xff] %v547_v36  ;;  %v351_v48 = vmul.f32 %v792_v0, %v246_v32  ;;  %v352_v49 = vmul.f32 %v792_v0, %v247_v33  ;;  %v263_v35 = vld [vmem:[%s797_s20 + $0x2c8] sm:$0xff]  ;;  %v264_v36 = vld [vmem:[%s797_s20 + $0x2d0] sm:$0xff] }
  0x48   : > { %646 = vst [vmem:[%s825_s25 + $0x210] sm:$0xff] %v548_v37  ;;  %v552_v47 = vmax.f32 %v454_v38, 0.0  ;;  %v353_v50 = vmul.f32 %v792_v0, %v248_v34  ;;  %647 = vst [vmem:[%s825_s25 + $0x218] sm:$0xff] %v549_v42  ;;  %v354_v53 = vmul.f32 %v792_v0, %v249_v39  ;;  %v355_v54 = vmul.f32 %v792_v0, %v250_v40  ;;  %v262_v34 = vld [vmem:[%s797_s20 + $0x2c0] sm:$0xff] }
  0x49   : > { %648 = vst [vmem:[%s825_s25 + $0x220] sm:$0xff] %v550_v43  ;;  %649 = vst [vmem:[%s825_s25 + $0x228] sm:$0xff] %v551_v44  ;;  %v553_v52 = vmax.f32 %v455_v45, 0.0  ;;  %v356_v55 = vmul.f32 %v792_v0, %v251_v41  ;;  %v456_v56 = vadd.f32 %v802_v1, %v351_v48  ;;  %v457_v57 = vadd.f32 %v802_v1, %v352_v49  ;;  %v265_v41 = vld [vmem:[%s797_s20 + $0x2d8] sm:$0xff]  ;;  %v266_v42 = vld [vmem:[%s797_s20 + $0x2e0] sm:$0xff] }
  0x4a   : > { %650 = vst [vmem:[%s825_s25 + $0x230] sm:$0xff] %v552_v47  ;;  %v458_v58 = vadd.f32 %v802_v1, %v353_v50  ;;  %v357_v59 = vmul.f32 %v792_v0, %v252_v46  ;;  %v459_v60 = vadd.f32 %v802_v1, %v354_v53  ;;  %v460_v61 = vadd.f32 %v802_v1, %v355_v54  ;;  %v267_v43 = vld [vmem:[%s797_s20 + $0x2e8] sm:$0xff]  ;;  %v268_v48 = vld [vmem:[%s797_s20 + $0x2f0] sm:$0xff]  ;;  %v269_v53 = vld [vmem:[%s797_s20 + $0x2f8] sm:$0xff] }
  0x4b   : > { %651 = vst [vmem:[%s825_s25 + $0x238] sm:$0xff] %v553_v52  ;;  %v461_v62 = vadd.f32 %v802_v1, %v356_v55  ;;  %v358_v63 = vmul.f32 %v792_v0, %v253_v51  ;;  %v554_v5 = vmax.f32 %v456_v56, 0.0  ;;  %v555_v6 = vmax.f32 %v457_v57, 0.0 }
  0x4c   : > { %v556_v7 = vmax.f32 %v458_v58, 0.0  ;;  %v462_v8 = vadd.f32 %v802_v1, %v357_v59  ;;  %v557_v12 = vmax.f32 %v459_v60, 0.0  ;;  %v558_v13 = vmax.f32 %v460_v61, 0.0 }
  0x4d   : > { %v559_v14 = vmax.f32 %v461_v62, 0.0  ;;  %v463_v15 = vadd.f32 %v802_v1, %v358_v63  ;;  %652 = vst [vmem:[%s825_s25 + $0x240] sm:$0xff] %v554_v5  ;;  %653 = vst [vmem:[%s825_s25 + $0x248] sm:$0xff] %v555_v6  ;;  %v359_v18 = vmul.f32 %v792_v0, %v254_v2  ;;  %v360_v19 = vmul.f32 %v792_v0, %v255_v3  ;;  %v271_v5 = vld [vmem:[%s797_s20 + $0x308] sm:$0xff] }
  0x4e   : > { %654 = vst [vmem:[%s825_s25 + $0x250] sm:$0xff] %v556_v7  ;;  %v560_v17 = vmax.f32 %v462_v8, 0.0  ;;  %v361_v20 = vmul.f32 %v792_v0, %v256_v4  ;;  %655 = vst [vmem:[%s825_s25 + $0x258] sm:$0xff] %v557_v12  ;;  %v362_v23 = vmul.f32 %v792_v0, %v257_v9  ;;  %v363_v24 = vmul.f32 %v792_v0, %v258_v10  ;;  %v270_v4 = vld [vmem:[%s797_s20 + $0x300] sm:$0xff] }
  0x4f   : > { %656 = vst [vmem:[%s825_s25 + $0x260] sm:$0xff] %v558_v13  ;;  %657 = vst [vmem:[%s825_s25 + $0x268] sm:$0xff] %v559_v14  ;;  %v561_v22 = vmax.f32 %v463_v15, 0.0  ;;  %v364_v25 = vmul.f32 %v792_v0, %v259_v11  ;;  %v464_v26 = vadd.f32 %v802_v1, %v359_v18  ;;  %v465_v27 = vadd.f32 %v802_v1, %v360_v19 }
  0x50   : > { %658 = vst [vmem:[%s825_s25 + $0x270] sm:$0xff] %v560_v17  ;;  %v466_v28 = vadd.f32 %v802_v1, %v361_v20  ;;  %v365_v29 = vmul.f32 %v792_v0, %v260_v16  ;;  %v467_v30 = vadd.f32 %v802_v1, %v362_v23  ;;  %v468_v31 = vadd.f32 %v802_v1, %v363_v24 }
  0x51   : > { %659 = vst [vmem:[%s825_s25 + $0x278] sm:$0xff] %v561_v22  ;;  %v469_v32 = vadd.f32 %v802_v1, %v364_v25  ;;  %v366_v33 = vmul.f32 %v792_v0, %v261_v21  ;;  %v562_v37 = vmax.f32 %v464_v26, 0.0  ;;  %v563_v38 = vmax.f32 %v465_v27, 0.0 }
  0x52   : > { %v564_v39 = vmax.f32 %v466_v28, 0.0  ;;  %v470_v40 = vadd.f32 %v802_v1, %v365_v29  ;;  %v565_v44 = vmax.f32 %v467_v30, 0.0  ;;  %v566_v45 = vmax.f32 %v468_v31, 0.0 }
  0x53   : > { %v567_v46 = vmax.f32 %v469_v32, 0.0  ;;  %v471_v47 = vadd.f32 %v802_v1, %v366_v33  ;;  %660 = vst [vmem:[%s825_s25 + $0x280] sm:$0xff] %v562_v37  ;;  %661 = vst [vmem:[%s825_s25 + $0x288] sm:$0xff] %v563_v38  ;;  %v367_v50 = vmul.f32 %v792_v0, %v262_v34  ;;  %v368_v51 = vmul.f32 %v792_v0, %v263_v35 }
  0x54   : > { %662 = vst [vmem:[%s825_s25 + $0x290] sm:$0xff] %v564_v39  ;;  %v568_v49 = vmax.f32 %v470_v40, 0.0  ;;  %v369_v52 = vmul.f32 %v792_v0, %v264_v36  ;;  %663 = vst [vmem:[%s825_s25 + $0x298] sm:$0xff] %v565_v44  ;;  %v370_v55 = vmul.f32 %v792_v0, %v265_v41  ;;  %v371_v56 = vmul.f32 %v792_v0, %v266_v42 }
  0x55   : > { %664 = vst [vmem:[%s825_s25 + $0x2a0] sm:$0xff] %v566_v45  ;;  %665 = vst [vmem:[%s825_s25 + $0x2a8] sm:$0xff] %v567_v46  ;;  %v569_v54 = vmax.f32 %v471_v47, 0.0  ;;  %v372_v57 = vmul.f32 %v792_v0, %v267_v43  ;;  %v472_v58 = vadd.f32 %v802_v1, %v367_v50  ;;  %v473_v59 = vadd.f32 %v802_v1, %v368_v51 }
  0x56   : > { %666 = vst [vmem:[%s825_s25 + $0x2b0] sm:$0xff] %v568_v49  ;;  %v474_v60 = vadd.f32 %v802_v1, %v369_v52  ;;  %v373_v61 = vmul.f32 %v792_v0, %v268_v48  ;;  %v475_v62 = vadd.f32 %v802_v1, %v370_v55  ;;  %v476_v63 = vadd.f32 %v802_v1, %v371_v56 }
  0x57   : > { %667 = vst [vmem:[%s825_s25 + $0x2b8] sm:$0xff] %v569_v54  ;;  %v477_v2 = vadd.f32 %v802_v1, %v372_v57  ;;  %v374_v3 = vmul.f32 %v792_v0, %v269_v53  ;;  %v570_v6 = vmax.f32 %v472_v58, 0.0  ;;  %v571_v7 = vmax.f32 %v473_v59, 0.0 }
  0x58   : > { %v572_v8 = vmax.f32 %v474_v60, 0.0  ;;  %v478_v9 = vadd.f32 %v802_v1, %v373_v61  ;;  %v573_v10 = vmax.f32 %v475_v62, 0.0  ;;  %v574_v11 = vmax.f32 %v476_v63, 0.0 }
  0x59   : > { %v575_v12 = vmax.f32 %v477_v2, 0.0  ;;  %v479_v13 = vadd.f32 %v802_v1, %v374_v3  ;;  %668 = vst [vmem:[%s825_s25 + $0x2c0] sm:$0xff] %v570_v6  ;;  %669 = vst [vmem:[%s825_s25 + $0x2c8] sm:$0xff] %v571_v7  ;;  %v375_v15 = vmul.f32 %v792_v0, %v270_v4  ;;  %v376_v16 = vmul.f32 %v792_v0, %v271_v5 }
  0x5a   : > { %670 = vst [vmem:[%s825_s25 + $0x2d0] sm:$0xff] %v572_v8  ;;  %v576_v14 = vmax.f32 %v478_v9, 0.0  ;;  %671 = vst [vmem:[%s825_s25 + $0x2d8] sm:$0xff] %v573_v10 }
  0x5b   : > { %672 = vst [vmem:[%s825_s25 + $0x2e0] sm:$0xff] %v574_v11  ;;  %673 = vst [vmem:[%s825_s25 + $0x2e8] sm:$0xff] %v575_v12  ;;  %v577_v17 = vmax.f32 %v479_v13, 0.0  ;;  %v480_v18 = vadd.f32 %v802_v1, %v375_v15  ;;  %v481_v19 = vadd.f32 %v802_v1, %v376_v16 }
  0x5c   : > { %674 = vst [vmem:[%s825_s25 + $0x2f0] sm:$0xff] %v576_v14 }
  0x5d   : > { %675 = vst [vmem:[%s825_s25 + $0x2f8] sm:$0xff] %v577_v17  ;;  %v578_v20 = vmax.f32 %v480_v18, 0.0  ;;  %v579_v21 = vmax.f32 %v481_v19, 0.0 }
  0x5f   : > { %676 = vst [vmem:[%s825_s25 + $0x300] sm:$0xff] %v578_v20  ;;  %677 = vst [vmem:[%s825_s25 + $0x308] sm:$0xff] %v579_v21 }
  0x60 PF: > { %s13_s12 = sadd.s32 1, %s759_s12  }
  0x61   : > { %p10_p4 = scmp.ge.s32.totalorder %s13_s12, 4  }
  0x63   :  { %12 = sbr.rel (!%p10_p4) target bundleno = 1 (0x1), region = 62 }

// kernel: recon224_forward.8
= control target key start
LH: loop header
LB: loop body
LE: loop exit
PB: predicated region body
PF: predicated region fallthrough
CT: control target
= control target key end

     0   :  { %s2257_s12 = smov 0   ;;  %s3886_s0 = inlined_call_operand.vmem [shape: f32[6272,128], index: 0, kind: input, shape index: {}]   ;;  %s3887_s1 = inlined_call_operand.vmem [shape: f32[1,128], index: 1, kind: input, shape index: {}]   ;;  %s3888_s2 = inlined_call_operand.vmem [shape: f32[1,128], index: 2, kind: input, shape index: {}]   ;;  %s3889_s3 = inlined_call_operand.vmem [shape: f32[6272,128], index: 3, kind: output, shape index: {}]  }
   0x1 LB: > { %s2204_s13 = sadd.s32 4294967295, %s2235_s12   ;;  %p2208_p0 = scmp.ge.s32.totalorder %s2235_s12, 1  ;;  %s2235_s12 = sphi %s2257_s12, %s13_s12  }
   0x2   : > { %p138_p1 = scmp.lt.s32.totalorder %s2235_s12, 3 }
   0x4   : > { %p139_p2 = pnand %p2208_p0, %p138_p1 }
   0x5   : > { %s162_s14 = smul.u32 (!%p139_p2), 392, %s2204_s13  ;;  %v2268_v0 = vld [vmem:[%s3887_s1] ss:$0 sm:$0xff] (!%p139_p2) }
   0x6   : > { %142 = sbr.rel (%p139_p2) target bundleno = 316 (0x13c), region = 32  ;;  %v2278_v1 = vld [vmem:[%s3888_s2] ss:$0 sm:$0xff] (!%p139_p2) }
   0x7   : > { %p163_p3 = scmp.lt.s32.totalorder (!%p139_p2), %s162_s14, 783 }
   0xd   : > { %s3891_s14 = smov (!%p163_p3, %s162_s14), 783 }
   0xe   : > { %s2209_s15 = sshll.u32 %s3891_s14, 3 }
   0xf   : > { %s2273_s20 = scalar_lea.vmem %s3886_s0, %s2209_s15  ;;  %s2301_s25 = scalar_lea.vmem %s3889_s3, %s2209_s15 }
  0x10   : > { %v174_v2 = vld [vmem:[%s2273_s20] sm:$0xff]  ;;  %v175_v3 = vld [vmem:[%s2273_s20 + $0x8] sm:$0xff]  ;;  %v176_v4 = vld [vmem:[%s2273_s20 + $0x10] sm:$0xff] }
  0x11   : > { %v573_v5 = vmul.f32 %v2268_v0, %v174_v2  ;;  %v574_v6 = vmul.f32 %v2268_v0, %v175_v3  ;;  %v575_v7 = vmul.f32 %v2268_v0, %v176_v4  ;;  %v177_v8 = vld [vmem:[%s2273_s20 + $0x18] sm:$0xff]  ;;  %v178_v9 = vld [vmem:[%s2273_s20 + $0x20] sm:$0xff]  ;;  %v179_v10 = vld [vmem:[%s2273_s20 + $0x28] sm:$0xff] }
  0x12   : > { %v576_v11 = vmul.f32 %v2268_v0, %v177_v8  ;;  %v577_v12 = vmul.f32 %v2268_v0, %v178_v9  ;;  %v578_v13 = vmul.f32 %v2268_v0, %v179_v10  ;;  %v180_v14 = vld [vmem:[%s2273_s20 + $0x30] sm:$0xff]  ;;  %v181_v15 = vld [vmem:[%s2273_s20 + $0x38] sm:$0xff]  ;;  %v182_v24 = vld [vmem:[%s2273_s20 + $0x40] sm:$0xff] }
  0x13   : > { %v972_v16 = vadd.f32 %v2278_v1, %v573_v5  ;;  %v973_v17 = vadd.f32 %v2278_v1, %v574_v6  ;;  %v974_v18 = vadd.f32 %v2278_v1, %v575_v7  ;;  %v579_v19 = vmul.f32 %v2268_v0, %v180_v14  ;;  %v183_v25 = vld [vmem:[%s2273_s20 + $0x48] sm:$0xff]  ;;  %v184_v26 = vld [vmem:[%s2273_s20 + $0x50] sm:$0xff]  ;;  %v185_v31 = vld [vmem:[%s2273_s20 + $0x58] sm:$0xff] }
  0x14   : > { %v975_v20 = vadd.f32 %v2278_v1, %v576_v11  ;;  %v976_v21 = vadd.f32 %v2278_v1, %v577_v12  ;;  %v977_v22 = vadd.f32 %v2278_v1, %v578_v13  ;;  %v580_v23 = vmul.f32 %v2268_v0, %v181_v15  ;;  %v186_v32 = vld [vmem:[%s2273_s20 + $0x60] sm:$0xff]  ;;  %v187_v33 = vld [vmem:[%s2273_s20 + $0x68] sm:$0xff]  ;;  %v188_v38 = vld [vmem:[%s2273_s20 + $0x70] sm:$0xff] }
  0x15   : > { %v1364_v27 = vmax.f32 %v972_v16, 0.0  ;;  %v1365_v28 = vmax.f32 %v973_v17, 0.0  ;;  %v1366_v29 = vmax.f32 %v974_v18, 0.0  ;;  %v978_v30 = vadd.f32 %v2278_v1, %v579_v19  ;;  %v189_v43 = vld [vmem:[%s2273_s20 + $0x78] sm:$0xff]  ;;  %v190_v56 = vld [vmem:[%s2273_s20 + $0x80] sm:$0xff]  ;;  %v191_v57 = vld [vmem:[%s2273_s20 + $0x88] sm:$0xff] }
  0x16   : > { %v1367_v34 = vmax.f32 %v975_v20, 0.0  ;;  %v1368_v35 = vmax.f32 %v976_v21, 0.0  ;;  %v1369_v36 = vmax.f32 %v977_v22, 0.0  ;;  %v979_v37 = vadd.f32 %v2278_v1, %v580_v23  ;;  %v192_v58 = vld [vmem:[%s2273_s20 + $0x90] sm:$0xff]  ;;  %v193_v63 = vld [vmem:[%s2273_s20 + $0x98] sm:$0xff]  ;;  %v194_v2 = vld [vmem:[%s2273_s20 + $0xa0] sm:$0xff] }
  0x17   : > { %1756 = vst [vmem:[%s2301_s25] sm:$0xff] %v1364_v27  ;;  %1757 = vst [vmem:[%s2301_s25 + $0x8] sm:$0xff] %v1365_v28  ;;  %v1370_v39 = vmax.f32 %v978_v30, 0.0  ;;  %v581_v40 = vmul.f32 %v2268_v0, %v182_v24  ;;  %v582_v41 = vmul.f32 %v2268_v0, %v183_v25  ;;  %v583_v42 = vmul.f32 %v2268_v0, %v184_v26  ;;  %v195_v3 = vld [vmem:[%s2273_s20 + $0xa8] sm:$0xff]  ;;  %v196_v8 = vld [vmem:[%s2273_s20 + $0xb0] sm:$0xff] }
  0x18   : > { %1758 = vst [vmem:[%s2301_s25 + $0x10] sm:$0xff] %v1366_v29  ;;  %1759 = vst [vmem:[%s2301_s25 + $0x18] sm:$0xff] %v1367_v34  ;;  %v1371_v44 = vmax.f32 %v979_v37, 0.0  ;;  %v584_v45 = vmul.f32 %v2268_v0, %v185_v31  ;;  %v585_v46 = vmul.f32 %v2268_v0, %v186_v32  ;;  %v586_v47 = vmul.f32 %v2268_v0, %v187_v33  ;;  %v197_v13 = vld [vmem:[%s2273_s20 + $0xb8] sm:$0xff]  ;;  %v198_v26 = vld [vmem:[%s2273_s20 + $0xc0] sm:$0xff] }
  0x19   : > { %1760 = vst [vmem:[%s2301_s25 + $0x20] sm:$0xff] %v1368_v35  ;;  %1761 = vst [vmem:[%s2301_s25 + $0x28] sm:$0xff] %v1369_v36  ;;  %v980_v48 = vadd.f32 %v2278_v1, %v581_v40  ;;  %v981_v49 = vadd.f32 %v2278_v1, %v582_v41  ;;  %v982_v50 = vadd.f32 %v2278_v1, %v583_v42  ;;  %v199_v27 = vld [vmem:[%s2273_s20 + $0xc8] sm:$0xff]  ;;  %v200_v28 = vld [vmem:[%s2273_s20 + $0xd0] sm:$0xff] }
  0x1a   : > { %1762 = vst [vmem:[%s2301_s25 + $0x30] sm:$0xff] %v1370_v39  ;;  %v587_v51 = vmul.f32 %v2268_v0, %v188_v38  ;;  %1763 = vst [vmem:[%s2301_s25 + $0x38] sm:$0xff] %v1371_v44  ;;  %v983_v52 = vadd.f32 %v2278_v1, %v584_v45  ;;  %v984_v53 = vadd.f32 %v2278_v1, %v585_v46  ;;  %v201_v33 = vld [vmem:[%s2273_s20 + $0xd8] sm:$0xff]  ;;  %v202_v34 = vld [vmem:[%s2273_s20 + $0xe0] sm:$0xff] }
  0x1b   : > { %v985_v54 = vadd.f32 %v2278_v1, %v586_v47  ;;  %v588_v55 = vmul.f32 %v2268_v0, %v189_v43  ;;  %v1372_v59 = vmax.f32 %v980_v48, 0.0  ;;  %v1373_v60 = vmax.f32 %v981_v49, 0.0  ;;  %v203_v35 = vld [vmem:[%s2273_s20 + $0xe8] sm:$0xff]  ;;  %v204_v40 = vld [vmem:[%s2273_s20 + $0xf0] sm:$0xff]  ;;  %v205_v45 = vld [vmem:[%s2273_s20 + $0xf8] sm:$0xff] }
  0x1c   : > { %v1374_v61 = vmax.f32 %v982_v50, 0.0  ;;  %v986_v62 = vadd.f32 %v2278_v1, %v587_v51  ;;  %v1375_v4 = vmax.f32 %v983_v52, 0.0  ;;  %v1376_v5 = vmax.f32 %v984_v53, 0.0 }
  0x1d   : > { %v1377_v6 = vmax.f32 %v985_v54, 0.0  ;;  %v987_v7 = vadd.f32 %v2278_v1, %v588_v55  ;;  %1764 = vst [vmem:[%s2301_s25 + $0x40] sm:$0xff] %v1372_v59  ;;  %1765 = vst [vmem:[%s2301_s25 + $0x48] sm:$0xff] %v1373_v60  ;;  %v589_v10 = vmul.f32 %v2268_v0, %v190_v56  ;;  %v590_v11 = vmul.f32 %v2268_v0, %v191_v57  ;;  %v207_v59 = vld [vmem:[%s2273_s20 + $0x108] sm:$0xff]  ;;  %v208_v60 = vld [vmem:[%s2273_s20 + $0x110] sm:$0xff] }
  0x1e   : > { %1766 = vst [vmem:[%s2301_s25 + $0x50] sm:$0xff] %v1374_v61  ;;  %v1378_v9 = vmax.f32 %v986_v62, 0.0  ;;  %v591_v12 = vmul.f32 %v2268_v0, %v192_v58  ;;  %1767 = vst [vmem:[%s2301_s25 + $0x58] sm:$0xff] %v1375_v4  ;;  %v592_v15 = vmul.f32 %v2268_v0, %v193_v63  ;;  %v593_v16 = vmul.f32 %v2268_v0, %v194_v2  ;;  %v206_v58 = vld [vmem:[%s2273_s20 + $0x100] sm:$0xff] }
  0x1f   : > { %1768 = vst [vmem:[%s2301_s25 + $0x60] sm:$0xff] %v1376_v5  ;;  %1769 = vst [vmem:[%s2301_s25 + $0x68] sm:$0xff] %v1377_v6  ;;  %v1379_v14 = vmax.f32 %v987_v7, 0.0  ;;  %v594_v17 = vmul.f32 %v2268_v0, %v195_v3  ;;  %v988_v18 = vadd.f32 %v2278_v1, %v589_v10  ;;  %v989_v19 = vadd.f32 %v2278_v1, %v590_v11  ;;  %v209_v3 = vld [vmem:[%s2273_s20 + $0x118] sm:$0xff]  ;;  %v210_v4 = vld [vmem:[%s2273_s20 + $0x120] sm:$0xff] }
  0x20   : > { %1770 = vst [vmem:[%s2301_s25 + $0x70] sm:$0xff] %v1378_v9  ;;  %v990_v20 = vadd.f32 %v2278_v1, %v591_v12  ;;  %v595_v21 = vmul.f32 %v2268_v0, %v196_v8  ;;  %v991_v22 = vadd.f32 %v2278_v1, %v592_v15  ;;  %v992_v23 = vadd.f32 %v2278_v1, %v593_v16  ;;  %v211_v5 = vld [vmem:[%s2273_s20 + $0x128] sm:$0xff]  ;;  %v212_v10 = vld [vmem:[%s2273_s20 + $0x130] sm:$0xff]  ;;  %v213_v15 = vld [vmem:[%s2273_s20 + $0x138] sm:$0xff] }
  0x21   : > { %1771 = vst [vmem:[%s2301_s25 + $0x78] sm:$0xff] %v1379_v14  ;;  %v993_v24 = vadd.f32 %v2278_v1, %v594_v17  ;;  %v596_v25 = vmul.f32 %v2268_v0, %v197_v13  ;;  %v1380_v29 = vmax.f32 %v988_v18, 0.0  ;;  %v1381_v30 = vmax.f32 %v989_v19, 0.0 }
  0x22   : > { %v1382_v31 = vmax.f32 %v990_v20, 0.0  ;;  %v994_v32 = vadd.f32 %v2278_v1, %v595_v21  ;;  %v1383_v36 = vmax.f32 %v991_v22, 0.0  ;;  %v1384_v37 = vmax.f32 %v992_v23, 0.0 }
  0x23   : > { %v1385_v38 = vmax.f32 %v993_v24, 0.0  ;;  %v995_v39 = vadd.f32 %v2278_v1, %v596_v25  ;;  %1772 = vst [vmem:[%s2301_s25 + $0x80] sm:$0xff] %v1380_v29  ;;  %1773 = vst [vmem:[%s2301_s25 + $0x88] sm:$0xff] %v1381_v30  ;;  %v597_v42 = vmul.f32 %v2268_v0, %v198_v26  ;;  %v598_v43 = vmul.f32 %v2268_v0, %v199_v27  ;;  %v215_v29 = vld [vmem:[%s2273_s20 + $0x148] sm:$0xff]  ;;  %v216_v30 = vld [vmem:[%s2273_s20 + $0x150] sm:$0xff] }
  0x24   : > { %1774 = vst [vmem:[%s2301_s25 + $0x90] sm:$0xff] %v1382_v31  ;;  %v1386_v41 = vmax.f32 %v994_v32, 0.0  ;;  %v599_v44 = vmul.f32 %v2268_v0, %v200_v28  ;;  %1775 = vst [vmem:[%s2301_s25 + $0x98] sm:$0xff] %v1383_v36  ;;  %v600_v47 = vmul.f32 %v2268_v0, %v201_v33  ;;  %v601_v48 = vmul.f32 %v2268_v0, %v202_v34  ;;  %v214_v28 = vld [vmem:[%s2273_s20 + $0x140] sm:$0xff] }
  0x25   : > { %1776 = vst [vmem:[%s2301_s25 + $0xa0] sm:$0xff] %v1384_v37  ;;  %1777 = vst [vmem:[%s2301_s25 + $0xa8] sm:$0xff] %v1385_v38  ;;  %v1387_v46 = vmax.f32 %v995_v39, 0.0  ;;  %v602_v49 = vmul.f32 %v2268_v0, %v203_v35  ;;  %v996_v50 = vadd.f32 %v2278_v1, %v597_v42  ;;  %v997_v51 = vadd.f32 %v2278_v1, %v598_v43  ;;  %v217_v35 = vld [vmem:[%s2273_s20 + $0x158] sm:$0xff]  ;;  %v218_v36 = vld [vmem:[%s2273_s20 + $0x160] sm:$0xff] }
  0x26   : > { %1778 = vst [vmem:[%s2301_s25 + $0xb0] sm:$0xff] %v1386_v41  ;;  %v998_v52 = vadd.f32 %v2278_v1, %v599_v44  ;;  %v603_v53 = vmul.f32 %v2268_v0, %v204_v40  ;;  %v999_v54 = vadd.f32 %v2278_v1, %v600_v47  ;;  %v1000_v55 = vadd.f32 %v2278_v1, %v601_v48  ;;  %v219_v37 = vld [vmem:[%s2273_s20 + $0x168] sm:$0xff]  ;;  %v220_v42 = vld [vmem:[%s2273_s20 + $0x170] sm:$0xff]  ;;  %v221_v47 = vld [vmem:[%s2273_s20 + $0x178] sm:$0xff] }
  0x27   : > { %1779 = vst [vmem:[%s2301_s25 + $0xb8] sm:$0xff] %v1387_v46  ;;  %v1001_v56 = vadd.f32 %v2278_v1, %v602_v49  ;;  %v604_v57 = vmul.f32 %v2268_v0, %v205_v45  ;;  %v1388_v61 = vmax.f32 %v996_v50, 0.0  ;;  %v1389_v62 = vmax.f32 %v997_v51, 0.0 }
  0x28   : > { %v1390_v63 = vmax.f32 %v998_v52, 0.0  ;;  %v1002_v2 = vadd.f32 %v2278_v1, %v603_v53  ;;  %v1391_v6 = vmax.f32 %v999_v54, 0.0  ;;  %v1392_v7 = vmax.f32 %v1000_v55, 0.0 }
  0x29   : > { %v1393_v8 = vmax.f32 %v1001_v56, 0.0  ;;  %v1003_v9 = vadd.f32 %v2278_v1, %v604_v57  ;;  %1780 = vst [vmem:[%s2301_s25 + $0xc0] sm:$0xff] %v1388_v61  ;;  %1781 = vst [vmem:[%s2301_s25 + $0xc8] sm:$0xff] %v1389_v62  ;;  %v605_v12 = vmul.f32 %v2268_v0, %v206_v58  ;;  %v606_v13 = vmul.f32 %v2268_v0, %v207_v59  ;;  %v223_v61 = vld [vmem:[%s2273_s20 + $0x188] sm:$0xff]  ;;  %v224_v62 = vld [vmem:[%s2273_s20 + $0x190] sm:$0xff] }
  0x2a   : > { %1782 = vst [vmem:[%s2301_s25 + $0xd0] sm:$0xff] %v1390_v63  ;;  %v1394_v11 = vmax.f32 %v1002_v2, 0.0  ;;  %v607_v14 = vmul.f32 %v2268_v0, %v208_v60  ;;  %1783 = vst [vmem:[%s2301_s25 + $0xd8] sm:$0xff] %v1391_v6  ;;  %v608_v17 = vmul.f32 %v2268_v0, %v209_v3  ;;  %v609_v18 = vmul.f32 %v2268_v0, %v210_v4  ;;  %v222_v60 = vld [vmem:[%s2273_s20 + $0x180] sm:$0xff] }
  0x2b   : > { %1784 = vst [vmem:[%s2301_s25 + $0xe0] sm:$0xff] %v1392_v7  ;;  %1785 = vst [vmem:[%s2301_s25 + $0xe8] sm:$0xff] %v1393_v8  ;;  %v1395_v16 = vmax.f32 %v1003_v9, 0.0  ;;  %v610_v19 = vmul.f32 %v2268_v0, %v211_v5  ;;  %v1004_v20 = vadd.f32 %v2278_v1, %v605_v12  ;;  %v1005_v21 = vadd.f32 %v2278_v1, %v606_v13  ;;  %v225_v5 = vld [vmem:[%s2273_s20 + $0x198] sm:$0xff]  ;;  %v226_v6 = vld [vmem:[%s2273_s20 + $0x1a0] sm:$0xff] }
  0x2c   : > { %1786 = vst [vmem:[%s2301_s25 + $0xf0] sm:$0xff] %v1394_v11  ;;  %v1006_v22 = vadd.f32 %v2278_v1, %v607_v14  ;;  %v611_v23 = vmul.f32 %v2268_v0, %v212_v10  ;;  %v1007_v24 = vadd.f32 %v2278_v1, %v608_v17  ;;  %v1008_v25 = vadd.f32 %v2278_v1, %v609_v18  ;;  %v227_v7 = vld [vmem:[%s2273_s20 + $0x1a8] sm:$0xff]  ;;  %v228_v12 = vld [vmem:[%s2273_s20 + $0x1b0] sm:$0xff]  ;;  %v229_v17 = vld [vmem:[%s2273_s20 + $0x1b8] sm:$0xff] }
  0x2d   : > { %1787 = vst [vmem:[%s2301_s25 + $0xf8] sm:$0xff] %v1395_v16  ;;  %v1009_v26 = vadd.f32 %v2278_v1, %v610_v19  ;;  %v612_v27 = vmul.f32 %v2268_v0, %v213_v15  ;;  %v1396_v31 = vmax.f32 %v1004_v20, 0.0  ;;  %v1397_v32 = vmax.f32 %v1005_v21, 0.0 }
  0x2e   : > { %v1398_v33 = vmax.f32 %v1006_v22, 0.0  ;;  %v1010_v34 = vadd.f32 %v2278_v1, %v611_v23  ;;  %v1399_v38 = vmax.f32 %v1007_v24, 0.0  ;;  %v1400_v39 = vmax.f32 %v1008_v25, 0.0 }
  0x2f   : > { %v1401_v40 = vmax.f32 %v1009_v26, 0.0  ;;  %v1011_v41 = vadd.f32 %v2278_v1, %v612_v27  ;;  %1788 = vst [vmem:[%s2301_s25 + $0x100] sm:$0xff] %v1396_v31  ;;  %1789 = vst [vmem:[%s2301_s25 + $0x108] sm:$0xff] %v1397_v32  ;;  %v613_v44 = vmul.f32 %v2268_v0, %v214_v28  ;;  %v614_v45 = vmul.f32 %v2268_v0, %v215_v29  ;;  %v231_v31 = vld [vmem:[%s2273_s20 + $0x1c8] sm:$0xff]  ;;  %v232_v32 = vld [vmem:[%s2273_s20 + $0x1d0] sm:$0xff] }
  0x30   : > { %1790 = vst [vmem:[%s2301_s25 + $0x110] sm:$0xff] %v1398_v33  ;;  %v1402_v43 = vmax.f32 %v1010_v34, 0.0  ;;  %v615_v46 = vmul.f32 %v2268_v0, %v216_v30  ;;  %1791 = vst [vmem:[%s2301_s25 + $0x118] sm:$0xff] %v1399_v38  ;;  %v616_v49 = vmul.f32 %v2268_v0, %v217_v35  ;;  %v617_v50 = vmul.f32 %v2268_v0, %v218_v36  ;;  %v230_v30 = vld [vmem:[%s2273_s20 + $0x1c0] sm:$0xff] }
  0x31   : > { %1792 = vst [vmem:[%s2301_s25 + $0x120] sm:$0xff] %v1400_v39  ;;  %1793 = vst [vmem:[%s2301_s25 + $0x128] sm:$0xff] %v1401_v40  ;;  %v1403_v48 = vmax.f32 %v1011_v41, 0.0  ;;  %v618_v51 = vmul.f32 %v2268_v0, %v219_v37  ;;  %v1012_v52 = vadd.f32 %v2278_v1, %v613_v44  ;;  %v1013_v53 = vadd.f32 %v2278_v1, %v614_v45  ;;  %v233_v37 = vld [vmem:[%s2273_s20 + $0x1d8] sm:$0xff]  ;;  %v234_v38 = vld [vmem:[%s2273_s20 + $0x1e0] sm:$0xff] }
  0x32   : > { %1794 = vst [vmem:[%s2301_s25 + $0x130] sm:$0xff] %v1402_v43  ;;  %v1014_v54 = vadd.f32 %v2278_v1, %v615_v46  ;;  %v619_v55 = vmul.f32 %v2268_v0, %v220_v42  ;;  %v1015_v56 = vadd.f32 %v2278_v1, %v616_v49  ;;  %v1016_v57 = vadd.f32 %v2278_v1, %v617_v50  ;;  %v235_v39 = vld [vmem:[%s2273_s20 + $0x1e8] sm:$0xff]  ;;  %v236_v44 = vld [vmem:[%s2273_s20 + $0x1f0] sm:$0xff]  ;;  %v237_v49 = vld [vmem:[%s2273_s20 + $0x1f8] sm:$0xff] }
  0x33   : > { %1795 = vst [vmem:[%s2301_s25 + $0x138] sm:$0xff] %v1403_v48  ;;  %v1017_v58 = vadd.f32 %v2278_v1, %v618_v51  ;;  %v620_v59 = vmul.f32 %v2268_v0, %v221_v47  ;;  %v1404_v63 = vmax.f32 %v1012_v52, 0.0  ;;  %v1405_v2 = vmax.f32 %v1013_v53, 0.0 }
  0x34   : > { %v1406_v3 = vmax.f32 %v1014_v54, 0.0  ;;  %v1018_v4 = vadd.f32 %v2278_v1, %v619_v55  ;;  %v1407_v8 = vmax.f32 %v1015_v56, 0.0  ;;  %v1408_v9 = vmax.f32 %v1016_v57, 0.0 }
  0x35   : > { %v1409_v10 = vmax.f32 %v1017_v58, 0.0  ;;  %v1019_v11 = vadd.f32 %v2278_v1, %v620_v59  ;;  %1796 = vst [vmem:[%s2301_s25 + $0x140] sm:$0xff] %v1404_v63  ;;  %1797 = vst [vmem:[%s2301_s25 + $0x148] sm:$0xff] %v1405_v2  ;;  %v621_v14 = vmul.f32 %v2268_v0, %v222_v60  ;;  %v622_v15 = vmul.f32 %v2268_v0, %v223_v61  ;;  %v239_v63 = vld [vmem:[%s2273_s20 + $0x208] sm:$0xff]  ;;  %v240_v2 = vld [vmem:[%s2273_s20 + $0x210] sm:$0xff] }
  0x36   : > { %1798 = vst [vmem:[%s2301_s25 + $0x150] sm:$0xff] %v1406_v3  ;;  %v1410_v13 = vmax.f32 %v1018_v4, 0.0  ;;  %v623_v16 = vmul.f32 %v2268_v0, %v224_v62  ;;  %1799 = vst [vmem:[%s2301_s25 + $0x158] sm:$0xff] %v1407_v8  ;;  %v624_v19 = vmul.f32 %v2268_v0, %v225_v5  ;;  %v625_v20 = vmul.f32 %v2268_v0, %v226_v6  ;;  %v238_v62 = vld [vmem:[%s2273_s20 + $0x200] sm:$0xff] }
  0x37   : > { %1800 = vst [vmem:[%s2301_s25 + $0x160] sm:$0xff] %v1408_v9  ;;  %1801 = vst [vmem:[%s2301_s25 + $0x168] sm:$0xff] %v1409_v10  ;;  %v1411_v18 = vmax.f32 %v1019_v11, 0.0  ;;  %v626_v21 = vmul.f32 %v2268_v0, %v227_v7  ;;  %v1020_v22 = vadd.f32 %v2278_v1, %v621_v14  ;;  %v1021_v23 = vadd.f32 %v2278_v1, %v622_v15  ;;  %v241_v7 = vld [vmem:[%s2273_s20 + $0x218] sm:$0xff]  ;;  %v242_v8 = vld [vmem:[%s2273_s20 + $0x220] sm:$0xff] }
  0x38   : > { %1802 = vst [vmem:[%s2301_s25 + $0x170] sm:$0xff] %v1410_v13  ;;  %v1022_v24 = vadd.f32 %v2278_v1, %v623_v16  ;;  %v627_v25 = vmul.f32 %v2268_v0, %v228_v12  ;;  %v1023_v26 = vadd.f32 %v2278_v1, %v624_v19  ;;  %v1024_v27 = vadd.f32 %v2278_v1, %v625_v20  ;;  %v243_v9 = vld [vmem:[%s2273_s20 + $0x228] sm:$0xff]  ;;  %v244_v14 = vld [vmem:[%s2273_s20 + $0x230] sm:$0xff]  ;;  %v245_v19 = vld [vmem:[%s2273_s20 + $0x238] sm:$0xff] }
  0x39   : > { %1803 = vst [vmem:[%s2301_s25 + $0x178] sm:$0xff] %v1411_v18  ;;  %v1025_v28 = vadd.f32 %v2278_v1, %v626_v21  ;;  %v628_v29 = vmul.f32 %v2268_v0, %v229_v17  ;;  %v1412_v33 = vmax.f32 %v1020_v22, 0.0  ;;  %v1413_v34 = vmax.f32 %v1021_v23, 0.0 }
  0x3a   : > { %v1414_v35 = vmax.f32 %v1022_v24, 0.0  ;;  %v1026_v36 = vadd.f32 %v2278_v1, %v627_v25  ;;  %v1415_v40 = vmax.f32 %v1023_v26, 0.0  ;;  %v1416_v41 = vmax.f32 %v1024_v27, 0.0 }
  0x3b   : > { %v1417_v42 = vmax.f32 %v1025_v28, 0.0  ;;  %v1027_v43 = vadd.f32 %v2278_v1, %v628_v29  ;;  %1804 = vst [vmem:[%s2301_s25 + $0x180] sm:$0xff] %v1412_v33  ;;  %1805 = vst [vmem:[%s2301_s25 + $0x188] sm:$0xff] %v1413_v34  ;;  %v629_v46 = vmul.f32 %v2268_v0, %v230_v30  ;;  %v630_v47 = vmul.f32 %v2268_v0, %v231_v31  ;;  %v247_v33 = vld [vmem:[%s2273_s20 + $0x248] sm:$0xff]  ;;  %v248_v34 = vld [vmem:[%s2273_s20 + $0x250] sm:$0xff] }
  0x3c   : > { %1806 = vst [vmem:[%s2301_s25 + $0x190] sm:$0xff] %v1414_v35  ;;  %v1418_v45 = vmax.f32 %v1026_v36, 0.0  ;;  %v631_v48 = vmul.f32 %v2268_v0, %v232_v32  ;;  %1807 = vst [vmem:[%s2301_s25 + $0x198] sm:$0xff] %v1415_v40  ;;  %v632_v51 = vmul.f32 %v2268_v0, %v233_v37  ;;  %v633_v52 = vmul.f32 %v2268_v0, %v234_v38  ;;  %v246_v32 = vld [vmem:[%s2273_s20 + $0x240] sm:$0xff] }
  0x3d   : > { %1808 = vst [vmem:[%s2301_s25 + $0x1a0] sm:$0xff] %v1416_v41  ;;  %1809 = vst [vmem:[%s2301_s25 + $0x1a8] sm:$0xff] %v1417_v42  ;;  %v1419_v50 = vmax.f32 %v1027_v43, 0.0  ;;  %v634_v53 = vmul.f32 %v2268_v0, %v235_v39  ;;  %v1028_v54 = vadd.f32 %v2278_v1, %v629_v46  ;;  %v1029_v55 = vadd.f32 %v2278_v1, %v630_v47  ;;  %v249_v39 = vld [vmem:[%s2273_s20 + $0x258] sm:$0xff]  ;;  %v250_v40 = vld [vmem:[%s2273_s20 + $0x260] sm:$0xff] }
  0x3e   : > { %1810 = vst [vmem:[%s2301_s25 + $0x1b0] sm:$0xff] %v1418_v45  ;;  %v1030_v56 = vadd.f32 %v2278_v1, %v631_v48  ;;  %v635_v57 = vmul.f32 %v2268_v0, %v236_v44  ;;  %v1031_v58 = vadd.f32 %v2278_v1, %v632_v51  ;;  %v1032_v59 = vadd.f32 %v2278_v1, %v633_v52  ;;  %v251_v41 = vld [vmem:[%s2273_s20 + $0x268] sm:$0xff]  ;;  %v252_v46 = vld [vmem:[%s2273_s20 + $0x270] sm:$0xff]  ;;  %v253_v51 = vld [vmem:[%s2273_s20 + $0x278] sm:$0xff] }
  0x3f   : > { %1811 = vst [vmem:[%s2301_s25 + $0x1b8] sm:$0xff] %v1419_v50  ;;  %v1033_v60 = vadd.f32 %v2278_v1, %v634_v53  ;;  %v636_v61 = vmul.f32 %v2268_v0, %v237_v49  ;;  %v1420_v3 = vmax.f32 %v1028_v54, 0.0  ;;  %v1421_v4 = vmax.f32 %v1029_v55, 0.0 }
  0x40   : > { %v1422_v5 = vmax.f32 %v1030_v56, 0.0  ;;  %v1034_v6 = vadd.f32 %v2278_v1, %v635_v57  ;;  %v1423_v10 = vmax.f32 %v1031_v58, 0.0  ;;  %v1424_v11 = vmax.f32 %v1032_v59, 0.0 }
  0x41   : > { %v1425_v12 = vmax.f32 %v1033_v60, 0.0  ;;  %v1035_v13 = vadd.f32 %v2278_v1, %v636_v61  ;;  %1812 = vst [vmem:[%s2301_s25 + $0x1c0] sm:$0xff] %v1420_v3  ;;  %1813 = vst [vmem:[%s2301_s25 + $0x1c8] sm:$0xff] %v1421_v4  ;;  %v637_v16 = vmul.f32 %v2268_v0, %v238_v62  ;;  %v638_v17 = vmul.f32 %v2268_v0, %v239_v63  ;;  %v255_v3 = vld [vmem:[%s2273_s20 + $0x288] sm:$0xff]  ;;  %v256_v4 = vld [vmem:[%s2273_s20 + $0x290] sm:$0xff] }
  0x42   : > { %1814 = vst [vmem:[%s2301_s25 + $0x1d0] sm:$0xff] %v1422_v5  ;;  %v1426_v15 = vmax.f32 %v1034_v6, 0.0  ;;  %v639_v18 = vmul.f32 %v2268_v0, %v240_v2  ;;  %1815 = vst [vmem:[%s2301_s25 + $0x1d8] sm:$0xff] %v1423_v10  ;;  %v640_v21 = vmul.f32 %v2268_v0, %v241_v7  ;;  %v641_v22 = vmul.f32 %v2268_v0, %v242_v8  ;;  %v254_v2 = vld [vmem:[%s2273_s20 + $0x280] sm:$0xff] }
  0x43   : > { %1816 = vst [vmem:[%s2301_s25 + $0x1e0] sm:$0xff] %v1424_v11  ;;  %1817 = vst [vmem:[%s2301_s25 + $0x1e8] sm:$0xff] %v1425_v12  ;;  %v1427_v20 = vmax.f32 %v1035_v13, 0.0  ;;  %v642_v23 = vmul.f32 %v2268_v0, %v243_v9  ;;  %v1036_v24 = vadd.f32 %v2278_v1, %v637_v16  ;;  %v1037_v25 = vadd.f32 %v2278_v1, %v638_v17  ;;  %v257_v9 = vld [vmem:[%s2273_s20 + $0x298] sm:$0xff]  ;;  %v258_v10 = vld [vmem:[%s2273_s20 + $0x2a0] sm:$0xff] }
  0x44   : > { %1818 = vst [vmem:[%s2301_s25 + $0x1f0] sm:$0xff] %v1426_v15  ;;  %v1038_v26 = vadd.f32 %v2278_v1, %v639_v18  ;;  %v643_v27 = vmul.f32 %v2268_v0, %v244_v14  ;;  %v1039_v28 = vadd.f32 %v2278_v1, %v640_v21  ;;  %v1040_v29 = vadd.f32 %v2278_v1, %v641_v22  ;;  %v259_v11 = vld [vmem:[%s2273_s20 + $0x2a8] sm:$0xff]  ;;  %v260_v16 = vld [vmem:[%s2273_s20 + $0x2b0] sm:$0xff]  ;;  %v261_v21 = vld [vmem:[%s2273_s20 + $0x2b8] sm:$0xff] }
  0x45   : > { %1819 = vst [vmem:[%s2301_s25 + $0x1f8] sm:$0xff] %v1427_v20  ;;  %v1041_v30 = vadd.f32 %v2278_v1, %v642_v23  ;;  %v644_v31 = vmul.f32 %v2268_v0, %v245_v19  ;;  %v1428_v35 = vmax.f32 %v1036_v24, 0.0  ;;  %v1429_v36 = vmax.f32 %v1037_v25, 0.0 }
  0x46   : > { %v1430_v37 = vmax.f32 %v1038_v26, 0.0  ;;  %v1042_v38 = vadd.f32 %v2278_v1, %v643_v27  ;;  %v1431_v42 = vmax.f32 %v1039_v28, 0.0  ;;  %v1432_v43 = vmax.f32 %v1040_v29, 0.0 }
  0x47   : > { %v1433_v44 = vmax.f32 %v1041_v30, 0.0  ;;  %v1043_v45 = vadd.f32 %v2278_v1, %v644_v31  ;;  %1820 = vst [vmem:[%s2301_s25 + $0x200] sm:$0xff] %v1428_v35  ;;  %1821 = vst [vmem:[%s2301_s25 + $0x208] sm:$0xff] %v1429_v36  ;;  %v645_v48 = vmul.f32 %v2268_v0, %v246_v32  ;;  %v646_v49 = vmul.f32 %v2268_v0, %v247_v33  ;;  %v263_v35 = vld [vmem:[%s2273_s20 + $0x2c8] sm:$0xff]  ;;  %v264_v36 = vld [vmem:[%s2273_s20 + $0x2d0] sm:$0xff] }
  0x48   : > { %1822 = vst [vmem:[%s2301_s25 + $0x210] sm:$0xff] %v1430_v37  ;;  %v1434_v47 = vmax.f32 %v1042_v38, 0.0  ;;  %v647_v50 = vmul.f32 %v2268_v0, %v248_v34  ;;  %1823 = vst [vmem:[%s2301_s25 + $0x218] sm:$0xff] %v1431_v42  ;;  %v648_v53 = vmul.f32 %v2268_v0, %v249_v39  ;;  %v649_v54 = vmul.f32 %v2268_v0, %v250_v40  ;;  %v262_v34 = vld [vmem:[%s2273_s20 + $0x2c0] sm:$0xff] }
  0x49   : > { %1824 = vst [vmem:[%s2301_s25 + $0x220] sm:$0xff] %v1432_v43  ;;  %1825 = vst [vmem:[%s2301_s25 + $0x228] sm:$0xff] %v1433_v44  ;;  %v1435_v52 = vmax.f32 %v1043_v45, 0.0  ;;  %v650_v55 = vmul.f32 %v2268_v0, %v251_v41  ;;  %v1044_v56 = vadd.f32 %v2278_v1, %v645_v48  ;;  %v1045_v57 = vadd.f32 %v2278_v1, %v646_v49  ;;  %v265_v41 = vld [vmem:[%s2273_s20 + $0x2d8] sm:$0xff]  ;;  %v266_v42 = vld [vmem:[%s2273_s20 + $0x2e0] sm:$0xff] }
  0x4a   : > { %1826 = vst [vmem:[%s2301_s25 + $0x230] sm:$0xff] %v1434_v47  ;;  %v1046_v58 = vadd.f32 %v2278_v1, %v647_v50  ;;  %v651_v59 = vmul.f32 %v2268_v0, %v252_v46  ;;  %v1047_v60 = vadd.f32 %v2278_v1, %v648_v53  ;;  %v1048_v61 = vadd.f32 %v2278_v1, %v649_v54  ;;  %v267_v43 = vld [vmem:[%s2273_s20 + $0x2e8] sm:$0xff]  ;;  %v268_v48 = vld [vmem:[%s2273_s20 + $0x2f0] sm:$0xff]  ;;  %v269_v53 = vld [vmem:[%s2273_s20 + $0x2f8] sm:$0xff] }
  0x4b   : > { %1827 = vst [vmem:[%s2301_s25 + $0x238] sm:$0xff] %v1435_v52  ;;  %v1049_v62 = vadd.f32 %v2278_v1, %v650_v55  ;;  %v652_v63 = vmul.f32 %v2268_v0, %v253_v51  ;;  %v1436_v5 = vmax.f32 %v1044_v56, 0.0  ;;  %v1437_v6 = vmax.f32 %v1045_v57, 0.0 }
  0x4c   : > { %v1438_v7 = vmax.f32 %v1046_v58, 0.0  ;;  %v1050_v8 = vadd.f32 %v2278_v1, %v651_v59  ;;  %v1439_v12 = vmax.f32 %v1047_v60, 0.0  ;;  %v1440_v13 = vmax.f32 %v1048_v61, 0.0 }
  0x4d   : > { %v1441_v14 = vmax.f32 %v1049_v62, 0.0  ;;  %v1051_v15 = vadd.f32 %v2278_v1, %v652_v63  ;;  %1828 = vst [vmem:[%s2301_s25 + $0x240] sm:$0xff] %v1436_v5  ;;  %1829 = vst [vmem:[%s2301_s25 + $0x248] sm:$0xff] %v1437_v6  ;;  %v653_v18 = vmul.f32 %v2268_v0, %v254_v2  ;;  %v654_v19 = vmul.f32 %v2268_v0, %v255_v3  ;;  %v271_v5 = vld [vmem:[%s2273_s20 + $0x308] sm:$0xff]  ;;  %v272_v6 = vld [vmem:[%s2273_s20 + $0x310] sm:$0xff] }
  0x4e   : > { %1830 = vst [vmem:[%s2301_s25 + $0x250] sm:$0xff] %v1438_v7  ;;  %v1442_v17 = vmax.f32 %v1050_v8, 0.0  ;;  %v655_v20 = vmul.f32 %v2268_v0, %v256_v4  ;;  %1831 = vst [vmem:[%s2301_s25 + $0x258] sm:$0xff] %v1439_v12  ;;  %v656_v23 = vmul.f32 %v2268_v0, %v257_v9  ;;  %v657_v24 = vmul.f32 %v2268_v0, %v258_v10  ;;  %v270_v4 = vld [vmem:[%s2273_s20 + $0x300] sm:$0xff] }
  0x4f   : > { %1832 = vst [vmem:[%s2301_s25 + $0x260] sm:$0xff] %v1440_v13  ;;  %1833 = vst [vmem:[%s2301_s25 + $0x268] sm:$0xff] %v1441_v14  ;;  %v1443_v22 = vmax.f32 %v1051_v15, 0.0  ;;  %v658_v25 = vmul.f32 %v2268_v0, %v259_v11  ;;  %v1052_v26 = vadd.f32 %v2278_v1, %v653_v18  ;;  %v1053_v27 = vadd.f32 %v2278_v1, %v654_v19  ;;  %v273_v11 = vld [vmem:[%s2273_s20 + $0x318] sm:$0xff]  ;;  %v274_v12 = vld [vmem:[%s2273_s20 + $0x320] sm:$0xff] }
  0x50   : > { %1834 = vst [vmem:[%s2301_s25 + $0x270] sm:$0xff] %v1442_v17  ;;  %v1054_v28 = vadd.f32 %v2278_v1, %v655_v20  ;;  %v659_v29 = vmul.f32 %v2268_v0, %v260_v16  ;;  %v1055_v30 = vadd.f32 %v2278_v1, %v656_v23  ;;  %v1056_v31 = vadd.f32 %v2278_v1, %v657_v24  ;;  %v275_v13 = vld [vmem:[%s2273_s20 + $0x328] sm:$0xff]  ;;  %v276_v18 = vld [vmem:[%s2273_s20 + $0x330] sm:$0xff]  ;;  %v277_v23 = vld [vmem:[%s2273_s20 + $0x338] sm:$0xff] }
  0x51   : > { %1835 = vst [vmem:[%s2301_s25 + $0x278] sm:$0xff] %v1443_v22  ;;  %v1057_v32 = vadd.f32 %v2278_v1, %v658_v25  ;;  %v660_v33 = vmul.f32 %v2268_v0, %v261_v21  ;;  %v1444_v37 = vmax.f32 %v1052_v26, 0.0  ;;  %v1445_v38 = vmax.f32 %v1053_v27, 0.0 }
  0x52   : > { %v1446_v39 = vmax.f32 %v1054_v28, 0.0  ;;  %v1058_v40 = vadd.f32 %v2278_v1, %v659_v29  ;;  %v1447_v44 = vmax.f32 %v1055_v30, 0.0  ;;  %v1448_v45 = vmax.f32 %v1056_v31, 0.0 }
  0x53   : > { %v1449_v46 = vmax.f32 %v1057_v32, 0.0  ;;  %v1059_v47 = vadd.f32 %v2278_v1, %v660_v33  ;;  %1836 = vst [vmem:[%s2301_s25 + $0x280] sm:$0xff] %v1444_v37  ;;  %1837 = vst [vmem:[%s2301_s25 + $0x288] sm:$0xff] %v1445_v38  ;;  %v661_v50 = vmul.f32 %v2268_v0, %v262_v34  ;;  %v662_v51 = vmul.f32 %v2268_v0, %v263_v35  ;;  %v279_v37 = vld [vmem:[%s2273_s20 + $0x348] sm:$0xff]  ;;  %v280_v38 = vld [vmem:[%s2273_s20 + $0x350] sm:$0xff] }
  0x54   : > { %1838 = vst [vmem:[%s2301_s25 + $0x290] sm:$0xff] %v1446_v39  ;;  %v1450_v49 = vmax.f32 %v1058_v40, 0.0  ;;  %v663_v52 = vmul.f32 %v2268_v0, %v264_v36  ;;  %1839 = vst [vmem:[%s2301_s25 + $0x298] sm:$0xff] %v1447_v44  ;;  %v664_v55 = vmul.f32 %v2268_v0, %v265_v41  ;;  %v665_v56 = vmul.f32 %v2268_v0, %v266_v42  ;;  %v278_v36 = vld [vmem:[%s2273_s20 + $0x340] sm:$0xff] }
  0x55   : > { %1840 = vst [vmem:[%s2301_s25 + $0x2a0] sm:$0xff] %v1448_v45  ;;  %1841 = vst [vmem:[%s2301_s25 + $0x2a8] sm:$0xff] %v1449_v46  ;;  %v1451_v54 = vmax.f32 %v1059_v47, 0.0  ;;  %v666_v57 = vmul.f32 %v2268_v0, %v267_v43  ;;  %v1060_v58 = vadd.f32 %v2278_v1, %v661_v50  ;;  %v1061_v59 = vadd.f32 %v2278_v1, %v662_v51  ;;  %v281_v43 = vld [vmem:[%s2273_s20 + $0x358] sm:$0xff]  ;;  %v282_v44 = vld [vmem:[%s2273_s20 + $0x360] sm:$0xff] }
  0x56   : > { %1842 = vst [vmem:[%s2301_s25 + $0x2b0] sm:$0xff] %v1450_v49  ;;  %v1062_v60 = vadd.f32 %v2278_v1, %v663_v52  ;;  %v667_v61 = vmul.f32 %v2268_v0, %v268_v48  ;;  %v1063_v62 = vadd.f32 %v2278_v1, %v664_v55  ;;  %v1064_v63 = vadd.f32 %v2278_v1, %v665_v56  ;;  %v283_v45 = vld [vmem:[%s2273_s20 + $0x368] sm:$0xff]  ;;  %v2701_v48 = vld [vmem:[%s3888_s2] ss:$0 sm:$0xff]  ;;  %v284_v50 = vld [vmem:[%s2273_s20 + $0x370] sm:$0xff] }
  0x57   : > { %1843 = vst [vmem:[%s2301_s25 + $0x2b8] sm:$0xff] %v1451_v54  ;;  %v1065_v2 = vadd.f32 %v2278_v1, %v666_v57  ;;  %v668_v3 = vmul.f32 %v2268_v0, %v269_v53  ;;  %v1452_v7 = vmax.f32 %v1060_v58, 0.0  ;;  %v1453_v8 = vmax.f32 %v1061_v59, 0.0  ;;  %v2711_v51 = vld [vmem:[%s3887_s1] ss:$0 sm:$0xff]  ;;  %v285_v55 = vld [vmem:[%s2273_s20 + $0x378] sm:$0xff] }
  0x58   : > { %v1454_v9 = vmax.f32 %v1062_v60, 0.0  ;;  %v1066_v10 = vadd.f32 %v2278_v1, %v667_v61  ;;  %v1455_v14 = vmax.f32 %v1063_v62, 0.0  ;;  %v1456_v15 = vmax.f32 %v1064_v63, 0.0 }
  0x59   : > { %v1457_v16 = vmax.f32 %v1065_v2, 0.0  ;;  %v1067_v17 = vadd.f32 %v2278_v1, %v668_v3  ;;  %1844 = vst [vmem:[%s2301_s25 + $0x2c0] sm:$0xff] %v1452_v7  ;;  %1845 = vst [vmem:[%s2301_s25 + $0x2c8] sm:$0xff] %v1453_v8  ;;  %v669_v20 = vmul.f32 %v2268_v0, %v270_v4  ;;  %v670_v21 = vmul.f32 %v2268_v0, %v271_v5  ;;  %v287_v7 = vld [vmem:[%s2273_s20 + $0x388] sm:$0xff]  ;;  %v288_v8 = vld [vmem:[%s2273_s20 + $0x390] sm:$0xff] }
  0x5a   : > { %1846 = vst [vmem:[%s2301_s25 + $0x2d0] sm:$0xff] %v1454_v9  ;;  %v1458_v19 = vmax.f32 %v1066_v10, 0.0  ;;  %v671_v22 = vmul.f32 %v2268_v0, %v272_v6  ;;  %1847 = vst [vmem:[%s2301_s25 + $0x2d8] sm:$0xff] %v1455_v14  ;;  %v672_v25 = vmul.f32 %v2268_v0, %v273_v11  ;;  %v673_v26 = vmul.f32 %v2268_v0, %v274_v12  ;;  %v286_v6 = vld [vmem:[%s2273_s20 + $0x380] sm:$0xff] }
  0x5b   : > { %1848 = vst [vmem:[%s2301_s25 + $0x2e0] sm:$0xff] %v1456_v15  ;;  %1849 = vst [vmem:[%s2301_s25 + $0x2e8] sm:$0xff] %v1457_v16  ;;  %v1459_v24 = vmax.f32 %v1067_v17, 0.0  ;;  %v674_v27 = vmul.f32 %v2268_v0, %v275_v13  ;;  %v1068_v28 = vadd.f32 %v2278_v1, %v669_v20  ;;  %v1069_v29 = vadd.f32 %v2278_v1, %v670_v21  ;;  %v289_v13 = vld [vmem:[%s2273_s20 + $0x398] sm:$0xff]  ;;  %v290_v14 = vld [vmem:[%s2273_s20 + $0x3a0] sm:$0xff] }
  0x5c   : > { %1850 = vst [vmem:[%s2301_s25 + $0x2f0] sm:$0xff] %v1458_v19  ;;  %v1070_v30 = vadd.f32 %v2278_v1, %v671_v22  ;;  %v675_v31 = vmul.f32 %v2268_v0, %v276_v18  ;;  %v1071_v32 = vadd.f32 %v2278_v1, %v672_v25  ;;  %v1072_v33 = vadd.f32 %v2278_v1, %v673_v26  ;;  %v291_v15 = vld [vmem:[%s2273_s20 + $0x3a8] sm:$0xff]  ;;  %v292_v20 = vld [vmem:[%s2273_s20 + $0x3b0] sm:$0xff]  ;;  %v293_v25 = vld [vmem:[%s2273_s20 + $0x3b8] sm:$0xff] }
  0x5d   : > { %1851 = vst [vmem:[%s2301_s25 + $0x2f8] sm:$0xff] %v1459_v24  ;;  %v1073_v34 = vadd.f32 %v2278_v1, %v674_v27  ;;  %v676_v35 = vmul.f32 %v2268_v0, %v277_v23  ;;  %v1460_v39 = vmax.f32 %v1068_v28, 0.0  ;;  %v1461_v40 = vmax.f32 %v1069_v29, 0.0 }
  0x5e   : > { %v1462_v41 = vmax.f32 %v1070_v30, 0.0  ;;  %v1074_v42 = vadd.f32 %v2278_v1, %v675_v31  ;;  %v1463_v46 = vmax.f32 %v1071_v32, 0.0  ;;  %v1464_v0 = vmax.f32 %v1072_v33, 0.0 }
  0x5f   : > { %v1465_v47 = vmax.f32 %v1073_v34, 0.0  ;;  %v1075_v49 = vadd.f32 %v2701_v48, %v676_v35  ;;  %1852 = vst [vmem:[%s2301_s25 + $0x300] sm:$0xff] %v1460_v39  ;;  %1853 = vst [vmem:[%s2301_s25 + $0x308] sm:$0xff] %v1461_v40  ;;  %v677_v52 = vmul.f32 %v2711_v51, %v278_v36  ;;  %v678_v53 = vmul.f32 %v2711_v51, %v279_v37  ;;  %v295_v39 = vld [vmem:[%s2273_s20 + $0x3c8] sm:$0xff]  ;;  %v296_v40 = vld [vmem:[%s2273_s20 + $0x3d0] sm:$0xff] }
  0x60   : > { %1854 = vst [vmem:[%s2301_s25 + $0x310] sm:$0xff] %v1462_v41  ;;  %v1466_v1 = vmax.f32 %v1074_v42, 0.0  ;;  %v679_v54 = vmul.f32 %v2711_v51, %v280_v38  ;;  %1855 = vst [vmem:[%s2301_s25 + $0x318] sm:$0xff] %v1463_v46  ;;  %v680_v57 = vmul.f32 %v2711_v51, %v281_v43  ;;  %v681_v58 = vmul.f32 %v2711_v51, %v282_v44  ;;  %v294_v38 = vld [vmem:[%s2273_s20 + $0x3c0] sm:$0xff] }
  0x61   : > { %1856 = vst [vmem:[%s2301_s25 + $0x320] sm:$0xff] %v1464_v0  ;;  %1857 = vst [vmem:[%s2301_s25 + $0x328] sm:$0xff] %v1465_v47  ;;  %v1467_v56 = vmax.f32 %v1075_v49, 0.0  ;;  %v682_v59 = vmul.f32 %v2711_v51, %v283_v45  ;;  %v1076_v60 = vadd.f32 %v2701_v48, %v677_v52  ;;  %v1077_v61 = vadd.f32 %v2701_v48, %v678_v53  ;;  %v297_v45 = vld [vmem:[%s2273_s20 + $0x3d8] sm:$0xff]  ;;  %v298_v46 = vld [vmem:[%s2273_s20 + $0x3e0] sm:$0xff] }
  0x62   : > { %1858 = vst [vmem:[%s2301_s25 + $0x330] sm:$0xff] %v1466_v1  ;;  %v1078_v62 = vadd.f32 %v2701_v48, %v679_v54  ;;  %v683_v63 = vmul.f32 %v2711_v51, %v284_v50  ;;  %v1079_v2 = vadd.f32 %v2701_v48, %v680_v57  ;;  %v1080_v3 = vadd.f32 %v2701_v48, %v681_v58  ;;  %v299_v0 = vld [vmem:[%s2273_s20 + $0x3e8] sm:$0xff]  ;;  %v300_v52 = vld [vmem:[%s2273_s20 + $0x3f0] sm:$0xff]  ;;  %v301_v57 = vld [vmem:[%s2273_s20 + $0x3f8] sm:$0xff] }
  0x63   : > { %1859 = vst [vmem:[%s2301_s25 + $0x338] sm:$0xff] %v1467_v56  ;;  %v1081_v4 = vadd.f32 %v2701_v48, %v682_v59  ;;  %v684_v5 = vmul.f32 %v2711_v51, %v285_v55  ;;  %v1468_v9 = vmax.f32 %v1076_v60, 0.0  ;;  %v1469_v10 = vmax.f32 %v1077_v61, 0.0 }
  0x64   : > { %v1470_v11 = vmax.f32 %v1078_v62, 0.0  ;;  %v1082_v12 = vadd.f32 %v2701_v48, %v683_v63  ;;  %v1471_v16 = vmax.f32 %v1079_v2, 0.0  ;;  %v1472_v17 = vmax.f32 %v1080_v3, 0.0 }
  0x65   : > { %v1473_v18 = vmax.f32 %v1081_v4, 0.0  ;;  %v1083_v19 = vadd.f32 %v2701_v48, %v684_v5  ;;  %1860 = vst [vmem:[%s2301_s25 + $0x340] sm:$0xff] %v1468_v9  ;;  %1861 = vst [vmem:[%s2301_s25 + $0x348] sm:$0xff] %v1469_v10  ;;  %v685_v22 = vmul.f32 %v2711_v51, %v286_v6  ;;  %v686_v23 = vmul.f32 %v2711_v51, %v287_v7  ;;  %v303_v9 = vld [vmem:[%s2273_s20 + $0x408] sm:$0xff]  ;;  %v304_v10 = vld [vmem:[%s2273_s20 + $0x410] sm:$0xff] }
  0x66   : > { %1862 = vst [vmem:[%s2301_s25 + $0x350] sm:$0xff] %v1470_v11  ;;  %v1474_v21 = vmax.f32 %v1082_v12, 0.0  ;;  %v687_v24 = vmul.f32 %v2711_v51, %v288_v8  ;;  %1863 = vst [vmem:[%s2301_s25 + $0x358] sm:$0xff] %v1471_v16  ;;  %v688_v27 = vmul.f32 %v2711_v51, %v289_v13  ;;  %v689_v28 = vmul.f32 %v2711_v51, %v290_v14  ;;  %v302_v8 = vld [vmem:[%s2273_s20 + $0x400] sm:$0xff] }
  0x67   : > { %1864 = vst [vmem:[%s2301_s25 + $0x360] sm:$0xff] %v1472_v17  ;;  %1865 = vst [vmem:[%s2301_s25 + $0x368] sm:$0xff] %v1473_v18  ;;  %v1475_v26 = vmax.f32 %v1083_v19, 0.0  ;;  %v690_v29 = vmul.f32 %v2711_v51, %v291_v15  ;;  %v1084_v30 = vadd.f32 %v2701_v48, %v685_v22  ;;  %v1085_v31 = vadd.f32 %v2701_v48, %v686_v23  ;;  %v305_v15 = vld [vmem:[%s2273_s20 + $0x418] sm:$0xff]  ;;  %v306_v16 = vld [vmem:[%s2273_s20 + $0x420] sm:$0xff] }
  0x68   : > { %1866 = vst [vmem:[%s2301_s25 + $0x370] sm:$0xff] %v1474_v21  ;;  %v1086_v32 = vadd.f32 %v2701_v48, %v687_v24  ;;  %v691_v33 = vmul.f32 %v2711_v51, %v292_v20  ;;  %v1087_v34 = vadd.f32 %v2701_v48, %v688_v27  ;;  %v1088_v35 = vadd.f32 %v2701_v48, %v689_v28  ;;  %v307_v17 = vld [vmem:[%s2273_s20 + $0x428] sm:$0xff]  ;;  %v308_v22 = vld [vmem:[%s2273_s20 + $0x430] sm:$0xff]  ;;  %v309_v27 = vld [vmem:[%s2273_s20 + $0x438] sm:$0xff] }
  0x69   : > { %1867 = vst [vmem:[%s2301_s25 + $0x378] sm:$0xff] %v1475_v26  ;;  %v1089_v36 = vadd.f32 %v2701_v48, %v690_v29  ;;  %v692_v37 = vmul.f32 %v2711_v51, %v293_v25  ;;  %v1476_v41 = vmax.f32 %v1084_v30, 0.0  ;;  %v1477_v42 = vmax.f32 %v1085_v31, 0.0 }
  0x6a   : > { %v1478_v43 = vmax.f32 %v1086_v32, 0.0  ;;  %v1090_v44 = vadd.f32 %v2701_v48, %v691_v33  ;;  %v1479_v47 = vmax.f32 %v1087_v34, 0.0  ;;  %v1480_v49 = vmax.f32 %v1088_v35, 0.0 }
  0x6b   : > { %v1481_v50 = vmax.f32 %v1089_v36, 0.0  ;;  %v1091_v1 = vadd.f32 %v2701_v48, %v692_v37  ;;  %1868 = vst [vmem:[%s2301_s25 + $0x380] sm:$0xff] %v1476_v41  ;;  %1869 = vst [vmem:[%s2301_s25 + $0x388] sm:$0xff] %v1477_v42  ;;  %v693_v54 = vmul.f32 %v2711_v51, %v294_v38  ;;  %v694_v55 = vmul.f32 %v2711_v51, %v295_v39  ;;  %v311_v41 = vld [vmem:[%s2273_s20 + $0x448] sm:$0xff]  ;;  %v312_v42 = vld [vmem:[%s2273_s20 + $0x450] sm:$0xff] }
  0x6c   : > { %1870 = vst [vmem:[%s2301_s25 + $0x390] sm:$0xff] %v1478_v43  ;;  %v1482_v53 = vmax.f32 %v1090_v44, 0.0  ;;  %v695_v56 = vmul.f32 %v2711_v51, %v296_v40  ;;  %1871 = vst [vmem:[%s2301_s25 + $0x398] sm:$0xff] %v1479_v47  ;;  %v696_v59 = vmul.f32 %v2711_v51, %v297_v45  ;;  %v697_v60 = vmul.f32 %v2711_v51, %v298_v46  ;;  %v310_v40 = vld [vmem:[%s2273_s20 + $0x440] sm:$0xff] }
  0x6d   : > { %1872 = vst [vmem:[%s2301_s25 + $0x3a0] sm:$0xff] %v1480_v49  ;;  %1873 = vst [vmem:[%s2301_s25 + $0x3a8] sm:$0xff] %v1481_v50  ;;  %v1483_v58 = vmax.f32 %v1091_v1, 0.0  ;;  %v698_v61 = vmul.f32 %v2711_v51, %v299_v0  ;;  %v1092_v62 = vadd.f32 %v2701_v48, %v693_v54  ;;  %v1093_v63 = vadd.f32 %v2701_v48, %v694_v55  ;;  %v313_v0 = vld [vmem:[%s2273_s20 + $0x458] sm:$0xff]  ;;  %v314_v47 = vld [vmem:[%s2273_s20 + $0x460] sm:$0xff] }
  0x6e   : > { %1874 = vst [vmem:[%s2301_s25 + $0x3b0] sm:$0xff] %v1482_v53  ;;  %v1094_v2 = vadd.f32 %v2701_v48, %v695_v56  ;;  %v699_v3 = vmul.f32 %v2711_v51, %v300_v52  ;;  %v1095_v4 = vadd.f32 %v2701_v48, %v696_v59  ;;  %v1096_v5 = vadd.f32 %v2701_v48, %v697_v60  ;;  %v315_v49 = vld [vmem:[%s2273_s20 + $0x468] sm:$0xff]  ;;  %v316_v54 = vld [vmem:[%s2273_s20 + $0x470] sm:$0xff]  ;;  %v317_v59 = vld [vmem:[%s2273_s20 + $0x478] sm:$0xff] }
  0x6f   : > { %1875 = vst [vmem:[%s2301_s25 + $0x3b8] sm:$0xff] %v1483_v58  ;;  %v1097_v6 = vadd.f32 %v2701_v48, %v698_v61  ;;  %v700_v7 = vmul.f32 %v2711_v51, %v301_v57  ;;  %v1484_v11 = vmax.f32 %v1092_v62, 0.0  ;;  %v1485_v12 = vmax.f32 %v1093_v63, 0.0 }
  0x70   : > { %v1486_v13 = vmax.f32 %v1094_v2, 0.0  ;;  %v1098_v14 = vadd.f32 %v2701_v48, %v699_v3  ;;  %v1487_v18 = vmax.f32 %v1095_v4, 0.0  ;;  %v1488_v19 = vmax.f32 %v1096_v5, 0.0 }
  0x71   : > { %v1489_v20 = vmax.f32 %v1097_v6, 0.0  ;;  %v1099_v21 = vadd.f32 %v2701_v48, %v700_v7  ;;  %1876 = vst [vmem:[%s2301_s25 + $0x3c0] sm:$0xff] %v1484_v11  ;;  %1877 = vst [vmem:[%s2301_s25 + $0x3c8] sm:$0xff] %v1485_v12  ;;  %v701_v24 = vmul.f32 %v2711_v51, %v302_v8  ;;  %v702_v25 = vmul.f32 %v2711_v51, %v303_v9  ;;  %v319_v11 = vld [vmem:[%s2273_s20 + $0x488] sm:$0xff]  ;;  %v320_v12 = vld [vmem:[%s2273_s20 + $0x490] sm:$0xff] }
  0x72   : > { %1878 = vst [vmem:[%s2301_s25 + $0x3d0] sm:$0xff] %v1486_v13  ;;  %v1490_v23 = vmax.f32 %v1098_v14, 0.0  ;;  %v703_v26 = vmul.f32 %v2711_v51, %v304_v10  ;;  %1879 = vst [vmem:[%s2301_s25 + $0x3d8] sm:$0xff] %v1487_v18  ;;  %v704_v29 = vmul.f32 %v2711_v51, %v305_v15  ;;  %v705_v30 = vmul.f32 %v2711_v51, %v306_v16  ;;  %v318_v10 = vld [vmem:[%s2273_s20 + $0x480] sm:$0xff] }
  0x73   : > { %1880 = vst [vmem:[%s2301_s25 + $0x3e0] sm:$0xff] %v1488_v19  ;;  %1881 = vst [vmem:[%s2301_s25 + $0x3e8] sm:$0xff] %v1489_v20  ;;  %v1491_v28 = vmax.f32 %v1099_v21, 0.0  ;;  %v706_v31 = vmul.f32 %v2711_v51, %v307_v17  ;;  %v1100_v32 = vadd.f32 %v2701_v48, %v701_v24  ;;  %v1101_v33 = vadd.f32 %v2701_v48, %v702_v25  ;;  %v321_v17 = vld [vmem:[%s2273_s20 + $0x498] sm:$0xff]  ;;  %v322_v18 = vld [vmem:[%s2273_s20 + $0x4a0] sm:$0xff] }
  0x74   : > { %1882 = vst [vmem:[%s2301_s25 + $0x3f0] sm:$0xff] %v1490_v23  ;;  %v1102_v34 = vadd.f32 %v2701_v48, %v703_v26  ;;  %v707_v35 = vmul.f32 %v2711_v51, %v308_v22  ;;  %v1103_v36 = vadd.f32 %v2701_v48, %v704_v29  ;;  %v1104_v37 = vadd.f32 %v2701_v48, %v705_v30  ;;  %v323_v19 = vld [vmem:[%s2273_s20 + $0x4a8] sm:$0xff]  ;;  %v324_v24 = vld [vmem:[%s2273_s20 + $0x4b0] sm:$0xff]  ;;  %v325_v29 = vld [vmem:[%s2273_s20 + $0x4b8] sm:$0xff] }
  0x75   : > { %1883 = vst [vmem:[%s2301_s25 + $0x3f8] sm:$0xff] %v1491_v28  ;;  %v1105_v38 = vadd.f32 %v2701_v48, %v706_v31  ;;  %v708_v39 = vmul.f32 %v2711_v51, %v309_v27  ;;  %v1492_v43 = vmax.f32 %v1100_v32, 0.0  ;;  %v1493_v44 = vmax.f32 %v1101_v33, 0.0 }
  0x76   : > { %v1494_v45 = vmax.f32 %v1102_v34, 0.0  ;;  %v1106_v46 = vadd.f32 %v2701_v48, %v707_v35  ;;  %v1495_v50 = vmax.f32 %v1103_v36, 0.0  ;;  %v1496_v1 = vmax.f32 %v1104_v37, 0.0 }
  0x77   : > { %v1497_v52 = vmax.f32 %v1105_v38, 0.0  ;;  %v1107_v53 = vadd.f32 %v2701_v48, %v708_v39  ;;  %1884 = vst [vmem:[%s2301_s25 + $0x400] sm:$0xff] %v1492_v43  ;;  %1885 = vst [vmem:[%s2301_s25 + $0x408] sm:$0xff] %v1493_v44  ;;  %v709_v56 = vmul.f32 %v2711_v51, %v310_v40  ;;  %v710_v57 = vmul.f32 %v2711_v51, %v311_v41  ;;  %v327_v43 = vld [vmem:[%s2273_s20 + $0x4c8] sm:$0xff]  ;;  %v328_v44 = vld [vmem:[%s2273_s20 + $0x4d0] sm:$0xff] }
  0x78   : > { %1886 = vst [vmem:[%s2301_s25 + $0x410] sm:$0xff] %v1494_v45  ;;  %v1498_v55 = vmax.f32 %v1106_v46, 0.0  ;;  %v711_v58 = vmul.f32 %v2711_v51, %v312_v42  ;;  %1887 = vst [vmem:[%s2301_s25 + $0x418] sm:$0xff] %v1495_v50  ;;  %v712_v61 = vmul.f32 %v2711_v51, %v313_v0  ;;  %v713_v62 = vmul.f32 %v2711_v51, %v314_v47  ;;  %v326_v42 = vld [vmem:[%s2273_s20 + $0x4c0] sm:$0xff] }
  0x79   : > { %1888 = vst [vmem:[%s2301_s25 + $0x420] sm:$0xff] %v1496_v1  ;;  %1889 = vst [vmem:[%s2301_s25 + $0x428] sm:$0xff] %v1497_v52  ;;  %v1499_v60 = vmax.f32 %v1107_v53, 0.0  ;;  %v714_v63 = vmul.f32 %v2711_v51, %v315_v49  ;;  %v1108_v2 = vadd.f32 %v2701_v48, %v709_v56  ;;  %v1109_v3 = vadd.f32 %v2701_v48, %v710_v57  ;;  %v329_v49 = vld [vmem:[%s2273_s20 + $0x4d8] sm:$0xff]  ;;  %v330_v50 = vld [vmem:[%s2273_s20 + $0x4e0] sm:$0xff] }
  0x7a   : > { %1890 = vst [vmem:[%s2301_s25 + $0x430] sm:$0xff] %v1498_v55  ;;  %v1110_v4 = vadd.f32 %v2701_v48, %v711_v58  ;;  %v715_v5 = vmul.f32 %v2711_v51, %v316_v54  ;;  %v1111_v6 = vadd.f32 %v2701_v48, %v712_v61  ;;  %v1112_v7 = vadd.f32 %v2701_v48, %v713_v62  ;;  %v331_v1 = vld [vmem:[%s2273_s20 + $0x4e8] sm:$0xff]  ;;  %v332_v56 = vld [vmem:[%s2273_s20 + $0x4f0] sm:$0xff]  ;;  %v333_v61 = vld [vmem:[%s2273_s20 + $0x4f8] sm:$0xff] }
  0x7b   : > { %1891 = vst [vmem:[%s2301_s25 + $0x438] sm:$0xff] %v1499_v60  ;;  %v1113_v8 = vadd.f32 %v2701_v48, %v714_v63  ;;  %v716_v9 = vmul.f32 %v2711_v51, %v317_v59  ;;  %v1500_v13 = vmax.f32 %v1108_v2, 0.0  ;;  %v1501_v14 = vmax.f32 %v1109_v3, 0.0 }
  0x7c   : > { %v1502_v15 = vmax.f32 %v1110_v4, 0.0  ;;  %v1114_v16 = vadd.f32 %v2701_v48, %v715_v5  ;;  %v1503_v20 = vmax.f32 %v1111_v6, 0.0  ;;  %v1504_v21 = vmax.f32 %v1112_v7, 0.0 }
  0x7d   : > { %v1505_v22 = vmax.f32 %v1113_v8, 0.0  ;;  %v1115_v23 = vadd.f32 %v2701_v48, %v716_v9  ;;  %1892 = vst [vmem:[%s2301_s25 + $0x440] sm:$0xff] %v1500_v13  ;;  %1893 = vst [vmem:[%s2301_s25 + $0x448] sm:$0xff] %v1501_v14  ;;  %v717_v26 = vmul.f32 %v2711_v51, %v318_v10  ;;  %v718_v27 = vmul.f32 %v2711_v51, %v319_v11  ;;  %v335_v13 = vld [vmem:[%s2273_s20 + $0x508] sm:$0xff]  ;;  %v336_v14 = vld [vmem:[%s2273_s20 + $0x510] sm:$0xff] }
  0x7e   : > { %1894 = vst [vmem:[%s2301_s25 + $0x450] sm:$0xff] %v1502_v15  ;;  %v1506_v25 = vmax.f32 %v1114_v16, 0.0  ;;  %v719_v28 = vmul.f32 %v2711_v51, %v320_v12  ;;  %1895 = vst [vmem:[%s2301_s25 + $0x458] sm:$0xff] %v1503_v20  ;;  %v720_v31 = vmul.f32 %v2711_v51, %v321_v17  ;;  %v721_v32 = vmul.f32 %v2711_v51, %v322_v18  ;;  %v334_v12 = vld [vmem:[%s2273_s20 + $0x500] sm:$0xff] }
  0x7f   : > { %1896 = vst [vmem:[%s2301_s25 + $0x460] sm:$0xff] %v1504_v21  ;;  %1897 = vst [vmem:[%s2301_s25 + $0x468] sm:$0xff] %v1505_v22  ;;  %v1507_v30 = vmax.f32 %v1115_v23, 0.0  ;;  %v722_v33 = vmul.f32 %v2711_v51, %v323_v19  ;;  %v1116_v34 = vadd.f32 %v2701_v48, %v717_v26  ;;  %v1117_v35 = vadd.f32 %v2701_v48, %v718_v27  ;;  %v337_v19 = vld [vmem:[%s2273_s20 + $0x518] sm:$0xff]  ;;  %v338_v20 = vld [vmem:[%s2273_s20 + $0x520] sm:$0xff] }
  0x80   : > { %1898 = vst [vmem:[%s2301_s25 + $0x470] sm:$0xff] %v1506_v25  ;;  %v1118_v36 = vadd.f32 %v2701_v48, %v719_v28  ;;  %v723_v37 = vmul.f32 %v2711_v51, %v324_v24  ;;  %v1119_v38 = vadd.f32 %v2701_v48, %v720_v31  ;;  %v1120_v39 = vadd.f32 %v2701_v48, %v721_v32  ;;  %v339_v21 = vld [vmem:[%s2273_s20 + $0x528] sm:$0xff]  ;;  %v340_v26 = vld [vmem:[%s2273_s20 + $0x530] sm:$0xff]  ;;  %v341_v31 = vld [vmem:[%s2273_s20 + $0x538] sm:$0xff] }
  0x81   : > { %1899 = vst [vmem:[%s2301_s25 + $0x478] sm:$0xff] %v1507_v30  ;;  %v1121_v40 = vadd.f32 %v2701_v48, %v722_v33  ;;  %v724_v41 = vmul.f32 %v2711_v51, %v325_v29  ;;  %v1508_v45 = vmax.f32 %v1116_v34, 0.0  ;;  %v1509_v46 = vmax.f32 %v1117_v35, 0.0 }
  0x82   : > { %v1510_v0 = vmax.f32 %v1118_v36, 0.0  ;;  %v1122_v47 = vadd.f32 %v2701_v48, %v723_v37  ;;  %v1511_v52 = vmax.f32 %v1119_v38, 0.0  ;;  %v1512_v53 = vmax.f32 %v1120_v39, 0.0 }
  0x83   : > { %v1513_v54 = vmax.f32 %v1121_v40, 0.0  ;;  %v1123_v55 = vadd.f32 %v2701_v48, %v724_v41  ;;  %1900 = vst [vmem:[%s2301_s25 + $0x480] sm:$0xff] %v1508_v45  ;;  %1901 = vst [vmem:[%s2301_s25 + $0x488] sm:$0xff] %v1509_v46  ;;  %v725_v58 = vmul.f32 %v2711_v51, %v326_v42  ;;  %v726_v59 = vmul.f32 %v2711_v51, %v327_v43  ;;  %v343_v45 = vld [vmem:[%s2273_s20 + $0x548] sm:$0xff]  ;;  %v344_v46 = vld [vmem:[%s2273_s20 + $0x550] sm:$0xff] }
  0x84   : > { %1902 = vst [vmem:[%s2301_s25 + $0x490] sm:$0xff] %v1510_v0  ;;  %v1514_v57 = vmax.f32 %v1122_v47, 0.0  ;;  %v727_v60 = vmul.f32 %v2711_v51, %v328_v44  ;;  %1903 = vst [vmem:[%s2301_s25 + $0x498] sm:$0xff] %v1511_v52  ;;  %v728_v63 = vmul.f32 %v2711_v51, %v329_v49  ;;  %v729_v2 = vmul.f32 %v2711_v51, %v330_v50  ;;  %v342_v44 = vld [vmem:[%s2273_s20 + $0x540] sm:$0xff] }
  0x85   : > { %1904 = vst [vmem:[%s2301_s25 + $0x4a0] sm:$0xff] %v1512_v53  ;;  %1905 = vst [vmem:[%s2301_s25 + $0x4a8] sm:$0xff] %v1513_v54  ;;  %v1515_v62 = vmax.f32 %v1123_v55, 0.0  ;;  %v730_v3 = vmul.f32 %v2711_v51, %v331_v1  ;;  %v1124_v4 = vadd.f32 %v2701_v48, %v725_v58  ;;  %v1125_v5 = vadd.f32 %v2701_v48, %v726_v59  ;;  %v345_v1 = vld [vmem:[%s2273_s20 + $0x558] sm:$0xff]  ;;  %v346_v52 = vld [vmem:[%s2273_s20 + $0x560] sm:$0xff] }
  0x86   : > { %1906 = vst [vmem:[%s2301_s25 + $0x4b0] sm:$0xff] %v1514_v57  ;;  %v1126_v6 = vadd.f32 %v2701_v48, %v727_v60  ;;  %v731_v7 = vmul.f32 %v2711_v51, %v332_v56  ;;  %v1127_v8 = vadd.f32 %v2701_v48, %v728_v63  ;;  %v1128_v9 = vadd.f32 %v2701_v48, %v729_v2  ;;  %v347_v53 = vld [vmem:[%s2273_s20 + $0x568] sm:$0xff]  ;;  %v348_v58 = vld [vmem:[%s2273_s20 + $0x570] sm:$0xff]  ;;  %v349_v63 = vld [vmem:[%s2273_s20 + $0x578] sm:$0xff] }
  0x87   : > { %1907 = vst [vmem:[%s2301_s25 + $0x4b8] sm:$0xff] %v1515_v62  ;;  %v1129_v10 = vadd.f32 %v2701_v48, %v730_v3  ;;  %v732_v11 = vmul.f32 %v2711_v51, %v333_v61  ;;  %v1516_v15 = vmax.f32 %v1124_v4, 0.0  ;;  %v1517_v16 = vmax.f32 %v1125_v5, 0.0 }
  0x88   : > { %v1518_v17 = vmax.f32 %v1126_v6, 0.0  ;;  %v1130_v18 = vadd.f32 %v2701_v48, %v731_v7  ;;  %v1519_v22 = vmax.f32 %v1127_v8, 0.0  ;;  %v1520_v23 = vmax.f32 %v1128_v9, 0.0 }
  0x89   : > { %v1521_v24 = vmax.f32 %v1129_v10, 0.0  ;;  %v1131_v25 = vadd.f32 %v2701_v48, %v732_v11  ;;  %1908 = vst [vmem:[%s2301_s25 + $0x4c0] sm:$0xff] %v1516_v15  ;;  %1909 = vst [vmem:[%s2301_s25 + $0x4c8] sm:$0xff] %v1517_v16  ;;  %v733_v28 = vmul.f32 %v2711_v51, %v334_v12  ;;  %v734_v29 = vmul.f32 %v2711_v51, %v335_v13  ;;  %v351_v15 = vld [vmem:[%s2273_s20 + $0x588] sm:$0xff]  ;;  %v352_v16 = vld [vmem:[%s2273_s20 + $0x590] sm:$0xff] }
  0x8a   : > { %1910 = vst [vmem:[%s2301_s25 + $0x4d0] sm:$0xff] %v1518_v17  ;;  %v1522_v27 = vmax.f32 %v1130_v18, 0.0  ;;  %v735_v30 = vmul.f32 %v2711_v51, %v336_v14  ;;  %1911 = vst [vmem:[%s2301_s25 + $0x4d8] sm:$0xff] %v1519_v22  ;;  %v736_v33 = vmul.f32 %v2711_v51, %v337_v19  ;;  %v737_v34 = vmul.f32 %v2711_v51, %v338_v20  ;;  %v350_v14 = vld [vmem:[%s2273_s20 + $0x580] sm:$0xff] }
  0x8b   : > { %1912 = vst [vmem:[%s2301_s25 + $0x4e0] sm:$0xff] %v1520_v23  ;;  %1913 = vst [vmem:[%s2301_s25 + $0x4e8] sm:$0xff] %v1521_v24  ;;  %v1523_v32 = vmax.f32 %v1131_v25, 0.0  ;;  %v738_v35 = vmul.f32 %v2711_v51, %v339_v21  ;;  %v1132_v36 = vadd.f32 %v2701_v48, %v733_v28  ;;  %v1133_v37 = vadd.f32 %v2701_v48, %v734_v29  ;;  %v353_v21 = vld [vmem:[%s2273_s20 + $0x598] sm:$0xff]  ;;  %v354_v22 = vld [vmem:[%s2273_s20 + $0x5a0] sm:$0xff] }
  0x8c   : > { %1914 = vst [vmem:[%s2301_s25 + $0x4f0] sm:$0xff] %v1522_v27  ;;  %v1134_v38 = vadd.f32 %v2701_v48, %v735_v30  ;;  %v739_v39 = vmul.f32 %v2711_v51, %v340_v26  ;;  %v1135_v40 = vadd.f32 %v2701_v48, %v736_v33  ;;  %v1136_v41 = vadd.f32 %v2701_v48, %v737_v34  ;;  %v355_v23 = vld [vmem:[%s2273_s20 + $0x5a8] sm:$0xff]  ;;  %v356_v28 = vld [vmem:[%s2273_s20 + $0x5b0] sm:$0xff]  ;;  %v357_v33 = vld [vmem:[%s2273_s20 + $0x5b8] sm:$0xff] }
  0x8d   : > { %1915 = vst [vmem:[%s2301_s25 + $0x4f8] sm:$0xff] %v1523_v32  ;;  %v1137_v42 = vadd.f32 %v2701_v48, %v738_v35  ;;  %v740_v43 = vmul.f32 %v2711_v51, %v341_v31  ;;  %v1524_v0 = vmax.f32 %v1132_v36, 0.0  ;;  %v1525_v47 = vmax.f32 %v1133_v37, 0.0 }
  0x8e   : > { %v1526_v49 = vmax.f32 %v1134_v38, 0.0  ;;  %v1138_v50 = vadd.f32 %v2701_v48, %v739_v39  ;;  %v1527_v54 = vmax.f32 %v1135_v40, 0.0  ;;  %v1528_v55 = vmax.f32 %v1136_v41, 0.0 }
  0x8f   : > { %v1529_v56 = vmax.f32 %v1137_v42, 0.0  ;;  %v1139_v57 = vadd.f32 %v2701_v48, %v740_v43  ;;  %1916 = vst [vmem:[%s2301_s25 + $0x500] sm:$0xff] %v1524_v0  ;;  %1917 = vst [vmem:[%s2301_s25 + $0x508] sm:$0xff] %v1525_v47  ;;  %v741_v60 = vmul.f32 %v2711_v51, %v342_v44  ;;  %v742_v61 = vmul.f32 %v2711_v51, %v343_v45  ;;  %v359_v0 = vld [vmem:[%s2273_s20 + $0x5c8] sm:$0xff]  ;;  %v360_v47 = vld [vmem:[%s2273_s20 + $0x5d0] sm:$0xff] }
  0x90   : > { %1918 = vst [vmem:[%s2301_s25 + $0x510] sm:$0xff] %v1526_v49  ;;  %v1530_v59 = vmax.f32 %v1138_v50, 0.0  ;;  %v743_v62 = vmul.f32 %v2711_v51, %v344_v46  ;;  %1919 = vst [vmem:[%s2301_s25 + $0x518] sm:$0xff] %v1527_v54  ;;  %v744_v3 = vmul.f32 %v2711_v51, %v345_v1  ;;  %v745_v4 = vmul.f32 %v2711_v51, %v346_v52  ;;  %v358_v46 = vld [vmem:[%s2273_s20 + $0x5c0] sm:$0xff] }
  0x91   : > { %1920 = vst [vmem:[%s2301_s25 + $0x520] sm:$0xff] %v1528_v55  ;;  %1921 = vst [vmem:[%s2301_s25 + $0x528] sm:$0xff] %v1529_v56  ;;  %v1531_v2 = vmax.f32 %v1139_v57, 0.0  ;;  %v746_v5 = vmul.f32 %v2711_v51, %v347_v53  ;;  %v1140_v6 = vadd.f32 %v2701_v48, %v741_v60  ;;  %v1141_v7 = vadd.f32 %v2701_v48, %v742_v61  ;;  %v361_v53 = vld [vmem:[%s2273_s20 + $0x5d8] sm:$0xff]  ;;  %v362_v54 = vld [vmem:[%s2273_s20 + $0x5e0] sm:$0xff] }
  0x92   : > { %1922 = vst [vmem:[%s2301_s25 + $0x530] sm:$0xff] %v1530_v59  ;;  %v1142_v8 = vadd.f32 %v2701_v48, %v743_v62  ;;  %v747_v9 = vmul.f32 %v2711_v51, %v348_v58  ;;  %v1143_v10 = vadd.f32 %v2701_v48, %v744_v3  ;;  %v1144_v11 = vadd.f32 %v2701_v48, %v745_v4  ;;  %v363_v55 = vld [vmem:[%s2273_s20 + $0x5e8] sm:$0xff]  ;;  %v364_v60 = vld [vmem:[%s2273_s20 + $0x5f0] sm:$0xff]  ;;  %v365_v3 = vld [vmem:[%s2273_s20 + $0x5f8] sm:$0xff] }
  0x93   : > { %1923 = vst [vmem:[%s2301_s25 + $0x538] sm:$0xff] %v1531_v2  ;;  %v1145_v12 = vadd.f32 %v2701_v48, %v746_v5  ;;  %v748_v13 = vmul.f32 %v2711_v51, %v349_v63  ;;  %v1532_v17 = vmax.f32 %v1140_v6, 0.0  ;;  %v1533_v18 = vmax.f32 %v1141_v7, 0.0 }
  0x94   : > { %v1534_v19 = vmax.f32 %v1142_v8, 0.0  ;;  %v1146_v20 = vadd.f32 %v2701_v48, %v747_v9  ;;  %v1535_v24 = vmax.f32 %v1143_v10, 0.0  ;;  %v1536_v25 = vmax.f32 %v1144_v11, 0.0 }
  0x95   : > { %v1537_v26 = vmax.f32 %v1145_v12, 0.0  ;;  %v1147_v27 = vadd.f32 %v2701_v48, %v748_v13  ;;  %1924 = vst [vmem:[%s2301_s25 + $0x540] sm:$0xff] %v1532_v17  ;;  %1925 = vst [vmem:[%s2301_s25 + $0x548] sm:$0xff] %v1533_v18  ;;  %v749_v30 = vmul.f32 %v2711_v51, %v350_v14  ;;  %v750_v31 = vmul.f32 %v2711_v51, %v351_v15  ;;  %v367_v17 = vld [vmem:[%s2273_s20 + $0x608] sm:$0xff]  ;;  %v368_v18 = vld [vmem:[%s2273_s20 + $0x610] sm:$0xff] }
  0x96   : > { %1926 = vst [vmem:[%s2301_s25 + $0x550] sm:$0xff] %v1534_v19  ;;  %v1538_v29 = vmax.f32 %v1146_v20, 0.0  ;;  %v751_v32 = vmul.f32 %v2711_v51, %v352_v16  ;;  %1927 = vst [vmem:[%s2301_s25 + $0x558] sm:$0xff] %v1535_v24  ;;  %v752_v35 = vmul.f32 %v2711_v51, %v353_v21  ;;  %v753_v36 = vmul.f32 %v2711_v51, %v354_v22  ;;  %v366_v16 = vld [vmem:[%s2273_s20 + $0x600] sm:$0xff] }
  0x97   : > { %1928 = vst [vmem:[%s2301_s25 + $0x560] sm:$0xff] %v1536_v25  ;;  %1929 = vst [vmem:[%s2301_s25 + $0x568] sm:$0xff] %v1537_v26  ;;  %v1539_v34 = vmax.f32 %v1147_v27, 0.0  ;;  %v754_v37 = vmul.f32 %v2711_v51, %v355_v23  ;;  %v1148_v38 = vadd.f32 %v2701_v48, %v749_v30  ;;  %v1149_v39 = vadd.f32 %v2701_v48, %v750_v31  ;;  %v369_v23 = vld [vmem:[%s2273_s20 + $0x618] sm:$0xff]  ;;  %v370_v24 = vld [vmem:[%s2273_s20 + $0x620] sm:$0xff] }
  0x98   : > { %1930 = vst [vmem:[%s2301_s25 + $0x570] sm:$0xff] %v1538_v29  ;;  %v1150_v40 = vadd.f32 %v2701_v48, %v751_v32  ;;  %v755_v41 = vmul.f32 %v2711_v51, %v356_v28  ;;  %v1151_v42 = vadd.f32 %v2701_v48, %v752_v35  ;;  %v1152_v43 = vadd.f32 %v2701_v48, %v753_v36  ;;  %v371_v25 = vld [vmem:[%s2273_s20 + $0x628] sm:$0xff]  ;;  %v372_v30 = vld [vmem:[%s2273_s20 + $0x630] sm:$0xff]  ;;  %v373_v35 = vld [vmem:[%s2273_s20 + $0x638] sm:$0xff] }
  0x99   : > { %1931 = vst [vmem:[%s2301_s25 + $0x578] sm:$0xff] %v1539_v34  ;;  %v1153_v44 = vadd.f32 %v2701_v48, %v754_v37  ;;  %v756_v45 = vmul.f32 %v2711_v51, %v357_v33  ;;  %v1540_v49 = vmax.f32 %v1148_v38, 0.0  ;;  %v1541_v50 = vmax.f32 %v1149_v39, 0.0 }
  0x9a   : > { %v1542_v1 = vmax.f32 %v1150_v40, 0.0  ;;  %v1154_v52 = vadd.f32 %v2701_v48, %v755_v41  ;;  %v1543_v56 = vmax.f32 %v1151_v42, 0.0  ;;  %v1544_v57 = vmax.f32 %v1152_v43, 0.0 }
  0x9b   : > { %v1545_v58 = vmax.f32 %v1153_v44, 0.0  ;;  %v1155_v59 = vadd.f32 %v2701_v48, %v756_v45  ;;  %1932 = vst [vmem:[%s2301_s25 + $0x580] sm:$0xff] %v1540_v49  ;;  %1933 = vst [vmem:[%s2301_s25 + $0x588] sm:$0xff] %v1541_v50  ;;  %v757_v62 = vmul.f32 %v2711_v51, %v358_v46  ;;  %v758_v63 = vmul.f32 %v2711_v51, %v359_v0  ;;  %v375_v49 = vld [vmem:[%s2273_s20 + $0x648] sm:$0xff]  ;;  %v376_v50 = vld [vmem:[%s2273_s20 + $0x650] sm:$0xff] }
  0x9c   : > { %1934 = vst [vmem:[%s2301_s25 + $0x590] sm:$0xff] %v1542_v1  ;;  %v1546_v61 = vmax.f32 %v1154_v52, 0.0  ;;  %v759_v2 = vmul.f32 %v2711_v51, %v360_v47  ;;  %1935 = vst [vmem:[%s2301_s25 + $0x598] sm:$0xff] %v1543_v56  ;;  %v760_v5 = vmul.f32 %v2711_v51, %v361_v53  ;;  %v761_v6 = vmul.f32 %v2711_v51, %v362_v54  ;;  %v374_v47 = vld [vmem:[%s2273_s20 + $0x640] sm:$0xff] }
  0x9d   : > { %1936 = vst [vmem:[%s2301_s25 + $0x5a0] sm:$0xff] %v1544_v57  ;;  %1937 = vst [vmem:[%s2301_s25 + $0x5a8] sm:$0xff] %v1545_v58  ;;  %v1547_v4 = vmax.f32 %v1155_v59, 0.0  ;;  %v762_v7 = vmul.f32 %v2711_v51, %v363_v55  ;;  %v1156_v8 = vadd.f32 %v2701_v48, %v757_v62  ;;  %v1157_v9 = vadd.f32 %v2701_v48, %v758_v63  ;;  %v377_v55 = vld [vmem:[%s2273_s20 + $0x658] sm:$0xff]  ;;  %v378_v56 = vld [vmem:[%s2273_s20 + $0x660] sm:$0xff] }
  0x9e   : > { %1938 = vst [vmem:[%s2301_s25 + $0x5b0] sm:$0xff] %v1546_v61  ;;  %v1158_v10 = vadd.f32 %v2701_v48, %v759_v2  ;;  %v763_v11 = vmul.f32 %v2711_v51, %v364_v60  ;;  %v1159_v12 = vadd.f32 %v2701_v48, %v760_v5  ;;  %v1160_v13 = vadd.f32 %v2701_v48, %v761_v6  ;;  %v379_v57 = vld [vmem:[%s2273_s20 + $0x668] sm:$0xff]  ;;  %v380_v62 = vld [vmem:[%s2273_s20 + $0x670] sm:$0xff]  ;;  %v381_v5 = vld [vmem:[%s2273_s20 + $0x678] sm:$0xff] }
  0x9f   : > { %1939 = vst [vmem:[%s2301_s25 + $0x5b8] sm:$0xff] %v1547_v4  ;;  %v1161_v14 = vadd.f32 %v2701_v48, %v762_v7  ;;  %v764_v15 = vmul.f32 %v2711_v51, %v365_v3  ;;  %v1548_v19 = vmax.f32 %v1156_v8, 0.0  ;;  %v1549_v20 = vmax.f32 %v1157_v9, 0.0 }
  0xa0   : > { %v1550_v21 = vmax.f32 %v1158_v10, 0.0  ;;  %v1162_v22 = vadd.f32 %v2701_v48, %v763_v11  ;;  %v1551_v26 = vmax.f32 %v1159_v12, 0.0  ;;  %v1552_v27 = vmax.f32 %v1160_v13, 0.0 }
  0xa1   : > { %v1553_v28 = vmax.f32 %v1161_v14, 0.0  ;;  %v1163_v29 = vadd.f32 %v2701_v48, %v764_v15  ;;  %1940 = vst [vmem:[%s2301_s25 + $0x5c0] sm:$0xff] %v1548_v19  ;;  %1941 = vst [vmem:[%s2301_s25 + $0x5c8] sm:$0xff] %v1549_v20  ;;  %v765_v32 = vmul.f32 %v2711_v51, %v366_v16  ;;  %v766_v33 = vmul.f32 %v2711_v51, %v367_v17  ;;  %v383_v19 = vld [vmem:[%s2273_s20 + $0x688] sm:$0xff]  ;;  %v384_v20 = vld [vmem:[%s2273_s20 + $0x690] sm:$0xff] }
  0xa2   : > { %1942 = vst [vmem:[%s2301_s25 + $0x5d0] sm:$0xff] %v1550_v21  ;;  %v1554_v31 = vmax.f32 %v1162_v22, 0.0  ;;  %v767_v34 = vmul.f32 %v2711_v51, %v368_v18  ;;  %1943 = vst [vmem:[%s2301_s25 + $0x5d8] sm:$0xff] %v1551_v26  ;;  %v768_v37 = vmul.f32 %v2711_v51, %v369_v23  ;;  %v769_v38 = vmul.f32 %v2711_v51, %v370_v24  ;;  %v382_v18 = vld [vmem:[%s2273_s20 + $0x680] sm:$0xff]  ;;  %v387_v26 = vld [vmem:[%s2273_s20 + $0x6a8] sm:$0xff] }
  0xa3   : > { %1944 = vst [vmem:[%s2301_s25 + $0x5e0] sm:$0xff] %v1552_v27  ;;  %1945 = vst [vmem:[%s2301_s25 + $0x5e8] sm:$0xff] %v1553_v28  ;;  %v1555_v36 = vmax.f32 %v1163_v29, 0.0  ;;  %v770_v39 = vmul.f32 %v2711_v51, %v371_v25  ;;  %v1164_v40 = vadd.f32 %v2701_v48, %v765_v32  ;;  %v1165_v41 = vadd.f32 %v2701_v48, %v766_v33  ;;  %v3123_v24 = vld [vmem:[%s3888_s2] ss:$0 sm:$0xff] }
  0xa4   : > { %1946 = vst [vmem:[%s2301_s25 + $0x5f0] sm:$0xff] %v1554_v31  ;;  %v1166_v42 = vadd.f32 %v2701_v48, %v767_v34  ;;  %v771_v43 = vmul.f32 %v2711_v51, %v372_v30  ;;  %v1167_v44 = vadd.f32 %v2701_v48, %v768_v37  ;;  %v1168_v45 = vadd.f32 %v2701_v48, %v769_v38  ;;  %v388_v31 = vld [vmem:[%s2273_s20 + $0x6b0] sm:$0xff]  ;;  %v3137_v33 = vld [vmem:[%s3887_s1] ss:$0 sm:$0xff]  ;;  %v389_v37 = vld [vmem:[%s2273_s20 + $0x6b8] sm:$0xff] }
  0xa5   : > { %1947 = vst [vmem:[%s2301_s25 + $0x5f8] sm:$0xff] %v1555_v36  ;;  %v1169_v46 = vadd.f32 %v2701_v48, %v770_v39  ;;  %v772_v0 = vmul.f32 %v2711_v51, %v373_v35  ;;  %v1556_v1 = vmax.f32 %v1164_v40, 0.0  ;;  %v1557_v52 = vmax.f32 %v1165_v41, 0.0 }
  0xa6   : > { %v1558_v53 = vmax.f32 %v1166_v42, 0.0  ;;  %v1170_v54 = vadd.f32 %v2701_v48, %v771_v43  ;;  %v1559_v58 = vmax.f32 %v1167_v44, 0.0  ;;  %v1560_v59 = vmax.f32 %v1168_v45, 0.0 }
  0xa7   : > { %v1561_v60 = vmax.f32 %v1169_v46, 0.0  ;;  %v1171_v61 = vadd.f32 %v2701_v48, %v772_v0  ;;  %1948 = vst [vmem:[%s2301_s25 + $0x600] sm:$0xff] %v1556_v1  ;;  %1949 = vst [vmem:[%s2301_s25 + $0x608] sm:$0xff] %v1557_v52  ;;  %v773_v2 = vmul.f32 %v2711_v51, %v374_v47  ;;  %v774_v3 = vmul.f32 %v2711_v51, %v375_v49  ;;  %v391_v1 = vld [vmem:[%s2273_s20 + $0x6c8] sm:$0xff]  ;;  %v392_v52 = vld [vmem:[%s2273_s20 + $0x6d0] sm:$0xff] }
  0xa8   : > { %1950 = vst [vmem:[%s2301_s25 + $0x610] sm:$0xff] %v1558_v53  ;;  %v1562_v63 = vmax.f32 %v1170_v54, 0.0  ;;  %v775_v4 = vmul.f32 %v2711_v51, %v376_v50  ;;  %1951 = vst [vmem:[%s2301_s25 + $0x618] sm:$0xff] %v1559_v58  ;;  %v776_v7 = vmul.f32 %v2711_v51, %v377_v55  ;;  %v777_v8 = vmul.f32 %v2711_v51, %v378_v56  ;;  %v390_v50 = vld [vmem:[%s2273_s20 + $0x6c0] sm:$0xff] }
  0xa9   : > { %1952 = vst [vmem:[%s2301_s25 + $0x620] sm:$0xff] %v1560_v59  ;;  %1953 = vst [vmem:[%s2301_s25 + $0x628] sm:$0xff] %v1561_v60  ;;  %v1563_v6 = vmax.f32 %v1171_v61, 0.0  ;;  %v778_v9 = vmul.f32 %v2711_v51, %v379_v57  ;;  %v1172_v10 = vadd.f32 %v2701_v48, %v773_v2  ;;  %v1173_v11 = vadd.f32 %v2701_v48, %v774_v3  ;;  %v393_v57 = vld [vmem:[%s2273_s20 + $0x6d8] sm:$0xff]  ;;  %v394_v58 = vld [vmem:[%s2273_s20 + $0x6e0] sm:$0xff] }
  0xaa   : > { %1954 = vst [vmem:[%s2301_s25 + $0x630] sm:$0xff] %v1562_v63  ;;  %v1174_v12 = vadd.f32 %v2701_v48, %v775_v4  ;;  %v779_v13 = vmul.f32 %v2711_v51, %v380_v62  ;;  %v1175_v14 = vadd.f32 %v2701_v48, %v776_v7  ;;  %v1176_v15 = vadd.f32 %v2701_v48, %v777_v8  ;;  %v395_v59 = vld [vmem:[%s2273_s20 + $0x6e8] sm:$0xff]  ;;  %v396_v2 = vld [vmem:[%s2273_s20 + $0x6f0] sm:$0xff]  ;;  %v397_v7 = vld [vmem:[%s2273_s20 + $0x6f8] sm:$0xff] }
  0xab   : > { %1955 = vst [vmem:[%s2301_s25 + $0x638] sm:$0xff] %v1563_v6  ;;  %v1177_v16 = vadd.f32 %v2701_v48, %v778_v9  ;;  %v780_v17 = vmul.f32 %v2711_v51, %v381_v5  ;;  %v1564_v21 = vmax.f32 %v1172_v10, 0.0  ;;  %v1565_v22 = vmax.f32 %v1173_v11, 0.0  ;;  %v385_v48 = vld [vmem:[%s2273_s20 + $0x698] sm:$0xff]  ;;  %v386_v51 = vld [vmem:[%s2273_s20 + $0x6a0] sm:$0xff] }
  0xac   : > { %v1566_v23 = vmax.f32 %v1174_v12, 0.0  ;;  %v1178_v25 = vadd.f32 %v3123_v24, %v779_v13  ;;  %v1567_v27 = vmax.f32 %v1175_v14, 0.0  ;;  %v1568_v28 = vmax.f32 %v1176_v15, 0.0 }
  0xad   : > { %v1569_v29 = vmax.f32 %v1177_v16, 0.0  ;;  %v1179_v30 = vadd.f32 %v3123_v24, %v780_v17  ;;  %1956 = vst [vmem:[%s2301_s25 + $0x640] sm:$0xff] %v1564_v21  ;;  %1957 = vst [vmem:[%s2301_s25 + $0x648] sm:$0xff] %v1565_v22  ;;  %v781_v34 = vmul.f32 %v3137_v33, %v382_v18  ;;  %v782_v35 = vmul.f32 %v3137_v33, %v383_v19  ;;  %v399_v21 = vld [vmem:[%s2273_s20 + $0x708] sm:$0xff]  ;;  %v400_v22 = vld [vmem:[%s2273_s20 + $0x710] sm:$0xff] }
  0xae   : > { %1958 = vst [vmem:[%s2301_s25 + $0x650] sm:$0xff] %v1566_v23  ;;  %v1570_v32 = vmax.f32 %v1178_v25, 0.0  ;;  %v783_v36 = vmul.f32 %v3137_v33, %v384_v20  ;;  %1959 = vst [vmem:[%s2301_s25 + $0x658] sm:$0xff] %v1567_v27  ;;  %v784_v39 = vmul.f32 %v3137_v33, %v385_v48  ;;  %v785_v40 = vmul.f32 %v3137_v33, %v386_v51  ;;  %v398_v20 = vld [vmem:[%s2273_s20 + $0x700] sm:$0xff] }
  0xaf   : > { %1960 = vst [vmem:[%s2301_s25 + $0x660] sm:$0xff] %v1568_v28  ;;  %1961 = vst [vmem:[%s2301_s25 + $0x668] sm:$0xff] %v1569_v29  ;;  %v1571_v38 = vmax.f32 %v1179_v30, 0.0  ;;  %v786_v41 = vmul.f32 %v3137_v33, %v387_v26  ;;  %v1180_v42 = vadd.f32 %v3123_v24, %v781_v34  ;;  %v1181_v43 = vadd.f32 %v3123_v24, %v782_v35  ;;  %v401_v26 = vld [vmem:[%s2273_s20 + $0x718] sm:$0xff]  ;;  %v402_v27 = vld [vmem:[%s2273_s20 + $0x720] sm:$0xff] }
  0xb0   : > { %1962 = vst [vmem:[%s2301_s25 + $0x670] sm:$0xff] %v1570_v32  ;;  %v1182_v44 = vadd.f32 %v3123_v24, %v783_v36  ;;  %v787_v45 = vmul.f32 %v3137_v33, %v388_v31  ;;  %v1183_v46 = vadd.f32 %v3123_v24, %v784_v39  ;;  %v1184_v0 = vadd.f32 %v3123_v24, %v785_v40  ;;  %v403_v28 = vld [vmem:[%s2273_s20 + $0x728] sm:$0xff]  ;;  %v404_v34 = vld [vmem:[%s2273_s20 + $0x730] sm:$0xff]  ;;  %v405_v39 = vld [vmem:[%s2273_s20 + $0x738] sm:$0xff] }
  0xb1   : > { %1963 = vst [vmem:[%s2301_s25 + $0x678] sm:$0xff] %v1571_v38  ;;  %v1185_v47 = vadd.f32 %v3123_v24, %v786_v41  ;;  %v788_v49 = vmul.f32 %v3137_v33, %v389_v37  ;;  %v1572_v53 = vmax.f32 %v1180_v42, 0.0  ;;  %v1573_v54 = vmax.f32 %v1181_v43, 0.0 }
  0xb2   : > { %v1574_v55 = vmax.f32 %v1182_v44, 0.0  ;;  %v1186_v56 = vadd.f32 %v3123_v24, %v787_v45  ;;  %v1575_v60 = vmax.f32 %v1183_v46, 0.0  ;;  %v1576_v61 = vmax.f32 %v1184_v0, 0.0 }
  0xb3   : > { %v1577_v62 = vmax.f32 %v1185_v47, 0.0  ;;  %v1187_v63 = vadd.f32 %v3123_v24, %v788_v49  ;;  %1964 = vst [vmem:[%s2301_s25 + $0x680] sm:$0xff] %v1572_v53  ;;  %1965 = vst [vmem:[%s2301_s25 + $0x688] sm:$0xff] %v1573_v54  ;;  %v789_v4 = vmul.f32 %v3137_v33, %v390_v50  ;;  %v790_v5 = vmul.f32 %v3137_v33, %v391_v1  ;;  %v407_v53 = vld [vmem:[%s2273_s20 + $0x748] sm:$0xff]  ;;  %v408_v54 = vld [vmem:[%s2273_s20 + $0x750] sm:$0xff] }
  0xb4   : > { %1966 = vst [vmem:[%s2301_s25 + $0x690] sm:$0xff] %v1574_v55  ;;  %v1578_v3 = vmax.f32 %v1186_v56, 0.0  ;;  %v791_v6 = vmul.f32 %v3137_v33, %v392_v52  ;;  %1967 = vst [vmem:[%s2301_s25 + $0x698] sm:$0xff] %v1575_v60  ;;  %v792_v9 = vmul.f32 %v3137_v33, %v393_v57  ;;  %v793_v10 = vmul.f32 %v3137_v33, %v394_v58  ;;  %v406_v52 = vld [vmem:[%s2273_s20 + $0x740] sm:$0xff] }
  0xb5   : > { %1968 = vst [vmem:[%s2301_s25 + $0x6a0] sm:$0xff] %v1576_v61  ;;  %1969 = vst [vmem:[%s2301_s25 + $0x6a8] sm:$0xff] %v1577_v62  ;;  %v1579_v8 = vmax.f32 %v1187_v63, 0.0  ;;  %v794_v11 = vmul.f32 %v3137_v33, %v395_v59  ;;  %v1188_v12 = vadd.f32 %v3123_v24, %v789_v4  ;;  %v1189_v13 = vadd.f32 %v3123_v24, %v790_v5  ;;  %v409_v59 = vld [vmem:[%s2273_s20 + $0x758] sm:$0xff]  ;;  %v410_v60 = vld [vmem:[%s2273_s20 + $0x760] sm:$0xff] }
  0xb6   : > { %1970 = vst [vmem:[%s2301_s25 + $0x6b0] sm:$0xff] %v1578_v3  ;;  %v1190_v14 = vadd.f32 %v3123_v24, %v791_v6  ;;  %v795_v15 = vmul.f32 %v3137_v33, %v396_v2  ;;  %v1191_v16 = vadd.f32 %v3123_v24, %v792_v9  ;;  %v1192_v17 = vadd.f32 %v3123_v24, %v793_v10  ;;  %v411_v61 = vld [vmem:[%s2273_s20 + $0x768] sm:$0xff]  ;;  %v412_v4 = vld [vmem:[%s2273_s20 + $0x770] sm:$0xff]  ;;  %v413_v9 = vld [vmem:[%s2273_s20 + $0x778] sm:$0xff] }
  0xb7   : > { %1971 = vst [vmem:[%s2301_s25 + $0x6b8] sm:$0xff] %v1579_v8  ;;  %v1193_v18 = vadd.f32 %v3123_v24, %v794_v11  ;;  %v796_v19 = vmul.f32 %v3137_v33, %v397_v7  ;;  %v1580_v23 = vmax.f32 %v1188_v12, 0.0  ;;  %v1581_v25 = vmax.f32 %v1189_v13, 0.0 }
  0xb8   : > { %v1582_v48 = vmax.f32 %v1190_v14, 0.0  ;;  %v1194_v51 = vadd.f32 %v3123_v24, %v795_v15  ;;  %v1583_v29 = vmax.f32 %v1191_v16, 0.0  ;;  %v1584_v30 = vmax.f32 %v1192_v17, 0.0 }
  0xb9   : > { %v1585_v31 = vmax.f32 %v1193_v18, 0.0  ;;  %v1195_v32 = vadd.f32 %v3123_v24, %v796_v19  ;;  %1972 = vst [vmem:[%s2301_s25 + $0x6c0] sm:$0xff] %v1580_v23  ;;  %1973 = vst [vmem:[%s2301_s25 + $0x6c8] sm:$0xff] %v1581_v25  ;;  %v797_v36 = vmul.f32 %v3137_v33, %v398_v20  ;;  %v798_v37 = vmul.f32 %v3137_v33, %v399_v21  ;;  %v415_v23 = vld [vmem:[%s2273_s20 + $0x788] sm:$0xff]  ;;  %v416_v25 = vld [vmem:[%s2273_s20 + $0x790] sm:$0xff] }
  0xba   : > { %1974 = vst [vmem:[%s2301_s25 + $0x6d0] sm:$0xff] %v1582_v48  ;;  %v1586_v35 = vmax.f32 %v1194_v51, 0.0  ;;  %v799_v38 = vmul.f32 %v3137_v33, %v400_v22  ;;  %1975 = vst [vmem:[%s2301_s25 + $0x6d8] sm:$0xff] %v1583_v29  ;;  %v800_v41 = vmul.f32 %v3137_v33, %v401_v26  ;;  %v801_v42 = vmul.f32 %v3137_v33, %v402_v27  ;;  %v414_v22 = vld [vmem:[%s2273_s20 + $0x780] sm:$0xff] }
  0xbb   : > { %1976 = vst [vmem:[%s2301_s25 + $0x6e0] sm:$0xff] %v1584_v30  ;;  %1977 = vst [vmem:[%s2301_s25 + $0x6e8] sm:$0xff] %v1585_v31  ;;  %v1587_v40 = vmax.f32 %v1195_v32, 0.0  ;;  %v802_v43 = vmul.f32 %v3137_v33, %v403_v28  ;;  %v1196_v44 = vadd.f32 %v3123_v24, %v797_v36  ;;  %v1197_v45 = vadd.f32 %v3123_v24, %v798_v37  ;;  %v417_v28 = vld [vmem:[%s2273_s20 + $0x798] sm:$0xff]  ;;  %v418_v29 = vld [vmem:[%s2273_s20 + $0x7a0] sm:$0xff] }
  0xbc   : > { %1978 = vst [vmem:[%s2301_s25 + $0x6f0] sm:$0xff] %v1586_v35  ;;  %v1198_v46 = vadd.f32 %v3123_v24, %v799_v38  ;;  %v803_v0 = vmul.f32 %v3137_v33, %v404_v34  ;;  %v1199_v47 = vadd.f32 %v3123_v24, %v800_v41  ;;  %v1200_v49 = vadd.f32 %v3123_v24, %v801_v42  ;;  %v419_v30 = vld [vmem:[%s2273_s20 + $0x7a8] sm:$0xff]  ;;  %v420_v36 = vld [vmem:[%s2273_s20 + $0x7b0] sm:$0xff]  ;;  %v421_v41 = vld [vmem:[%s2273_s20 + $0x7b8] sm:$0xff] }
  0xbd   : > { %1979 = vst [vmem:[%s2301_s25 + $0x6f8] sm:$0xff] %v1587_v40  ;;  %v1201_v50 = vadd.f32 %v3123_v24, %v802_v43  ;;  %v804_v1 = vmul.f32 %v3137_v33, %v405_v39  ;;  %v1588_v55 = vmax.f32 %v1196_v44, 0.0  ;;  %v1589_v56 = vmax.f32 %v1197_v45, 0.0 }
  0xbe   : > { %v1590_v57 = vmax.f32 %v1198_v46, 0.0  ;;  %v1202_v58 = vadd.f32 %v3123_v24, %v803_v0  ;;  %v1591_v62 = vmax.f32 %v1199_v47, 0.0  ;;  %v1592_v63 = vmax.f32 %v1200_v49, 0.0 }
  0xbf   : > { %v1593_v2 = vmax.f32 %v1201_v50, 0.0  ;;  %v1203_v3 = vadd.f32 %v3123_v24, %v804_v1  ;;  %1980 = vst [vmem:[%s2301_s25 + $0x700] sm:$0xff] %v1588_v55  ;;  %1981 = vst [vmem:[%s2301_s25 + $0x708] sm:$0xff] %v1589_v56  ;;  %v805_v6 = vmul.f32 %v3137_v33, %v406_v52  ;;  %v806_v7 = vmul.f32 %v3137_v33, %v407_v53  ;;  %v423_v55 = vld [vmem:[%s2273_s20 + $0x7c8] sm:$0xff]  ;;  %v424_v56 = vld [vmem:[%s2273_s20 + $0x7d0] sm:$0xff] }
  0xc0   : > { %1982 = vst [vmem:[%s2301_s25 + $0x710] sm:$0xff] %v1590_v57  ;;  %v1594_v5 = vmax.f32 %v1202_v58, 0.0  ;;  %v807_v8 = vmul.f32 %v3137_v33, %v408_v54  ;;  %1983 = vst [vmem:[%s2301_s25 + $0x718] sm:$0xff] %v1591_v62  ;;  %v808_v11 = vmul.f32 %v3137_v33, %v409_v59  ;;  %v809_v12 = vmul.f32 %v3137_v33, %v410_v60  ;;  %v422_v54 = vld [vmem:[%s2273_s20 + $0x7c0] sm:$0xff] }
  0xc1   : > { %1984 = vst [vmem:[%s2301_s25 + $0x720] sm:$0xff] %v1592_v63  ;;  %1985 = vst [vmem:[%s2301_s25 + $0x728] sm:$0xff] %v1593_v2  ;;  %v1595_v10 = vmax.f32 %v1203_v3, 0.0  ;;  %v810_v13 = vmul.f32 %v3137_v33, %v411_v61  ;;  %v1204_v14 = vadd.f32 %v3123_v24, %v805_v6  ;;  %v1205_v15 = vadd.f32 %v3123_v24, %v806_v7  ;;  %v425_v61 = vld [vmem:[%s2273_s20 + $0x7d8] sm:$0xff]  ;;  %v426_v62 = vld [vmem:[%s2273_s20 + $0x7e0] sm:$0xff] }
  0xc2   : > { %1986 = vst [vmem:[%s2301_s25 + $0x730] sm:$0xff] %v1594_v5  ;;  %v1206_v16 = vadd.f32 %v3123_v24, %v807_v8  ;;  %v811_v17 = vmul.f32 %v3137_v33, %v412_v4  ;;  %v1207_v18 = vadd.f32 %v3123_v24, %v808_v11  ;;  %v1208_v19 = vadd.f32 %v3123_v24, %v809_v12  ;;  %v427_v63 = vld [vmem:[%s2273_s20 + $0x7e8] sm:$0xff]  ;;  %v428_v6 = vld [vmem:[%s2273_s20 + $0x7f0] sm:$0xff]  ;;  %v429_v11 = vld [vmem:[%s2273_s20 + $0x7f8] sm:$0xff] }
  0xc3   : > { %1987 = vst [vmem:[%s2301_s25 + $0x738] sm:$0xff] %v1595_v10  ;;  %v1209_v20 = vadd.f32 %v3123_v24, %v810_v13  ;;  %v812_v21 = vmul.f32 %v3137_v33, %v413_v9  ;;  %v1596_v48 = vmax.f32 %v1204_v14, 0.0  ;;  %v1597_v51 = vmax.f32 %v1205_v15, 0.0 }
  0xc4   : > { %v1598_v26 = vmax.f32 %v1206_v16, 0.0  ;;  %v1210_v27 = vadd.f32 %v3123_v24, %v811_v17  ;;  %v1599_v31 = vmax.f32 %v1207_v18, 0.0  ;;  %v1600_v32 = vmax.f32 %v1208_v19, 0.0 }
  0xc5   : > { %v1601_v34 = vmax.f32 %v1209_v20, 0.0  ;;  %v1211_v35 = vadd.f32 %v3123_v24, %v812_v21  ;;  %1988 = vst [vmem:[%s2301_s25 + $0x740] sm:$0xff] %v1596_v48  ;;  %1989 = vst [vmem:[%s2301_s25 + $0x748] sm:$0xff] %v1597_v51  ;;  %v813_v38 = vmul.f32 %v3137_v33, %v414_v22  ;;  %v814_v39 = vmul.f32 %v3137_v33, %v415_v23  ;;  %v431_v48 = vld [vmem:[%s2273_s20 + $0x808] sm:$0xff]  ;;  %v432_v51 = vld [vmem:[%s2273_s20 + $0x810] sm:$0xff] }
  0xc6   : > { %1990 = vst [vmem:[%s2301_s25 + $0x750] sm:$0xff] %v1598_v26  ;;  %v1602_v37 = vmax.f32 %v1210_v27, 0.0  ;;  %v815_v40 = vmul.f32 %v3137_v33, %v416_v25  ;;  %1991 = vst [vmem:[%s2301_s25 + $0x758] sm:$0xff] %v1599_v31  ;;  %v816_v43 = vmul.f32 %v3137_v33, %v417_v28  ;;  %v817_v44 = vmul.f32 %v3137_v33, %v418_v29  ;;  %v430_v25 = vld [vmem:[%s2273_s20 + $0x800] sm:$0xff] }
  0xc7   : > { %1992 = vst [vmem:[%s2301_s25 + $0x760] sm:$0xff] %v1600_v32  ;;  %1993 = vst [vmem:[%s2301_s25 + $0x768] sm:$0xff] %v1601_v34  ;;  %v1603_v42 = vmax.f32 %v1211_v35, 0.0  ;;  %v818_v45 = vmul.f32 %v3137_v33, %v419_v30  ;;  %v1212_v46 = vadd.f32 %v3123_v24, %v813_v38  ;;  %v1213_v0 = vadd.f32 %v3123_v24, %v814_v39  ;;  %v433_v30 = vld [vmem:[%s2273_s20 + $0x818] sm:$0xff]  ;;  %v434_v31 = vld [vmem:[%s2273_s20 + $0x820] sm:$0xff] }
  0xc8   : > { %1994 = vst [vmem:[%s2301_s25 + $0x770] sm:$0xff] %v1602_v37  ;;  %v1214_v47 = vadd.f32 %v3123_v24, %v815_v40  ;;  %v819_v49 = vmul.f32 %v3137_v33, %v420_v36  ;;  %v1215_v50 = vadd.f32 %v3123_v24, %v816_v43  ;;  %v1216_v1 = vadd.f32 %v3123_v24, %v817_v44  ;;  %v435_v32 = vld [vmem:[%s2273_s20 + $0x828] sm:$0xff]  ;;  %v436_v38 = vld [vmem:[%s2273_s20 + $0x830] sm:$0xff]  ;;  %v437_v43 = vld [vmem:[%s2273_s20 + $0x838] sm:$0xff] }
  0xc9   : > { %1995 = vst [vmem:[%s2301_s25 + $0x778] sm:$0xff] %v1603_v42  ;;  %v1217_v52 = vadd.f32 %v3123_v24, %v818_v45  ;;  %v820_v53 = vmul.f32 %v3137_v33, %v421_v41  ;;  %v1604_v57 = vmax.f32 %v1212_v46, 0.0  ;;  %v1605_v58 = vmax.f32 %v1213_v0, 0.0 }
  0xca   : > { %v1606_v59 = vmax.f32 %v1214_v47, 0.0  ;;  %v1218_v60 = vadd.f32 %v3123_v24, %v819_v49  ;;  %v1607_v2 = vmax.f32 %v1215_v50, 0.0  ;;  %v1608_v3 = vmax.f32 %v1216_v1, 0.0 }
  0xcb   : > { %v1609_v4 = vmax.f32 %v1217_v52, 0.0  ;;  %v1219_v5 = vadd.f32 %v3123_v24, %v820_v53  ;;  %1996 = vst [vmem:[%s2301_s25 + $0x780] sm:$0xff] %v1604_v57  ;;  %1997 = vst [vmem:[%s2301_s25 + $0x788] sm:$0xff] %v1605_v58  ;;  %v821_v8 = vmul.f32 %v3137_v33, %v422_v54  ;;  %v822_v9 = vmul.f32 %v3137_v33, %v423_v55  ;;  %v439_v57 = vld [vmem:[%s2273_s20 + $0x848] sm:$0xff]  ;;  %v440_v58 = vld [vmem:[%s2273_s20 + $0x850] sm:$0xff] }
  0xcc   : > { %1998 = vst [vmem:[%s2301_s25 + $0x790] sm:$0xff] %v1606_v59  ;;  %v1610_v7 = vmax.f32 %v1218_v60, 0.0  ;;  %v823_v10 = vmul.f32 %v3137_v33, %v424_v56  ;;  %1999 = vst [vmem:[%s2301_s25 + $0x798] sm:$0xff] %v1607_v2  ;;  %v824_v13 = vmul.f32 %v3137_v33, %v425_v61  ;;  %v825_v14 = vmul.f32 %v3137_v33, %v426_v62  ;;  %v438_v56 = vld [vmem:[%s2273_s20 + $0x840] sm:$0xff] }
  0xcd   : > { %2000 = vst [vmem:[%s2301_s25 + $0x7a0] sm:$0xff] %v1608_v3  ;;  %2001 = vst [vmem:[%s2301_s25 + $0x7a8] sm:$0xff] %v1609_v4  ;;  %v1611_v12 = vmax.f32 %v1219_v5, 0.0  ;;  %v826_v15 = vmul.f32 %v3137_v33, %v427_v63  ;;  %v1220_v16 = vadd.f32 %v3123_v24, %v821_v8  ;;  %v1221_v17 = vadd.f32 %v3123_v24, %v822_v9  ;;  %v441_v63 = vld [vmem:[%s2273_s20 + $0x858] sm:$0xff]  ;;  %v442_v2 = vld [vmem:[%s2273_s20 + $0x860] sm:$0xff] }
  0xce   : > { %2002 = vst [vmem:[%s2301_s25 + $0x7b0] sm:$0xff] %v1610_v7  ;;  %v1222_v18 = vadd.f32 %v3123_v24, %v823_v10  ;;  %v827_v19 = vmul.f32 %v3137_v33, %v428_v6  ;;  %v1223_v20 = vadd.f32 %v3123_v24, %v824_v13  ;;  %v1224_v21 = vadd.f32 %v3123_v24, %v825_v14  ;;  %v443_v3 = vld [vmem:[%s2273_s20 + $0x868] sm:$0xff]  ;;  %v444_v8 = vld [vmem:[%s2273_s20 + $0x870] sm:$0xff]  ;;  %v445_v13 = vld [vmem:[%s2273_s20 + $0x878] sm:$0xff] }
  0xcf   : > { %2003 = vst [vmem:[%s2301_s25 + $0x7b8] sm:$0xff] %v1611_v12  ;;  %v1225_v22 = vadd.f32 %v3123_v24, %v826_v15  ;;  %v828_v23 = vmul.f32 %v3137_v33, %v429_v11  ;;  %v1612_v26 = vmax.f32 %v1220_v16, 0.0  ;;  %v1613_v27 = vmax.f32 %v1221_v17, 0.0 }
  0xd0   : > { %v1614_v28 = vmax.f32 %v1222_v18, 0.0  ;;  %v1226_v29 = vadd.f32 %v3123_v24, %v827_v19  ;;  %v1615_v34 = vmax.f32 %v1223_v20, 0.0  ;;  %v1616_v35 = vmax.f32 %v1224_v21, 0.0 }
  0xd1   : > { %v1617_v36 = vmax.f32 %v1225_v22, 0.0  ;;  %v1227_v37 = vadd.f32 %v3123_v24, %v828_v23  ;;  %2004 = vst [vmem:[%s2301_s25 + $0x7c0] sm:$0xff] %v1612_v26  ;;  %2005 = vst [vmem:[%s2301_s25 + $0x7c8] sm:$0xff] %v1613_v27  ;;  %v829_v40 = vmul.f32 %v3137_v33, %v430_v25  ;;  %v830_v41 = vmul.f32 %v3137_v33, %v431_v48  ;;  %v447_v26 = vld [vmem:[%s2273_s20 + $0x888] sm:$0xff]  ;;  %v448_v27 = vld [vmem:[%s2273_s20 + $0x890] sm:$0xff] }
  0xd2   : > { %2006 = vst [vmem:[%s2301_s25 + $0x7d0] sm:$0xff] %v1614_v28  ;;  %v1618_v39 = vmax.f32 %v1226_v29, 0.0  ;;  %v831_v42 = vmul.f32 %v3137_v33, %v432_v51  ;;  %2007 = vst [vmem:[%s2301_s25 + $0x7d8] sm:$0xff] %v1615_v34  ;;  %v832_v45 = vmul.f32 %v3137_v33, %v433_v30  ;;  %v833_v46 = vmul.f32 %v3137_v33, %v434_v31  ;;  %v446_v51 = vld [vmem:[%s2273_s20 + $0x880] sm:$0xff] }
  0xd3   : > { %2008 = vst [vmem:[%s2301_s25 + $0x7e0] sm:$0xff] %v1616_v35  ;;  %2009 = vst [vmem:[%s2301_s25 + $0x7e8] sm:$0xff] %v1617_v36  ;;  %v1619_v44 = vmax.f32 %v1227_v37, 0.0  ;;  %v834_v0 = vmul.f32 %v3137_v33, %v435_v32  ;;  %v1228_v47 = vadd.f32 %v3123_v24, %v829_v40  ;;  %v1229_v49 = vadd.f32 %v3123_v24, %v830_v41  ;;  %v449_v32 = vld [vmem:[%s2273_s20 + $0x898] sm:$0xff]  ;;  %v450_v34 = vld [vmem:[%s2273_s20 + $0x8a0] sm:$0xff] }
  0xd4   : > { %2010 = vst [vmem:[%s2301_s25 + $0x7f0] sm:$0xff] %v1618_v39  ;;  %v1230_v50 = vadd.f32 %v3123_v24, %v831_v42  ;;  %v835_v1 = vmul.f32 %v3137_v33, %v436_v38  ;;  %v1231_v52 = vadd.f32 %v3123_v24, %v832_v45  ;;  %v1232_v53 = vadd.f32 %v3123_v24, %v833_v46  ;;  %v451_v35 = vld [vmem:[%s2273_s20 + $0x8a8] sm:$0xff]  ;;  %v452_v40 = vld [vmem:[%s2273_s20 + $0x8b0] sm:$0xff]  ;;  %v453_v45 = vld [vmem:[%s2273_s20 + $0x8b8] sm:$0xff] }
  0xd5   : > { %2011 = vst [vmem:[%s2301_s25 + $0x7f8] sm:$0xff] %v1619_v44  ;;  %v1233_v54 = vadd.f32 %v3123_v24, %v834_v0  ;;  %v836_v55 = vmul.f32 %v3137_v33, %v437_v43  ;;  %v1620_v59 = vmax.f32 %v1228_v47, 0.0  ;;  %v1621_v60 = vmax.f32 %v1229_v49, 0.0 }
  0xd6   : > { %v1622_v61 = vmax.f32 %v1230_v50, 0.0  ;;  %v1234_v62 = vadd.f32 %v3123_v24, %v835_v1  ;;  %v1623_v4 = vmax.f32 %v1231_v52, 0.0  ;;  %v1624_v5 = vmax.f32 %v1232_v53, 0.0 }
  0xd7   : > { %v1625_v6 = vmax.f32 %v1233_v54, 0.0  ;;  %v1235_v7 = vadd.f32 %v3123_v24, %v836_v55  ;;  %2012 = vst [vmem:[%s2301_s25 + $0x800] sm:$0xff] %v1620_v59  ;;  %2013 = vst [vmem:[%s2301_s25 + $0x808] sm:$0xff] %v1621_v60  ;;  %v837_v10 = vmul.f32 %v3137_v33, %v438_v56  ;;  %v838_v11 = vmul.f32 %v3137_v33, %v439_v57  ;;  %v455_v59 = vld [vmem:[%s2273_s20 + $0x8c8] sm:$0xff]  ;;  %v456_v60 = vld [vmem:[%s2273_s20 + $0x8d0] sm:$0xff] }
  0xd8   : > { %2014 = vst [vmem:[%s2301_s25 + $0x810] sm:$0xff] %v1622_v61  ;;  %v1626_v9 = vmax.f32 %v1234_v62, 0.0  ;;  %v839_v12 = vmul.f32 %v3137_v33, %v440_v58  ;;  %2015 = vst [vmem:[%s2301_s25 + $0x818] sm:$0xff] %v1623_v4  ;;  %v840_v15 = vmul.f32 %v3137_v33, %v441_v63  ;;  %v841_v16 = vmul.f32 %v3137_v33, %v442_v2  ;;  %v454_v58 = vld [vmem:[%s2273_s20 + $0x8c0] sm:$0xff] }
  0xd9   : > { %2016 = vst [vmem:[%s2301_s25 + $0x820] sm:$0xff] %v1624_v5  ;;  %2017 = vst [vmem:[%s2301_s25 + $0x828] sm:$0xff] %v1625_v6  ;;  %v1627_v14 = vmax.f32 %v1235_v7, 0.0  ;;  %v842_v17 = vmul.f32 %v3137_v33, %v443_v3  ;;  %v1236_v18 = vadd.f32 %v3123_v24, %v837_v10  ;;  %v1237_v19 = vadd.f32 %v3123_v24, %v838_v11  ;;  %v457_v3 = vld [vmem:[%s2273_s20 + $0x8d8] sm:$0xff]  ;;  %v458_v4 = vld [vmem:[%s2273_s20 + $0x8e0] sm:$0xff] }
  0xda   : > { %2018 = vst [vmem:[%s2301_s25 + $0x830] sm:$0xff] %v1626_v9  ;;  %v1238_v20 = vadd.f32 %v3123_v24, %v839_v12  ;;  %v843_v21 = vmul.f32 %v3137_v33, %v444_v8  ;;  %v1239_v22 = vadd.f32 %v3123_v24, %v840_v15  ;;  %v1240_v23 = vadd.f32 %v3123_v24, %v841_v16  ;;  %v459_v5 = vld [vmem:[%s2273_s20 + $0x8e8] sm:$0xff]  ;;  %v460_v10 = vld [vmem:[%s2273_s20 + $0x8f0] sm:$0xff]  ;;  %v461_v15 = vld [vmem:[%s2273_s20 + $0x8f8] sm:$0xff] }
  0xdb   : > { %2019 = vst [vmem:[%s2301_s25 + $0x838] sm:$0xff] %v1627_v14  ;;  %v1241_v25 = vadd.f32 %v3123_v24, %v842_v17  ;;  %v844_v48 = vmul.f32 %v3137_v33, %v445_v13  ;;  %v1628_v28 = vmax.f32 %v1236_v18, 0.0  ;;  %v1629_v29 = vmax.f32 %v1237_v19, 0.0 }
  0xdc   : > { %v1630_v30 = vmax.f32 %v1238_v20, 0.0  ;;  %v1242_v31 = vadd.f32 %v3123_v24, %v843_v21  ;;  %v1631_v36 = vmax.f32 %v1239_v22, 0.0  ;;  %v1632_v37 = vmax.f32 %v1240_v23, 0.0 }
  0xdd   : > { %v1633_v38 = vmax.f32 %v1241_v25, 0.0  ;;  %v1243_v39 = vadd.f32 %v3123_v24, %v844_v48  ;;  %2020 = vst [vmem:[%s2301_s25 + $0x840] sm:$0xff] %v1628_v28  ;;  %2021 = vst [vmem:[%s2301_s25 + $0x848] sm:$0xff] %v1629_v29  ;;  %v845_v42 = vmul.f32 %v3137_v33, %v446_v51  ;;  %v846_v43 = vmul.f32 %v3137_v33, %v447_v26  ;;  %v463_v28 = vld [vmem:[%s2273_s20 + $0x908] sm:$0xff]  ;;  %v464_v29 = vld [vmem:[%s2273_s20 + $0x910] sm:$0xff] }
  0xde   : > { %2022 = vst [vmem:[%s2301_s25 + $0x850] sm:$0xff] %v1630_v30  ;;  %v1634_v41 = vmax.f32 %v1242_v31, 0.0  ;;  %v847_v44 = vmul.f32 %v3137_v33, %v448_v27  ;;  %2023 = vst [vmem:[%s2301_s25 + $0x858] sm:$0xff] %v1631_v36  ;;  %v848_v0 = vmul.f32 %v3137_v33, %v449_v32  ;;  %v849_v47 = vmul.f32 %v3137_v33, %v450_v34  ;;  %v462_v27 = vld [vmem:[%s2273_s20 + $0x900] sm:$0xff] }
  0xdf   : > { %2024 = vst [vmem:[%s2301_s25 + $0x860] sm:$0xff] %v1632_v37  ;;  %2025 = vst [vmem:[%s2301_s25 + $0x868] sm:$0xff] %v1633_v38  ;;  %v1635_v46 = vmax.f32 %v1243_v39, 0.0  ;;  %v850_v49 = vmul.f32 %v3137_v33, %v451_v35  ;;  %v1244_v50 = vadd.f32 %v3123_v24, %v845_v42  ;;  %v1245_v1 = vadd.f32 %v3123_v24, %v846_v43  ;;  %v465_v35 = vld [vmem:[%s2273_s20 + $0x918] sm:$0xff]  ;;  %v466_v36 = vld [vmem:[%s2273_s20 + $0x920] sm:$0xff] }
  0xe0   : > { %2026 = vst [vmem:[%s2301_s25 + $0x870] sm:$0xff] %v1634_v41  ;;  %v1246_v52 = vadd.f32 %v3123_v24, %v847_v44  ;;  %v851_v53 = vmul.f32 %v3137_v33, %v452_v40  ;;  %v1247_v54 = vadd.f32 %v3123_v24, %v848_v0  ;;  %v1248_v55 = vadd.f32 %v3123_v24, %v849_v47  ;;  %v467_v37 = vld [vmem:[%s2273_s20 + $0x928] sm:$0xff]  ;;  %v468_v42 = vld [vmem:[%s2273_s20 + $0x930] sm:$0xff]  ;;  %v469_v0 = vld [vmem:[%s2273_s20 + $0x938] sm:$0xff] }
  0xe1   : > { %2027 = vst [vmem:[%s2301_s25 + $0x878] sm:$0xff] %v1635_v46  ;;  %v1249_v56 = vadd.f32 %v3123_v24, %v850_v49  ;;  %v852_v57 = vmul.f32 %v3137_v33, %v453_v45  ;;  %v1636_v61 = vmax.f32 %v1244_v50, 0.0  ;;  %v1637_v62 = vmax.f32 %v1245_v1, 0.0 }
  0xe2   : > { %v1638_v63 = vmax.f32 %v1246_v52, 0.0  ;;  %v1250_v2 = vadd.f32 %v3123_v24, %v851_v53  ;;  %v1639_v6 = vmax.f32 %v1247_v54, 0.0  ;;  %v1640_v7 = vmax.f32 %v1248_v55, 0.0 }
  0xe3   : > { %v1641_v8 = vmax.f32 %v1249_v56, 0.0  ;;  %v1251_v9 = vadd.f32 %v3123_v24, %v852_v57  ;;  %2028 = vst [vmem:[%s2301_s25 + $0x880] sm:$0xff] %v1636_v61  ;;  %2029 = vst [vmem:[%s2301_s25 + $0x888] sm:$0xff] %v1637_v62  ;;  %v853_v12 = vmul.f32 %v3137_v33, %v454_v58  ;;  %v854_v13 = vmul.f32 %v3137_v33, %v455_v59  ;;  %v471_v61 = vld [vmem:[%s2273_s20 + $0x948] sm:$0xff]  ;;  %v472_v62 = vld [vmem:[%s2273_s20 + $0x950] sm:$0xff] }
  0xe4   : > { %2030 = vst [vmem:[%s2301_s25 + $0x890] sm:$0xff] %v1638_v63  ;;  %v1642_v11 = vmax.f32 %v1250_v2, 0.0  ;;  %v855_v14 = vmul.f32 %v3137_v33, %v456_v60  ;;  %2031 = vst [vmem:[%s2301_s25 + $0x898] sm:$0xff] %v1639_v6  ;;  %v856_v17 = vmul.f32 %v3137_v33, %v457_v3  ;;  %v857_v18 = vmul.f32 %v3137_v33, %v458_v4  ;;  %v470_v60 = vld [vmem:[%s2273_s20 + $0x940] sm:$0xff] }
  0xe5   : > { %2032 = vst [vmem:[%s2301_s25 + $0x8a0] sm:$0xff] %v1640_v7  ;;  %2033 = vst [vmem:[%s2301_s25 + $0x8a8] sm:$0xff] %v1641_v8  ;;  %v1643_v16 = vmax.f32 %v1251_v9, 0.0  ;;  %v858_v19 = vmul.f32 %v3137_v33, %v459_v5  ;;  %v1252_v20 = vadd.f32 %v3123_v24, %v853_v12  ;;  %v1253_v21 = vadd.f32 %v3123_v24, %v854_v13  ;;  %v473_v5 = vld [vmem:[%s2273_s20 + $0x958] sm:$0xff]  ;;  %v474_v6 = vld [vmem:[%s2273_s20 + $0x960] sm:$0xff] }
  0xe6   : > { %2034 = vst [vmem:[%s2301_s25 + $0x8b0] sm:$0xff] %v1642_v11  ;;  %v1254_v22 = vadd.f32 %v3123_v24, %v855_v14  ;;  %v859_v23 = vmul.f32 %v3137_v33, %v460_v10  ;;  %v1255_v25 = vadd.f32 %v3123_v24, %v856_v17  ;;  %v1256_v48 = vadd.f32 %v3123_v24, %v857_v18  ;;  %v475_v7 = vld [vmem:[%s2273_s20 + $0x968] sm:$0xff]  ;;  %v476_v12 = vld [vmem:[%s2273_s20 + $0x970] sm:$0xff]  ;;  %v477_v17 = vld [vmem:[%s2273_s20 + $0x978] sm:$0xff] }
  0xe7   : > { %2035 = vst [vmem:[%s2301_s25 + $0x8b8] sm:$0xff] %v1643_v16  ;;  %v1257_v51 = vadd.f32 %v3123_v24, %v858_v19  ;;  %v860_v26 = vmul.f32 %v3137_v33, %v461_v15  ;;  %v1644_v30 = vmax.f32 %v1252_v20, 0.0  ;;  %v1645_v31 = vmax.f32 %v1253_v21, 0.0 }
  0xe8   : > { %v1646_v32 = vmax.f32 %v1254_v22, 0.0  ;;  %v1258_v34 = vadd.f32 %v3123_v24, %v859_v23  ;;  %v1647_v38 = vmax.f32 %v1255_v25, 0.0  ;;  %v1648_v39 = vmax.f32 %v1256_v48, 0.0 }
  0xe9   : > { %v1649_v40 = vmax.f32 %v1257_v51, 0.0  ;;  %v1259_v41 = vadd.f32 %v3123_v24, %v860_v26  ;;  %2036 = vst [vmem:[%s2301_s25 + $0x8c0] sm:$0xff] %v1644_v30  ;;  %2037 = vst [vmem:[%s2301_s25 + $0x8c8] sm:$0xff] %v1645_v31  ;;  %v861_v44 = vmul.f32 %v3137_v33, %v462_v27  ;;  %v862_v45 = vmul.f32 %v3137_v33, %v463_v28  ;;  %v479_v30 = vld [vmem:[%s2273_s20 + $0x988] sm:$0xff]  ;;  %v480_v31 = vld [vmem:[%s2273_s20 + $0x990] sm:$0xff] }
  0xea   : > { %2038 = vst [vmem:[%s2301_s25 + $0x8d0] sm:$0xff] %v1646_v32  ;;  %v1650_v43 = vmax.f32 %v1258_v34, 0.0  ;;  %v863_v46 = vmul.f32 %v3137_v33, %v464_v29  ;;  %2039 = vst [vmem:[%s2301_s25 + $0x8d8] sm:$0xff] %v1647_v38  ;;  %v864_v49 = vmul.f32 %v3137_v33, %v465_v35  ;;  %v865_v50 = vmul.f32 %v3137_v33, %v466_v36  ;;  %v478_v29 = vld [vmem:[%s2273_s20 + $0x980] sm:$0xff] }
  0xeb   : > { %2040 = vst [vmem:[%s2301_s25 + $0x8e0] sm:$0xff] %v1648_v39  ;;  %2041 = vst [vmem:[%s2301_s25 + $0x8e8] sm:$0xff] %v1649_v40  ;;  %v1651_v47 = vmax.f32 %v1259_v41, 0.0  ;;  %v866_v1 = vmul.f32 %v3137_v33, %v467_v37  ;;  %v1260_v52 = vadd.f32 %v3123_v24, %v861_v44  ;;  %v1261_v53 = vadd.f32 %v3123_v24, %v862_v45  ;;  %v481_v37 = vld [vmem:[%s2273_s20 + $0x998] sm:$0xff]  ;;  %v482_v38 = vld [vmem:[%s2273_s20 + $0x9a0] sm:$0xff] }
  0xec   : > { %2042 = vst [vmem:[%s2301_s25 + $0x8f0] sm:$0xff] %v1650_v43  ;;  %v1262_v54 = vadd.f32 %v3123_v24, %v863_v46  ;;  %v867_v55 = vmul.f32 %v3137_v33, %v468_v42  ;;  %v1263_v56 = vadd.f32 %v3123_v24, %v864_v49  ;;  %v1264_v57 = vadd.f32 %v3123_v24, %v865_v50  ;;  %v483_v39 = vld [vmem:[%s2273_s20 + $0x9a8] sm:$0xff]  ;;  %v484_v44 = vld [vmem:[%s2273_s20 + $0x9b0] sm:$0xff]  ;;  %v485_v49 = vld [vmem:[%s2273_s20 + $0x9b8] sm:$0xff] }
  0xed   : > { %2043 = vst [vmem:[%s2301_s25 + $0x8f8] sm:$0xff] %v1651_v47  ;;  %v1265_v58 = vadd.f32 %v3123_v24, %v866_v1  ;;  %v868_v59 = vmul.f32 %v3137_v33, %v469_v0  ;;  %v1652_v63 = vmax.f32 %v1260_v52, 0.0  ;;  %v1653_v2 = vmax.f32 %v1261_v53, 0.0 }
  0xee   : > { %v1654_v3 = vmax.f32 %v1262_v54, 0.0  ;;  %v1266_v4 = vadd.f32 %v3123_v24, %v867_v55  ;;  %v1655_v8 = vmax.f32 %v1263_v56, 0.0  ;;  %v1656_v9 = vmax.f32 %v1264_v57, 0.0 }
  0xef   : > { %v1657_v10 = vmax.f32 %v1265_v58, 0.0  ;;  %v1267_v11 = vadd.f32 %v3123_v24, %v868_v59  ;;  %2044 = vst [vmem:[%s2301_s25 + $0x900] sm:$0xff] %v1652_v63  ;;  %2045 = vst [vmem:[%s2301_s25 + $0x908] sm:$0xff] %v1653_v2  ;;  %v869_v14 = vmul.f32 %v3137_v33, %v470_v60  ;;  %v870_v15 = vmul.f32 %v3137_v33, %v471_v61  ;;  %v3544_v60 = vld [vmem:[%s3888_s2] ss:$0 sm:$0xff]  ;;  %v487_v2 = vld [vmem:[%s2273_s20 + $0x9c8] sm:$0xff] }
  0xf0   : > { %2046 = vst [vmem:[%s2301_s25 + $0x910] sm:$0xff] %v1654_v3  ;;  %v1658_v13 = vmax.f32 %v1266_v4, 0.0  ;;  %v871_v16 = vmul.f32 %v3137_v33, %v472_v62  ;;  %2047 = vst [vmem:[%s2301_s25 + $0x918] sm:$0xff] %v1655_v8  ;;  %v872_v19 = vmul.f32 %v3137_v33, %v473_v5  ;;  %v873_v20 = vmul.f32 %v3137_v33, %v474_v6  ;;  %v486_v63 = vld [vmem:[%s2273_s20 + $0x9c0] sm:$0xff]  ;;  %v488_v3 = vld [vmem:[%s2273_s20 + $0x9d0] sm:$0xff] }
  0xf1   : > { %2048 = vst [vmem:[%s2301_s25 + $0x920] sm:$0xff] %v1656_v9  ;;  %2049 = vst [vmem:[%s2301_s25 + $0x928] sm:$0xff] %v1657_v10  ;;  %v1659_v18 = vmax.f32 %v1267_v11, 0.0  ;;  %v874_v21 = vmul.f32 %v3137_v33, %v475_v7  ;;  %v1268_v22 = vadd.f32 %v3123_v24, %v869_v14  ;;  %v1269_v23 = vadd.f32 %v3123_v24, %v870_v15  ;;  %v489_v7 = vld [vmem:[%s2273_s20 + $0x9d8] sm:$0xff]  ;;  %v490_v8 = vld [vmem:[%s2273_s20 + $0x9e0] sm:$0xff] }
  0xf2   : > { %2050 = vst [vmem:[%s2301_s25 + $0x930] sm:$0xff] %v1658_v13  ;;  %v1270_v25 = vadd.f32 %v3123_v24, %v871_v16  ;;  %v875_v48 = vmul.f32 %v3137_v33, %v476_v12  ;;  %v1271_v51 = vadd.f32 %v3123_v24, %v872_v19  ;;  %v1272_v26 = vadd.f32 %v3123_v24, %v873_v20  ;;  %v491_v9 = vld [vmem:[%s2273_s20 + $0x9e8] sm:$0xff]  ;;  %v492_v13 = vld [vmem:[%s2273_s20 + $0x9f0] sm:$0xff]  ;;  %v3563_v15 = vld [vmem:[%s3887_s1] ss:$0 sm:$0xff] }
  0xf3   : > { %2051 = vst [vmem:[%s2301_s25 + $0x938] sm:$0xff] %v1659_v18  ;;  %v1273_v27 = vadd.f32 %v3123_v24, %v874_v21  ;;  %v876_v28 = vmul.f32 %v3137_v33, %v477_v17  ;;  %v1660_v32 = vmax.f32 %v1268_v22, 0.0  ;;  %v1661_v34 = vmax.f32 %v1269_v23, 0.0  ;;  %v493_v19 = vld [vmem:[%s2273_s20 + $0x9f8] sm:$0xff] }
  0xf4   : > { %v1662_v35 = vmax.f32 %v1270_v25, 0.0  ;;  %v1274_v36 = vadd.f32 %v3123_v24, %v875_v48  ;;  %v1663_v40 = vmax.f32 %v1271_v51, 0.0  ;;  %v1664_v41 = vmax.f32 %v1272_v26, 0.0 }
  0xf5   : > { %v1665_v42 = vmax.f32 %v1273_v27, 0.0  ;;  %v1275_v43 = vadd.f32 %v3123_v24, %v876_v28  ;;  %2052 = vst [vmem:[%s2301_s25 + $0x940] sm:$0xff] %v1660_v32  ;;  %2053 = vst [vmem:[%s2301_s25 + $0x948] sm:$0xff] %v1661_v34  ;;  %v877_v46 = vmul.f32 %v3137_v33, %v478_v29  ;;  %v878_v0 = vmul.f32 %v3137_v33, %v479_v30  ;;  %v495_v32 = vld [vmem:[%s2273_s20 + $0xa08] sm:$0xff]  ;;  %v496_v34 = vld [vmem:[%s2273_s20 + $0xa10] sm:$0xff] }
  0xf6   : > { %2054 = vst [vmem:[%s2301_s25 + $0x950] sm:$0xff] %v1662_v35  ;;  %v1666_v45 = vmax.f32 %v1274_v36, 0.0  ;;  %v879_v47 = vmul.f32 %v3137_v33, %v480_v31  ;;  %2055 = vst [vmem:[%s2301_s25 + $0x958] sm:$0xff] %v1663_v40  ;;  %v880_v1 = vmul.f32 %v3137_v33, %v481_v37  ;;  %v881_v52 = vmul.f32 %v3137_v33, %v482_v38  ;;  %v494_v31 = vld [vmem:[%s2273_s20 + $0xa00] sm:$0xff] }
  0xf7   : > { %2056 = vst [vmem:[%s2301_s25 + $0x960] sm:$0xff] %v1664_v41  ;;  %2057 = vst [vmem:[%s2301_s25 + $0x968] sm:$0xff] %v1665_v42  ;;  %v1667_v50 = vmax.f32 %v1275_v43, 0.0  ;;  %v882_v53 = vmul.f32 %v3137_v33, %v483_v39  ;;  %v1276_v54 = vadd.f32 %v3123_v24, %v877_v46  ;;  %v1277_v55 = vadd.f32 %v3123_v24, %v878_v0  ;;  %v497_v39 = vld [vmem:[%s2273_s20 + $0xa18] sm:$0xff]  ;;  %v498_v40 = vld [vmem:[%s2273_s20 + $0xa20] sm:$0xff] }
  0xf8   : > { %2058 = vst [vmem:[%s2301_s25 + $0x970] sm:$0xff] %v1666_v45  ;;  %v1278_v56 = vadd.f32 %v3123_v24, %v879_v47  ;;  %v883_v57 = vmul.f32 %v3137_v33, %v484_v44  ;;  %v1279_v58 = vadd.f32 %v3123_v24, %v880_v1  ;;  %v1280_v59 = vadd.f32 %v3123_v24, %v881_v52  ;;  %v499_v41 = vld [vmem:[%s2273_s20 + $0xa28] sm:$0xff]  ;;  %v500_v46 = vld [vmem:[%s2273_s20 + $0xa30] sm:$0xff]  ;;  %v501_v1 = vld [vmem:[%s2273_s20 + $0xa38] sm:$0xff] }
  0xf9   : > { %2059 = vst [vmem:[%s2301_s25 + $0x978] sm:$0xff] %v1667_v50  ;;  %v1281_v61 = vadd.f32 %v3544_v60, %v882_v53  ;;  %v884_v62 = vmul.f32 %v3137_v33, %v485_v49  ;;  %v1668_v4 = vmax.f32 %v1276_v54, 0.0  ;;  %v1669_v5 = vmax.f32 %v1277_v55, 0.0 }
  0xfa   : > { %v1670_v6 = vmax.f32 %v1278_v56, 0.0  ;;  %v1282_v24 = vadd.f32 %v3544_v60, %v883_v57  ;;  %v1671_v10 = vmax.f32 %v1279_v58, 0.0  ;;  %v1672_v33 = vmax.f32 %v1280_v59, 0.0 }
  0xfb   : > { %v1673_v11 = vmax.f32 %v1281_v61, 0.0  ;;  %v1283_v12 = vadd.f32 %v3544_v60, %v884_v62  ;;  %2060 = vst [vmem:[%s2301_s25 + $0x980] sm:$0xff] %v1668_v4  ;;  %2061 = vst [vmem:[%s2301_s25 + $0x988] sm:$0xff] %v1669_v5  ;;  %v885_v16 = vmul.f32 %v3563_v15, %v486_v63  ;;  %v886_v17 = vmul.f32 %v3563_v15, %v487_v2  ;;  %v503_v4 = vld [vmem:[%s2273_s20 + $0xa48] sm:$0xff]  ;;  %v504_v5 = vld [vmem:[%s2273_s20 + $0xa50] sm:$0xff] }
  0xfc   : > { %2062 = vst [vmem:[%s2301_s25 + $0x990] sm:$0xff] %v1670_v6  ;;  %v1674_v14 = vmax.f32 %v1282_v24, 0.0  ;;  %v887_v18 = vmul.f32 %v3563_v15, %v488_v3  ;;  %2063 = vst [vmem:[%s2301_s25 + $0x998] sm:$0xff] %v1671_v10  ;;  %v888_v21 = vmul.f32 %v3563_v15, %v489_v7  ;;  %v889_v22 = vmul.f32 %v3563_v15, %v490_v8  ;;  %v502_v3 = vld [vmem:[%s2273_s20 + $0xa40] sm:$0xff] }
  0xfd   : > { %2064 = vst [vmem:[%s2301_s25 + $0x9a0] sm:$0xff] %v1672_v33  ;;  %2065 = vst [vmem:[%s2301_s25 + $0x9a8] sm:$0xff] %v1673_v11  ;;  %v1675_v20 = vmax.f32 %v1283_v12, 0.0  ;;  %v890_v23 = vmul.f32 %v3563_v15, %v491_v9  ;;  %v1284_v25 = vadd.f32 %v3544_v60, %v885_v16  ;;  %v1285_v48 = vadd.f32 %v3544_v60, %v886_v17  ;;  %v505_v9 = vld [vmem:[%s2273_s20 + $0xa58] sm:$0xff]  ;;  %v506_v10 = vld [vmem:[%s2273_s20 + $0xa60] sm:$0xff] }
  0xfe   : > { %2066 = vst [vmem:[%s2301_s25 + $0x9b0] sm:$0xff] %v1674_v14  ;;  %v1286_v51 = vadd.f32 %v3544_v60, %v887_v18  ;;  %v891_v26 = vmul.f32 %v3563_v15, %v492_v13  ;;  %v1287_v27 = vadd.f32 %v3544_v60, %v888_v21  ;;  %v1288_v28 = vadd.f32 %v3544_v60, %v889_v22  ;;  %v507_v33 = vld [vmem:[%s2273_s20 + $0xa68] sm:$0xff]  ;;  %v508_v16 = vld [vmem:[%s2273_s20 + $0xa70] sm:$0xff]  ;;  %v509_v21 = vld [vmem:[%s2273_s20 + $0xa78] sm:$0xff] }
  0xff   : > { %2067 = vst [vmem:[%s2301_s25 + $0x9b8] sm:$0xff] %v1675_v20  ;;  %v1289_v29 = vadd.f32 %v3544_v60, %v890_v23  ;;  %v892_v30 = vmul.f32 %v3563_v15, %v493_v19  ;;  %v1676_v35 = vmax.f32 %v1284_v25, 0.0  ;;  %v1677_v36 = vmax.f32 %v1285_v48, 0.0 }
 0x100   : > { %v1678_v37 = vmax.f32 %v1286_v51, 0.0  ;;  %v1290_v38 = vadd.f32 %v3544_v60, %v891_v26  ;;  %v1679_v42 = vmax.f32 %v1287_v27, 0.0  ;;  %v1680_v43 = vmax.f32 %v1288_v28, 0.0 }
 0x101   : > { %v1681_v44 = vmax.f32 %v1289_v29, 0.0  ;;  %v1291_v45 = vadd.f32 %v3544_v60, %v892_v30  ;;  %2068 = vst [vmem:[%s2301_s25 + $0x9c0] sm:$0xff] %v1676_v35  ;;  %2069 = vst [vmem:[%s2301_s25 + $0x9c8] sm:$0xff] %v1677_v36  ;;  %v893_v47 = vmul.f32 %v3563_v15, %v494_v31  ;;  %v894_v49 = vmul.f32 %v3563_v15, %v495_v32  ;;  %v511_v35 = vld [vmem:[%s2273_s20 + $0xa88] sm:$0xff]  ;;  %v512_v36 = vld [vmem:[%s2273_s20 + $0xa90] sm:$0xff] }
 0x102   : > { %2070 = vst [vmem:[%s2301_s25 + $0x9d0] sm:$0xff] %v1678_v37  ;;  %v1682_v0 = vmax.f32 %v1290_v38, 0.0  ;;  %v895_v50 = vmul.f32 %v3563_v15, %v496_v34  ;;  %2071 = vst [vmem:[%s2301_s25 + $0x9d8] sm:$0xff] %v1679_v42  ;;  %v896_v53 = vmul.f32 %v3563_v15, %v497_v39  ;;  %v897_v54 = vmul.f32 %v3563_v15, %v498_v40  ;;  %v510_v34 = vld [vmem:[%s2273_s20 + $0xa80] sm:$0xff] }
 0x103   : > { %2072 = vst [vmem:[%s2301_s25 + $0x9e0] sm:$0xff] %v1680_v43  ;;  %2073 = vst [vmem:[%s2301_s25 + $0x9e8] sm:$0xff] %v1681_v44  ;;  %v1683_v52 = vmax.f32 %v1291_v45, 0.0  ;;  %v898_v55 = vmul.f32 %v3563_v15, %v499_v41  ;;  %v1292_v56 = vadd.f32 %v3544_v60, %v893_v47  ;;  %v1293_v57 = vadd.f32 %v3544_v60, %v894_v49  ;;  %v513_v41 = vld [vmem:[%s2273_s20 + $0xa98] sm:$0xff]  ;;  %v514_v42 = vld [vmem:[%s2273_s20 + $0xaa0] sm:$0xff] }
 0x104   : > { %2074 = vst [vmem:[%s2301_s25 + $0x9f0] sm:$0xff] %v1682_v0  ;;  %v1294_v58 = vadd.f32 %v3544_v60, %v895_v50  ;;  %v899_v59 = vmul.f32 %v3563_v15, %v500_v46  ;;  %v1295_v61 = vadd.f32 %v3544_v60, %v896_v53  ;;  %v1296_v62 = vadd.f32 %v3544_v60, %v897_v54  ;;  %v515_v43 = vld [vmem:[%s2273_s20 + $0xaa8] sm:$0xff]  ;;  %v516_v47 = vld [vmem:[%s2273_s20 + $0xab0] sm:$0xff]  ;;  %v517_v53 = vld [vmem:[%s2273_s20 + $0xab8] sm:$0xff] }
 0x105   : > { %2075 = vst [vmem:[%s2301_s25 + $0x9f8] sm:$0xff] %v1683_v52  ;;  %v1297_v63 = vadd.f32 %v3544_v60, %v898_v55  ;;  %v900_v2 = vmul.f32 %v3563_v15, %v501_v1  ;;  %v1684_v6 = vmax.f32 %v1292_v56, 0.0  ;;  %v1685_v24 = vmax.f32 %v1293_v57, 0.0 }
 0x106   : > { %v1686_v7 = vmax.f32 %v1294_v58, 0.0  ;;  %v1298_v8 = vadd.f32 %v3544_v60, %v899_v59  ;;  %v1687_v11 = vmax.f32 %v1295_v61, 0.0  ;;  %v1688_v12 = vmax.f32 %v1296_v62, 0.0 }
 0x107   : > { %v1689_v13 = vmax.f32 %v1297_v63, 0.0  ;;  %v1299_v14 = vadd.f32 %v3544_v60, %v900_v2  ;;  %2076 = vst [vmem:[%s2301_s25 + $0xa00] sm:$0xff] %v1684_v6  ;;  %2077 = vst [vmem:[%s2301_s25 + $0xa08] sm:$0xff] %v1685_v24  ;;  %v901_v18 = vmul.f32 %v3563_v15, %v502_v3  ;;  %v902_v19 = vmul.f32 %v3563_v15, %v503_v4  ;;  %v519_v6 = vld [vmem:[%s2273_s20 + $0xac8] sm:$0xff]  ;;  %v520_v24 = vld [vmem:[%s2273_s20 + $0xad0] sm:$0xff] }
 0x108   : > { %2078 = vst [vmem:[%s2301_s25 + $0xa10] sm:$0xff] %v1686_v7  ;;  %v1690_v17 = vmax.f32 %v1298_v8, 0.0  ;;  %v903_v20 = vmul.f32 %v3563_v15, %v504_v5  ;;  %2079 = vst [vmem:[%s2301_s25 + $0xa18] sm:$0xff] %v1687_v11  ;;  %v904_v23 = vmul.f32 %v3563_v15, %v505_v9  ;;  %v905_v25 = vmul.f32 %v3563_v15, %v506_v10  ;;  %v518_v5 = vld [vmem:[%s2273_s20 + $0xac0] sm:$0xff] }
 0x109   : > { %2080 = vst [vmem:[%s2301_s25 + $0xa20] sm:$0xff] %v1688_v12  ;;  %2081 = vst [vmem:[%s2301_s25 + $0xa28] sm:$0xff] %v1689_v13  ;;  %v1691_v22 = vmax.f32 %v1299_v14, 0.0  ;;  %v906_v48 = vmul.f32 %v3563_v15, %v507_v33  ;;  %v1300_v51 = vadd.f32 %v3544_v60, %v901_v18  ;;  %v1301_v26 = vadd.f32 %v3544_v60, %v902_v19  ;;  %v521_v33 = vld [vmem:[%s2273_s20 + $0xad8] sm:$0xff]  ;;  %v522_v11 = vld [vmem:[%s2273_s20 + $0xae0] sm:$0xff] }
 0x10a   : > { %2082 = vst [vmem:[%s2301_s25 + $0xa30] sm:$0xff] %v1690_v17  ;;  %v1302_v27 = vadd.f32 %v3544_v60, %v903_v20  ;;  %v907_v28 = vmul.f32 %v3563_v15, %v508_v16  ;;  %v1303_v29 = vadd.f32 %v3544_v60, %v904_v23  ;;  %v1304_v30 = vadd.f32 %v3544_v60, %v905_v25  ;;  %v523_v12 = vld [vmem:[%s2273_s20 + $0xae8] sm:$0xff]  ;;  %v524_v18 = vld [vmem:[%s2273_s20 + $0xaf0] sm:$0xff]  ;;  %v525_v23 = vld [vmem:[%s2273_s20 + $0xaf8] sm:$0xff] }
 0x10b   : > { %2083 = vst [vmem:[%s2301_s25 + $0xa38] sm:$0xff] %v1691_v22  ;;  %v1305_v31 = vadd.f32 %v3544_v60, %v906_v48  ;;  %v908_v32 = vmul.f32 %v3563_v15, %v509_v21  ;;  %v1692_v37 = vmax.f32 %v1300_v51, 0.0  ;;  %v1693_v38 = vmax.f32 %v1301_v26, 0.0 }
 0x10c   : > { %v1694_v39 = vmax.f32 %v1302_v27, 0.0  ;;  %v1306_v40 = vadd.f32 %v3544_v60, %v907_v28  ;;  %v1695_v44 = vmax.f32 %v1303_v29, 0.0  ;;  %v1696_v45 = vmax.f32 %v1304_v30, 0.0 }
 0x10d   : > { %v1697_v46 = vmax.f32 %v1305_v31, 0.0  ;;  %v1307_v0 = vadd.f32 %v3544_v60, %v908_v32  ;;  %2084 = vst [vmem:[%s2301_s25 + $0xa40] sm:$0xff] %v1692_v37  ;;  %2085 = vst [vmem:[%s2301_s25 + $0xa48] sm:$0xff] %v1693_v38  ;;  %v909_v50 = vmul.f32 %v3563_v15, %v510_v34  ;;  %v910_v1 = vmul.f32 %v3563_v15, %v511_v35  ;;  %v527_v37 = vld [vmem:[%s2273_s20 + $0xb08] sm:$0xff]  ;;  %v528_v38 = vld [vmem:[%s2273_s20 + $0xb10] sm:$0xff] }
 0x10e   : > { %2086 = vst [vmem:[%s2301_s25 + $0xa50] sm:$0xff] %v1694_v39  ;;  %v1698_v49 = vmax.f32 %v1306_v40, 0.0  ;;  %v911_v52 = vmul.f32 %v3563_v15, %v512_v36  ;;  %2087 = vst [vmem:[%s2301_s25 + $0xa58] sm:$0xff] %v1695_v44  ;;  %v912_v55 = vmul.f32 %v3563_v15, %v513_v41  ;;  %v913_v56 = vmul.f32 %v3563_v15, %v514_v42  ;;  %v526_v36 = vld [vmem:[%s2273_s20 + $0xb00] sm:$0xff] }
 0x10f   : > { %2088 = vst [vmem:[%s2301_s25 + $0xa60] sm:$0xff] %v1696_v45  ;;  %2089 = vst [vmem:[%s2301_s25 + $0xa68] sm:$0xff] %v1697_v46  ;;  %v1699_v54 = vmax.f32 %v1307_v0, 0.0  ;;  %v914_v57 = vmul.f32 %v3563_v15, %v515_v43  ;;  %v1308_v58 = vadd.f32 %v3544_v60, %v909_v50  ;;  %v1309_v59 = vadd.f32 %v3544_v60, %v910_v1  ;;  %v529_v43 = vld [vmem:[%s2273_s20 + $0xb18] sm:$0xff]  ;;  %v530_v44 = vld [vmem:[%s2273_s20 + $0xb20] sm:$0xff] }
 0x110   : > { %2090 = vst [vmem:[%s2301_s25 + $0xa70] sm:$0xff] %v1698_v49  ;;  %v1310_v61 = vadd.f32 %v3544_v60, %v911_v52  ;;  %v915_v62 = vmul.f32 %v3563_v15, %v516_v47  ;;  %v1311_v63 = vadd.f32 %v3544_v60, %v912_v55  ;;  %v1312_v2 = vadd.f32 %v3544_v60, %v913_v56  ;;  %v531_v45 = vld [vmem:[%s2273_s20 + $0xb28] sm:$0xff]  ;;  %v532_v50 = vld [vmem:[%s2273_s20 + $0xb30] sm:$0xff]  ;;  %v533_v55 = vld [vmem:[%s2273_s20 + $0xb38] sm:$0xff] }
 0x111   : > { %2091 = vst [vmem:[%s2301_s25 + $0xa78] sm:$0xff] %v1699_v54  ;;  %v1313_v3 = vadd.f32 %v3544_v60, %v914_v57  ;;  %v916_v4 = vmul.f32 %v3563_v15, %v517_v53  ;;  %v1700_v7 = vmax.f32 %v1308_v58, 0.0  ;;  %v1701_v8 = vmax.f32 %v1309_v59, 0.0 }
 0x112   : > { %v1702_v9 = vmax.f32 %v1310_v61, 0.0  ;;  %v1314_v10 = vadd.f32 %v3544_v60, %v915_v62  ;;  %v1703_v13 = vmax.f32 %v1311_v63, 0.0  ;;  %v1704_v14 = vmax.f32 %v1312_v2, 0.0 }
 0x113   : > { %v1705_v16 = vmax.f32 %v1313_v3, 0.0  ;;  %v1315_v17 = vadd.f32 %v3544_v60, %v916_v4  ;;  %2092 = vst [vmem:[%s2301_s25 + $0xa80] sm:$0xff] %v1700_v7  ;;  %2093 = vst [vmem:[%s2301_s25 + $0xa88] sm:$0xff] %v1701_v8  ;;  %v917_v20 = vmul.f32 %v3563_v15, %v518_v5  ;;  %v918_v21 = vmul.f32 %v3563_v15, %v519_v6  ;;  %v535_v7 = vld [vmem:[%s2273_s20 + $0xb48] sm:$0xff]  ;;  %v536_v8 = vld [vmem:[%s2273_s20 + $0xb50] sm:$0xff] }
 0x114   : > { %2094 = vst [vmem:[%s2301_s25 + $0xa90] sm:$0xff] %v1702_v9  ;;  %v1706_v19 = vmax.f32 %v1314_v10, 0.0  ;;  %v919_v22 = vmul.f32 %v3563_v15, %v520_v24  ;;  %2095 = vst [vmem:[%s2301_s25 + $0xa98] sm:$0xff] %v1703_v13  ;;  %v920_v48 = vmul.f32 %v3563_v15, %v521_v33  ;;  %v921_v51 = vmul.f32 %v3563_v15, %v522_v11  ;;  %v534_v24 = vld [vmem:[%s2273_s20 + $0xb40] sm:$0xff] }
 0x115   : > { %2096 = vst [vmem:[%s2301_s25 + $0xaa0] sm:$0xff] %v1704_v14  ;;  %2097 = vst [vmem:[%s2301_s25 + $0xaa8] sm:$0xff] %v1705_v16  ;;  %v1707_v25 = vmax.f32 %v1315_v17, 0.0  ;;  %v922_v26 = vmul.f32 %v3563_v15, %v523_v12  ;;  %v1316_v27 = vadd.f32 %v3544_v60, %v917_v20  ;;  %v1317_v28 = vadd.f32 %v3544_v60, %v918_v21  ;;  %v537_v12 = vld [vmem:[%s2273_s20 + $0xb58] sm:$0xff]  ;;  %v538_v13 = vld [vmem:[%s2273_s20 + $0xb60] sm:$0xff] }
 0x116   : > { %2098 = vst [vmem:[%s2301_s25 + $0xab0] sm:$0xff] %v1706_v19  ;;  %v1318_v29 = vadd.f32 %v3544_v60, %v919_v22  ;;  %v923_v30 = vmul.f32 %v3563_v15, %v524_v18  ;;  %v1319_v31 = vadd.f32 %v3544_v60, %v920_v48  ;;  %v1320_v32 = vadd.f32 %v3544_v60, %v921_v51  ;;  %v539_v14 = vld [vmem:[%s2273_s20 + $0xb68] sm:$0xff]  ;;  %v540_v20 = vld [vmem:[%s2273_s20 + $0xb70] sm:$0xff]  ;;  %v541_v48 = vld [vmem:[%s2273_s20 + $0xb78] sm:$0xff] }
 0x117   : > { %2099 = vst [vmem:[%s2301_s25 + $0xab8] sm:$0xff] %v1707_v25  ;;  %v1321_v34 = vadd.f32 %v3544_v60, %v922_v26  ;;  %v924_v35 = vmul.f32 %v3563_v15, %v525_v23  ;;  %v1708_v39 = vmax.f32 %v1316_v27, 0.0  ;;  %v1709_v40 = vmax.f32 %v1317_v28, 0.0 }
 0x118   : > { %v1710_v41 = vmax.f32 %v1318_v29, 0.0  ;;  %v1322_v42 = vadd.f32 %v3544_v60, %v923_v30  ;;  %v1711_v46 = vmax.f32 %v1319_v31, 0.0  ;;  %v1712_v0 = vmax.f32 %v1320_v32, 0.0 }
 0x119   : > { %v1713_v47 = vmax.f32 %v1321_v34, 0.0  ;;  %v1323_v49 = vadd.f32 %v3544_v60, %v924_v35  ;;  %2100 = vst [vmem:[%s2301_s25 + $0xac0] sm:$0xff] %v1708_v39  ;;  %2101 = vst [vmem:[%s2301_s25 + $0xac8] sm:$0xff] %v1709_v40  ;;  %v925_v52 = vmul.f32 %v3563_v15, %v526_v36  ;;  %v926_v53 = vmul.f32 %v3563_v15, %v527_v37  ;;  %v543_v39 = vld [vmem:[%s2273_s20 + $0xb88] sm:$0xff]  ;;  %v544_v40 = vld [vmem:[%s2273_s20 + $0xb90] sm:$0xff] }
 0x11a   : > { %2102 = vst [vmem:[%s2301_s25 + $0xad0] sm:$0xff] %v1710_v41  ;;  %v1714_v1 = vmax.f32 %v1322_v42, 0.0  ;;  %v927_v54 = vmul.f32 %v3563_v15, %v528_v38  ;;  %2103 = vst [vmem:[%s2301_s25 + $0xad8] sm:$0xff] %v1711_v46  ;;  %v928_v57 = vmul.f32 %v3563_v15, %v529_v43  ;;  %v929_v58 = vmul.f32 %v3563_v15, %v530_v44  ;;  %v542_v38 = vld [vmem:[%s2273_s20 + $0xb80] sm:$0xff] }
 0x11b   : > { %2104 = vst [vmem:[%s2301_s25 + $0xae0] sm:$0xff] %v1712_v0  ;;  %2105 = vst [vmem:[%s2301_s25 + $0xae8] sm:$0xff] %v1713_v47  ;;  %v1715_v56 = vmax.f32 %v1323_v49, 0.0  ;;  %v930_v59 = vmul.f32 %v3563_v15, %v531_v45  ;;  %v1324_v61 = vadd.f32 %v3544_v60, %v925_v52  ;;  %v1325_v62 = vadd.f32 %v3544_v60, %v926_v53  ;;  %v545_v45 = vld [vmem:[%s2273_s20 + $0xb98] sm:$0xff]  ;;  %v546_v46 = vld [vmem:[%s2273_s20 + $0xba0] sm:$0xff] }
 0x11c   : > { %2106 = vst [vmem:[%s2301_s25 + $0xaf0] sm:$0xff] %v1714_v1  ;;  %v1326_v63 = vadd.f32 %v3544_v60, %v927_v54  ;;  %v931_v2 = vmul.f32 %v3563_v15, %v532_v50  ;;  %v1327_v3 = vadd.f32 %v3544_v60, %v928_v57  ;;  %v1328_v4 = vadd.f32 %v3544_v60, %v929_v58  ;;  %v547_v0 = vld [vmem:[%s2273_s20 + $0xba8] sm:$0xff]  ;;  %v548_v52 = vld [vmem:[%s2273_s20 + $0xbb0] sm:$0xff]  ;;  %v549_v57 = vld [vmem:[%s2273_s20 + $0xbb8] sm:$0xff] }
 0x11d   : > { %2107 = vst [vmem:[%s2301_s25 + $0xaf8] sm:$0xff] %v1715_v56  ;;  %v1329_v5 = vadd.f32 %v3544_v60, %v930_v59  ;;  %v932_v6 = vmul.f32 %v3563_v15, %v533_v55  ;;  %v1716_v9 = vmax.f32 %v1324_v61, 0.0  ;;  %v1717_v10 = vmax.f32 %v1325_v62, 0.0 }
 0x11e   : > { %v1718_v33 = vmax.f32 %v1326_v63, 0.0  ;;  %v1330_v11 = vadd.f32 %v3544_v60, %v931_v2  ;;  %v1719_v16 = vmax.f32 %v1327_v3, 0.0  ;;  %v1720_v17 = vmax.f32 %v1328_v4, 0.0 }
 0x11f   : > { %v1721_v18 = vmax.f32 %v1329_v5, 0.0  ;;  %v1331_v19 = vadd.f32 %v3544_v60, %v932_v6  ;;  %2108 = vst [vmem:[%s2301_s25 + $0xb00] sm:$0xff] %v1716_v9  ;;  %2109 = vst [vmem:[%s2301_s25 + $0xb08] sm:$0xff] %v1717_v10  ;;  %v933_v22 = vmul.f32 %v3563_v15, %v534_v24  ;;  %v934_v23 = vmul.f32 %v3563_v15, %v535_v7  ;;  %v551_v9 = vld [vmem:[%s2273_s20 + $0xbc8] sm:$0xff]  ;;  %v552_v10 = vld [vmem:[%s2273_s20 + $0xbd0] sm:$0xff] }
 0x120   : > { %2110 = vst [vmem:[%s2301_s25 + $0xb10] sm:$0xff] %v1718_v33  ;;  %v1722_v21 = vmax.f32 %v1330_v11, 0.0  ;;  %v935_v25 = vmul.f32 %v3563_v15, %v536_v8  ;;  %2111 = vst [vmem:[%s2301_s25 + $0xb18] sm:$0xff] %v1719_v16  ;;  %v936_v26 = vmul.f32 %v3563_v15, %v537_v12  ;;  %v937_v27 = vmul.f32 %v3563_v15, %v538_v13  ;;  %v550_v8 = vld [vmem:[%s2273_s20 + $0xbc0] sm:$0xff] }
 0x121   : > { %2112 = vst [vmem:[%s2301_s25 + $0xb20] sm:$0xff] %v1720_v17  ;;  %2113 = vst [vmem:[%s2301_s25 + $0xb28] sm:$0xff] %v1721_v18  ;;  %v1723_v51 = vmax.f32 %v1331_v19, 0.0  ;;  %v938_v28 = vmul.f32 %v3563_v15, %v539_v14  ;;  %v1332_v29 = vadd.f32 %v3544_v60, %v933_v22  ;;  %v1333_v30 = vadd.f32 %v3544_v60, %v934_v23  ;;  %v553_v14 = vld [vmem:[%s2273_s20 + $0xbd8] sm:$0xff]  ;;  %v554_v16 = vld [vmem:[%s2273_s20 + $0xbe0] sm:$0xff] }
 0x122   : > { %2114 = vst [vmem:[%s2301_s25 + $0xb30] sm:$0xff] %v1722_v21  ;;  %v1334_v31 = vadd.f32 %v3544_v60, %v935_v25  ;;  %v939_v32 = vmul.f32 %v3563_v15, %v540_v20  ;;  %v1335_v34 = vadd.f32 %v3544_v60, %v936_v26  ;;  %v1336_v35 = vadd.f32 %v3544_v60, %v937_v27  ;;  %v555_v17 = vld [vmem:[%s2273_s20 + $0xbe8] sm:$0xff]  ;;  %v556_v22 = vld [vmem:[%s2273_s20 + $0xbf0] sm:$0xff]  ;;  %v557_v26 = vld [vmem:[%s2273_s20 + $0xbf8] sm:$0xff] }
 0x123   : > { %2115 = vst [vmem:[%s2301_s25 + $0xb38] sm:$0xff] %v1723_v51  ;;  %v1337_v36 = vadd.f32 %v3544_v60, %v938_v28  ;;  %v940_v37 = vmul.f32 %v3563_v15, %v541_v48  ;;  %v1724_v41 = vmax.f32 %v1332_v29, 0.0  ;;  %v1725_v42 = vmax.f32 %v1333_v30, 0.0 }
 0x124   : > { %v1726_v43 = vmax.f32 %v1334_v31, 0.0  ;;  %v1338_v44 = vadd.f32 %v3544_v60, %v939_v32  ;;  %v1727_v47 = vmax.f32 %v1335_v34, 0.0  ;;  %v1728_v49 = vmax.f32 %v1336_v35, 0.0 }
 0x125   : > { %v1729_v50 = vmax.f32 %v1337_v36, 0.0  ;;  %v1339_v1 = vadd.f32 %v3544_v60, %v940_v37  ;;  %2116 = vst [vmem:[%s2301_s25 + $0xb40] sm:$0xff] %v1724_v41  ;;  %2117 = vst [vmem:[%s2301_s25 + $0xb48] sm:$0xff] %v1725_v42  ;;  %v941_v54 = vmul.f32 %v3563_v15, %v542_v38  ;;  %v942_v55 = vmul.f32 %v3563_v15, %v543_v39  ;;  %v559_v41 = vld [vmem:[%s2273_s20 + $0xc08] sm:$0xff]  ;;  %v560_v42 = vld [vmem:[%s2273_s20 + $0xc10] sm:$0xff] }
 0x126   : > { %2118 = vst [vmem:[%s2301_s25 + $0xb50] sm:$0xff] %v1726_v43  ;;  %v1730_v53 = vmax.f32 %v1338_v44, 0.0  ;;  %v943_v56 = vmul.f32 %v3563_v15, %v544_v40  ;;  %2119 = vst [vmem:[%s2301_s25 + $0xb58] sm:$0xff] %v1727_v47  ;;  %v944_v59 = vmul.f32 %v3563_v15, %v545_v45  ;;  %v945_v61 = vmul.f32 %v3563_v15, %v546_v46  ;;  %v558_v40 = vld [vmem:[%s2273_s20 + $0xc00] sm:$0xff] }
 0x127   : > { %2120 = vst [vmem:[%s2301_s25 + $0xb60] sm:$0xff] %v1728_v49  ;;  %2121 = vst [vmem:[%s2301_s25 + $0xb68] sm:$0xff] %v1729_v50  ;;  %v1731_v58 = vmax.f32 %v1339_v1, 0.0  ;;  %v946_v62 = vmul.f32 %v3563_v15, %v547_v0  ;;  %v1340_v63 = vadd.f32 %v3544_v60, %v941_v54  ;;  %v1341_v2 = vadd.f32 %v3544_v60, %v942_v55  ;;  %v561_v0 = vld [vmem:[%s2273_s20 + $0xc18] sm:$0xff]  ;;  %v562_v47 = vld [vmem:[%s2273_s20 + $0xc20] sm:$0xff] }
 0x128   : > { %2122 = vst [vmem:[%s2301_s25 + $0xb70] sm:$0xff] %v1730_v53  ;;  %v1342_v3 = vadd.f32 %v3544_v60, %v943_v56  ;;  %v947_v4 = vmul.f32 %v3563_v15, %v548_v52  ;;  %v1343_v5 = vadd.f32 %v3544_v60, %v944_v59  ;;  %v1344_v6 = vadd.f32 %v3544_v60, %v945_v61  ;;  %v563_v49 = vld [vmem:[%s2273_s20 + $0xc28] sm:$0xff]  ;;  %v564_v54 = vld [vmem:[%s2273_s20 + $0xc30] sm:$0xff]  ;;  %v565_v59 = vld [vmem:[%s2273_s20 + $0xc38] sm:$0xff] }
 0x129   : > { %2123 = vst [vmem:[%s2301_s25 + $0xb78] sm:$0xff] %v1731_v58  ;;  %v1345_v24 = vadd.f32 %v3544_v60, %v946_v62  ;;  %v948_v7 = vmul.f32 %v3563_v15, %v549_v57  ;;  %v1732_v33 = vmax.f32 %v1340_v63, 0.0  ;;  %v1733_v11 = vmax.f32 %v1341_v2, 0.0 }
 0x12a   : > { %v1734_v12 = vmax.f32 %v1342_v3, 0.0  ;;  %v1346_v13 = vadd.f32 %v3544_v60, %v947_v4  ;;  %v1735_v18 = vmax.f32 %v1343_v5, 0.0  ;;  %v1736_v19 = vmax.f32 %v1344_v6, 0.0 }
 0x12b   : > { %v1737_v20 = vmax.f32 %v1345_v24, 0.0  ;;  %v1347_v21 = vadd.f32 %v3544_v60, %v948_v7  ;;  %2124 = vst [vmem:[%s2301_s25 + $0xb80] sm:$0xff] %v1732_v33  ;;  %2125 = vst [vmem:[%s2301_s25 + $0xb88] sm:$0xff] %v1733_v11  ;;  %v949_v25 = vmul.f32 %v3563_v15, %v550_v8  ;;  %v950_v48 = vmul.f32 %v3563_v15, %v551_v9 }
 0x12c   : > { %2126 = vst [vmem:[%s2301_s25 + $0xb90] sm:$0xff] %v1734_v12  ;;  %v1738_v23 = vmax.f32 %v1346_v13, 0.0  ;;  %v951_v51 = vmul.f32 %v3563_v15, %v552_v10  ;;  %2127 = vst [vmem:[%s2301_s25 + $0xb98] sm:$0xff] %v1735_v18  ;;  %v952_v28 = vmul.f32 %v3563_v15, %v553_v14  ;;  %v953_v29 = vmul.f32 %v3563_v15, %v554_v16 }
 0x12d   : > { %2128 = vst [vmem:[%s2301_s25 + $0xba0] sm:$0xff] %v1736_v19  ;;  %2129 = vst [vmem:[%s2301_s25 + $0xba8] sm:$0xff] %v1737_v20  ;;  %v1739_v27 = vmax.f32 %v1347_v21, 0.0  ;;  %v954_v30 = vmul.f32 %v3563_v15, %v555_v17  ;;  %v1348_v31 = vadd.f32 %v3544_v60, %v949_v25  ;;  %v1349_v32 = vadd.f32 %v3544_v60, %v950_v48 }
 0x12e   : > { %2130 = vst [vmem:[%s2301_s25 + $0xbb0] sm:$0xff] %v1738_v23  ;;  %v1350_v34 = vadd.f32 %v3544_v60, %v951_v51  ;;  %v955_v35 = vmul.f32 %v3563_v15, %v556_v22  ;;  %v1351_v36 = vadd.f32 %v3544_v60, %v952_v28  ;;  %v1352_v37 = vadd.f32 %v3544_v60, %v953_v29 }
 0x12f   : > { %2131 = vst [vmem:[%s2301_s25 + $0xbb8] sm:$0xff] %v1739_v27  ;;  %v1353_v38 = vadd.f32 %v3544_v60, %v954_v30  ;;  %v956_v39 = vmul.f32 %v3563_v15, %v557_v26  ;;  %v1740_v43 = vmax.f32 %v1348_v31, 0.0  ;;  %v1741_v44 = vmax.f32 %v1349_v32, 0.0 }
 0x130   : > { %v1742_v45 = vmax.f32 %v1350_v34, 0.0  ;;  %v1354_v46 = vadd.f32 %v3544_v60, %v955_v35  ;;  %v1743_v50 = vmax.f32 %v1351_v36, 0.0  ;;  %v1744_v1 = vmax.f32 %v1352_v37, 0.0 }
 0x131   : > { %v1745_v52 = vmax.f32 %v1353_v38, 0.0  ;;  %v1355_v53 = vadd.f32 %v3544_v60, %v956_v39  ;;  %2132 = vst [vmem:[%s2301_s25 + $0xbc0] sm:$0xff] %v1740_v43  ;;  %2133 = vst [vmem:[%s2301_s25 + $0xbc8] sm:$0xff] %v1741_v44  ;;  %v957_v56 = vmul.f32 %v3563_v15, %v558_v40  ;;  %v958_v57 = vmul.f32 %v3563_v15, %v559_v41 }
 0x132   : > { %2134 = vst [vmem:[%s2301_s25 + $0xbd0] sm:$0xff] %v1742_v45  ;;  %v1746_v55 = vmax.f32 %v1354_v46, 0.0  ;;  %v959_v58 = vmul.f32 %v3563_v15, %v560_v42  ;;  %2135 = vst [vmem:[%s2301_s25 + $0xbd8] sm:$0xff] %v1743_v50  ;;  %v960_v62 = vmul.f32 %v3563_v15, %v561_v0  ;;  %v961_v63 = vmul.f32 %v3563_v15, %v562_v47 }
 0x133   : > { %2136 = vst [vmem:[%s2301_s25 + $0xbe0] sm:$0xff] %v1744_v1  ;;  %2137 = vst [vmem:[%s2301_s25 + $0xbe8] sm:$0xff] %v1745_v52  ;;  %v1747_v61 = vmax.f32 %v1355_v53, 0.0  ;;  %v962_v2 = vmul.f32 %v3563_v15, %v563_v49  ;;  %v1356_v3 = vadd.f32 %v3544_v60, %v957_v56  ;;  %v1357_v4 = vadd.f32 %v3544_v60, %v958_v57 }
 0x134   : > { %2138 = vst [vmem:[%s2301_s25 + $0xbf0] sm:$0xff] %v1746_v55  ;;  %v1358_v5 = vadd.f32 %v3544_v60, %v959_v58  ;;  %v963_v6 = vmul.f32 %v3563_v15, %v564_v54  ;;  %v1359_v24 = vadd.f32 %v3544_v60, %v960_v62  ;;  %v1360_v7 = vadd.f32 %v3544_v60, %v961_v63 }
 0x135   : > { %2139 = vst [vmem:[%s2301_s25 + $0xbf8] sm:$0xff] %v1747_v61  ;;  %v1361_v8 = vadd.f32 %v3544_v60, %v962_v2  ;;  %v964_v9 = vmul.f32 %v3563_v15, %v565_v59  ;;  %v1748_v10 = vmax.f32 %v1356_v3, 0.0  ;;  %v1749_v33 = vmax.f32 %v1357_v4, 0.0 }
 0x136   : > { %v1750_v11 = vmax.f32 %v1358_v5, 0.0  ;;  %v1362_v12 = vadd.f32 %v3544_v60, %v963_v6  ;;  %v1751_v13 = vmax.f32 %v1359_v24, 0.0  ;;  %v1752_v14 = vmax.f32 %v1360_v7, 0.0 }
 0x137   : > { %v1753_v16 = vmax.f32 %v1361_v8, 0.0  ;;  %v1363_v17 = vadd.f32 %v3544_v60, %v964_v9  ;;  %2140 = vst [vmem:[%s2301_s25 + $0xc00] sm:$0xff] %v1748_v10  ;;  %2141 = vst [vmem:[%s2301_s25 + $0xc08] sm:$0xff] %v1749_v33 }
 0x138   : > { %2142 = vst [vmem:[%s2301_s25 + $0xc10] sm:$0xff] %v1750_v11  ;;  %v1754_v18 = vmax.f32 %v1362_v12, 0.0  ;;  %2143 = vst [vmem:[%s2301_s25 + $0xc18] sm:$0xff] %v1751_v13 }
 0x139   : > { %2144 = vst [vmem:[%s2301_s25 + $0xc20] sm:$0xff] %v1752_v14  ;;  %2145 = vst [vmem:[%s2301_s25 + $0xc28] sm:$0xff] %v1753_v16  ;;  %v1755_v15 = vmax.f32 %v1363_v17, 0.0 }
 0x13a   : > { %2146 = vst [vmem:[%s2301_s25 + $0xc30] sm:$0xff] %v1754_v18 }
 0x13b   : > { %2147 = vst [vmem:[%s2301_s25 + $0xc38] sm:$0xff] %v1755_v15 }
 0x13c PF: > { %s13_s12 = sadd.s32 1, %s2235_s12  }
 0x13d   : > { %p10_p4 = scmp.ge.s32.totalorder %s13_s12, 4  }
 0x13f   :  { %12 = sbr.rel (!%p10_p4) target bundleno = 1 (0x1), region = 62 }

// kernel: tile.29
= control target key start
LH: loop header
LB: loop body
LE: loop exit
PB: predicated region body
PF: predicated region fallthrough
CT: control target
= control target key end

     0   :  { %s22_s0 = inlined_call_operand.vmem [shape: f32[64], index: 0, kind: input, shape index: {}]   ;;  %s23_s1 = inlined_call_operand.vmem [shape: f32[2,64], index: 1, kind: output, shape index: {}]  }
   0x1   :  { %v4_v0 = vld [vmem:[%s22_s0] ss:$0 sm:$0xff] }
   0x2   :  { %5 = vst [vmem:[%s23_s1] sm:$0x3] %v4_v0 }

// kernel: tile.31
= control target key start
LH: loop header
LB: loop body
LE: loop exit
PB: predicated region body
PF: predicated region fallthrough
CT: control target
= control target key end

     0   :  { %vm7_vm0 = vcmask 523264   ;;  %vm13_vm1 = vcmask 1048064   ;;  %s39_s0 = inlined_call_operand.vmem [shape: f32[2,64], index: 0, kind: input, shape index: {}]   ;;  %s40_s1 = inlined_call_operand.vmem [shape: f32[1,128], index: 1, kind: output, shape index: {}]  }
   0x1   :  { %v4_v0 = vld [vmem:[%s39_s0] sm:$0x3]  ;;  %s22_s0 = smov 64  }
   0x2   :  { %5 = vst [vmem:[#allocation1] sm:$0x3] %v4_v0 }
   0x9   :  { %v10_v1 = vld [vmem:[#allocation1 + $0x1] sm:$0x1]   ;;  %v6_v2 = vld [vmem:[#allocation1] sm:$0x1]  }
   0xa   :  { %11 = vrot.lane.b32.xlu0 %v10_v1, %s22_s0  ;;  %8 = vst.msk [vmem:[#allocation0] sm:$0x1] %vm7_vm0, %v6_v2  }
  0x7c   :  { %v12_v3 = vpop.permute.xlu0 %11  }
  0x7d   :  { %14 = vst.msk [vmem:[#allocation0] sm:$0x1] %vm13_vm1, %v12_v3  }
  0x84   :  { %v18_v4 = vld [vmem:[#allocation0] sm:$0x1] }
  0x85   :  { %20 = vst [vmem:[%s40_s1] sm:$0x1] %v18_v4 }

// kernel: recon224_forward.9
= control target key start
LH: loop header
LB: loop body
LE: loop exit
PB: predicated region body
PF: predicated region fallthrough
CT: control target
= control target key end

     0   :  { %s2257_s12 = smov 0   ;;  %s3886_s0 = inlined_call_operand.vmem [shape: f32[12544,128], index: 0, kind: input, shape index: {}]   ;;  %s3887_s1 = inlined_call_operand.vmem [shape: f32[1,128], index: 1, kind: input, shape index: {}]   ;;  %s3888_s2 = inlined_call_operand.vmem [shape: f32[1,128], index: 2, kind: input, shape index: {}]   ;;  %s3889_s3 = inlined_call_operand.vmem [shape: f32[12544,128], index: 3, kind: output, shape index: {}]  }
   0x1 LB: > { %s2204_s13 = sadd.s32 4294967295, %s2235_s12   ;;  %p2208_p0 = scmp.ge.s32.totalorder %s2235_s12, 1  ;;  %s2235_s12 = sphi %s2257_s12, %s13_s12  }
   0x2   : > { %p138_p1 = scmp.lt.s32.totalorder %s2235_s12, 5 }
   0x4   : > { %p139_p2 = pnand %p2208_p0, %p138_p1 }
   0x5   : > { %s162_s14 = smul.u32 (!%p139_p2), 392, %s2204_s13  ;;  %v2268_v0 = vld [vmem:[%s3887_s1] ss:$0 sm:$0xff] (!%p139_p2) }
   0x6   : > { %142 = sbr.rel (%p139_p2) target bundleno = 316 (0x13c), region = 32  ;;  %v2278_v1 = vld [vmem:[%s3888_s2] ss:$0 sm:$0xff] (!%p139_p2) }
   0x7   : > { %p163_p3 = scmp.lt.s32.totalorder (!%p139_p2), %s162_s14, 1567 }
   0xd   : > { %s3891_s14 = smov (!%p163_p3, %s162_s14), 1567 }
   0xe   : > { %s2209_s15 = sshll.u32 %s3891_s14, 3 }
   0xf   : > { %s2273_s20 = scalar_lea.vmem %s3886_s0, %s2209_s15  ;;  %s2301_s25 = scalar_lea.vmem %s3889_s3, %s2209_s15 }
  0x10   : > { %v174_v2 = vld [vmem:[%s2273_s20] sm:$0xff]  ;;  %v175_v3 = vld [vmem:[%s2273_s20 + $0x8] sm:$0xff]  ;;  %v176_v4 = vld [vmem:[%s2273_s20 + $0x10] sm:$0xff] }
  0x11   : > { %v573_v5 = vmul.f32 %v2268_v0, %v174_v2  ;;  %v574_v6 = vmul.f32 %v2268_v0, %v175_v3  ;;  %v575_v7 = vmul.f32 %v2268_v0, %v176_v4  ;;  %v177_v8 = vld [vmem:[%s2273_s20 + $0x18] sm:$0xff]  ;;  %v178_v9 = vld [vmem:[%s2273_s20 + $0x20] sm:$0xff]  ;;  %v179_v10 = vld [vmem:[%s2273_s20 + $0x28] sm:$0xff] }
  0x12   : > { %v576_v11 = vmul.f32 %v2268_v0, %v177_v8  ;;  %v577_v12 = vmul.f32 %v2268_v0, %v178_v9  ;;  %v578_v13 = vmul.f32 %v2268_v0, %v179_v10  ;;  %v180_v14 = vld [vmem:[%s2273_s20 + $0x30] sm:$0xff]  ;;  %v181_v15 = vld [vmem:[%s2273_s20 + $0x38] sm:$0xff]  ;;  %v182_v24 = vld [vmem:[%s2273_s20 + $0x40] sm:$0xff] }
  0x13   : > { %v972_v16 = vadd.f32 %v2278_v1, %v573_v5  ;;  %v973_v17 = vadd.f32 %v2278_v1, %v574_v6  ;;  %v974_v18 = vadd.f32 %v2278_v1, %v575_v7  ;;  %v579_v19 = vmul.f32 %v2268_v0, %v180_v14  ;;  %v183_v25 = vld [vmem:[%s2273_s20 + $0x48] sm:$0xff]  ;;  %v184_v26 = vld [vmem:[%s2273_s20 + $0x50] sm:$0xff]  ;;  %v185_v31 = vld [vmem:[%s2273_s20 + $0x58] sm:$0xff] }
  0x14   : > { %v975_v20 = vadd.f32 %v2278_v1, %v576_v11  ;;  %v976_v21 = vadd.f32 %v2278_v1, %v577_v12  ;;  %v977_v22 = vadd.f32 %v2278_v1, %v578_v13  ;;  %v580_v23 = vmul.f32 %v2268_v0, %v181_v15  ;;  %v186_v32 = vld [vmem:[%s2273_s20 + $0x60] sm:$0xff]  ;;  %v187_v33 = vld [vmem:[%s2273_s20 + $0x68] sm:$0xff]  ;;  %v188_v38 = vld [vmem:[%s2273_s20 + $0x70] sm:$0xff] }
  0x15   : > { %v1364_v27 = vmax.f32 %v972_v16, 0.0  ;;  %v1365_v28 = vmax.f32 %v973_v17, 0.0  ;;  %v1366_v29 = vmax.f32 %v974_v18, 0.0  ;;  %v978_v30 = vadd.f32 %v2278_v1, %v579_v19  ;;  %v189_v43 = vld [vmem:[%s2273_s20 + $0x78] sm:$0xff]  ;;  %v190_v56 = vld [vmem:[%s2273_s20 + $0x80] sm:$0xff]  ;;  %v191_v57 = vld [vmem:[%s2273_s20 + $0x88] sm:$0xff] }
  0x16   : > { %v1367_v34 = vmax.f32 %v975_v20, 0.0  ;;  %v1368_v35 = vmax.f32 %v976_v21, 0.0  ;;  %v1369_v36 = vmax.f32 %v977_v22, 0.0  ;;  %v979_v37 = vadd.f32 %v2278_v1, %v580_v23  ;;  %v192_v58 = vld [vmem:[%s2273_s20 + $0x90] sm:$0xff]  ;;  %v193_v63 = vld [vmem:[%s2273_s20 + $0x98] sm:$0xff]  ;;  %v194_v2 = vld [vmem:[%s2273_s20 + $0xa0] sm:$0xff] }
  0x17   : > { %1756 = vst [vmem:[%s2301_s25] sm:$0xff] %v1364_v27  ;;  %1757 = vst [vmem:[%s2301_s25 + $0x8] sm:$0xff] %v1365_v28  ;;  %v1370_v39 = vmax.f32 %v978_v30, 0.0  ;;  %v581_v40 = vmul.f32 %v2268_v0, %v182_v24  ;;  %v582_v41 = vmul.f32 %v2268_v0, %v183_v25  ;;  %v583_v42 = vmul.f32 %v2268_v0, %v184_v26  ;;  %v195_v3 = vld [vmem:[%s2273_s20 + $0xa8] sm:$0xff]  ;;  %v196_v8 = vld [vmem:[%s2273_s20 + $0xb0] sm:$0xff] }
  0x18   : > { %1758 = vst [vmem:[%s2301_s25 + $0x10] sm:$0xff] %v1366_v29  ;;  %1759 = vst [vmem:[%s2301_s25 + $0x18] sm:$0xff] %v1367_v34  ;;  %v1371_v44 = vmax.f32 %v979_v37, 0.0  ;;  %v584_v45 = vmul.f32 %v2268_v0, %v185_v31  ;;  %v585_v46 = vmul.f32 %v2268_v0, %v186_v32  ;;  %v586_v47 = vmul.f32 %v2268_v0, %v187_v33  ;;  %v197_v13 = vld [vmem:[%s2273_s20 + $0xb8] sm:$0xff]  ;;  %v198_v26 = vld [vmem:[%s2273_s20 + $0xc0] sm:$0xff] }
  0x19   : > { %1760 = vst [vmem:[%s2301_s25 + $0x20] sm:$0xff] %v1368_v35  ;;  %1761 = vst [vmem:[%s2301_s25 + $0x28] sm:$0xff] %v1369_v36  ;;  %v980_v48 = vadd.f32 %v2278_v1, %v581_v40  ;;  %v981_v49 = vadd.f32 %v2278_v1, %v582_v41  ;;  %v982_v50 = vadd.f32 %v2278_v1, %v583_v42  ;;  %v199_v27 = vld [vmem:[%s2273_s20 + $0xc8] sm:$0xff]  ;;  %v200_v28 = vld [vmem:[%s2273_s20 + $0xd0] sm:$0xff] }
  0x1a   : > { %1762 = vst [vmem:[%s2301_s25 + $0x30] sm:$0xff] %v1370_v39  ;;  %v587_v51 = vmul.f32 %v2268_v0, %v188_v38  ;;  %1763 = vst [vmem:[%s2301_s25 + $0x38] sm:$0xff] %v1371_v44  ;;  %v983_v52 = vadd.f32 %v2278_v1, %v584_v45  ;;  %v984_v53 = vadd.f32 %v2278_v1, %v585_v46  ;;  %v201_v33 = vld [vmem:[%s2273_s20 + $0xd8] sm:$0xff]  ;;  %v202_v34 = vld [vmem:[%s2273_s20 + $0xe0] sm:$0xff] }
  0x1b   : > { %v985_v54 = vadd.f32 %v2278_v1, %v586_v47  ;;  %v588_v55 = vmul.f32 %v2268_v0, %v189_v43  ;;  %v1372_v59 = vmax.f32 %v980_v48, 0.0  ;;  %v1373_v60 = vmax.f32 %v981_v49, 0.0  ;;  %v203_v35 = vld [vmem:[%s2273_s20 + $0xe8] sm:$0xff]  ;;  %v204_v40 = vld [vmem:[%s2273_s20 + $0xf0] sm:$0xff]  ;;  %v205_v45 = vld [vmem:[%s2273_s20 + $0xf8] sm:$0xff] }
  0x1c   : > { %v1374_v61 = vmax.f32 %v982_v50, 0.0  ;;  %v986_v62 = vadd.f32 %v2278_v1, %v587_v51  ;;  %v1375_v4 = vmax.f32 %v983_v52, 0.0  ;;  %v1376_v5 = vmax.f32 %v984_v53, 0.0 }
  0x1d   : > { %v1377_v6 = vmax.f32 %v985_v54, 0.0  ;;  %v987_v7 = vadd.f32 %v2278_v1, %v588_v55  ;;  %1764 = vst [vmem:[%s2301_s25 + $0x40] sm:$0xff] %v1372_v59  ;;  %1765 = vst [vmem:[%s2301_s25 + $0x48] sm:$0xff] %v1373_v60  ;;  %v589_v10 = vmul.f32 %v2268_v0, %v190_v56  ;;  %v590_v11 = vmul.f32 %v2268_v0, %v191_v57  ;;  %v207_v59 = vld [vmem:[%s2273_s20 + $0x108] sm:$0xff]  ;;  %v208_v60 = vld [vmem:[%s2273_s20 + $0x110] sm:$0xff] }
  0x1e   : > { %1766 = vst [vmem:[%s2301_s25 + $0x50] sm:$0xff] %v1374_v61  ;;  %v1378_v9 = vmax.f32 %v986_v62, 0.0  ;;  %v591_v12 = vmul.f32 %v2268_v0, %v192_v58  ;;  %1767 = vst [vmem:[%s2301_s25 + $0x58] sm:$0xff] %v1375_v4  ;;  %v592_v15 = vmul.f32 %v2268_v0, %v193_v63  ;;  %v593_v16 = vmul.f32 %v2268_v0, %v194_v2  ;;  %v206_v58 = vld [vmem:[%s2273_s20 + $0x100] sm:$0xff] }
  0x1f   : > { %1768 = vst [vmem:[%s2301_s25 + $0x60] sm:$0xff] %v1376_v5  ;;  %1769 = vst [vmem:[%s2301_s25 + $0x68] sm:$0xff] %v1377_v6  ;;  %v1379_v14 = vmax.f32 %v987_v7, 0.0  ;;  %v594_v17 = vmul.f32 %v2268_v0, %v195_v3  ;;  %v988_v18 = vadd.f32 %v2278_v1, %v589_v10  ;;  %v989_v19 = vadd.f32 %v2278_v1, %v590_v11  ;;  %v209_v3 = vld [vmem:[%s2273_s20 + $0x118] sm:$0xff]  ;;  %v210_v4 = vld [vmem:[%s2273_s20 + $0x120] sm:$0xff] }
  0x20   : > { %1770 = vst [vmem:[%s2301_s25 + $0x70] sm:$0xff] %v1378_v9  ;;  %v990_v20 = vadd.f32 %v2278_v1, %v591_v12  ;;  %v595_v21 = vmul.f32 %v2268_v0, %v196_v8  ;;  %v991_v22 = vadd.f32 %v2278_v1, %v592_v15  ;;  %v992_v23 = vadd.f32 %v2278_v1, %v593_v16  ;;  %v211_v5 = vld [vmem:[%s2273_s20 + $0x128] sm:$0xff]  ;;  %v212_v10 = vld [vmem:[%s2273_s20 + $0x130] sm:$0xff]  ;;  %v213_v15 = vld [vmem:[%s2273_s20 + $0x138] sm:$0xff] }
  0x21   : > { %1771 = vst [vmem:[%s2301_s25 + $0x78] sm:$0xff] %v1379_v14  ;;  %v993_v24 = vadd.f32 %v2278_v1, %v594_v17  ;;  %v596_v25 = vmul.f32 %v2268_v0, %v197_v13  ;;  %v1380_v29 = vmax.f32 %v988_v18, 0.0  ;;  %v1381_v30 = vmax.f32 %v989_v19, 0.0 }
  0x22   : > { %v1382_v31 = vmax.f32 %v990_v20, 0.0  ;;  %v994_v32 = vadd.f32 %v2278_v1, %v595_v21  ;;  %v1383_v36 = vmax.f32 %v991_v22, 0.0  ;;  %v1384_v37 = vmax.f32 %v992_v23, 0.0 }
  0x23   : > { %v1385_v38 = vmax.f32 %v993_v24, 0.0  ;;  %v995_v39 = vadd.f32 %v2278_v1, %v596_v25  ;;  %1772 = vst [vmem:[%s2301_s25 + $0x80] sm:$0xff] %v1380_v29  ;;  %1773 = vst [vmem:[%s2301_s25 + $0x88] sm:$0xff] %v1381_v30  ;;  %v597_v42 = vmul.f32 %v2268_v0, %v198_v26  ;;  %v598_v43 = vmul.f32 %v2268_v0, %v199_v27  ;;  %v215_v29 = vld [vmem:[%s2273_s20 + $0x148] sm:$0xff]  ;;  %v216_v30 = vld [vmem:[%s2273_s20 + $0x150] sm:$0xff] }
  0x24   : > { %1774 = vst [vmem:[%s2301_s25 + $0x90] sm:$0xff] %v1382_v31  ;;  %v1386_v41 = vmax.f32 %v994_v32, 0.0  ;;  %v599_v44 = vmul.f32 %v2268_v0, %v200_v28  ;;  %1775 = vst [vmem:[%s2301_s25 + $0x98] sm:$0xff] %v1383_v36  ;;  %v600_v47 = vmul.f32 %v2268_v0, %v201_v33  ;;  %v601_v48 = vmul.f32 %v2268_v0, %v202_v34  ;;  %v214_v28 = vld [vmem:[%s2273_s20 + $0x140] sm:$0xff] }
  0x25   : > { %1776 = vst [vmem:[%s2301_s25 + $0xa0] sm:$0xff] %v1384_v37  ;;  %1777 = vst [vmem:[%s2301_s25 + $0xa8] sm:$0xff] %v1385_v38  ;;  %v1387_v46 = vmax.f32 %v995_v39, 0.0  ;;  %v602_v49 = vmul.f32 %v2268_v0, %v203_v35  ;;  %v996_v50 = vadd.f32 %v2278_v1, %v597_v42  ;;  %v997_v51 = vadd.f32 %v2278_v1, %v598_v43  ;;  %v217_v35 = vld [vmem:[%s2273_s20 + $0x158] sm:$0xff]  ;;  %v218_v36 = vld [vmem:[%s2273_s20 + $0x160] sm:$0xff] }
  0x26   : > { %1778 = vst [vmem:[%s2301_s25 + $0xb0] sm:$0xff] %v1386_v41  ;;  %v998_v52 = vadd.f32 %v2278_v1, %v599_v44  ;;  %v603_v53 = vmul.f32 %v2268_v0, %v204_v40  ;;  %v999_v54 = vadd.f32 %v2278_v1, %v600_v47  ;;  %v1000_v55 = vadd.f32 %v2278_v1, %v601_v48  ;;  %v219_v37 = vld [vmem:[%s2273_s20 + $0x168] sm:$0xff]  ;;  %v220_v42 = vld [vmem:[%s2273_s20 + $0x170] sm:$0xff]  ;;  %v221_v47 = vld [vmem:[%s2273_s20 + $0x178] sm:$0xff] }
  0x27   : > { %1779 = vst [vmem:[%s2301_s25 + $0xb8] sm:$0xff] %v1387_v46  ;;  %v1001_v56 = vadd.f32 %v2278_v1, %v602_v49  ;;  %v604_v57 = vmul.f32 %v2268_v0, %v205_v45  ;;  %v1388_v61 = vmax.f32 %v996_v50, 0.0  ;;  %v1389_v62 = vmax.f32 %v997_v51, 0.0 }
  0x28   : > { %v1390_v63 = vmax.f32 %v998_v52, 0.0  ;;  %v1002_v2 = vadd.f32 %v2278_v1, %v603_v53  ;;  %v1391_v6 = vmax.f32 %v999_v54, 0.0  ;;  %v1392_v7 = vmax.f32 %v1000_v55, 0.0 }
  0x29   : > { %v1393_v8 = vmax.f32 %v1001_v56, 0.0  ;;  %v1003_v9 = vadd.f32 %v2278_v1, %v604_v57  ;;  %1780 = vst [vmem:[%s2301_s25 + $0xc0] sm:$0xff] %v1388_v61  ;;  %1781 = vst [vmem:[%s2301_s25 + $0xc8] sm:$0xff] %v1389_v62  ;;  %v605_v12 = vmul.f32 %v2268_v0, %v206_v58  ;;  %v606_v13 = vmul.f32 %v2268_v0, %v207_v59  ;;  %v223_v61 = vld [vmem:[%s2273_s20 + $0x188] sm:$0xff]  ;;  %v224_v62 = vld [vmem:[%s2273_s20 + $0x190] sm:$0xff] }
  0x2a   : > { %1782 = vst [vmem:[%s2301_s25 + $0xd0] sm:$0xff] %v1390_v63  ;;  %v1394_v11 = vmax.f32 %v1002_v2, 0.0  ;;  %v607_v14 = vmul.f32 %v2268_v0, %v208_v60  ;;  %1783 = vst [vmem:[%s2301_s25 + $0xd8] sm:$0xff] %v1391_v6  ;;  %v608_v17 = vmul.f32 %v2268_v0, %v209_v3  ;;  %v609_v18 = vmul.f32 %v2268_v0, %v210_v4  ;;  %v222_v60 = vld [vmem:[%s2273_s20 + $0x180] sm:$0xff] }
  0x2b   : > { %1784 = vst [vmem:[%s2301_s25 + $0xe0] sm:$0xff] %v1392_v7  ;;  %1785 = vst [vmem:[%s2301_s25 + $0xe8] sm:$0xff] %v1393_v8  ;;  %v1395_v16 = vmax.f32 %v1003_v9, 0.0  ;;  %v610_v19 = vmul.f32 %v2268_v0, %v211_v5  ;;  %v1004_v20 = vadd.f32 %v2278_v1, %v605_v12  ;;  %v1005_v21 = vadd.f32 %v2278_v1, %v606_v13  ;;  %v225_v5 = vld [vmem:[%s2273_s20 + $0x198] sm:$0xff]  ;;  %v226_v6 = vld [vmem:[%s2273_s20 + $0x1a0] sm:$0xff] }
  0x2c   : > { %1786 = vst [vmem:[%s2301_s25 + $0xf0] sm:$0xff] %v1394_v11  ;;  %v1006_v22 = vadd.f32 %v2278_v1, %v607_v14  ;;  %v611_v23 = vmul.f32 %v2268_v0, %v212_v10  ;;  %v1007_v24 = vadd.f32 %v2278_v1, %v608_v17  ;;  %v1008_v25 = vadd.f32 %v2278_v1, %v609_v18  ;;  %v227_v7 = vld [vmem:[%s2273_s20 + $0x1a8] sm:$0xff]  ;;  %v228_v12 = vld [vmem:[%s2273_s20 + $0x1b0] sm:$0xff]  ;;  %v229_v17 = vld [vmem:[%s2273_s20 + $0x1b8] sm:$0xff] }
  0x2d   : > { %1787 = vst [vmem:[%s2301_s25 + $0xf8] sm:$0xff] %v1395_v16  ;;  %v1009_v26 = vadd.f32 %v2278_v1, %v610_v19  ;;  %v612_v27 = vmul.f32 %v2268_v0, %v213_v15  ;;  %v1396_v31 = vmax.f32 %v1004_v20, 0.0  ;;  %v1397_v32 = vmax.f32 %v1005_v21, 0.0 }
  0x2e   : > { %v1398_v33 = vmax.f32 %v1006_v22, 0.0  ;;  %v1010_v34 = vadd.f32 %v2278_v1, %v611_v23  ;;  %v1399_v38 = vmax.f32 %v1007_v24, 0.0  ;;  %v1400_v39 = vmax.f32 %v1008_v25, 0.0 }
  0x2f   : > { %v1401_v40 = vmax.f32 %v1009_v26, 0.0  ;;  %v1011_v41 = vadd.f32 %v2278_v1, %v612_v27  ;;  %1788 = vst [vmem:[%s2301_s25 + $0x100] sm:$0xff] %v1396_v31  ;;  %1789 = vst [vmem:[%s2301_s25 + $0x108] sm:$0xff] %v1397_v32  ;;  %v613_v44 = vmul.f32 %v2268_v0, %v214_v28  ;;  %v614_v45 = vmul.f32 %v2268_v0, %v215_v29  ;;  %v231_v31 = vld [vmem:[%s2273_s20 + $0x1c8] sm:$0xff]  ;;  %v232_v32 = vld [vmem:[%s2273_s20 + $0x1d0] sm:$0xff] }
  0x30   : > { %1790 = vst [vmem:[%s2301_s25 + $0x110] sm:$0xff] %v1398_v33  ;;  %v1402_v43 = vmax.f32 %v1010_v34, 0.0  ;;  %v615_v46 = vmul.f32 %v2268_v0, %v216_v30  ;;  %1791 = vst [vmem:[%s2301_s25 + $0x118] sm:$0xff] %v1399_v38  ;;  %v616_v49 = vmul.f32 %v2268_v0, %v217_v35  ;;  %v617_v50 = vmul.f32 %v2268_v0, %v218_v36  ;;  %v230_v30 = vld [vmem:[%s2273_s20 + $0x1c0] sm:$0xff] }
  0x31   : > { %1792 = vst [vmem:[%s2301_s25 + $0x120] sm:$0xff] %v1400_v39  ;;  %1793 = vst [vmem:[%s2301_s25 + $0x128] sm:$0xff] %v1401_v40  ;;  %v1403_v48 = vmax.f32 %v1011_v41, 0.0  ;;  %v618_v51 = vmul.f32 %v2268_v0, %v219_v37  ;;  %v1012_v52 = vadd.f32 %v2278_v1, %v613_v44  ;;  %v1013_v53 = vadd.f32 %v2278_v1, %v614_v45  ;;  %v233_v37 = vld [vmem:[%s2273_s20 + $0x1d8] sm:$0xff]  ;;  %v234_v38 = vld [vmem:[%s2273_s20 + $0x1e0] sm:$0xff] }
  0x32   : > { %1794 = vst [vmem:[%s2301_s25 + $0x130] sm:$0xff] %v1402_v43  ;;  %v1014_v54 = vadd.f32 %v2278_v1, %v615_v46  ;;  %v619_v55 = vmul.f32 %v2268_v0, %v220_v42  ;;  %v1015_v56 = vadd.f32 %v2278_v1, %v616_v49  ;;  %v1016_v57 = vadd.f32 %v2278_v1, %v617_v50  ;;  %v235_v39 = vld [vmem:[%s2273_s20 + $0x1e8] sm:$0xff]  ;;  %v236_v44 = vld [vmem:[%s2273_s20 + $0x1f0] sm:$0xff]  ;;  %v237_v49 = vld [vmem:[%s2273_s20 + $0x1f8] sm:$0xff] }
  0x33   : > { %1795 = vst [vmem:[%s2301_s25 + $0x138] sm:$0xff] %v1403_v48  ;;  %v1017_v58 = vadd.f32 %v2278_v1, %v618_v51  ;;  %v620_v59 = vmul.f32 %v2268_v0, %v221_v47  ;;  %v1404_v63 = vmax.f32 %v1012_v52, 0.0  ;;  %v1405_v2 = vmax.f32 %v1013_v53, 0.0 }
  0x34   : > { %v1406_v3 = vmax.f32 %v1014_v54, 0.0  ;;  %v1018_v4 = vadd.f32 %v2278_v1, %v619_v55  ;;  %v1407_v8 = vmax.f32 %v1015_v56, 0.0  ;;  %v1408_v9 = vmax.f32 %v1016_v57, 0.0 }
  0x35   : > { %v1409_v10 = vmax.f32 %v1017_v58, 0.0  ;;  %v1019_v11 = vadd.f32 %v2278_v1, %v620_v59  ;;  %1796 = vst [vmem:[%s2301_s25 + $0x140] sm:$0xff] %v1404_v63  ;;  %1797 = vst [vmem:[%s2301_s25 + $0x148] sm:$0xff] %v1405_v2  ;;  %v621_v14 = vmul.f32 %v2268_v0, %v222_v60  ;;  %v622_v15 = vmul.f32 %v2268_v0, %v223_v61  ;;  %v239_v63 = vld [vmem:[%s2273_s20 + $0x208] sm:$0xff]  ;;  %v240_v2 = vld [vmem:[%s2273_s20 + $0x210] sm:$0xff] }
  0x36   : > { %1798 = vst [vmem:[%s2301_s25 + $0x150] sm:$0xff] %v1406_v3  ;;  %v1410_v13 = vmax.f32 %v1018_v4, 0.0  ;;  %v623_v16 = vmul.f32 %v2268_v0, %v224_v62  ;;  %1799 = vst [vmem:[%s2301_s25 + $0x158] sm:$0xff] %v1407_v8  ;;  %v624_v19 = vmul.f32 %v2268_v0, %v225_v5  ;;  %v625_v20 = vmul.f32 %v2268_v0, %v226_v6  ;;  %v238_v62 = vld [vmem:[%s2273_s20 + $0x200] sm:$0xff] }
  0x37   : > { %1800 = vst [vmem:[%s2301_s25 + $0x160] sm:$0xff] %v1408_v9  ;;  %1801 = vst [vmem:[%s2301_s25 + $0x168] sm:$0xff] %v1409_v10  ;;  %v1411_v18 = vmax.f32 %v1019_v11, 0.0  ;;  %v626_v21 = vmul.f32 %v2268_v0, %v227_v7  ;;  %v1020_v22 = vadd.f32 %v2278_v1, %v621_v14  ;;  %v1021_v23 = vadd.f32 %v2278_v1, %v622_v15  ;;  %v241_v7 = vld [vmem:[%s2273_s20 + $0x218] sm:$0xff]  ;;  %v242_v8 = vld [vmem:[%s2273_s20 + $0x220] sm:$0xff] }
  0x38   : > { %1802 = vst [vmem:[%s2301_s25 + $0x170] sm:$0xff] %v1410_v13  ;;  %v1022_v24 = vadd.f32 %v2278_v1, %v623_v16  ;;  %v627_v25 = vmul.f32 %v2268_v0, %v228_v12  ;;  %v1023_v26 = vadd.f32 %v2278_v1, %v624_v19  ;;  %v1024_v27 = vadd.f32 %v2278_v1, %v625_v20  ;;  %v243_v9 = vld [vmem:[%s2273_s20 + $0x228] sm:$0xff]  ;;  %v244_v14 = vld [vmem:[%s2273_s20 + $0x230] sm:$0xff]  ;;  %v245_v19 = vld [vmem:[%s2273_s20 + $0x238] sm:$0xff] }
  0x39   : > { %1803 = vst [vmem:[%s2301_s25 + $0x178] sm:$0xff] %v1411_v18  ;;  %v1025_v28 = vadd.f32 %v2278_v1, %v626_v21  ;;  %v628_v29 = vmul.f32 %v2268_v0, %v229_v17  ;;  %v1412_v33 = vmax.f32 %v1020_v22, 0.0  ;;  %v1413_v34 = vmax.f32 %v1021_v23, 0.0 }
  0x3a   : > { %v1414_v35 = vmax.f32 %v1022_v24, 0.0  ;;  %v1026_v36 = vadd.f32 %v2278_v1, %v627_v25  ;;  %v1415_v40 = vmax.f32 %v1023_v26, 0.0  ;;  %v1416_v41 = vmax.f32 %v1024_v27, 0.0 }
  0x3b   : > { %v1417_v42 = vmax.f32 %v1025_v28, 0.0  ;;  %v1027_v43 = vadd.f32 %v2278_v1, %v628_v29  ;;  %1804 = vst [vmem:[%s2301_s25 + $0x180] sm:$0xff] %v1412_v33  ;;  %1805 = vst [vmem:[%s2301_s25 + $0x188] sm:$0xff] %v1413_v34  ;;  %v629_v46 = vmul.f32 %v2268_v0, %v230_v30  ;;  %v630_v47 = vmul.f32 %v2268_v0, %v231_v31  ;;  %v247_v33 = vld [vmem:[%s2273_s20 + $0x248] sm:$0xff]  ;;  %v248_v34 = vld [vmem:[%s2273_s20 + $0x250] sm:$0xff] }
  0x3c   : > { %1806 = vst [vmem:[%s2301_s25 + $0x190] sm:$0xff] %v1414_v35  ;;  %v1418_v45 = vmax.f32 %v1026_v36, 0.0  ;;  %v631_v48 = vmul.f32 %v2268_v0, %v232_v32  ;;  %1807 = vst [vmem:[%s2301_s25 + $0x198] sm:$0xff] %v1415_v40  ;;  %v632_v51 = vmul.f32 %v2268_v0, %v233_v37  ;;  %v633_v52 = vmul.f32 %v2268_v0, %v234_v38  ;;  %v246_v32 = vld [vmem:[%s2273_s20 + $0x240] sm:$0xff] }
  0x3d   : > { %1808 = vst [vmem:[%s2301_s25 + $0x1a0] sm:$0xff] %v1416_v41  ;;  %1809 = vst [vmem:[%s2301_s25 + $0x1a8] sm:$0xff] %v1417_v42  ;;  %v1419_v50 = vmax.f32 %v1027_v43, 0.0  ;;  %v634_v53 = vmul.f32 %v2268_v0, %v235_v39  ;;  %v1028_v54 = vadd.f32 %v2278_v1, %v629_v46  ;;  %v1029_v55 = vadd.f32 %v2278_v1, %v630_v47  ;;  %v249_v39 = vld [vmem:[%s2273_s20 + $0x258] sm:$0xff]  ;;  %v250_v40 = vld [vmem:[%s2273_s20 + $0x260] sm:$0xff] }
  0x3e   : > { %1810 = vst [vmem:[%s2301_s25 + $0x1b0] sm:$0xff] %v1418_v45  ;;  %v1030_v56 = vadd.f32 %v2278_v1, %v631_v48  ;;  %v635_v57 = vmul.f32 %v2268_v0, %v236_v44  ;;  %v1031_v58 = vadd.f32 %v2278_v1, %v632_v51  ;;  %v1032_v59 = vadd.f32 %v2278_v1, %v633_v52  ;;  %v251_v41 = vld [vmem:[%s2273_s20 + $0x268] sm:$0xff]  ;;  %v252_v46 = vld [vmem:[%s2273_s20 + $0x270] sm:$0xff]  ;;  %v253_v51 = vld [vmem:[%s2273_s20 + $0x278] sm:$0xff] }
  0x3f   : > { %1811 = vst [vmem:[%s2301_s25 + $0x1b8] sm:$0xff] %v1419_v50  ;;  %v1033_v60 = vadd.f32 %v2278_v1, %v634_v53  ;;  %v636_v61 = vmul.f32 %v2268_v0, %v237_v49  ;;  %v1420_v3 = vmax.f32 %v1028_v54, 0.0  ;;  %v1421_v4 = vmax.f32 %v1029_v55, 0.0 }
  0x40   : > { %v1422_v5 = vmax.f32 %v1030_v56, 0.0  ;;  %v1034_v6 = vadd.f32 %v2278_v1, %v635_v57  ;;  %v1423_v10 = vmax.f32 %v1031_v58, 0.0  ;;  %v1424_v11 = vmax.f32 %v1032_v59, 0.0 }
  0x41   : > { %v1425_v12 = vmax.f32 %v1033_v60, 0.0  ;;  %v1035_v13 = vadd.f32 %v2278_v1, %v636_v61  ;;  %1812 = vst [vmem:[%s2301_s25 + $0x1c0] sm:$0xff] %v1420_v3  ;;  %1813 = vst [vmem:[%s2301_s25 + $0x1c8] sm:$0xff] %v1421_v4  ;;  %v637_v16 = vmul.f32 %v2268_v0, %v238_v62  ;;  %v638_v17 = vmul.f32 %v2268_v0, %v239_v63  ;;  %v255_v3 = vld [vmem:[%s2273_s20 + $0x288] sm:$0xff]  ;;  %v256_v4 = vld [vmem:[%s2273_s20 + $0x290] sm:$0xff] }
  0x42   : > { %1814 = vst [vmem:[%s2301_s25 + $0x1d0] sm:$0xff] %v1422_v5  ;;  %v1426_v15 = vmax.f32 %v1034_v6, 0.0  ;;  %v639_v18 = vmul.f32 %v2268_v0, %v240_v2  ;;  %1815 = vst [vmem:[%s2301_s25 + $0x1d8] sm:$0xff] %v1423_v10  ;;  %v640_v21 = vmul.f32 %v2268_v0, %v241_v7  ;;  %v641_v22 = vmul.f32 %v2268_v0, %v242_v8  ;;  %v254_v2 = vld [vmem:[%s2273_s20 + $0x280] sm:$0xff] }
  0x43   : > { %1816 = vst [vmem:[%s2301_s25 + $0x1e0] sm:$0xff] %v1424_v11  ;;  %1817 = vst [vmem:[%s2301_s25 + $0x1e8] sm:$0xff] %v1425_v12  ;;  %v1427_v20 = vmax.f32 %v1035_v13, 0.0  ;;  %v642_v23 = vmul.f32 %v2268_v0, %v243_v9  ;;  %v1036_v24 = vadd.f32 %v2278_v1, %v637_v16  ;;  %v1037_v25 = vadd.f32 %v2278_v1, %v638_v17  ;;  %v257_v9 = vld [vmem:[%s2273_s20 + $0x298] sm:$0xff]  ;;  %v258_v10 = vld [vmem:[%s2273_s20 + $0x2a0] sm:$0xff] }
  0x44   : > { %1818 = vst [vmem:[%s2301_s25 + $0x1f0] sm:$0xff] %v1426_v15  ;;  %v1038_v26 = vadd.f32 %v2278_v1, %v639_v18  ;;  %v643_v27 = vmul.f32 %v2268_v0, %v244_v14  ;;  %v1039_v28 = vadd.f32 %v2278_v1, %v640_v21  ;;  %v1040_v29 = vadd.f32 %v2278_v1, %v641_v22  ;;  %v259_v11 = vld [vmem:[%s2273_s20 + $0x2a8] sm:$0xff]  ;;  %v260_v16 = vld [vmem:[%s2273_s20 + $0x2b0] sm:$0xff]  ;;  %v261_v21 = vld [vmem:[%s2273_s20 + $0x2b8] sm:$0xff] }
  0x45   : > { %1819 = vst [vmem:[%s2301_s25 + $0x1f8] sm:$0xff] %v1427_v20  ;;  %v1041_v30 = vadd.f32 %v2278_v1, %v642_v23  ;;  %v644_v31 = vmul.f32 %v2268_v0, %v245_v19  ;;  %v1428_v35 = vmax.f32 %v1036_v24, 0.0  ;;  %v1429_v36 = vmax.f32 %v1037_v25, 0.0 }
  0x46   : > { %v1430_v37 = vmax.f32 %v1038_v26, 0.0  ;;  %v1042_v38 = vadd.f32 %v2278_v1, %v643_v27  ;;  %v1431_v42 = vmax.f32 %v1039_v28, 0.0  ;;  %v1432_v43 = vmax.f32 %v1040_v29, 0.0 }
  0x47   : > { %v1433_v44 = vmax.f32 %v1041_v30, 0.0  ;;  %v1043_v45 = vadd.f32 %v2278_v1, %v644_v31  ;;  %1820 = vst [vmem:[%s2301_s25 + $0x200] sm:$0xff] %v1428_v35  ;;  %1821 = vst [vmem:[%s2301_s25 + $0x208] sm:$0xff] %v1429_v36  ;;  %v645_v48 = vmul.f32 %v2268_v0, %v246_v32  ;;  %v646_v49 = vmul.f32 %v2268_v0, %v247_v33  ;;  %v263_v35 = vld [vmem:[%s2273_s20 + $0x2c8] sm:$0xff]  ;;  %v264_v36 = vld [vmem:[%s2273_s20 + $0x2d0] sm:$0xff] }
  0x48   : > { %1822 = vst [vmem:[%s2301_s25 + $0x210] sm:$0xff] %v1430_v37  ;;  %v1434_v47 = vmax.f32 %v1042_v38, 0.0  ;;  %v647_v50 = vmul.f32 %v2268_v0, %v248_v34  ;;  %1823 = vst [vmem:[%s2301_s25 + $0x218] sm:$0xff] %v1431_v42  ;;  %v648_v53 = vmul.f32 %v2268_v0, %v249_v39  ;;  %v649_v54 = vmul.f32 %v2268_v0, %v250_v40  ;;  %v262_v34 = vld [vmem:[%s2273_s20 + $0x2c0] sm:$0xff] }
  0x49   : > { %1824 = vst [vmem:[%s2301_s25 + $0x220] sm:$0xff] %v1432_v43  ;;  %1825 = vst [vmem:[%s2301_s25 + $0x228] sm:$0xff] %v1433_v44  ;;  %v1435_v52 = vmax.f32 %v1043_v45, 0.0  ;;  %v650_v55 = vmul.f32 %v2268_v0, %v251_v41  ;;  %v1044_v56 = vadd.f32 %v2278_v1, %v645_v48  ;;  %v1045_v57 = vadd.f32 %v2278_v1, %v646_v49  ;;  %v265_v41 = vld [vmem:[%s2273_s20 + $0x2d8] sm:$0xff]  ;;  %v266_v42 = vld [vmem:[%s2273_s20 + $0x2e0] sm:$0xff] }
  0x4a   : > { %1826 = vst [vmem:[%s2301_s25 + $0x230] sm:$0xff] %v1434_v47  ;;  %v1046_v58 = vadd.f32 %v2278_v1, %v647_v50  ;;  %v651_v59 = vmul.f32 %v2268_v0, %v252_v46  ;;  %v1047_v60 = vadd.f32 %v2278_v1, %v648_v53  ;;  %v1048_v61 = vadd.f32 %v2278_v1, %v649_v54  ;;  %v267_v43 = vld [vmem:[%s2273_s20 + $0x2e8] sm:$0xff]  ;;  %v268_v48 = vld [vmem:[%s2273_s20 + $0x2f0] sm:$0xff]  ;;  %v269_v53 = vld [vmem:[%s2273_s20 + $0x2f8] sm:$0xff] }
  0x4b   : > { %1827 = vst [vmem:[%s2301_s25 + $0x238] sm:$0xff] %v1435_v52  ;;  %v1049_v62 = vadd.f32 %v2278_v1, %v650_v55  ;;  %v652_v63 = vmul.f32 %v2268_v0, %v253_v51  ;;  %v1436_v5 = vmax.f32 %v1044_v56, 0.0  ;;  %v1437_v6 = vmax.f32 %v1045_v57, 0.0 }
  0x4c   : > { %v1438_v7 = vmax.f32 %v1046_v58, 0.0  ;;  %v1050_v8 = vadd.f32 %v2278_v1, %v651_v59  ;;  %v1439_v12 = vmax.f32 %v1047_v60, 0.0  ;;  %v1440_v13 = vmax.f32 %v1048_v61, 0.0 }
  0x4d   : > { %v1441_v14 = vmax.f32 %v1049_v62, 0.0  ;;  %v1051_v15 = vadd.f32 %v2278_v1, %v652_v63  ;;  %1828 = vst [vmem:[%s2301_s25 + $0x240] sm:$0xff] %v1436_v5  ;;  %1829 = vst [vmem:[%s2301_s25 + $0x248] sm:$0xff] %v1437_v6  ;;  %v653_v18 = vmul.f32 %v2268_v0, %v254_v2  ;;  %v654_v19 = vmul.f32 %v2268_v0, %v255_v3  ;;  %v271_v5 = vld [vmem:[%s2273_s20 + $0x308] sm:$0xff]  ;;  %v272_v6 = vld [vmem:[%s2273_s20 + $0x310] sm:$0xff] }
  0x4e   : > { %1830 = vst [vmem:[%s2301_s25 + $0x250] sm:$0xff] %v1438_v7  ;;  %v1442_v17 = vmax.f32 %v1050_v8, 0.0  ;;  %v655_v20 = vmul.f32 %v2268_v0, %v256_v4  ;;  %1831 = vst [vmem:[%s2301_s25 + $0x258] sm:$0xff] %v1439_v12  ;;  %v656_v23 = vmul.f32 %v2268_v0, %v257_v9  ;;  %v657_v24 = vmul.f32 %v2268_v0, %v258_v10  ;;  %v270_v4 = vld [vmem:[%s2273_s20 + $0x300] sm:$0xff] }
  0x4f   : > { %1832 = vst [vmem:[%s2301_s25 + $0x260] sm:$0xff] %v1440_v13  ;;  %1833 = vst [vmem:[%s2301_s25 + $0x268] sm:$0xff] %v1441_v14  ;;  %v1443_v22 = vmax.f32 %v1051_v15, 0.0  ;;  %v658_v25 = vmul.f32 %v2268_v0, %v259_v11  ;;  %v1052_v26 = vadd.f32 %v2278_v1, %v653_v18  ;;  %v1053_v27 = vadd.f32 %v2278_v1, %v654_v19  ;;  %v273_v11 = vld [vmem:[%s2273_s20 + $0x318] sm:$0xff]  ;;  %v274_v12 = vld [vmem:[%s2273_s20 + $0x320] sm:$0xff] }
  0x50   : > { %1834 = vst [vmem:[%s2301_s25 + $0x270] sm:$0xff] %v1442_v17  ;;  %v1054_v28 = vadd.f32 %v2278_v1, %v655_v20  ;;  %v659_v29 = vmul.f32 %v2268_v0, %v260_v16  ;;  %v1055_v30 = vadd.f32 %v2278_v1, %v656_v23  ;;  %v1056_v31 = vadd.f32 %v2278_v1, %v657_v24  ;;  %v275_v13 = vld [vmem:[%s2273_s20 + $0x328] sm:$0xff]  ;;  %v276_v18 = vld [vmem:[%s2273_s20 + $0x330] sm:$0xff]  ;;  %v277_v23 = vld [vmem:[%s2273_s20 + $0x338] sm:$0xff] }
  0x51   : > { %1835 = vst [vmem:[%s2301_s25 + $0x278] sm:$0xff] %v1443_v22  ;;  %v1057_v32 = vadd.f32 %v2278_v1, %v658_v25  ;;  %v660_v33 = vmul.f32 %v2268_v0, %v261_v21  ;;  %v1444_v37 = vmax.f32 %v1052_v26, 0.0  ;;  %v1445_v38 = vmax.f32 %v1053_v27, 0.0 }
  0x52   : > { %v1446_v39 = vmax.f32 %v1054_v28, 0.0  ;;  %v1058_v40 = vadd.f32 %v2278_v1, %v659_v29  ;;  %v1447_v44 = vmax.f32 %v1055_v30, 0.0  ;;  %v1448_v45 = vmax.f32 %v1056_v31, 0.0 }
  0x53   : > { %v1449_v46 = vmax.f32 %v1057_v32, 0.0  ;;  %v1059_v47 = vadd.f32 %v2278_v1, %v660_v33  ;;  %1836 = vst [vmem:[%s2301_s25 + $0x280] sm:$0xff] %v1444_v37  ;;  %1837 = vst [vmem:[%s2301_s25 + $0x288] sm:$0xff] %v1445_v38  ;;  %v661_v50 = vmul.f32 %v2268_v0, %v262_v34  ;;  %v662_v51 = vmul.f32 %v2268_v0, %v263_v35  ;;  %v279_v37 = vld [vmem:[%s2273_s20 + $0x348] sm:$0xff]  ;;  %v280_v38 = vld [vmem:[%s2273_s20 + $0x350] sm:$0xff] }
  0x54   : > { %1838 = vst [vmem:[%s2301_s25 + $0x290] sm:$0xff] %v1446_v39  ;;  %v1450_v49 = vmax.f32 %v1058_v40, 0.0  ;;  %v663_v52 = vmul.f32 %v2268_v0, %v264_v36  ;;  %1839 = vst [vmem:[%s2301_s25 + $0x298] sm:$0xff] %v1447_v44  ;;  %v664_v55 = vmul.f32 %v2268_v0, %v265_v41  ;;  %v665_v56 = vmul.f32 %v2268_v0, %v266_v42  ;;  %v278_v36 = vld [vmem:[%s2273_s20 + $0x340] sm:$0xff] }
  0x55   : > { %1840 = vst [vmem:[%s2301_s25 + $0x2a0] sm:$0xff] %v1448_v45  ;;  %1841 = vst [vmem:[%s2301_s25 + $0x2a8] sm:$0xff] %v1449_v46  ;;  %v1451_v54 = vmax.f32 %v1059_v47, 0.0  ;;  %v666_v57 = vmul.f32 %v2268_v0, %v267_v43  ;;  %v1060_v58 = vadd.f32 %v2278_v1, %v661_v50  ;;  %v1061_v59 = vadd.f32 %v2278_v1, %v662_v51  ;;  %v281_v43 = vld [vmem:[%s2273_s20 + $0x358] sm:$0xff]  ;;  %v282_v44 = vld [vmem:[%s2273_s20 + $0x360] sm:$0xff] }
  0x56   : > { %1842 = vst [vmem:[%s2301_s25 + $0x2b0] sm:$0xff] %v1450_v49  ;;  %v1062_v60 = vadd.f32 %v2278_v1, %v663_v52  ;;  %v667_v61 = vmul.f32 %v2268_v0, %v268_v48  ;;  %v1063_v62 = vadd.f32 %v2278_v1, %v664_v55  ;;  %v1064_v63 = vadd.f32 %v2278_v1, %v665_v56  ;;  %v283_v45 = vld [vmem:[%s2273_s20 + $0x368] sm:$0xff]  ;;  %v2701_v48 = vld [vmem:[%s3888_s2] ss:$0 sm:$0xff]  ;;  %v284_v50 = vld [vmem:[%s2273_s20 + $0x370] sm:$0xff] }
  0x57   : > { %1843 = vst [vmem:[%s2301_s25 + $0x2b8] sm:$0xff] %v1451_v54  ;;  %v1065_v2 = vadd.f32 %v2278_v1, %v666_v57  ;;  %v668_v3 = vmul.f32 %v2268_v0, %v269_v53  ;;  %v1452_v7 = vmax.f32 %v1060_v58, 0.0  ;;  %v1453_v8 = vmax.f32 %v1061_v59, 0.0  ;;  %v2711_v51 = vld [vmem:[%s3887_s1] ss:$0 sm:$0xff]  ;;  %v285_v55 = vld [vmem:[%s2273_s20 + $0x378] sm:$0xff] }
  0x58   : > { %v1454_v9 = vmax.f32 %v1062_v60, 0.0  ;;  %v1066_v10 = vadd.f32 %v2278_v1, %v667_v61  ;;  %v1455_v14 = vmax.f32 %v1063_v62, 0.0  ;;  %v1456_v15 = vmax.f32 %v1064_v63, 0.0 }
  0x59   : > { %v1457_v16 = vmax.f32 %v1065_v2, 0.0  ;;  %v1067_v17 = vadd.f32 %v2278_v1, %v668_v3  ;;  %1844 = vst [vmem:[%s2301_s25 + $0x2c0] sm:$0xff] %v1452_v7  ;;  %1845 = vst [vmem:[%s2301_s25 + $0x2c8] sm:$0xff] %v1453_v8  ;;  %v669_v20 = vmul.f32 %v2268_v0, %v270_v4  ;;  %v670_v21 = vmul.f32 %v2268_v0, %v271_v5  ;;  %v287_v7 = vld [vmem:[%s2273_s20 + $0x388] sm:$0xff]  ;;  %v288_v8 = vld [vmem:[%s2273_s20 + $0x390] sm:$0xff] }
  0x5a   : > { %1846 = vst [vmem:[%s2301_s25 + $0x2d0] sm:$0xff] %v1454_v9  ;;  %v1458_v19 = vmax.f32 %v1066_v10, 0.0  ;;  %v671_v22 = vmul.f32 %v2268_v0, %v272_v6  ;;  %1847 = vst [vmem:[%s2301_s25 + $0x2d8] sm:$0xff] %v1455_v14  ;;  %v672_v25 = vmul.f32 %v2268_v0, %v273_v11  ;;  %v673_v26 = vmul.f32 %v2268_v0, %v274_v12  ;;  %v286_v6 = vld [vmem:[%s2273_s20 + $0x380] sm:$0xff] }
  0x5b   : > { %1848 = vst [vmem:[%s2301_s25 + $0x2e0] sm:$0xff] %v1456_v15  ;;  %1849 = vst [vmem:[%s2301_s25 + $0x2e8] sm:$0xff] %v1457_v16  ;;  %v1459_v24 = vmax.f32 %v1067_v17, 0.0  ;;  %v674_v27 = vmul.f32 %v2268_v0, %v275_v13  ;;  %v1068_v28 = vadd.f32 %v2278_v1, %v669_v20  ;;  %v1069_v29 = vadd.f32 %v2278_v1, %v670_v21  ;;  %v289_v13 = vld [vmem:[%s2273_s20 + $0x398] sm:$0xff]  ;;  %v290_v14 = vld [vmem:[%s2273_s20 + $0x3a0] sm:$0xff] }
  0x5c   : > { %1850 = vst [vmem:[%s2301_s25 + $0x2f0] sm:$0xff] %v1458_v19  ;;  %v1070_v30 = vadd.f32 %v2278_v1, %v671_v22  ;;  %v675_v31 = vmul.f32 %v2268_v0, %v276_v18  ;;  %v1071_v32 = vadd.f32 %v2278_v1, %v672_v25  ;;  %v1072_v33 = vadd.f32 %v2278_v1, %v673_v26  ;;  %v291_v15 = vld [vmem:[%s2273_s20 + $0x3a8] sm:$0xff]  ;;  %v292_v20 = vld [vmem:[%s2273_s20 + $0x3b0] sm:$0xff]  ;;  %v293_v25 = vld [vmem:[%s2273_s20 + $0x3b8] sm:$0xff] }
  0x5d   : > { %1851 = vst [vmem:[%s2301_s25 + $0x2f8] sm:$0xff] %v1459_v24  ;;  %v1073_v34 = vadd.f32 %v2278_v1, %v674_v27  ;;  %v676_v35 = vmul.f32 %v2268_v0, %v277_v23  ;;  %v1460_v39 = vmax.f32 %v1068_v28, 0.0  ;;  %v1461_v40 = vmax.f32 %v1069_v29, 0.0 }
  0x5e   : > { %v1462_v41 = vmax.f32 %v1070_v30, 0.0  ;;  %v1074_v42 = vadd.f32 %v2278_v1, %v675_v31  ;;  %v1463_v46 = vmax.f32 %v1071_v32, 0.0  ;;  %v1464_v0 = vmax.f32 %v1072_v33, 0.0 }
  0x5f   : > { %v1465_v47 = vmax.f32 %v1073_v34, 0.0  ;;  %v1075_v49 = vadd.f32 %v2701_v48, %v676_v35  ;;  %1852 = vst [vmem:[%s2301_s25 + $0x300] sm:$0xff] %v1460_v39  ;;  %1853 = vst [vmem:[%s2301_s25 + $0x308] sm:$0xff] %v1461_v40  ;;  %v677_v52 = vmul.f32 %v2711_v51, %v278_v36  ;;  %v678_v53 = vmul.f32 %v2711_v51, %v279_v37  ;;  %v295_v39 = vld [vmem:[%s2273_s20 + $0x3c8] sm:$0xff]  ;;  %v296_v40 = vld [vmem:[%s2273_s20 + $0x3d0] sm:$0xff] }
  0x60   : > { %1854 = vst [vmem:[%s2301_s25 + $0x310] sm:$0xff] %v1462_v41  ;;  %v1466_v1 = vmax.f32 %v1074_v42, 0.0  ;;  %v679_v54 = vmul.f32 %v2711_v51, %v280_v38  ;;  %1855 = vst [vmem:[%s2301_s25 + $0x318] sm:$0xff] %v1463_v46  ;;  %v680_v57 = vmul.f32 %v2711_v51, %v281_v43  ;;  %v681_v58 = vmul.f32 %v2711_v51, %v282_v44  ;;  %v294_v38 = vld [vmem:[%s2273_s20 + $0x3c0] sm:$0xff] }
  0x61   : > { %1856 = vst [vmem:[%s2301_s25 + $0x320] sm:$0xff] %v1464_v0  ;;  %1857 = vst [vmem:[%s2301_s25 + $0x328] sm:$0xff] %v1465_v47  ;;  %v1467_v56 = vmax.f32 %v1075_v49, 0.0  ;;  %v682_v59 = vmul.f32 %v2711_v51, %v283_v45  ;;  %v1076_v60 = vadd.f32 %v2701_v48, %v677_v52  ;;  %v1077_v61 = vadd.f32 %v2701_v48, %v678_v53  ;;  %v297_v45 = vld [vmem:[%s2273_s20 + $0x3d8] sm:$0xff]  ;;  %v298_v46 = vld [vmem:[%s2273_s20 + $0x3e0] sm:$0xff] }
  0x62   : > { %1858 = vst [vmem:[%s2301_s25 + $0x330] sm:$0xff] %v1466_v1  ;;  %v1078_v62 = vadd.f32 %v2701_v48, %v679_v54  ;;  %v683_v63 = vmul.f32 %v2711_v51, %v284_v50  ;;  %v1079_v2 = vadd.f32 %v2701_v48, %v680_v57  ;;  %v1080_v3 = vadd.f32 %v2701_v48, %v681_v58  ;;  %v299_v0 = vld [vmem:[%s2273_s20 + $0x3e8] sm:$0xff]  ;;  %v300_v52 = vld [vmem:[%s2273_s20 + $0x3f0] sm:$0xff]  ;;  %v301_v57 = vld [vmem:[%s2273_s20 + $0x3f8] sm:$0xff] }
  0x63   : > { %1859 = vst [vmem:[%s2301_s25 + $0x338] sm:$0xff] %v1467_v56  ;;  %v1081_v4 = vadd.f32 %v2701_v48, %v682_v59  ;;  %v684_v5 = vmul.f32 %v2711_v51, %v285_v55  ;;  %v1468_v9 = vmax.f32 %v1076_v60, 0.0  ;;  %v1469_v10 = vmax.f32 %v1077_v61, 0.0 }
  0x64   : > { %v1470_v11 = vmax.f32 %v1078_v62, 0.0  ;;  %v1082_v12 = vadd.f32 %v2701_v48, %v683_v63  ;;  %v1471_v16 = vmax.f32 %v1079_v2, 0.0  ;;  %v1472_v17 = vmax.f32 %v1080_v3, 0.0 }
  0x65   : > { %v1473_v18 = vmax.f32 %v1081_v4, 0.0  ;;  %v1083_v19 = vadd.f32 %v2701_v48, %v684_v5  ;;  %1860 = vst [vmem:[%s2301_s25 + $0x340] sm:$0xff] %v1468_v9  ;;  %1861 = vst [vmem:[%s2301_s25 + $0x348] sm:$0xff] %v1469_v10  ;;  %v685_v22 = vmul.f32 %v2711_v51, %v286_v6  ;;  %v686_v23 = vmul.f32 %v2711_v51, %v287_v7  ;;  %v303_v9 = vld [vmem:[%s2273_s20 + $0x408] sm:$0xff]  ;;  %v304_v10 = vld [vmem:[%s2273_s20 + $0x410] sm:$0xff] }
  0x66   : > { %1862 = vst [vmem:[%s2301_s25 + $0x350] sm:$0xff] %v1470_v11  ;;  %v1474_v21 = vmax.f32 %v1082_v12, 0.0  ;;  %v687_v24 = vmul.f32 %v2711_v51, %v288_v8  ;;  %1863 = vst [vmem:[%s2301_s25 + $0x358] sm:$0xff] %v1471_v16  ;;  %v688_v27 = vmul.f32 %v2711_v51, %v289_v13  ;;  %v689_v28 = vmul.f32 %v2711_v51, %v290_v14  ;;  %v302_v8 = vld [vmem:[%s2273_s20 + $0x400] sm:$0xff] }
  0x67   : > { %1864 = vst [vmem:[%s2301_s25 + $0x360] sm:$0xff] %v1472_v17  ;;  %1865 = vst [vmem:[%s2301_s25 + $0x368] sm:$0xff] %v1473_v18  ;;  %v1475_v26 = vmax.f32 %v1083_v19, 0.0  ;;  %v690_v29 = vmul.f32 %v2711_v51, %v291_v15  ;;  %v1084_v30 = vadd.f32 %v2701_v48, %v685_v22  ;;  %v1085_v31 = vadd.f32 %v2701_v48, %v686_v23  ;;  %v305_v15 = vld [vmem:[%s2273_s20 + $0x418] sm:$0xff]  ;;  %v306_v16 = vld [vmem:[%s2273_s20 + $0x420] sm:$0xff] }
  0x68   : > { %1866 = vst [vmem:[%s2301_s25 + $0x370] sm:$0xff] %v1474_v21  ;;  %v1086_v32 = vadd.f32 %v2701_v48, %v687_v24  ;;  %v691_v33 = vmul.f32 %v2711_v51, %v292_v20  ;;  %v1087_v34 = vadd.f32 %v2701_v48, %v688_v27  ;;  %v1088_v35 = vadd.f32 %v2701_v48, %v689_v28  ;;  %v307_v17 = vld [vmem:[%s2273_s20 + $0x428] sm:$0xff]  ;;  %v308_v22 = vld [vmem:[%s2273_s20 + $0x430] sm:$0xff]  ;;  %v309_v27 = vld [vmem:[%s2273_s20 + $0x438] sm:$0xff] }
  0x69   : > { %1867 = vst [vmem:[%s2301_s25 + $0x378] sm:$0xff] %v1475_v26  ;;  %v1089_v36 = vadd.f32 %v2701_v48, %v690_v29  ;;  %v692_v37 = vmul.f32 %v2711_v51, %v293_v25  ;;  %v1476_v41 = vmax.f32 %v1084_v30, 0.0  ;;  %v1477_v42 = vmax.f32 %v1085_v31, 0.0 }
  0x6a   : > { %v1478_v43 = vmax.f32 %v1086_v32, 0.0  ;;  %v1090_v44 = vadd.f32 %v2701_v48, %v691_v33  ;;  %v1479_v47 = vmax.f32 %v1087_v34, 0.0  ;;  %v1480_v49 = vmax.f32 %v1088_v35, 0.0 }
  0x6b   : > { %v1481_v50 = vmax.f32 %v1089_v36, 0.0  ;;  %v1091_v1 = vadd.f32 %v2701_v48, %v692_v37  ;;  %1868 = vst [vmem:[%s2301_s25 + $0x380] sm:$0xff] %v1476_v41  ;;  %1869 = vst [vmem:[%s2301_s25 + $0x388] sm:$0xff] %v1477_v42  ;;  %v693_v54 = vmul.f32 %v2711_v51, %v294_v38  ;;  %v694_v55 = vmul.f32 %v2711_v51, %v295_v39  ;;  %v311_v41 = vld [vmem:[%s2273_s20 + $0x448] sm:$0xff]  ;;  %v312_v42 = vld [vmem:[%s2273_s20 + $0x450] sm:$0xff] }
  0x6c   : > { %1870 = vst [vmem:[%s2301_s25 + $0x390] sm:$0xff] %v1478_v43  ;;  %v1482_v53 = vmax.f32 %v1090_v44, 0.0  ;;  %v695_v56 = vmul.f32 %v2711_v51, %v296_v40  ;;  %1871 = vst [vmem:[%s2301_s25 + $0x398] sm:$0xff] %v1479_v47  ;;  %v696_v59 = vmul.f32 %v2711_v51, %v297_v45  ;;  %v697_v60 = vmul.f32 %v2711_v51, %v298_v46  ;;  %v310_v40 = vld [vmem:[%s2273_s20 + $0x440] sm:$0xff] }
  0x6d   : > { %1872 = vst [vmem:[%s2301_s25 + $0x3a0] sm:$0xff] %v1480_v49  ;;  %1873 = vst [vmem:[%s2301_s25 + $0x3a8] sm:$0xff] %v1481_v50  ;;  %v1483_v58 = vmax.f32 %v1091_v1, 0.0  ;;  %v698_v61 = vmul.f32 %v2711_v51, %v299_v0  ;;  %v1092_v62 = vadd.f32 %v2701_v48, %v693_v54  ;;  %v1093_v63 = vadd.f32 %v2701_v48, %v694_v55  ;;  %v313_v0 = vld [vmem:[%s2273_s20 + $0x458] sm:$0xff]  ;;  %v314_v47 = vld [vmem:[%s2273_s20 + $0x460] sm:$0xff] }
  0x6e   : > { %1874 = vst [vmem:[%s2301_s25 + $0x3b0] sm:$0xff] %v1482_v53  ;;  %v1094_v2 = vadd.f32 %v2701_v48, %v695_v56  ;;  %v699_v3 = vmul.f32 %v2711_v51, %v300_v52  ;;  %v1095_v4 = vadd.f32 %v2701_v48, %v696_v59  ;;  %v1096_v5 = vadd.f32 %v2701_v48, %v697_v60  ;;  %v315_v49 = vld [vmem:[%s2273_s20 + $0x468] sm:$0xff]  ;;  %v316_v54 = vld [vmem:[%s2273_s20 + $0x470] sm:$0xff]  ;;  %v317_v59 = vld [vmem:[%s2273_s20 + $0x478] sm:$0xff] }
  0x6f   : > { %1875 = vst [vmem:[%s2301_s25 + $0x3b8] sm:$0xff] %v1483_v58  ;;  %v1097_v6 = vadd.f32 %v2701_v48, %v698_v61  ;;  %v700_v7 = vmul.f32 %v2711_v51, %v301_v57  ;;  %v1484_v11 = vmax.f32 %v1092_v62, 0.0  ;;  %v1485_v12 = vmax.f32 %v1093_v63, 0.0 }
  0x70   : > { %v1486_v13 = vmax.f32 %v1094_v2, 0.0  ;;  %v1098_v14 = vadd.f32 %v2701_v48, %v699_v3  ;;  %v1487_v18 = vmax.f32 %v1095_v4, 0.0  ;;  %v1488_v19 = vmax.f32 %v1096_v5, 0.0 }
  0x71   : > { %v1489_v20 = vmax.f32 %v1097_v6, 0.0  ;;  %v1099_v21 = vadd.f32 %v2701_v48, %v700_v7  ;;  %1876 = vst [vmem:[%s2301_s25 + $0x3c0] sm:$0xff] %v1484_v11  ;;  %1877 = vst [vmem:[%s2301_s25 + $0x3c8] sm:$0xff] %v1485_v12  ;;  %v701_v24 = vmul.f32 %v2711_v51, %v302_v8  ;;  %v702_v25 = vmul.f32 %v2711_v51, %v303_v9  ;;  %v319_v11 = vld [vmem:[%s2273_s20 + $0x488] sm:$0xff]  ;;  %v320_v12 = vld [vmem:[%s2273_s20 + $0x490] sm:$0xff] }
  0x72   : > { %1878 = vst [vmem:[%s2301_s25 + $0x3d0] sm:$0xff] %v1486_v13  ;;  %v1490_v23 = vmax.f32 %v1098_v14, 0.0  ;;  %v703_v26 = vmul.f32 %v2711_v51, %v304_v10  ;;  %1879 = vst [vmem:[%s2301_s25 + $0x3d8] sm:$0xff] %v1487_v18  ;;  %v704_v29 = vmul.f32 %v2711_v51, %v305_v15  ;;  %v705_v30 = vmul.f32 %v2711_v51, %v306_v16  ;;  %v318_v10 = vld [vmem:[%s2273_s20 + $0x480] sm:$0xff] }
  0x73   : > { %1880 = vst [vmem:[%s2301_s25 + $0x3e0] sm:$0xff] %v1488_v19  ;;  %1881 = vst [vmem:[%s2301_s25 + $0x3e8] sm:$0xff] %v1489_v20  ;;  %v1491_v28 = vmax.f32 %v1099_v21, 0.0  ;;  %v706_v31 = vmul.f32 %v2711_v51, %v307_v17  ;;  %v1100_v32 = vadd.f32 %v2701_v48, %v701_v24  ;;  %v1101_v33 = vadd.f32 %v2701_v48, %v702_v25  ;;  %v321_v17 = vld [vmem:[%s2273_s20 + $0x498] sm:$0xff]  ;;  %v322_v18 = vld [vmem:[%s2273_s20 + $0x4a0] sm:$0xff] }
  0x74   : > { %1882 = vst [vmem:[%s2301_s25 + $0x3f0] sm:$0xff] %v1490_v23  ;;  %v1102_v34 = vadd.f32 %v2701_v48, %v703_v26  ;;  %v707_v35 = vmul.f32 %v2711_v51, %v308_v22  ;;  %v1103_v36 = vadd.f32 %v2701_v48, %v704_v29  ;;  %v1104_v37 = vadd.f32 %v2701_v48, %v705_v30  ;;  %v323_v19 = vld [vmem:[%s2273_s20 + $0x4a8] sm:$0xff]  ;;  %v324_v24 = vld [vmem:[%s2273_s20 + $0x4b0] sm:$0xff]  ;;  %v325_v29 = vld [vmem:[%s2273_s20 + $0x4b8] sm:$0xff] }
  0x75   : > { %1883 = vst [vmem:[%s2301_s25 + $0x3f8] sm:$0xff] %v1491_v28  ;;  %v1105_v38 = vadd.f32 %v2701_v48, %v706_v31  ;;  %v708_v39 = vmul.f32 %v2711_v51, %v309_v27  ;;  %v1492_v43 = vmax.f32 %v1100_v32, 0.0  ;;  %v1493_v44 = vmax.f32 %v1101_v33, 0.0 }
  0x76   : > { %v1494_v45 = vmax.f32 %v1102_v34, 0.0  ;;  %v1106_v46 = vadd.f32 %v2701_v48, %v707_v35  ;;  %v1495_v50 = vmax.f32 %v1103_v36, 0.0  ;;  %v1496_v1 = vmax.f32 %v1104_v37, 0.0 }
  0x77   : > { %v1497_v52 = vmax.f32 %v1105_v38, 0.0  ;;  %v1107_v53 = vadd.f32 %v2701_v48, %v708_v39  ;;  %1884 = vst [vmem:[%s2301_s25 + $0x400] sm:$0xff] %v1492_v43  ;;  %1885 = vst [vmem:[%s2301_s25 + $0x408] sm:$0xff] %v1493_v44  ;;  %v709_v56 = vmul.f32 %v2711_v51, %v310_v40  ;;  %v710_v57 = vmul.f32 %v2711_v51, %v311_v41  ;;  %v327_v43 = vld [vmem:[%s2273_s20 + $0x4c8] sm:$0xff]  ;;  %v328_v44 = vld [vmem:[%s2273_s20 + $0x4d0] sm:$0xff] }
  0x78   : > { %1886 = vst [vmem:[%s2301_s25 + $0x410] sm:$0xff] %v1494_v45  ;;  %v1498_v55 = vmax.f32 %v1106_v46, 0.0  ;;  %v711_v58 = vmul.f32 %v2711_v51, %v312_v42  ;;  %1887 = vst [vmem:[%s2301_s25 + $0x418] sm:$0xff] %v1495_v50  ;;  %v712_v61 = vmul.f32 %v2711_v51, %v313_v0  ;;  %v713_v62 = vmul.f32 %v2711_v51, %v314_v47  ;;  %v326_v42 = vld [vmem:[%s2273_s20 + $0x4c0] sm:$0xff] }
  0x79   : > { %1888 = vst [vmem:[%s2301_s25 + $0x420] sm:$0xff] %v1496_v1  ;;  %1889 = vst [vmem:[%s2301_s25 + $0x428] sm:$0xff] %v1497_v52  ;;  %v1499_v60 = vmax.f32 %v1107_v53, 0.0  ;;  %v714_v63 = vmul.f32 %v2711_v51, %v315_v49  ;;  %v1108_v2 = vadd.f32 %v2701_v48, %v709_v56  ;;  %v1109_v3 = vadd.f32 %v2701_v48, %v710_v57  ;;  %v329_v49 = vld [vmem:[%s2273_s20 + $0x4d8] sm:$0xff]  ;;  %v330_v50 = vld [vmem:[%s2273_s20 + $0x4e0] sm:$0xff] }
  0x7a   : > { %1890 = vst [vmem:[%s2301_s25 + $0x430] sm:$0xff] %v1498_v55  ;;  %v1110_v4 = vadd.f32 %v2701_v48, %v711_v58  ;;  %v715_v5 = vmul.f32 %v2711_v51, %v316_v54  ;;  %v1111_v6 = vadd.f32 %v2701_v48, %v712_v61  ;;  %v1112_v7 = vadd.f32 %v2701_v48, %v713_v62  ;;  %v331_v1 = vld [vmem:[%s2273_s20 + $0x4e8] sm:$0xff]  ;;  %v332_v56 = vld [vmem:[%s2273_s20 + $0x4f0] sm:$0xff]  ;;  %v333_v61 = vld [vmem:[%s2273_s20 + $0x4f8] sm:$0xff] }
  0x7b   : > { %1891 = vst [vmem:[%s2301_s25 + $0x438] sm:$0xff] %v1499_v60  ;;  %v1113_v8 = vadd.f32 %v2701_v48, %v714_v63  ;;  %v716_v9 = vmul.f32 %v2711_v51, %v317_v59  ;;  %v1500_v13 = vmax.f32 %v1108_v2, 0.0  ;;  %v1501_v14 = vmax.f32 %v1109_v3, 0.0 }
  0x7c   : > { %v1502_v15 = vmax.f32 %v1110_v4, 0.0  ;;  %v1114_v16 = vadd.f32 %v2701_v48, %v715_v5  ;;  %v1503_v20 = vmax.f32 %v1111_v6, 0.0  ;;  %v1504_v21 = vmax.f32 %v1112_v7, 0.0 }
  0x7d   : > { %v1505_v22 = vmax.f32 %v1113_v8, 0.0  ;;  %v1115_v23 = vadd.f32 %v2701_v48, %v716_v9  ;;  %1892 = vst [vmem:[%s2301_s25 + $0x440] sm:$0xff] %v1500_v13  ;;  %1893 = vst [vmem:[%s2301_s25 + $0x448] sm:$0xff] %v1501_v14  ;;  %v717_v26 = vmul.f32 %v2711_v51, %v318_v10  ;;  %v718_v27 = vmul.f32 %v2711_v51, %v319_v11  ;;  %v335_v13 = vld [vmem:[%s2273_s20 + $0x508] sm:$0xff]  ;;  %v336_v14 = vld [vmem:[%s2273_s20 + $0x510] sm:$0xff] }
  0x7e   : > { %1894 = vst [vmem:[%s2301_s25 + $0x450] sm:$0xff] %v1502_v15  ;;  %v1506_v25 = vmax.f32 %v1114_v16, 0.0  ;;  %v719_v28 = vmul.f32 %v2711_v51, %v320_v12  ;;  %1895 = vst [vmem:[%s2301_s25 + $0x458] sm:$0xff] %v1503_v20  ;;  %v720_v31 = vmul.f32 %v2711_v51, %v321_v17  ;;  %v721_v32 = vmul.f32 %v2711_v51, %v322_v18  ;;  %v334_v12 = vld [vmem:[%s2273_s20 + $0x500] sm:$0xff] }
  0x7f   : > { %1896 = vst [vmem:[%s2301_s25 + $0x460] sm:$0xff] %v1504_v21  ;;  %1897 = vst [vmem:[%s2301_s25 + $0x468] sm:$0xff] %v1505_v22  ;;  %v1507_v30 = vmax.f32 %v1115_v23, 0.0  ;;  %v722_v33 = vmul.f32 %v2711_v51, %v323_v19  ;;  %v1116_v34 = vadd.f32 %v2701_v48, %v717_v26  ;;  %v1117_v35 = vadd.f32 %v2701_v48, %v718_v27  ;;  %v337_v19 = vld [vmem:[%s2273_s20 + $0x518] sm:$0xff]  ;;  %v338_v20 = vld [vmem:[%s2273_s20 + $0x520] sm:$0xff] }
  0x80   : > { %1898 = vst [vmem:[%s2301_s25 + $0x470] sm:$0xff] %v1506_v25  ;;  %v1118_v36 = vadd.f32 %v2701_v48, %v719_v28  ;;  %v723_v37 = vmul.f32 %v2711_v51, %v324_v24  ;;  %v1119_v38 = vadd.f32 %v2701_v48, %v720_v31  ;;  %v1120_v39 = vadd.f32 %v2701_v48, %v721_v32  ;;  %v339_v21 = vld [vmem:[%s2273_s20 + $0x528] sm:$0xff]  ;;  %v340_v26 = vld [vmem:[%s2273_s20 + $0x530] sm:$0xff]  ;;  %v341_v31 = vld [vmem:[%s2273_s20 + $0x538] sm:$0xff] }
  0x81   : > { %1899 = vst [vmem:[%s2301_s25 + $0x478] sm:$0xff] %v1507_v30  ;;  %v1121_v40 = vadd.f32 %v2701_v48, %v722_v33  ;;  %v724_v41 = vmul.f32 %v2711_v51, %v325_v29  ;;  %v1508_v45 = vmax.f32 %v1116_v34, 0.0  ;;  %v1509_v46 = vmax.f32 %v1117_v35, 0.0 }
  0x82   : > { %v1510_v0 = vmax.f32 %v1118_v36, 0.0  ;;  %v1122_v47 = vadd.f32 %v2701_v48, %v723_v37  ;;  %v1511_v52 = vmax.f32 %v1119_v38, 0.0  ;;  %v1512_v53 = vmax.f32 %v1120_v39, 0.0 }
  0x83   : > { %v1513_v54 = vmax.f32 %v1121_v40, 0.0  ;;  %v1123_v55 = vadd.f32 %v2701_v48, %v724_v41  ;;  %1900 = vst [vmem:[%s2301_s25 + $0x480] sm:$0xff] %v1508_v45  ;;  %1901 = vst [vmem:[%s2301_s25 + $0x488] sm:$0xff] %v1509_v46  ;;  %v725_v58 = vmul.f32 %v2711_v51, %v326_v42  ;;  %v726_v59 = vmul.f32 %v2711_v51, %v327_v43  ;;  %v343_v45 = vld [vmem:[%s2273_s20 + $0x548] sm:$0xff]  ;;  %v344_v46 = vld [vmem:[%s2273_s20 + $0x550] sm:$0xff] }
  0x84   : > { %1902 = vst [vmem:[%s2301_s25 + $0x490] sm:$0xff] %v1510_v0  ;;  %v1514_v57 = vmax.f32 %v1122_v47, 0.0  ;;  %v727_v60 = vmul.f32 %v2711_v51, %v328_v44  ;;  %1903 = vst [vmem:[%s2301_s25 + $0x498] sm:$0xff] %v1511_v52  ;;  %v728_v63 = vmul.f32 %v2711_v51, %v329_v49  ;;  %v729_v2 = vmul.f32 %v2711_v51, %v330_v50  ;;  %v342_v44 = vld [vmem:[%s2273_s20 + $0x540] sm:$0xff] }
  0x85   : > { %1904 = vst [vmem:[%s2301_s25 + $0x4a0] sm:$0xff] %v1512_v53  ;;  %1905 = vst [vmem:[%s2301_s25 + $0x4a8] sm:$0xff] %v1513_v54  ;;  %v1515_v62 = vmax.f32 %v1123_v55, 0.0  ;;  %v730_v3 = vmul.f32 %v2711_v51, %v331_v1  ;;  %v1124_v4 = vadd.f32 %v2701_v48, %v725_v58  ;;  %v1125_v5 = vadd.f32 %v2701_v48, %v726_v59  ;;  %v345_v1 = vld [vmem:[%s2273_s20 + $0x558] sm:$0xff]  ;;  %v346_v52 = vld [vmem:[%s2273_s20 + $0x560] sm:$0xff] }
  0x86   : > { %1906 = vst [vmem:[%s2301_s25 + $0x4b0] sm:$0xff] %v1514_v57  ;;  %v1126_v6 = vadd.f32 %v2701_v48, %v727_v60  ;;  %v731_v7 = vmul.f32 %v2711_v51, %v332_v56  ;;  %v1127_v8 = vadd.f32 %v2701_v48, %v728_v63  ;;  %v1128_v9 = vadd.f32 %v2701_v48, %v729_v2  ;;  %v347_v53 = vld [vmem:[%s2273_s20 + $0x568] sm:$0xff]  ;;  %v348_v58 = vld [vmem:[%s2273_s20 + $0x570] sm:$0xff]  ;;  %v349_v63 = vld [vmem:[%s2273_s20 + $0x578] sm:$0xff] }
  0x87   : > { %1907 = vst [vmem:[%s2301_s25 + $0x4b8] sm:$0xff] %v1515_v62  ;;  %v1129_v10 = vadd.f32 %v2701_v48, %v730_v3  ;;  %v732_v11 = vmul.f32 %v2711_v51, %v333_v61  ;;  %v1516_v15 = vmax.f32 %v1124_v4, 0.0  ;;  %v1517_v16 = vmax.f32 %v1125_v5, 0.0 }
  0x88   : > { %v1518_v17 = vmax.f32 %v1126_v6, 0.0  ;;  %v1130_v18 = vadd.f32 %v2701_v48, %v731_v7  ;;  %v1519_v22 = vmax.f32 %v1127_v8, 0.0  ;;  %v1520_v23 = vmax.f32 %v1128_v9, 0.0 }
  0x89   : > { %v1521_v24 = vmax.f32 %v1129_v10, 0.0  ;;  %v1131_v25 = vadd.f32 %v2701_v48, %v732_v11  ;;  %1908 = vst [vmem:[%s2301_s25 + $0x4c0] sm:$0xff] %v1516_v15  ;;  %1909 = vst [vmem:[%s2301_s25 + $0x4c8] sm:$0xff] %v1517_v16  ;;  %v733_v28 = vmul.f32 %v2711_v51, %v334_v12  ;;  %v734_v29 = vmul.f32 %v2711_v51, %v335_v13  ;;  %v351_v15 = vld [vmem:[%s2273_s20 + $0x588] sm:$0xff]  ;;  %v352_v16 = vld [vmem:[%s2273_s20 + $0x590] sm:$0xff] }
  0x8a   : > { %1910 = vst [vmem:[%s2301_s25 + $0x4d0] sm:$0xff] %v1518_v17  ;;  %v1522_v27 = vmax.f32 %v1130_v18, 0.0  ;;  %v735_v30 = vmul.f32 %v2711_v51, %v336_v14  ;;  %1911 = vst [vmem:[%s2301_s25 + $0x4d8] sm:$0xff] %v1519_v22  ;;  %v736_v33 = vmul.f32 %v2711_v51, %v337_v19  ;;  %v737_v34 = vmul.f32 %v2711_v51, %v338_v20  ;;  %v350_v14 = vld [vmem:[%s2273_s20 + $0x580] sm:$0xff] }
  0x8b   : > { %1912 = vst [vmem:[%s2301_s25 + $0x4e0] sm:$0xff] %v1520_v23  ;;  %1913 = vst [vmem:[%s2301_s25 + $0x4e8] sm:$0xff] %v1521_v24  ;;  %v1523_v32 = vmax.f32 %v1131_v25, 0.0  ;;  %v738_v35 = vmul.f32 %v2711_v51, %v339_v21  ;;  %v1132_v36 = vadd.f32 %v2701_v48, %v733_v28  ;;  %v1133_v37 = vadd.f32 %v2701_v48, %v734_v29  ;;  %v353_v21 = vld [vmem:[%s2273_s20 + $0x598] sm:$0xff]  ;;  %v354_v22 = vld [vmem:[%s2273_s20 + $0x5a0] sm:$0xff] }
  0x8c   : > { %1914 = vst [vmem:[%s2301_s25 + $0x4f0] sm:$0xff] %v1522_v27  ;;  %v1134_v38 = vadd.f32 %v2701_v48, %v735_v30  ;;  %v739_v39 = vmul.f32 %v2711_v51, %v340_v26  ;;  %v1135_v40 = vadd.f32 %v2701_v48, %v736_v33  ;;  %v1136_v41 = vadd.f32 %v2701_v48, %v737_v34  ;;  %v355_v23 = vld [vmem:[%s2273_s20 + $0x5a8] sm:$0xff]  ;;  %v356_v28 = vld [vmem:[%s2273_s20 + $0x5b0] sm:$0xff]  ;;  %v357_v33 = vld [vmem:[%s2273_s20 + $0x5b8] sm:$0xff] }
  0x8d   : > { %1915 = vst [vmem:[%s2301_s25 + $0x4f8] sm:$0xff] %v1523_v32  ;;  %v1137_v42 = vadd.f32 %v2701_v48, %v738_v35  ;;  %v740_v43 = vmul.f32 %v2711_v51, %v341_v31  ;;  %v1524_v0 = vmax.f32 %v1132_v36, 0.0  ;;  %v1525_v47 = vmax.f32 %v1133_v37, 0.0 }
  0x8e   : > { %v1526_v49 = vmax.f32 %v1134_v38, 0.0  ;;  %v1138_v50 = vadd.f32 %v2701_v48, %v739_v39  ;;  %v1527_v54 = vmax.f32 %v1135_v40, 0.0  ;;  %v1528_v55 = vmax.f32 %v1136_v41, 0.0 }
  0x8f   : > { %v1529_v56 = vmax.f32 %v1137_v42, 0.0  ;;  %v1139_v57 = vadd.f32 %v2701_v48, %v740_v43  ;;  %1916 = vst [vmem:[%s2301_s25 + $0x500] sm:$0xff] %v1524_v0  ;;  %1917 = vst [vmem:[%s2301_s25 + $0x508] sm:$0xff] %v1525_v47  ;;  %v741_v60 = vmul.f32 %v2711_v51, %v342_v44  ;;  %v742_v61 = vmul.f32 %v2711_v51, %v343_v45  ;;  %v359_v0 = vld [vmem:[%s2273_s20 + $0x5c8] sm:$0xff]  ;;  %v360_v47 = vld [vmem:[%s2273_s20 + $0x5d0] sm:$0xff] }
  0x90   : > { %1918 = vst [vmem:[%s2301_s25 + $0x510] sm:$0xff] %v1526_v49  ;;  %v1530_v59 = vmax.f32 %v1138_v50, 0.0  ;;  %v743_v62 = vmul.f32 %v2711_v51, %v344_v46  ;;  %1919 = vst [vmem:[%s2301_s25 + $0x518] sm:$0xff] %v1527_v54  ;;  %v744_v3 = vmul.f32 %v2711_v51, %v345_v1  ;;  %v745_v4 = vmul.f32 %v2711_v51, %v346_v52  ;;  %v358_v46 = vld [vmem:[%s2273_s20 + $0x5c0] sm:$0xff] }
  0x91   : > { %1920 = vst [vmem:[%s2301_s25 + $0x520] sm:$0xff] %v1528_v55  ;;  %1921 = vst [vmem:[%s2301_s25 + $0x528] sm:$0xff] %v1529_v56  ;;  %v1531_v2 = vmax.f32 %v1139_v57, 0.0  ;;  %v746_v5 = vmul.f32 %v2711_v51, %v347_v53  ;;  %v1140_v6 = vadd.f32 %v2701_v48, %v741_v60  ;;  %v1141_v7 = vadd.f32 %v2701_v48, %v742_v61  ;;  %v361_v53 = vld [vmem:[%s2273_s20 + $0x5d8] sm:$0xff]  ;;  %v362_v54 = vld [vmem:[%s2273_s20 + $0x5e0] sm:$0xff] }
  0x92   : > { %1922 = vst [vmem:[%s2301_s25 + $0x530] sm:$0xff] %v1530_v59  ;;  %v1142_v8 = vadd.f32 %v2701_v48, %v743_v62  ;;  %v747_v9 = vmul.f32 %v2711_v51, %v348_v58  ;;  %v1143_v10 = vadd.f32 %v2701_v48, %v744_v3  ;;  %v1144_v11 = vadd.f32 %v2701_v48, %v745_v4  ;;  %v363_v55 = vld [vmem:[%s2273_s20 + $0x5e8] sm:$0xff]  ;;  %v364_v60 = vld [vmem:[%s2273_s20 + $0x5f0] sm:$0xff]  ;;  %v365_v3 = vld [vmem:[%s2273_s20 + $0x5f8] sm:$0xff] }
  0x93   : > { %1923 = vst [vmem:[%s2301_s25 + $0x538] sm:$0xff] %v1531_v2  ;;  %v1145_v12 = vadd.f32 %v2701_v48, %v746_v5  ;;  %v748_v13 = vmul.f32 %v2711_v51, %v349_v63  ;;  %v1532_v17 = vmax.f32 %v1140_v6, 0.0  ;;  %v1533_v18 = vmax.f32 %v1141_v7, 0.0 }
  0x94   : > { %v1534_v19 = vmax.f32 %v1142_v8, 0.0  ;;  %v1146_v20 = vadd.f32 %v2701_v48, %v747_v9  ;;  %v1535_v24 = vmax.f32 %v1143_v10, 0.0  ;;  %v1536_v25 = vmax.f32 %v1144_v11, 0.0 }
  0x95   : > { %v1537_v26 = vmax.f32 %v1145_v12, 0.0  ;;  %v1147_v27 = vadd.f32 %v2701_v48, %v748_v13  ;;  %1924 = vst [vmem:[%s2301_s25 + $0x540] sm:$0xff] %v1532_v17  ;;  %1925 = vst [vmem:[%s2301_s25 + $0x548] sm:$0xff] %v1533_v18  ;;  %v749_v30 = vmul.f32 %v2711_v51, %v350_v14  ;;  %v750_v31 = vmul.f32 %v2711_v51, %v351_v15  ;;  %v367_v17 = vld [vmem:[%s2273_s20 + $0x608] sm:$0xff]  ;;  %v368_v18 = vld [vmem:[%s2273_s20 + $0x610] sm:$0xff] }
  0x96   : > { %1926 = vst [vmem:[%s2301_s25 + $0x550] sm:$0xff] %v1534_v19  ;;  %v1538_v29 = vmax.f32 %v1146_v20, 0.0  ;;  %v751_v32 = vmul.f32 %v2711_v51, %v352_v16  ;;  %1927 = vst [vmem:[%s2301_s25 + $0x558] sm:$0xff] %v1535_v24  ;;  %v752_v35 = vmul.f32 %v2711_v51, %v353_v21  ;;  %v753_v36 = vmul.f32 %v2711_v51, %v354_v22  ;;  %v366_v16 = vld [vmem:[%s2273_s20 + $0x600] sm:$0xff] }
  0x97   : > { %1928 = vst [vmem:[%s2301_s25 + $0x560] sm:$0xff] %v1536_v25  ;;  %1929 = vst [vmem:[%s2301_s25 + $0x568] sm:$0xff] %v1537_v26  ;;  %v1539_v34 = vmax.f32 %v1147_v27, 0.0  ;;  %v754_v37 = vmul.f32 %v2711_v51, %v355_v23  ;;  %v1148_v38 = vadd.f32 %v2701_v48, %v749_v30  ;;  %v1149_v39 = vadd.f32 %v2701_v48, %v750_v31  ;;  %v369_v23 = vld [vmem:[%s2273_s20 + $0x618] sm:$0xff]  ;;  %v370_v24 = vld [vmem:[%s2273_s20 + $0x620] sm:$0xff] }
  0x98   : > { %1930 = vst [vmem:[%s2301_s25 + $0x570] sm:$0xff] %v1538_v29  ;;  %v1150_v40 = vadd.f32 %v2701_v48, %v751_v32  ;;  %v755_v41 = vmul.f32 %v2711_v51, %v356_v28  ;;  %v1151_v42 = vadd.f32 %v2701_v48, %v752_v35  ;;  %v1152_v43 = vadd.f32 %v2701_v48, %v753_v36  ;;  %v371_v25 = vld [vmem:[%s2273_s20 + $0x628] sm:$0xff]  ;;  %v372_v30 = vld [vmem:[%s2273_s20 + $0x630] sm:$0xff]  ;;  %v373_v35 = vld [vmem:[%s2273_s20 + $0x638] sm:$0xff] }
  0x99   : > { %1931 = vst [vmem:[%s2301_s25 + $0x578] sm:$0xff] %v1539_v34  ;;  %v1153_v44 = vadd.f32 %v2701_v48, %v754_v37  ;;  %v756_v45 = vmul.f32 %v2711_v51, %v357_v33  ;;  %v1540_v49 = vmax.f32 %v1148_v38, 0.0  ;;  %v1541_v50 = vmax.f32 %v1149_v39, 0.0 }
  0x9a   : > { %v1542_v1 = vmax.f32 %v1150_v40, 0.0  ;;  %v1154_v52 = vadd.f32 %v2701_v48, %v755_v41  ;;  %v1543_v56 = vmax.f32 %v1151_v42, 0.0  ;;  %v1544_v57 = vmax.f32 %v1152_v43, 0.0 }
  0x9b   : > { %v1545_v58 = vmax.f32 %v1153_v44, 0.0  ;;  %v1155_v59 = vadd.f32 %v2701_v48, %v756_v45  ;;  %1932 = vst [vmem:[%s2301_s25 + $0x580] sm:$0xff] %v1540_v49  ;;  %1933 = vst [vmem:[%s2301_s25 + $0x588] sm:$0xff] %v1541_v50  ;;  %v757_v62 = vmul.f32 %v2711_v51, %v358_v46  ;;  %v758_v63 = vmul.f32 %v2711_v51, %v359_v0  ;;  %v375_v49 = vld [vmem:[%s2273_s20 + $0x648] sm:$0xff]  ;;  %v376_v50 = vld [vmem:[%s2273_s20 + $0x650] sm:$0xff] }
  0x9c   : > { %1934 = vst [vmem:[%s2301_s25 + $0x590] sm:$0xff] %v1542_v1  ;;  %v1546_v61 = vmax.f32 %v1154_v52, 0.0  ;;  %v759_v2 = vmul.f32 %v2711_v51, %v360_v47  ;;  %1935 = vst [vmem:[%s2301_s25 + $0x598] sm:$0xff] %v1543_v56  ;;  %v760_v5 = vmul.f32 %v2711_v51, %v361_v53  ;;  %v761_v6 = vmul.f32 %v2711_v51, %v362_v54  ;;  %v374_v47 = vld [vmem:[%s2273_s20 + $0x640] sm:$0xff] }
  0x9d   : > { %1936 = vst [vmem:[%s2301_s25 + $0x5a0] sm:$0xff] %v1544_v57  ;;  %1937 = vst [vmem:[%s2301_s25 + $0x5a8] sm:$0xff] %v1545_v58  ;;  %v1547_v4 = vmax.f32 %v1155_v59, 0.0  ;;  %v762_v7 = vmul.f32 %v2711_v51, %v363_v55  ;;  %v1156_v8 = vadd.f32 %v2701_v48, %v757_v62  ;;  %v1157_v9 = vadd.f32 %v2701_v48, %v758_v63  ;;  %v377_v55 = vld [vmem:[%s2273_s20 + $0x658] sm:$0xff]  ;;  %v378_v56 = vld [vmem:[%s2273_s20 + $0x660] sm:$0xff] }
  0x9e   : > { %1938 = vst [vmem:[%s2301_s25 + $0x5b0] sm:$0xff] %v1546_v61  ;;  %v1158_v10 = vadd.f32 %v2701_v48, %v759_v2  ;;  %v763_v11 = vmul.f32 %v2711_v51, %v364_v60  ;;  %v1159_v12 = vadd.f32 %v2701_v48, %v760_v5  ;;  %v1160_v13 = vadd.f32 %v2701_v48, %v761_v6  ;;  %v379_v57 = vld [vmem:[%s2273_s20 + $0x668] sm:$0xff]  ;;  %v380_v62 = vld [vmem:[%s2273_s20 + $0x670] sm:$0xff]  ;;  %v381_v5 = vld [vmem:[%s2273_s20 + $0x678] sm:$0xff] }
  0x9f   : > { %1939 = vst [vmem:[%s2301_s25 + $0x5b8] sm:$0xff] %v1547_v4  ;;  %v1161_v14 = vadd.f32 %v2701_v48, %v762_v7  ;;  %v764_v15 = vmul.f32 %v2711_v51, %v365_v3  ;;  %v1548_v19 = vmax.f32 %v1156_v8, 0.0  ;;  %v1549_v20 = vmax.f32 %v1157_v9, 0.0 }
  0xa0   : > { %v1550_v21 = vmax.f32 %v1158_v10, 0.0  ;;  %v1162_v22 = vadd.f32 %v2701_v48, %v763_v11  ;;  %v1551_v26 = vmax.f32 %v1159_v12, 0.0  ;;  %v1552_v27 = vmax.f32 %v1160_v13, 0.0 }
  0xa1   : > { %v1553_v28 = vmax.f32 %v1161_v14, 0.0  ;;  %v1163_v29 = vadd.f32 %v2701_v48, %v764_v15  ;;  %1940 = vst [vmem:[%s2301_s25 + $0x5c0] sm:$0xff] %v1548_v19  ;;  %1941 = vst [vmem:[%s2301_s25 + $0x5c8] sm:$0xff] %v1549_v20  ;;  %v765_v32 = vmul.f32 %v2711_v51, %v366_v16  ;;  %v766_v33 = vmul.f32 %v2711_v51, %v367_v17  ;;  %v383_v19 = vld [vmem:[%s2273_s20 + $0x688] sm:$0xff]  ;;  %v384_v20 = vld [vmem:[%s2273_s20 + $0x690] sm:$0xff] }
  0xa2   : > { %1942 = vst [vmem:[%s2301_s25 + $0x5d0] sm:$0xff] %v1550_v21  ;;  %v1554_v31 = vmax.f32 %v1162_v22, 0.0  ;;  %v767_v34 = vmul.f32 %v2711_v51, %v368_v18  ;;  %1943 = vst [vmem:[%s2301_s25 + $0x5d8] sm:$0xff] %v1551_v26  ;;  %v768_v37 = vmul.f32 %v2711_v51, %v369_v23  ;;  %v769_v38 = vmul.f32 %v2711_v51, %v370_v24  ;;  %v382_v18 = vld [vmem:[%s2273_s20 + $0x680] sm:$0xff]  ;;  %v387_v26 = vld [vmem:[%s2273_s20 + $0x6a8] sm:$0xff] }
  0xa3   : > { %1944 = vst [vmem:[%s2301_s25 + $0x5e0] sm:$0xff] %v1552_v27  ;;  %1945 = vst [vmem:[%s2301_s25 + $0x5e8] sm:$0xff] %v1553_v28  ;;  %v1555_v36 = vmax.f32 %v1163_v29, 0.0  ;;  %v770_v39 = vmul.f32 %v2711_v51, %v371_v25  ;;  %v1164_v40 = vadd.f32 %v2701_v48, %v765_v32  ;;  %v1165_v41 = vadd.f32 %v2701_v48, %v766_v33  ;;  %v3123_v24 = vld [vmem:[%s3888_s2] ss:$0 sm:$0xff] }
  0xa4   : > { %1946 = vst [vmem:[%s2301_s25 + $0x5f0] sm:$0xff] %v1554_v31  ;;  %v1166_v42 = vadd.f32 %v2701_v48, %v767_v34  ;;  %v771_v43 = vmul.f32 %v2711_v51, %v372_v30  ;;  %v1167_v44 = vadd.f32 %v2701_v48, %v768_v37  ;;  %v1168_v45 = vadd.f32 %v2701_v48, %v769_v38  ;;  %v388_v31 = vld [vmem:[%s2273_s20 + $0x6b0] sm:$0xff]  ;;  %v3137_v33 = vld [vmem:[%s3887_s1] ss:$0 sm:$0xff]  ;;  %v389_v37 = vld [vmem:[%s2273_s20 + $0x6b8] sm:$0xff] }
  0xa5   : > { %1947 = vst [vmem:[%s2301_s25 + $0x5f8] sm:$0xff] %v1555_v36  ;;  %v1169_v46 = vadd.f32 %v2701_v48, %v770_v39  ;;  %v772_v0 = vmul.f32 %v2711_v51, %v373_v35  ;;  %v1556_v1 = vmax.f32 %v1164_v40, 0.0  ;;  %v1557_v52 = vmax.f32 %v1165_v41, 0.0 }
  0xa6   : > { %v1558_v53 = vmax.f32 %v1166_v42, 0.0  ;;  %v1170_v54 = vadd.f32 %v2701_v48, %v771_v43  ;;  %v1559_v58 = vmax.f32 %v1167_v44, 0.0  ;;  %v1560_v59 = vmax.f32 %v1168_v45, 0.0 }
  0xa7   : > { %v1561_v60 = vmax.f32 %v1169_v46, 0.0  ;;  %v1171_v61 = vadd.f32 %v2701_v48, %v772_v0  ;;  %1948 = vst [vmem:[%s2301_s25 + $0x600] sm:$0xff] %v1556_v1  ;;  %1949 = vst [vmem:[%s2301_s25 + $0x608] sm:$0xff] %v1557_v52  ;;  %v773_v2 = vmul.f32 %v2711_v51, %v374_v47  ;;  %v774_v3 = vmul.f32 %v2711_v51, %v375_v49  ;;  %v391_v1 = vld [vmem:[%s2273_s20 + $0x6c8] sm:$0xff]  ;;  %v392_v52 = vld [vmem:[%s2273_s20 + $0x6d0] sm:$0xff] }
  0xa8   : > { %1950 = vst [vmem:[%s2301_s25 + $0x610] sm:$0xff] %v1558_v53  ;;  %v1562_v63 = vmax.f32 %v1170_v54, 0.0  ;;  %v775_v4 = vmul.f32 %v2711_v51, %v376_v50  ;;  %1951 = vst [vmem:[%s2301_s25 + $0x618] sm:$0xff] %v1559_v58  ;;  %v776_v7 = vmul.f32 %v2711_v51, %v377_v55  ;;  %v777_v8 = vmul.f32 %v2711_v51, %v378_v56  ;;  %v390_v50 = vld [vmem:[%s2273_s20 + $0x6c0] sm:$0xff] }
  0xa9   : > { %1952 = vst [vmem:[%s2301_s25 + $0x620] sm:$0xff] %v1560_v59  ;;  %1953 = vst [vmem:[%s2301_s25 + $0x628] sm:$0xff] %v1561_v60  ;;  %v1563_v6 = vmax.f32 %v1171_v61, 0.0  ;;  %v778_v9 = vmul.f32 %v2711_v51, %v379_v57  ;;  %v1172_v10 = vadd.f32 %v2701_v48, %v773_v2  ;;  %v1173_v11 = vadd.f32 %v2701_v48, %v774_v3  ;;  %v393_v57 = vld [vmem:[%s2273_s20 + $0x6d8] sm:$0xff]  ;;  %v394_v58 = vld [vmem:[%s2273_s20 + $0x6e0] sm:$0xff] }
  0xaa   : > { %1954 = vst [vmem:[%s2301_s25 + $0x630] sm:$0xff] %v1562_v63  ;;  %v1174_v12 = vadd.f32 %v2701_v48, %v775_v4  ;;  %v779_v13 = vmul.f32 %v2711_v51, %v380_v62  ;;  %v1175_v14 = vadd.f32 %v2701_v48, %v776_v7  ;;  %v1176_v15 = vadd.f32 %v2701_v48, %v777_v8  ;;  %v395_v59 = vld [vmem:[%s2273_s20 + $0x6e8] sm:$0xff]  ;;  %v396_v2 = vld [vmem:[%s2273_s20 + $0x6f0] sm:$0xff]  ;;  %v397_v7 = vld [vmem:[%s2273_s20 + $0x6f8] sm:$0xff] }
  0xab   : > { %1955 = vst [vmem:[%s2301_s25 + $0x638] sm:$0xff] %v1563_v6  ;;  %v1177_v16 = vadd.f32 %v2701_v48, %v778_v9  ;;  %v780_v17 = vmul.f32 %v2711_v51, %v381_v5  ;;  %v1564_v21 = vmax.f32 %v1172_v10, 0.0  ;;  %v1565_v22 = vmax.f32 %v1173_v11, 0.0  ;;  %v385_v48 = vld [vmem:[%s2273_s20 + $0x698] sm:$0xff]  ;;  %v386_v51 = vld [vmem:[%s2273_s20 + $0x6a0] sm:$0xff] }
  0xac   : > { %v1566_v23 = vmax.f32 %v1174_v12, 0.0  ;;  %v1178_v25 = vadd.f32 %v3123_v24, %v779_v13  ;;  %v1567_v27 = vmax.f32 %v1175_v14, 0.0  ;;  %v1568_v28 = vmax.f32 %v1176_v15, 0.0 }
  0xad   : > { %v1569_v29 = vmax.f32 %v1177_v16, 0.0  ;;  %v1179_v30 = vadd.f32 %v3123_v24, %v780_v17  ;;  %1956 = vst [vmem:[%s2301_s25 + $0x640] sm:$0xff] %v1564_v21  ;;  %1957 = vst [vmem:[%s2301_s25 + $0x648] sm:$0xff] %v1565_v22  ;;  %v781_v34 = vmul.f32 %v3137_v33, %v382_v18  ;;  %v782_v35 = vmul.f32 %v3137_v33, %v383_v19  ;;  %v399_v21 = vld [vmem:[%s2273_s20 + $0x708] sm:$0xff]  ;;  %v400_v22 = vld [vmem:[%s2273_s20 + $0x710] sm:$0xff] }
  0xae   : > { %1958 = vst [vmem:[%s2301_s25 + $0x650] sm:$0xff] %v1566_v23  ;;  %v1570_v32 = vmax.f32 %v1178_v25, 0.0  ;;  %v783_v36 = vmul.f32 %v3137_v33, %v384_v20  ;;  %1959 = vst [vmem:[%s2301_s25 + $0x658] sm:$0xff] %v1567_v27  ;;  %v784_v39 = vmul.f32 %v3137_v33, %v385_v48  ;;  %v785_v40 = vmul.f32 %v3137_v33, %v386_v51  ;;  %v398_v20 = vld [vmem:[%s2273_s20 + $0x700] sm:$0xff] }
  0xaf   : > { %1960 = vst [vmem:[%s2301_s25 + $0x660] sm:$0xff] %v1568_v28  ;;  %1961 = vst [vmem:[%s2301_s25 + $0x668] sm:$0xff] %v1569_v29  ;;  %v1571_v38 = vmax.f32 %v1179_v30, 0.0  ;;  %v786_v41 = vmul.f32 %v3137_v33, %v387_v26  ;;  %v1180_v42 = vadd.f32 %v3123_v24, %v781_v34  ;;  %v1181_v43 = vadd.f32 %v3123_v24, %v782_v35  ;;  %v401_v26 = vld [vmem:[%s2273_s20 + $0x718] sm:$0xff]  ;;  %v402_v27 = vld [vmem:[%s2273_s20 + $0x720] sm:$0xff] }
  0xb0   : > { %1962 = vst [vmem:[%s2301_s25 + $0x670] sm:$0xff] %v1570_v32  ;;  %v1182_v44 = vadd.f32 %v3123_v24, %v783_v36  ;;  %v787_v45 = vmul.f32 %v3137_v33, %v388_v31  ;;  %v1183_v46 = vadd.f32 %v3123_v24, %v784_v39  ;;  %v1184_v0 = vadd.f32 %v3123_v24, %v785_v40  ;;  %v403_v28 = vld [vmem:[%s2273_s20 + $0x728] sm:$0xff]  ;;  %v404_v34 = vld [vmem:[%s2273_s20 + $0x730] sm:$0xff]  ;;  %v405_v39 = vld [vmem:[%s2273_s20 + $0x738] sm:$0xff] }
  0xb1   : > { %1963 = vst [vmem:[%s2301_s25 + $0x678] sm:$0xff] %v1571_v38  ;;  %v1185_v47 = vadd.f32 %v3123_v24, %v786_v41  ;;  %v788_v49 = vmul.f32 %v3137_v33, %v389_v37  ;;  %v1572_v53 = vmax.f32 %v1180_v42, 0.0  ;;  %v1573_v54 = vmax.f32 %v1181_v43, 0.0 }
  0xb2   : > { %v1574_v55 = vmax.f32 %v1182_v44, 0.0  ;;  %v1186_v56 = vadd.f32 %v3123_v24, %v787_v45  ;;  %v1575_v60 = vmax.f32 %v1183_v46, 0.0  ;;  %v1576_v61 = vmax.f32 %v1184_v0, 0.0 }
  0xb3   : > { %v1577_v62 = vmax.f32 %v1185_v47, 0.0  ;;  %v1187_v63 = vadd.f32 %v3123_v24, %v788_v49  ;;  %1964 = vst [vmem:[%s2301_s25 + $0x680] sm:$0xff] %v1572_v53  ;;  %1965 = vst [vmem:[%s2301_s25 + $0x688] sm:$0xff] %v1573_v54  ;;  %v789_v4 = vmul.f32 %v3137_v33, %v390_v50  ;;  %v790_v5 = vmul.f32 %v3137_v33, %v391_v1  ;;  %v407_v53 = vld [vmem:[%s2273_s20 + $0x748] sm:$0xff]  ;;  %v408_v54 = vld [vmem:[%s2273_s20 + $0x750] sm:$0xff] }
  0xb4   : > { %1966 = vst [vmem:[%s2301_s25 + $0x690] sm:$0xff] %v1574_v55  ;;  %v1578_v3 = vmax.f32 %v1186_v56, 0.0  ;;  %v791_v6 = vmul.f32 %v3137_v33, %v392_v52  ;;  %1967 = vst [vmem:[%s2301_s25 + $0x698] sm:$0xff] %v1575_v60  ;;  %v792_v9 = vmul.f32 %v3137_v33, %v393_v57  ;;  %v793_v10 = vmul.f32 %v3137_v33, %v394_v58  ;;  %v406_v52 = vld [vmem:[%s2273_s20 + $0x740] sm:$0xff] }
  0xb5   : > { %1968 = vst [vmem:[%s2301_s25 + $0x6a0] sm:$0xff] %v1576_v61  ;;  %1969 = vst [vmem:[%s2301_s25 + $0x6a8] sm:$0xff] %v1577_v62  ;;  %v1579_v8 = vmax.f32 %v1187_v63, 0.0  ;;  %v794_v11 = vmul.f32 %v3137_v33, %v395_v59  ;;  %v1188_v12 = vadd.f32 %v3123_v24, %v789_v4  ;;  %v1189_v13 = vadd.f32 %v3123_v24, %v790_v5  ;;  %v409_v59 = vld [vmem:[%s2273_s20 + $0x758] sm:$0xff]  ;;  %v410_v60 = vld [vmem:[%s2273_s20 + $0x760] sm:$0xff] }
  0xb6   : > { %1970 = vst [vmem:[%s2301_s25 + $0x6b0] sm:$0xff] %v1578_v3  ;;  %v1190_v14 = vadd.f32 %v3123_v24, %v791_v6  ;;  %v795_v15 = vmul.f32 %v3137_v33, %v396_v2  ;;  %v1191_v16 = vadd.f32 %v3123_v24, %v792_v9  ;;  %v1192_v17 = vadd.f32 %v3123_v24, %v793_v10  ;;  %v411_v61 = vld [vmem:[%s2273_s20 + $0x768] sm:$0xff]  ;;  %v412_v4 = vld [vmem:[%s2273_s20 + $0x770] sm:$0xff]  ;;  %v413_v9 = vld [vmem:[%s2273_s20 + $0x778] sm:$0xff] }
  0xb7   : > { %1971 = vst [vmem:[%s2301_s25 + $0x6b8] sm:$0xff] %v1579_v8  ;;  %v1193_v18 = vadd.f32 %v3123_v24, %v794_v11  ;;  %v796_v19 = vmul.f32 %v3137_v33, %v397_v7  ;;  %v1580_v23 = vmax.f32 %v1188_v12, 0.0  ;;  %v1581_v25 = vmax.f32 %v1189_v13, 0.0 }
  0xb8   : > { %v1582_v48 = vmax.f32 %v1190_v14, 0.0  ;;  %v1194_v51 = vadd.f32 %v3123_v24, %v795_v15  ;;  %v1583_v29 = vmax.f32 %v1191_v16, 0.0  ;;  %v1584_v30 = vmax.f32 %v1192_v17, 0.0 }
  0xb9   : > { %v1585_v31 = vmax.f32 %v1193_v18, 0.0  ;;  %v1195_v32 = vadd.f32 %v3123_v24, %v796_v19  ;;  %1972 = vst [vmem:[%s2301_s25 + $0x6c0] sm:$0xff] %v1580_v23  ;;  %1973 = vst [vmem:[%s2301_s25 + $0x6c8] sm:$0xff] %v1581_v25  ;;  %v797_v36 = vmul.f32 %v3137_v33, %v398_v20  ;;  %v798_v37 = vmul.f32 %v3137_v33, %v399_v21  ;;  %v415_v23 = vld [vmem:[%s2273_s20 + $0x788] sm:$0xff]  ;;  %v416_v25 = vld [vmem:[%s2273_s20 + $0x790] sm:$0xff] }
  0xba   : > { %1974 = vst [vmem:[%s2301_s25 + $0x6d0] sm:$0xff] %v1582_v48  ;;  %v1586_v35 = vmax.f32 %v1194_v51, 0.0  ;;  %v799_v38 = vmul.f32 %v3137_v33, %v400_v22  ;;  %1975 = vst [vmem:[%s2301_s25 + $0x6d8] sm:$0xff] %v1583_v29  ;;  %v800_v41 = vmul.f32 %v3137_v33, %v401_v26  ;;  %v801_v42 = vmul.f32 %v3137_v33, %v402_v27  ;;  %v414_v22 = vld [vmem:[%s2273_s20 + $0x780] sm:$0xff] }
  0xbb   : > { %1976 = vst [vmem:[%s2301_s25 + $0x6e0] sm:$0xff] %v1584_v30  ;;  %1977 = vst [vmem:[%s2301_s25 + $0x6e8] sm:$0xff] %v1585_v31  ;;  %v1587_v40 = vmax.f32 %v1195_v32, 0.0  ;;  %v802_v43 = vmul.f32 %v3137_v33, %v403_v28  ;;  %v1196_v44 = vadd.f32 %v3123_v24, %v797_v36  ;;  %v1197_v45 = vadd.f32 %v3123_v24, %v798_v37  ;;  %v417_v28 = vld [vmem:[%s2273_s20 + $0x798] sm:$0xff]  ;;  %v418_v29 = vld [vmem:[%s2273_s20 + $0x7a0] sm:$0xff] }
  0xbc   : > { %1978 = vst [vmem:[%s2301_s25 + $0x6f0] sm:$0xff] %v1586_v35  ;;  %v1198_v46 = vadd.f32 %v3123_v24, %v799_v38  ;;  %v803_v0 = vmul.f32 %v3137_v33, %v404_v34  ;;  %v1199_v47 = vadd.f32 %v3123_v24, %v800_v41  ;;  %v1200_v49 = vadd.f32 %v3123_v24, %v801_v42  ;;  %v419_v30 = vld [vmem:[%s2273_s20 + $0x7a8] sm:$0xff]  ;;  %v420_v36 = vld [vmem:[%s2273_s20 + $0x7b0] sm:$0xff]  ;;  %v421_v41 = vld [vmem:[%s2273_s20 + $0x7b8] sm:$0xff] }
  0xbd   : > { %1979 = vst [vmem:[%s2301_s25 + $0x6f8] sm:$0xff] %v1587_v40  ;;  %v1201_v50 = vadd.f32 %v3123_v24, %v802_v43  ;;  %v804_v1 = vmul.f32 %v3137_v33, %v405_v39  ;;  %v1588_v55 = vmax.f32 %v1196_v44, 0.0  ;;  %v1589_v56 = vmax.f32 %v1197_v45, 0.0 }
  0xbe   : > { %v1590_v57 = vmax.f32 %v1198_v46, 0.0  ;;  %v1202_v58 = vadd.f32 %v3123_v24, %v803_v0  ;;  %v1591_v62 = vmax.f32 %v1199_v47, 0.0  ;;  %v1592_v63 = vmax.f32 %v1200_v49, 0.0 }
  0xbf   : > { %v1593_v2 = vmax.f32 %v1201_v50, 0.0  ;;  %v1203_v3 = vadd.f32 %v3123_v24, %v804_v1  ;;  %1980 = vst [vmem:[%s2301_s25 + $0x700] sm:$0xff] %v1588_v55  ;;  %1981 = vst [vmem:[%s2301_s25 + $0x708] sm:$0xff] %v1589_v56  ;;  %v805_v6 = vmul.f32 %v3137_v33, %v406_v52  ;;  %v806_v7 = vmul.f32 %v3137_v33, %v407_v53  ;;  %v423_v55 = vld [vmem:[%s2273_s20 + $0x7c8] sm:$0xff]  ;;  %v424_v56 = vld [vmem:[%s2273_s20 + $0x7d0] sm:$0xff] }
  0xc0   : > { %1982 = vst [vmem:[%s2301_s25 + $0x710] sm:$0xff] %v1590_v57  ;;  %v1594_v5 = vmax.f32 %v1202_v58, 0.0  ;;  %v807_v8 = vmul.f32 %v3137_v33, %v408_v54  ;;  %1983 = vst [vmem:[%s2301_s25 + $0x718] sm:$0xff] %v1591_v62  ;;  %v808_v11 = vmul.f32 %v3137_v33, %v409_v59  ;;  %v809_v12 = vmul.f32 %v3137_v33, %v410_v60  ;;  %v422_v54 = vld [vmem:[%s2273_s20 + $0x7c0] sm:$0xff] }
  0xc1   : > { %1984 = vst [vmem:[%s2301_s25 + $0x720] sm:$0xff] %v1592_v63  ;;  %1985 = vst [vmem:[%s2301_s25 + $0x728] sm:$0xff] %v1593_v2  ;;  %v1595_v10 = vmax.f32 %v1203_v3, 0.0  ;;  %v810_v13 = vmul.f32 %v3137_v33, %v411_v61  ;;  %v1204_v14 = vadd.f32 %v3123_v24, %v805_v6  ;;  %v1205_v15 = vadd.f32 %v3123_v24, %v806_v7  ;;  %v425_v61 = vld [vmem:[%s2273_s20 + $0x7d8] sm:$0xff]  ;;  %v426_v62 = vld [vmem:[%s2273_s20 + $0x7e0] sm:$0xff] }
  0xc2   : > { %1986 = vst [vmem:[%s2301_s25 + $0x730] sm:$0xff] %v1594_v5  ;;  %v1206_v16 = vadd.f32 %v3123_v24, %v807_v8  ;;  %v811_v17 = vmul.f32 %v3137_v33, %v412_v4  ;;  %v1207_v18 = vadd.f32 %v3123_v24, %v808_v11  ;;  %v1208_v19 = vadd.f32 %v3123_v24, %v809_v12  ;;  %v427_v63 = vld [vmem:[%s2273_s20 + $0x7e8] sm:$0xff]  ;;  %v428_v6 = vld [vmem:[%s2273_s20 + $0x7f0] sm:$0xff]  ;;  %v429_v11 = vld [vmem:[%s2273_s20 + $0x7f8] sm:$0xff] }
  0xc3   : > { %1987 = vst [vmem:[%s2301_s25 + $0x738] sm:$0xff] %v1595_v10  ;;  %v1209_v20 = vadd.f32 %v3123_v24, %v810_v13  ;;  %v812_v21 = vmul.f32 %v3137_v33, %v413_v9  ;;  %v1596_v48 = vmax.f32 %v1204_v14, 0.0  ;;  %v1597_v51 = vmax.f32 %v1205_v15, 0.0 }
  0xc4   : > { %v1598_v26 = vmax.f32 %v1206_v16, 0.0  ;;  %v1210_v27 = vadd.f32 %v3123_v24, %v811_v17  ;;  %v1599_v31 = vmax.f32 %v1207_v18, 0.0  ;;  %v1600_v32 = vmax.f32 %v1208_v19, 0.0 }
  0xc5   : > { %v1601_v34 = vmax.f32 %v1209_v20, 0.0  ;;  %v1211_v35 = vadd.f32 %v3123_v24, %v812_v21  ;;  %1988 = vst [vmem:[%s2301_s25 + $0x740] sm:$0xff] %v1596_v48  ;;  %1989 = vst [vmem:[%s2301_s25 + $0x748] sm:$0xff] %v1597_v51  ;;  %v813_v38 = vmul.f32 %v3137_v33, %v414_v22  ;;  %v814_v39 = vmul.f32 %v3137_v33, %v415_v23  ;;  %v431_v48 = vld [vmem:[%s2273_s20 + $0x808] sm:$0xff]  ;;  %v432_v51 = vld [vmem:[%s2273_s20 + $0x810] sm:$0xff] }
  0xc6   : > { %1990 = vst [vmem:[%s2301_s25 + $0x750] sm:$0xff] %v1598_v26  ;;  %v1602_v37 = vmax.f32 %v1210_v27, 0.0  ;;  %v815_v40 = vmul.f32 %v3137_v33, %v416_v25  ;;  %1991 = vst [vmem:[%s2301_s25 + $0x758] sm:$0xff] %v1599_v31  ;;  %v816_v43 = vmul.f32 %v3137_v33, %v417_v28  ;;  %v817_v44 = vmul.f32 %v3137_v33, %v418_v29  ;;  %v430_v25 = vld [vmem:[%s2273_s20 + $0x800] sm:$0xff] }
  0xc7   : > { %1992 = vst [vmem:[%s2301_s25 + $0x760] sm:$0xff] %v1600_v32  ;;  %1993 = vst [vmem:[%s2301_s25 + $0x768] sm:$0xff] %v1601_v34  ;;  %v1603_v42 = vmax.f32 %v1211_v35, 0.0  ;;  %v818_v45 = vmul.f32 %v3137_v33, %v419_v30  ;;  %v1212_v46 = vadd.f32 %v3123_v24, %v813_v38  ;;  %v1213_v0 = vadd.f32 %v3123_v24, %v814_v39  ;;  %v433_v30 = vld [vmem:[%s2273_s20 + $0x818] sm:$0xff]  ;;  %v434_v31 = vld [vmem:[%s2273_s20 + $0x820] sm:$0xff] }
  0xc8   : > { %1994 = vst [vmem:[%s2301_s25 + $0x770] sm:$0xff] %v1602_v37  ;;  %v1214_v47 = vadd.f32 %v3123_v24, %v815_v40  ;;  %v819_v49 = vmul.f32 %v3137_v33, %v420_v36  ;;  %v1215_v50 = vadd.f32 %v3123_v24, %v816_v43  ;;  %v1216_v1 = vadd.f32 %v3123_v24, %v817_v44  ;;  %v435_v32 = vld [vmem:[%s2273_s20 + $0x828] sm:$0xff]  ;;  %v436_v38 = vld [vmem:[%s2273_s20 + $0x830] sm:$0xff]  ;;  %v437_v43 = vld [vmem:[%s2273_s20 + $0x838] sm:$0xff] }
  0xc9   : > { %1995 = vst [vmem:[%s2301_s25 + $0x778] sm:$0xff] %v1603_v42  ;;  %v1217_v52 = vadd.f32 %v3123_v24, %v818_v45  ;;  %v820_v53 = vmul.f32 %v3137_v33, %v421_v41  ;;  %v1604_v57 = vmax.f32 %v1212_v46, 0.0  ;;  %v1605_v58 = vmax.f32 %v1213_v0, 0.0 }
  0xca   : > { %v1606_v59 = vmax.f32 %v1214_v47, 0.0  ;;  %v1218_v60 = vadd.f32 %v3123_v24, %v819_v49  ;;  %v1607_v2 = vmax.f32 %v1215_v50, 0.0  ;;  %v1608_v3 = vmax.f32 %v1216_v1, 0.0 }
  0xcb   : > { %v1609_v4 = vmax.f32 %v1217_v52, 0.0  ;;  %v1219_v5 = vadd.f32 %v3123_v24, %v820_v53  ;;  %1996 = vst [vmem:[%s2301_s25 + $0x780] sm:$0xff] %v1604_v57  ;;  %1997 = vst [vmem:[%s2301_s25 + $0x788] sm:$0xff] %v1605_v58  ;;  %v821_v8 = vmul.f32 %v3137_v33, %v422_v54  ;;  %v822_v9 = vmul.f32 %v3137_v33, %v423_v55  ;;  %v439_v57 = vld [vmem:[%s2273_s20 + $0x848] sm:$0xff]  ;;  %v440_v58 = vld [vmem:[%s2273_s20 + $0x850] sm:$0xff] }
  0xcc   : > { %1998 = vst [vmem:[%s2301_s25 + $0x790] sm:$0xff] %v1606_v59  ;;  %v1610_v7 = vmax.f32 %v1218_v60, 0.0  ;;  %v823_v10 = vmul.f32 %v3137_v33, %v424_v56  ;;  %1999 = vst [vmem:[%s2301_s25 + $0x798] sm:$0xff] %v1607_v2  ;;  %v824_v13 = vmul.f32 %v3137_v33, %v425_v61  ;;  %v825_v14 = vmul.f32 %v3137_v33, %v426_v62  ;;  %v438_v56 = vld [vmem:[%s2273_s20 + $0x840] sm:$0xff] }
  0xcd   : > { %2000 = vst [vmem:[%s2301_s25 + $0x7a0] sm:$0xff] %v1608_v3  ;;  %2001 = vst [vmem:[%s2301_s25 + $0x7a8] sm:$0xff] %v1609_v4  ;;  %v1611_v12 = vmax.f32 %v1219_v5, 0.0  ;;  %v826_v15 = vmul.f32 %v3137_v33, %v427_v63  ;;  %v1220_v16 = vadd.f32 %v3123_v24, %v821_v8  ;;  %v1221_v17 = vadd.f32 %v3123_v24, %v822_v9  ;;  %v441_v63 = vld [vmem:[%s2273_s20 + $0x858] sm:$0xff]  ;;  %v442_v2 = vld [vmem:[%s2273_s20 + $0x860] sm:$0xff] }
  0xce   : > { %2002 = vst [vmem:[%s2301_s25 + $0x7b0] sm:$0xff] %v1610_v7  ;;  %v1222_v18 = vadd.f32 %v3123_v24, %v823_v10  ;;  %v827_v19 = vmul.f32 %v3137_v33, %v428_v6  ;;  %v1223_v20 = vadd.f32 %v3123_v24, %v824_v13  ;;  %v1224_v21 = vadd.f32 %v3123_v24, %v825_v14  ;;  %v443_v3 = vld [vmem:[%s2273_s20 + $0x868] sm:$0xff]  ;;  %v444_v8 = vld [vmem:[%s2273_s20 + $0x870] sm:$0xff]  ;;  %v445_v13 = vld [vmem:[%s2273_s20 + $0x878] sm:$0xff] }
  0xcf   : > { %2003 = vst [vmem:[%s2301_s25 + $0x7b8] sm:$0xff] %v1611_v12  ;;  %v1225_v22 = vadd.f32 %v3123_v24, %v826_v15  ;;  %v828_v23 = vmul.f32 %v3137_v33, %v429_v11  ;;  %v1612_v26 = vmax.f32 %v1220_v16, 0.0  ;;  %v1613_v27 = vmax.f32 %v1221_v17, 0.0 }
  0xd0   : > { %v1614_v28 = vmax.f32 %v1222_v18, 0.0  ;;  %v1226_v29 = vadd.f32 %v3123_v24, %v827_v19  ;;  %v1615_v34 = vmax.f32 %v1223_v20, 0.0  ;;  %v1616_v35 = vmax.f32 %v1224_v21, 0.0 }
  0xd1   : > { %v1617_v36 = vmax.f32 %v1225_v22, 0.0  ;;  %v1227_v37 = vadd.f32 %v3123_v24, %v828_v23  ;;  %2004 = vst [vmem:[%s2301_s25 + $0x7c0] sm:$0xff] %v1612_v26  ;;  %2005 = vst [vmem:[%s2301_s25 + $0x7c8] sm:$0xff] %v1613_v27  ;;  %v829_v40 = vmul.f32 %v3137_v33, %v430_v25  ;;  %v830_v41 = vmul.f32 %v3137_v33, %v431_v48  ;;  %v447_v26 = vld [vmem:[%s2273_s20 + $0x888] sm:$0xff]  ;;  %v448_v27 = vld [vmem:[%s2273_s20 + $0x890] sm:$0xff] }
  0xd2   : > { %2006 = vst [vmem:[%s2301_s25 + $0x7d0] sm:$0xff] %v1614_v28  ;;  %v1618_v39 = vmax.f32 %v1226_v29, 0.0  ;;  %v831_v42 = vmul.f32 %v3137_v33, %v432_v51  ;;  %2007 = vst [vmem:[%s2301_s25 + $0x7d8] sm:$0xff] %v1615_v34  ;;  %v832_v45 = vmul.f32 %v3137_v33, %v433_v30  ;;  %v833_v46 = vmul.f32 %v3137_v33, %v434_v31  ;;  %v446_v51 = vld [vmem:[%s2273_s20 + $0x880] sm:$0xff] }
  0xd3   : > { %2008 = vst [vmem:[%s2301_s25 + $0x7e0] sm:$0xff] %v1616_v35  ;;  %2009 = vst [vmem:[%s2301_s25 + $0x7e8] sm:$0xff] %v1617_v36  ;;  %v1619_v44 = vmax.f32 %v1227_v37, 0.0  ;;  %v834_v0 = vmul.f32 %v3137_v33, %v435_v32  ;;  %v1228_v47 = vadd.f32 %v3123_v24, %v829_v40  ;;  %v1229_v49 = vadd.f32 %v3123_v24, %v830_v41  ;;  %v449_v32 = vld [vmem:[%s2273_s20 + $0x898] sm:$0xff]  ;;  %v450_v34 = vld [vmem:[%s2273_s20 + $0x8a0] sm:$0xff] }
  0xd4   : > { %2010 = vst [vmem:[%s2301_s25 + $0x7f0] sm:$0xff] %v1618_v39  ;;  %v1230_v50 = vadd.f32 %v3123_v24, %v831_v42  ;;  %v835_v1 = vmul.f32 %v3137_v33, %v436_v38  ;;  %v1231_v52 = vadd.f32 %v3123_v24, %v832_v45  ;;  %v1232_v53 = vadd.f32 %v3123_v24, %v833_v46  ;;  %v451_v35 = vld [vmem:[%s2273_s20 + $0x8a8] sm:$0xff]  ;;  %v452_v40 = vld [vmem:[%s2273_s20 + $0x8b0] sm:$0xff]  ;;  %v453_v45 = vld [vmem:[%s2273_s20 + $0x8b8] sm:$0xff] }
  0xd5   : > { %2011 = vst [vmem:[%s2301_s25 + $0x7f8] sm:$0xff] %v1619_v44  ;;  %v1233_v54 = vadd.f32 %v3123_v24, %v834_v0  ;;  %v836_v55 = vmul.f32 %v3137_v33, %v437_v43  ;;  %v1620_v59 = vmax.f32 %v1228_v47, 0.0  ;;  %v1621_v60 = vmax.f32 %v1229_v49, 0.0 }
  0xd6   : > { %v1622_v61 = vmax.f32 %v1230_v50, 0.0  ;;  %v1234_v62 = vadd.f32 %v3123_v24, %v835_v1  ;;  %v1623_v4 = vmax.f32 %v1231_v52, 0.0  ;;  %v1624_v5 = vmax.f32 %v1232_v53, 0.0 }
  0xd7   : > { %v1625_v6 = vmax.f32 %v1233_v54, 0.0  ;;  %v1235_v7 = vadd.f32 %v3123_v24, %v836_v55  ;;  %2012 = vst [vmem:[%s2301_s25 + $0x800] sm:$0xff] %v1620_v59  ;;  %2013 = vst [vmem:[%s2301_s25 + $0x808] sm:$0xff] %v1621_v60  ;;  %v837_v10 = vmul.f32 %v3137_v33, %v438_v56  ;;  %v838_v11 = vmul.f32 %v3137_v33, %v439_v57  ;;  %v455_v59 = vld [vmem:[%s2273_s20 + $0x8c8] sm:$0xff]  ;;  %v456_v60 = vld [vmem:[%s2273_s20 + $0x8d0] sm:$0xff] }
  0xd8   : > { %2014 = vst [vmem:[%s2301_s25 + $0x810] sm:$0xff] %v1622_v61  ;;  %v1626_v9 = vmax.f32 %v1234_v62, 0.0  ;;  %v839_v12 = vmul.f32 %v3137_v33, %v440_v58  ;;  %2015 = vst [vmem:[%s2301_s25 + $0x818] sm:$0xff] %v1623_v4  ;;  %v840_v15 = vmul.f32 %v3137_v33, %v441_v63  ;;  %v841_v16 = vmul.f32 %v3137_v33, %v442_v2  ;;  %v454_v58 = vld [vmem:[%s2273_s20 + $0x8c0] sm:$0xff] }
  0xd9   : > { %2016 = vst [vmem:[%s2301_s25 + $0x820] sm:$0xff] %v1624_v5  ;;  %2017 = vst [vmem:[%s2301_s25 + $0x828] sm:$0xff] %v1625_v6  ;;  %v1627_v14 = vmax.f32 %v1235_v7, 0.0  ;;  %v842_v17 = vmul.f32 %v3137_v33, %v443_v3  ;;  %v1236_v18 = vadd.f32 %v3123_v24, %v837_v10  ;;  %v1237_v19 = vadd.f32 %v3123_v24, %v838_v11  ;;  %v457_v3 = vld [vmem:[%s2273_s20 + $0x8d8] sm:$0xff]  ;;  %v458_v4 = vld [vmem:[%s2273_s20 + $0x8e0] sm:$0xff] }
  0xda   : > { %2018 = vst [vmem:[%s2301_s25 + $0x830] sm:$0xff] %v1626_v9  ;;  %v1238_v20 = vadd.f32 %v3123_v24, %v839_v12  ;;  %v843_v21 = vmul.f32 %v3137_v33, %v444_v8  ;;  %v1239_v22 = vadd.f32 %v3123_v24, %v840_v15  ;;  %v1240_v23 = vadd.f32 %v3123_v24, %v841_v16  ;;  %v459_v5 = vld [vmem:[%s2273_s20 + $0x8e8] sm:$0xff]  ;;  %v460_v10 = vld [vmem:[%s2273_s20 + $0x8f0] sm:$0xff]  ;;  %v461_v15 = vld [vmem:[%s2273_s20 + $0x8f8] sm:$0xff] }
  0xdb   : > { %2019 = vst [vmem:[%s2301_s25 + $0x838] sm:$0xff] %v1627_v14  ;;  %v1241_v25 = vadd.f32 %v3123_v24, %v842_v17  ;;  %v844_v48 = vmul.f32 %v3137_v33, %v445_v13  ;;  %v1628_v28 = vmax.f32 %v1236_v18, 0.0  ;;  %v1629_v29 = vmax.f32 %v1237_v19, 0.0 }
  0xdc   : > { %v1630_v30 = vmax.f32 %v1238_v20, 0.0  ;;  %v1242_v31 = vadd.f32 %v3123_v24, %v843_v21  ;;  %v1631_v36 = vmax.f32 %v1239_v22, 0.0  ;;  %v1632_v37 = vmax.f32 %v1240_v23, 0.0 }
  0xdd   : > { %v1633_v38 = vmax.f32 %v1241_v25, 0.0  ;;  %v1243_v39 = vadd.f32 %v3123_v24, %v844_v48  ;;  %2020 = vst [vmem:[%s2301_s25 + $0x840] sm:$0xff] %v1628_v28  ;;  %2021 = vst [vmem:[%s2301_s25 + $0x848] sm:$0xff] %v1629_v29  ;;  %v845_v42 = vmul.f32 %v3137_v33, %v446_v51  ;;  %v846_v43 = vmul.f32 %v3137_v33, %v447_v26  ;;  %v463_v28 = vld [vmem:[%s2273_s20 + $0x908] sm:$0xff]  ;;  %v464_v29 = vld [vmem:[%s2273_s20 + $0x910] sm:$0xff] }
  0xde   : > { %2022 = vst [vmem:[%s2301_s25 + $0x850] sm:$0xff] %v1630_v30  ;;  %v1634_v41 = vmax.f32 %v1242_v31, 0.0  ;;  %v847_v44 = vmul.f32 %v3137_v33, %v448_v27  ;;  %2023 = vst [vmem:[%s2301_s25 + $0x858] sm:$0xff] %v1631_v36  ;;  %v848_v0 = vmul.f32 %v3137_v33, %v449_v32  ;;  %v849_v47 = vmul.f32 %v3137_v33, %v450_v34  ;;  %v462_v27 = vld [vmem:[%s2273_s20 + $0x900] sm:$0xff] }
  0xdf   : > { %2024 = vst [vmem:[%s2301_s25 + $0x860] sm:$0xff] %v1632_v37  ;;  %2025 = vst [vmem:[%s2301_s25 + $0x868] sm:$0xff] %v1633_v38  ;;  %v1635_v46 = vmax.f32 %v1243_v39, 0.0  ;;  %v850_v49 = vmul.f32 %v3137_v33, %v451_v35  ;;  %v1244_v50 = vadd.f32 %v3123_v24, %v845_v42  ;;  %v1245_v1 = vadd.f32 %v3123_v24, %v846_v43  ;;  %v465_v35 = vld [vmem:[%s2273_s20 + $0x918] sm:$0xff]  ;;  %v466_v36 = vld [vmem:[%s2273_s20 + $0x920] sm:$0xff] }
  0xe0   : > { %2026 = vst [vmem:[%s2301_s25 + $0x870] sm:$0xff] %v1634_v41  ;;  %v1246_v52 = vadd.f32 %v3123_v24, %v847_v44  ;;  %v851_v53 = vmul.f32 %v3137_v33, %v452_v40  ;;  %v1247_v54 = vadd.f32 %v3123_v24, %v848_v0  ;;  %v1248_v55 = vadd.f32 %v3123_v24, %v849_v47  ;;  %v467_v37 = vld [vmem:[%s2273_s20 + $0x928] sm:$0xff]  ;;  %v468_v42 = vld [vmem:[%s2273_s20 + $0x930] sm:$0xff]  ;;  %v469_v0 = vld [vmem:[%s2273_s20 + $0x938] sm:$0xff] }
  0xe1   : > { %2027 = vst [vmem:[%s2301_s25 + $0x878] sm:$0xff] %v1635_v46  ;;  %v1249_v56 = vadd.f32 %v3123_v24, %v850_v49  ;;  %v852_v57 = vmul.f32 %v3137_v33, %v453_v45  ;;  %v1636_v61 = vmax.f32 %v1244_v50, 0.0  ;;  %v1637_v62 = vmax.f32 %v1245_v1, 0.0 }
  0xe2   : > { %v1638_v63 = vmax.f32 %v1246_v52, 0.0  ;;  %v1250_v2 = vadd.f32 %v3123_v24, %v851_v53  ;;  %v1639_v6 = vmax.f32 %v1247_v54, 0.0  ;;  %v1640_v7 = vmax.f32 %v1248_v55, 0.0 }
  0xe3   : > { %v1641_v8 = vmax.f32 %v1249_v56, 0.0  ;;  %v1251_v9 = vadd.f32 %v3123_v24, %v852_v57  ;;  %2028 = vst [vmem:[%s2301_s25 + $0x880] sm:$0xff] %v1636_v61  ;;  %2029 = vst [vmem:[%s2301_s25 + $0x888] sm:$0xff] %v1637_v62  ;;  %v853_v12 = vmul.f32 %v3137_v33, %v454_v58  ;;  %v854_v13 = vmul.f32 %v3137_v33, %v455_v59  ;;  %v471_v61 = vld [vmem:[%s2273_s20 + $0x948] sm:$0xff]  ;;  %v472_v62 = vld [vmem:[%s2273_s20 + $0x950] sm:$0xff] }
  0xe4   : > { %2030 = vst [vmem:[%s2301_s25 + $0x890] sm:$0xff] %v1638_v63  ;;  %v1642_v11 = vmax.f32 %v1250_v2, 0.0  ;;  %v855_v14 = vmul.f32 %v3137_v33, %v456_v60  ;;  %2031 = vst [vmem:[%s2301_s25 + $0x898] sm:$0xff] %v1639_v6  ;;  %v856_v17 = vmul.f32 %v3137_v33, %v457_v3  ;;  %v857_v18 = vmul.f32 %v3137_v33, %v458_v4  ;;  %v470_v60 = vld [vmem:[%s2273_s20 + $0x940] sm:$0xff] }
  0xe5   : > { %2032 = vst [vmem:[%s2301_s25 + $0x8a0] sm:$0xff] %v1640_v7  ;;  %2033 = vst [vmem:[%s2301_s25 + $0x8a8] sm:$0xff] %v1641_v8  ;;  %v1643_v16 = vmax.f32 %v1251_v9, 0.0  ;;  %v858_v19 = vmul.f32 %v3137_v33, %v459_v5  ;;  %v1252_v20 = vadd.f32 %v3123_v24, %v853_v12  ;;  %v1253_v21 = vadd.f32 %v3123_v24, %v854_v13  ;;  %v473_v5 = vld [vmem:[%s2273_s20 + $0x958] sm:$0xff]  ;;  %v474_v6 = vld [vmem:[%s2273_s20 + $0x960] sm:$0xff] }
  0xe6   : > { %2034 = vst [vmem:[%s2301_s25 + $0x8b0] sm:$0xff] %v1642_v11  ;;  %v1254_v22 = vadd.f32 %v3123_v24, %v855_v14  ;;  %v859_v23 = vmul.f32 %v3137_v33, %v460_v10  ;;  %v1255_v25 = vadd.f32 %v3123_v24, %v856_v17  ;;  %v1256_v48 = vadd.f32 %v3123_v24, %v857_v18  ;;  %v475_v7 = vld [vmem:[%s2273_s20 + $0x968] sm:$0xff]  ;;  %v476_v12 = vld [vmem:[%s2273_s20 + $0x970] sm:$0xff]  ;;  %v477_v17 = vld [vmem:[%s2273_s20 + $0x978] sm:$0xff] }
  0xe7   : > { %2035 = vst [vmem:[%s2301_s25 + $0x8b8] sm:$0xff] %v1643_v16  ;;  %v1257_v51 = vadd.f32 %v3123_v24, %v858_v19  ;;  %v860_v26 = vmul.f32 %v3137_v33, %v461_v15  ;;  %v1644_v30 = vmax.f32 %v1252_v20, 0.0  ;;  %v1645_v31 = vmax.f32 %v1253_v21, 0.0 }
  0xe8   : > { %v1646_v32 = vmax.f32 %v1254_v22, 0.0  ;;  %v1258_v34 = vadd.f32 %v3123_v24, %v859_v23  ;;  %v1647_v38 = vmax.f32 %v1255_v25, 0.0  ;;  %v1648_v39 = vmax.f32 %v1256_v48, 0.0 }
  0xe9   : > { %v1649_v40 = vmax.f32 %v1257_v51, 0.0  ;;  %v1259_v41 = vadd.f32 %v3123_v24, %v860_v26  ;;  %2036 = vst [vmem:[%s2301_s25 + $0x8c0] sm:$0xff] %v1644_v30  ;;  %2037 = vst [vmem:[%s2301_s25 + $0x8c8] sm:$0xff] %v1645_v31  ;;  %v861_v44 = vmul.f32 %v3137_v33, %v462_v27  ;;  %v862_v45 = vmul.f32 %v3137_v33, %v463_v28  ;;  %v479_v30 = vld [vmem:[%s2273_s20 + $0x988] sm:$0xff]  ;;  %v480_v31 = vld [vmem:[%s2273_s20 + $0x990] sm:$0xff] }
  0xea   : > { %2038 = vst [vmem:[%s2301_s25 + $0x8d0] sm:$0xff] %v1646_v32  ;;  %v1650_v43 = vmax.f32 %v1258_v34, 0.0  ;;  %v863_v46 = vmul.f32 %v3137_v33, %v464_v29  ;;  %2039 = vst [vmem:[%s2301_s25 + $0x8d8] sm:$0xff] %v1647_v38  ;;  %v864_v49 = vmul.f32 %v3137_v33, %v465_v35  ;;  %v865_v50 = vmul.f32 %v3137_v33, %v466_v36  ;;  %v478_v29 = vld [vmem:[%s2273_s20 + $0x980] sm:$0xff] }
  0xeb   : > { %2040 = vst [vmem:[%s2301_s25 + $0x8e0] sm:$0xff] %v1648_v39  ;;  %2041 = vst [vmem:[%s2301_s25 + $0x8e8] sm:$0xff] %v1649_v40  ;;  %v1651_v47 = vmax.f32 %v1259_v41, 0.0  ;;  %v866_v1 = vmul.f32 %v3137_v33, %v467_v37  ;;  %v1260_v52 = vadd.f32 %v3123_v24, %v861_v44  ;;  %v1261_v53 = vadd.f32 %v3123_v24, %v862_v45  ;;  %v481_v37 = vld [vmem:[%s2273_s20 + $0x998] sm:$0xff]  ;;  %v482_v38 = vld [vmem:[%s2273_s20 + $0x9a0] sm:$0xff] }
  0xec   : > { %2042 = vst [vmem:[%s2301_s25 + $0x8f0] sm:$0xff] %v1650_v43  ;;  %v1262_v54 = vadd.f32 %v3123_v24, %v863_v46  ;;  %v867_v55 = vmul.f32 %v3137_v33, %v468_v42  ;;  %v1263_v56 = vadd.f32 %v3123_v24, %v864_v49  ;;  %v1264_v57 = vadd.f32 %v3123_v24, %v865_v50  ;;  %v483_v39 = vld [vmem:[%s2273_s20 + $0x9a8] sm:$0xff]  ;;  %v484_v44 = vld [vmem:[%s2273_s20 + $0x9b0] sm:$0xff]  ;;  %v485_v49 = vld [vmem:[%s2273_s20 + $0x9b8] sm:$0xff] }
  0xed   : > { %2043 = vst [vmem:[%s2301_s25 + $0x8f8] sm:$0xff] %v1651_v47  ;;  %v1265_v58 = vadd.f32 %v3123_v24, %v866_v1  ;;  %v868_v59 = vmul.f32 %v3137_v33, %v469_v0  ;;  %v1652_v63 = vmax.f32 %v1260_v52, 0.0  ;;  %v1653_v2 = vmax.f32 %v1261_v53, 0.0 }
  0xee   : > { %v1654_v3 = vmax.f32 %v1262_v54, 0.0  ;;  %v1266_v4 = vadd.f32 %v3123_v24, %v867_v55  ;;  %v1655_v8 = vmax.f32 %v1263_v56, 0.0  ;;  %v1656_v9 = vmax.f32 %v1264_v57, 0.0 }
  0xef   : > { %v1657_v10 = vmax.f32 %v1265_v58, 0.0  ;;  %v1267_v11 = vadd.f32 %v3123_v24, %v868_v59  ;;  %2044 = vst [vmem:[%s2301_s25 + $0x900] sm:$0xff] %v1652_v63  ;;  %2045 = vst [vmem:[%s2301_s25 + $0x908] sm:$0xff] %v1653_v2  ;;  %v869_v14 = vmul.f32 %v3137_v33, %v470_v60  ;;  %v870_v15 = vmul.f32 %v3137_v33, %v471_v61  ;;  %v3544_v60 = vld [vmem:[%s3888_s2] ss:$0 sm:$0xff]  ;;  %v487_v2 = vld [vmem:[%s2273_s20 + $0x9c8] sm:$0xff] }
  0xf0   : > { %2046 = vst [vmem:[%s2301_s25 + $0x910] sm:$0xff] %v1654_v3  ;;  %v1658_v13 = vmax.f32 %v1266_v4, 0.0  ;;  %v871_v16 = vmul.f32 %v3137_v33, %v472_v62  ;;  %2047 = vst [vmem:[%s2301_s25 + $0x918] sm:$0xff] %v1655_v8  ;;  %v872_v19 = vmul.f32 %v3137_v33, %v473_v5  ;;  %v873_v20 = vmul.f32 %v3137_v33, %v474_v6  ;;  %v486_v63 = vld [vmem:[%s2273_s20 + $0x9c0] sm:$0xff]  ;;  %v488_v3 = vld [vmem:[%s2273_s20 + $0x9d0] sm:$0xff] }
  0xf1   : > { %2048 = vst [vmem:[%s2301_s25 + $0x920] sm:$0xff] %v1656_v9  ;;  %2049 = vst [vmem:[%s2301_s25 + $0x928] sm:$0xff] %v1657_v10  ;;  %v1659_v18 = vmax.f32 %v1267_v11, 0.0  ;;  %v874_v21 = vmul.f32 %v3137_v33, %v475_v7  ;;  %v1268_v22 = vadd.f32 %v3123_v24, %v869_v14  ;;  %v1269_v23 = vadd.f32 %v3123_v24, %v870_v15  ;;  %v489_v7 = vld [vmem:[%s2273_s20 + $0x9d8] sm:$0xff]  ;;  %v490_v8 = vld [vmem:[%s2273_s20 + $0x9e0] sm:$0xff] }
  0xf2   : > { %2050 = vst [vmem:[%s2301_s25 + $0x930] sm:$0xff] %v1658_v13  ;;  %v1270_v25 = vadd.f32 %v3123_v24, %v871_v16  ;;  %v875_v48 = vmul.f32 %v3137_v33, %v476_v12  ;;  %v1271_v51 = vadd.f32 %v3123_v24, %v872_v19  ;;  %v1272_v26 = vadd.f32 %v3123_v24, %v873_v20  ;;  %v491_v9 = vld [vmem:[%s2273_s20 + $0x9e8] sm:$0xff]  ;;  %v492_v13 = vld [vmem:[%s2273_s20 + $0x9f0] sm:$0xff]  ;;  %v3563_v15 = vld [vmem:[%s3887_s1] ss:$0 sm:$0xff] }
  0xf3   : > { %2051 = vst [vmem:[%s2301_s25 + $0x938] sm:$0xff] %v1659_v18  ;;  %v1273_v27 = vadd.f32 %v3123_v24, %v874_v21  ;;  %v876_v28 = vmul.f32 %v3137_v33, %v477_v17  ;;  %v1660_v32 = vmax.f32 %v1268_v22, 0.0  ;;  %v1661_v34 = vmax.f32 %v1269_v23, 0.0  ;;  %v493_v19 = vld [vmem:[%s2273_s20 + $0x9f8] sm:$0xff] }
  0xf4   : > { %v1662_v35 = vmax.f32 %v1270_v25, 0.0  ;;  %v1274_v36 = vadd.f32 %v3123_v24, %v875_v48  ;;  %v1663_v40 = vmax.f32 %v1271_v51, 0.0  ;;  %v1664_v41 = vmax.f32 %v1272_v26, 0.0 }
  0xf5   : > { %v1665_v42 = vmax.f32 %v1273_v27, 0.0  ;;  %v1275_v43 = vadd.f32 %v3123_v24, %v876_v28  ;;  %2052 = vst [vmem:[%s2301_s25 + $0x940] sm:$0xff] %v1660_v32  ;;  %2053 = vst [vmem:[%s2301_s25 + $0x948] sm:$0xff] %v1661_v34  ;;  %v877_v46 = vmul.f32 %v3137_v33, %v478_v29  ;;  %v878_v0 = vmul.f32 %v3137_v33, %v479_v30  ;;  %v495_v32 = vld [vmem:[%s2273_s20 + $0xa08] sm:$0xff]  ;;  %v496_v34 = vld [vmem:[%s2273_s20 + $0xa10] sm:$0xff] }
  0xf6   : > { %2054 = vst [vmem:[%s2301_s25 + $0x950] sm:$0xff] %v1662_v35  ;;  %v1666_v45 = vmax.f32 %v1274_v36, 0.0  ;;  %v879_v47 = vmul.f32 %v3137_v33, %v480_v31  ;;  %2055 = vst [vmem:[%s2301_s25 + $0x958] sm:$0xff] %v1663_v40  ;;  %v880_v1 = vmul.f32 %v3137_v33, %v481_v37  ;;  %v881_v52 = vmul.f32 %v3137_v33, %v482_v38  ;;  %v494_v31 = vld [vmem:[%s2273_s20 + $0xa00] sm:$0xff] }
  0xf7   : > { %2056 = vst [vmem:[%s2301_s25 + $0x960] sm:$0xff] %v1664_v41  ;;  %2057 = vst [vmem:[%s2301_s25 + $0x968] sm:$0xff] %v1665_v42  ;;  %v1667_v50 = vmax.f32 %v1275_v43, 0.0  ;;  %v882_v53 = vmul.f32 %v3137_v33, %v483_v39  ;;  %v1276_v54 = vadd.f32 %v3123_v24, %v877_v46  ;;  %v1277_v55 = vadd.f32 %v3123_v24, %v878_v0  ;;  %v497_v39 = vld [vmem:[%s2273_s20 + $0xa18] sm:$0xff]  ;;  %v498_v40 = vld [vmem:[%s2273_s20 + $0xa20] sm:$0xff] }
  0xf8   : > { %2058 = vst [vmem:[%s2301_s25 + $0x970] sm:$0xff] %v1666_v45  ;;  %v1278_v56 = vadd.f32 %v3123_v24, %v879_v47  ;;  %v883_v57 = vmul.f32 %v3137_v33, %v484_v44  ;;  %v1279_v58 = vadd.f32 %v3123_v24, %v880_v1  ;;  %v1280_v59 = vadd.f32 %v3123_v24, %v881_v52  ;;  %v499_v41 = vld [vmem:[%s2273_s20 + $0xa28] sm:$0xff]  ;;  %v500_v46 = vld [vmem:[%s2273_s20 + $0xa30] sm:$0xff]  ;;  %v501_v1 = vld [vmem:[%s2273_s20 + $0xa38] sm:$0xff] }
  0xf9   : > { %2059 = vst [vmem:[%s2301_s25 + $0x978] sm:$0xff] %v1667_v50  ;;  %v1281_v61 = vadd.f32 %v3544_v60, %v882_v53  ;;  %v884_v62 = vmul.f32 %v3137_v33, %v485_v49  ;;  %v1668_v4 = vmax.f32 %v1276_v54, 0.0  ;;  %v1669_v5 = vmax.f32 %v1277_v55, 0.0 }
  0xfa   : > { %v1670_v6 = vmax.f32 %v1278_v56, 0.0  ;;  %v1282_v24 = vadd.f32 %v3544_v60, %v883_v57  ;;  %v1671_v10 = vmax.f32 %v1279_v58, 0.0  ;;  %v1672_v33 = vmax.f32 %v1280_v59, 0.0 }
  0xfb   : > { %v1673_v11 = vmax.f32 %v1281_v61, 0.0  ;;  %v1283_v12 = vadd.f32 %v3544_v60, %v884_v62  ;;  %2060 = vst [vmem:[%s2301_s25 + $0x980] sm:$0xff] %v1668_v4  ;;  %2061 = vst [vmem:[%s2301_s25 + $0x988] sm:$0xff] %v1669_v5  ;;  %v885_v16 = vmul.f32 %v3563_v15, %v486_v63  ;;  %v886_v17 = vmul.f32 %v3563_v15, %v487_v2  ;;  %v503_v4 = vld [vmem:[%s2273_s20 + $0xa48] sm:$0xff]  ;;  %v504_v5 = vld [vmem:[%s2273_s20 + $0xa50] sm:$0xff] }
  0xfc   : > { %2062 = vst [vmem:[%s2301_s25 + $0x990] sm:$0xff] %v1670_v6  ;;  %v1674_v14 = vmax.f32 %v1282_v24, 0.0  ;;  %v887_v18 = vmul.f32 %v3563_v15, %v488_v3  ;;  %2063 = vst [vmem:[%s2301_s25 + $0x998] sm:$0xff] %v1671_v10  ;;  %v888_v21 = vmul.f32 %v3563_v15, %v489_v7  ;;  %v889_v22 = vmul.f32 %v3563_v15, %v490_v8  ;;  %v502_v3 = vld [vmem:[%s2273_s20 + $0xa40] sm:$0xff] }
  0xfd   : > { %2064 = vst [vmem:[%s2301_s25 + $0x9a0] sm:$0xff] %v1672_v33  ;;  %2065 = vst [vmem:[%s2301_s25 + $0x9a8] sm:$0xff] %v1673_v11  ;;  %v1675_v20 = vmax.f32 %v1283_v12, 0.0  ;;  %v890_v23 = vmul.f32 %v3563_v15, %v491_v9  ;;  %v1284_v25 = vadd.f32 %v3544_v60, %v885_v16  ;;  %v1285_v48 = vadd.f32 %v3544_v60, %v886_v17  ;;  %v505_v9 = vld [vmem:[%s2273_s20 + $0xa58] sm:$0xff]  ;;  %v506_v10 = vld [vmem:[%s2273_s20 + $0xa60] sm:$0xff] }
  0xfe   : > { %2066 = vst [vmem:[%s2301_s25 + $0x9b0] sm:$0xff] %v1674_v14  ;;  %v1286_v51 = vadd.f32 %v3544_v60, %v887_v18  ;;  %v891_v26 = vmul.f32 %v3563_v15, %v492_v13  ;;  %v1287_v27 = vadd.f32 %v3544_v60, %v888_v21  ;;  %v1288_v28 = vadd.f32 %v3544_v60, %v889_v22  ;;  %v507_v33 = vld [vmem:[%s2273_s20 + $0xa68] sm:$0xff]  ;;  %v508_v16 = vld [vmem:[%s2273_s20 + $0xa70] sm:$0xff]  ;;  %v509_v21 = vld [vmem:[%s2273_s20 + $0xa78] sm:$0xff] }
  0xff   : > { %2067 = vst [vmem:[%s2301_s25 + $0x9b8] sm:$0xff] %v1675_v20  ;;  %v1289_v29 = vadd.f32 %v3544_v60, %v890_v23  ;;  %v892_v30 = vmul.f32 %v3563_v15, %v493_v19  ;;  %v1676_v35 = vmax.f32 %v1284_v25, 0.0  ;;  %v1677_v36 = vmax.f32 %v1285_v48, 0.0 }
 0x100   : > { %v1678_v37 = vmax.f32 %v1286_v51, 0.0  ;;  %v1290_v38 = vadd.f32 %v3544_v60, %v891_v26  ;;  %v1679_v42 = vmax.f32 %v1287_v27, 0.0  ;;  %v1680_v43 = vmax.f32 %v1288_v28, 0.0 }
 0x101   : > { %v1681_v44 = vmax.f32 %v1289_v29, 0.0  ;;  %v1291_v45 = vadd.f32 %v3544_v60, %v892_v30  ;;  %2068 = vst [vmem:[%s2301_s25 + $0x9c0] sm:$0xff] %v1676_v35  ;;  %2069 = vst [vmem:[%s2301_s25 + $0x9c8] sm:$0xff] %v1677_v36  ;;  %v893_v47 = vmul.f32 %v3563_v15, %v494_v31  ;;  %v894_v49 = vmul.f32 %v3563_v15, %v495_v32  ;;  %v511_v35 = vld [vmem:[%s2273_s20 + $0xa88] sm:$0xff]  ;;  %v512_v36 = vld [vmem:[%s2273_s20 + $0xa90] sm:$0xff] }
 0x102   : > { %2070 = vst [vmem:[%s2301_s25 + $0x9d0] sm:$0xff] %v1678_v37  ;;  %v1682_v0 = vmax.f32 %v1290_v38, 0.0  ;;  %v895_v50 = vmul.f32 %v3563_v15, %v496_v34  ;;  %2071 = vst [vmem:[%s2301_s25 + $0x9d8] sm:$0xff] %v1679_v42  ;;  %v896_v53 = vmul.f32 %v3563_v15, %v497_v39  ;;  %v897_v54 = vmul.f32 %v3563_v15, %v498_v40  ;;  %v510_v34 = vld [vmem:[%s2273_s20 + $0xa80] sm:$0xff] }
 0x103   : > { %2072 = vst [vmem:[%s2301_s25 + $0x9e0] sm:$0xff] %v1680_v43  ;;  %2073 = vst [vmem:[%s2301_s25 + $0x9e8] sm:$0xff] %v1681_v44  ;;  %v1683_v52 = vmax.f32 %v1291_v45, 0.0  ;;  %v898_v55 = vmul.f32 %v3563_v15, %v499_v41  ;;  %v1292_v56 = vadd.f32 %v3544_v60, %v893_v47  ;;  %v1293_v57 = vadd.f32 %v3544_v60, %v894_v49  ;;  %v513_v41 = vld [vmem:[%s2273_s20 + $0xa98] sm:$0xff]  ;;  %v514_v42 = vld [vmem:[%s2273_s20 + $0xaa0] sm:$0xff] }
 0x104   : > { %2074 = vst [vmem:[%s2301_s25 + $0x9f0] sm:$0xff] %v1682_v0  ;;  %v1294_v58 = vadd.f32 %v3544_v60, %v895_v50  ;;  %v899_v59 = vmul.f32 %v3563_v15, %v500_v46  ;;  %v1295_v61 = vadd.f32 %v3544_v60, %v896_v53  ;;  %v1296_v62 = vadd.f32 %v3544_v60, %v897_v54  ;;  %v515_v43 = vld [vmem:[%s2273_s20 + $0xaa8] sm:$0xff]  ;;  %v516_v47 = vld [vmem:[%s2273_s20 + $0xab0] sm:$0xff]  ;;  %v517_v53 = vld [vmem:[%s2273_s20 + $0xab8] sm:$0xff] }
 0x105   : > { %2075 = vst [vmem:[%s2301_s25 + $0x9f8] sm:$0xff] %v1683_v52  ;;  %v1297_v63 = vadd.f32 %v3544_v60, %v898_v55  ;;  %v900_v2 = vmul.f32 %v3563_v15, %v501_v1  ;;  %v1684_v6 = vmax.f32 %v1292_v56, 0.0  ;;  %v1685_v24 = vmax.f32 %v1293_v57, 0.0 }
 0x106   : > { %v1686_v7 = vmax.f32 %v1294_v58, 0.0  ;;  %v1298_v8 = vadd.f32 %v3544_v60, %v899_v59  ;;  %v1687_v11 = vmax.f32 %v1295_v61, 0.0  ;;  %v1688_v12 = vmax.f32 %v1296_v62, 0.0 }
 0x107   : > { %v1689_v13 = vmax.f32 %v1297_v63, 0.0  ;;  %v1299_v14 = vadd.f32 %v3544_v60, %v900_v2  ;;  %2076 = vst [vmem:[%s2301_s25 + $0xa00] sm:$0xff] %v1684_v6  ;;  %2077 = vst [vmem:[%s2301_s25 + $0xa08] sm:$0xff] %v1685_v24  ;;  %v901_v18 = vmul.f32 %v3563_v15, %v502_v3  ;;  %v902_v19 = vmul.f32 %v3563_v15, %v503_v4  ;;  %v519_v6 = vld [vmem:[%s2273_s20 + $0xac8] sm:$0xff]  ;;  %v520_v24 = vld [vmem:[%s2273_s20 + $0xad0] sm:$0xff] }
 0x108   : > { %2078 = vst [vmem:[%s2301_s25 + $0xa10] sm:$0xff] %v1686_v7  ;;  %v1690_v17 = vmax.f32 %v1298_v8, 0.0  ;;  %v903_v20 = vmul.f32 %v3563_v15, %v504_v5  ;;  %2079 = vst [vmem:[%s2301_s25 + $0xa18] sm:$0xff] %v1687_v11  ;;  %v904_v23 = vmul.f32 %v3563_v15, %v505_v9  ;;  %v905_v25 = vmul.f32 %v3563_v15, %v506_v10  ;;  %v518_v5 = vld [vmem:[%s2273_s20 + $0xac0] sm:$0xff] }
 0x109   : > { %2080 = vst [vmem:[%s2301_s25 + $0xa20] sm:$0xff] %v1688_v12  ;;  %2081 = vst [vmem:[%s2301_s25 + $0xa28] sm:$0xff] %v1689_v13  ;;  %v1691_v22 = vmax.f32 %v1299_v14, 0.0  ;;  %v906_v48 = vmul.f32 %v3563_v15, %v507_v33  ;;  %v1300_v51 = vadd.f32 %v3544_v60, %v901_v18  ;;  %v1301_v26 = vadd.f32 %v3544_v60, %v902_v19  ;;  %v521_v33 = vld [vmem:[%s2273_s20 + $0xad8] sm:$0xff]  ;;  %v522_v11 = vld [vmem:[%s2273_s20 + $0xae0] sm:$0xff] }
 0x10a   : > { %2082 = vst [vmem:[%s2301_s25 + $0xa30] sm:$0xff] %v1690_v17  ;;  %v1302_v27 = vadd.f32 %v3544_v60, %v903_v20  ;;  %v907_v28 = vmul.f32 %v3563_v15, %v508_v16  ;;  %v1303_v29 = vadd.f32 %v3544_v60, %v904_v23  ;;  %v1304_v30 = vadd.f32 %v3544_v60, %v905_v25  ;;  %v523_v12 = vld [vmem:[%s2273_s20 + $0xae8] sm:$0xff]  ;;  %v524_v18 = vld [vmem:[%s2273_s20 + $0xaf0] sm:$0xff]  ;;  %v525_v23 = vld [vmem:[%s2273_s20 + $0xaf8] sm:$0xff] }
 0x10b   : > { %2083 = vst [vmem:[%s2301_s25 + $0xa38] sm:$0xff] %v1691_v22  ;;  %v1305_v31 = vadd.f32 %v3544_v60, %v906_v48  ;;  %v908_v32 = vmul.f32 %v3563_v15, %v509_v21  ;;  %v1692_v37 = vmax.f32 %v1300_v51, 0.0  ;;  %v1693_v38 = vmax.f32 %v1301_v26, 0.0 }
 0x10c   : > { %v1694_v39 = vmax.f32 %v1302_v27, 0.0  ;;  %v1306_v40 = vadd.f32 %v3544_v60, %v907_v28  ;;  %v1695_v44 = vmax.f32 %v1303_v29, 0.0  ;;  %v1696_v45 = vmax.f32 %v1304_v30, 0.0 }
 0x10d   : > { %v1697_v46 = vmax.f32 %v1305_v31, 0.0  ;;  %v1307_v0 = vadd.f32 %v3544_v60, %v908_v32  ;;  %2084 = vst [vmem:[%s2301_s25 + $0xa40] sm:$0xff] %v1692_v37  ;;  %2085 = vst [vmem:[%s2301_s25 + $0xa48] sm:$0xff] %v1693_v38  ;;  %v909_v50 = vmul.f32 %v3563_v15, %v510_v34  ;;  %v910_v1 = vmul.f32 %v3563_v15, %v511_v35  ;;  %v527_v37 = vld [vmem:[%s2273_s20 + $0xb08] sm:$0xff]  ;;  %v528_v38 = vld [vmem:[%s2273_s20 + $0xb10] sm:$0xff] }
 0x10e   : > { %2086 = vst [vmem:[%s2301_s25 + $0xa50] sm:$0xff] %v1694_v39  ;;  %v1698_v49 = vmax.f32 %v1306_v40, 0.0  ;;  %v911_v52 = vmul.f32 %v3563_v15, %v512_v36  ;;  %2087 = vst [vmem:[%s2301_s25 + $0xa58] sm:$0xff] %v1695_v44  ;;  %v912_v55 = vmul.f32 %v3563_v15, %v513_v41  ;;  %v913_v56 = vmul.f32 %v3563_v15, %v514_v42  ;;  %v526_v36 = vld [vmem:[%s2273_s20 + $0xb00] sm:$0xff] }
 0x10f   : > { %2088 = vst [vmem:[%s2301_s25 + $0xa60] sm:$0xff] %v1696_v45  ;;  %2089 = vst [vmem:[%s2301_s25 + $0xa68] sm:$0xff] %v1697_v46  ;;  %v1699_v54 = vmax.f32 %v1307_v0, 0.0  ;;  %v914_v57 = vmul.f32 %v3563_v15, %v515_v43  ;;  %v1308_v58 = vadd.f32 %v3544_v60, %v909_v50  ;;  %v1309_v59 = vadd.f32 %v3544_v60, %v910_v1  ;;  %v529_v43 = vld [vmem:[%s2273_s20 + $0xb18] sm:$0xff]  ;;  %v530_v44 = vld [vmem:[%s2273_s20 + $0xb20] sm:$0xff] }
 0x110   : > { %2090 = vst [vmem:[%s2301_s25 + $0xa70] sm:$0xff] %v1698_v49  ;;  %v1310_v61 = vadd.f32 %v3544_v60, %v911_v52  ;;  %v915_v62 = vmul.f32 %v3563_v15, %v516_v47  ;;  %v1311_v63 = vadd.f32 %v3544_v60, %v912_v55  ;;  %v1312_v2 = vadd.f32 %v3544_v60, %v913_v56  ;;  %v531_v45 = vld [vmem:[%s2273_s20 + $0xb28] sm:$0xff]  ;;  %v532_v50 = vld [vmem:[%s2273_s20 + $0xb30] sm:$0xff]  ;;  %v533_v55 = vld [vmem:[%s2273_s20 + $0xb38] sm:$0xff] }
 0x111   : > { %2091 = vst [vmem:[%s2301_s25 + $0xa78] sm:$0xff] %v1699_v54  ;;  %v1313_v3 = vadd.f32 %v3544_v60, %v914_v57  ;;  %v916_v4 = vmul.f32 %v3563_v15, %v517_v53  ;;  %v1700_v7 = vmax.f32 %v1308_v58, 0.0  ;;  %v1701_v8 = vmax.f32 %v1309_v59, 0.0 }
 0x112   : > { %v1702_v9 = vmax.f32 %v1310_v61, 0.0  ;;  %v1314_v10 = vadd.f32 %v3544_v60, %v915_v62  ;;  %v1703_v13 = vmax.f32 %v1311_v63, 0.0  ;;  %v1704_v14 = vmax.f32 %v1312_v2, 0.0 }
 0x113   : > { %v1705_v16 = vmax.f32 %v1313_v3, 0.0  ;;  %v1315_v17 = vadd.f32 %v3544_v60, %v916_v4  ;;  %2092 = vst [vmem:[%s2301_s25 + $0xa80] sm:$0xff] %v1700_v7  ;;  %2093 = vst [vmem:[%s2301_s25 + $0xa88] sm:$0xff] %v1701_v8  ;;  %v917_v20 = vmul.f32 %v3563_v15, %v518_v5  ;;  %v918_v21 = vmul.f32 %v3563_v15, %v519_v6  ;;  %v535_v7 = vld [vmem:[%s2273_s20 + $0xb48] sm:$0xff]  ;;  %v536_v8 = vld [vmem:[%s2273_s20 + $0xb50] sm:$0xff] }
 0x114   : > { %2094 = vst [vmem:[%s2301_s25 + $0xa90] sm:$0xff] %v1702_v9  ;;  %v1706_v19 = vmax.f32 %v1314_v10, 0.0  ;;  %v919_v22 = vmul.f32 %v3563_v15, %v520_v24  ;;  %2095 = vst [vmem:[%s2301_s25 + $0xa98] sm:$0xff] %v1703_v13  ;;  %v920_v48 = vmul.f32 %v3563_v15, %v521_v33  ;;  %v921_v51 = vmul.f32 %v3563_v15, %v522_v11  ;;  %v534_v24 = vld [vmem:[%s2273_s20 + $0xb40] sm:$0xff] }
 0x115   : > { %2096 = vst [vmem:[%s2301_s25 + $0xaa0] sm:$0xff] %v1704_v14  ;;  %2097 = vst [vmem:[%s2301_s25 + $0xaa8] sm:$0xff] %v1705_v16  ;;  %v1707_v25 = vmax.f32 %v1315_v17, 0.0  ;;  %v922_v26 = vmul.f32 %v3563_v15, %v523_v12  ;;  %v1316_v27 = vadd.f32 %v3544_v60, %v917_v20  ;;  %v1317_v28 = vadd.f32 %v3544_v60, %v918_v21  ;;  %v537_v12 = vld [vmem:[%s2273_s20 + $0xb58] sm:$0xff]  ;;  %v538_v13 = vld [vmem:[%s2273_s20 + $0xb60] sm:$0xff] }
 0x116   : > { %2098 = vst [vmem:[%s2301_s25 + $0xab0] sm:$0xff] %v1706_v19  ;;  %v1318_v29 = vadd.f32 %v3544_v60, %v919_v22  ;;  %v923_v30 = vmul.f32 %v3563_v15, %v524_v18  ;;  %v1319_v31 = vadd.f32 %v3544_v60, %v920_v48  ;;  %v1320_v32 = vadd.f32 %v3544_v60, %v921_v51  ;;  %v539_v14 = vld [vmem:[%s2273_s20 + $0xb68] sm:$0xff]  ;;  %v540_v20 = vld [vmem:[%s2273_s20 + $0xb70] sm:$0xff]  ;;  %v541_v48 = vld [vmem:[%s2273_s20 + $0xb78] sm:$0xff] }
 0x117   : > { %2099 = vst [vmem:[%s2301_s25 + $0xab8] sm:$0xff] %v1707_v25  ;;  %v1321_v34 = vadd.f32 %v3544_v60, %v922_v26  ;;  %v924_v35 = vmul.f32 %v3563_v15, %v525_v23  ;;  %v1708_v39 = vmax.f32 %v1316_v27, 0.0  ;;  %v1709_v40 = vmax.f32 %v1317_v28, 0.0 }
 0x118   : > { %v1710_v41 = vmax.f32 %v1318_v29, 0.0  ;;  %v1322_v42 = vadd.f32 %v3544_v60, %v923_v30  ;;  %v1711_v46 = vmax.f32 %v1319_v31, 0.0  ;;  %v1712_v0 = vmax.f32 %v1320_v32, 0.0 }
 0x119   : > { %v1713_v47 = vmax.f32 %v1321_v34, 0.0  ;;  %v1323_v49 = vadd.f32 %v3544_v60, %v924_v35  ;;  %2100 = vst [vmem:[%s2301_s25 + $0xac0] sm:$0xff] %v1708_v39  ;;  %2101 = vst [vmem:[%s2301_s25 + $0xac8] sm:$0xff] %v1709_v40  ;;  %v925_v52 = vmul.f32 %v3563_v15, %v526_v36  ;;  %v926_v53 = vmul.f32 %v3563_v15, %v527_v37  ;;  %v543_v39 = vld [vmem:[%s2273_s20 + $0xb88] sm:$0xff]  ;;  %v544_v40 = vld [vmem:[%s2273_s20 + $0xb90] sm:$0xff] }
 0x11a   : > { %2102 = vst [vmem:[%s2301_s25 + $0xad0] sm:$0xff] %v1710_v41  ;;  %v1714_v1 = vmax.f32 %v1322_v42, 0.0  ;;  %v927_v54 = vmul.f32 %v3563_v15, %v528_v38  ;;  %2103 = vst [vmem:[%s2301_s25 + $0xad8] sm:$0xff] %v1711_v46  ;;  %v928_v57 = vmul.f32 %v3563_v15, %v529_v43  ;;  %v929_v58 = vmul.f32 %v3563_v15, %v530_v44  ;;  %v542_v38 = vld [vmem:[%s2273_s20 + $0xb80] sm:$0xff] }
 0x11b   : > { %2104 = vst [vmem:[%s2301_s25 + $0xae0] sm:$0xff] %v1712_v0  ;;  %2105 = vst [vmem:[%s2301_s25 + $0xae8] sm:$0xff] %v1713_v47  ;;  %v1715_v56 = vmax.f32 %v1323_v49, 0.0  ;;  %v930_v59 = vmul.f32 %v3563_v15, %v531_v45  ;;  %v1324_v61 = vadd.f32 %v3544_v60, %v925_v52  ;;  %v1325_v62 = vadd.f32 %v3544_v60, %v926_v53  ;;  %v545_v45 = vld [vmem:[%s2273_s20 + $0xb98] sm:$0xff]  ;;  %v546_v46 = vld [vmem:[%s2273_s20 + $0xba0] sm:$0xff] }
 0x11c   : > { %2106 = vst [vmem:[%s2301_s25 + $0xaf0] sm:$0xff] %v1714_v1  ;;  %v1326_v63 = vadd.f32 %v3544_v60, %v927_v54  ;;  %v931_v2 = vmul.f32 %v3563_v15, %v532_v50  ;;  %v1327_v3 = vadd.f32 %v3544_v60, %v928_v57  ;;  %v1328_v4 = vadd.f32 %v3544_v60, %v929_v58  ;;  %v547_v0 = vld [vmem:[%s2273_s20 + $0xba8] sm:$0xff]  ;;  %v548_v52 = vld [vmem:[%s2273_s20 + $0xbb0] sm:$0xff]  ;;  %v549_v57 = vld [vmem:[%s2273_s20 + $0xbb8] sm:$0xff] }
 0x11d   : > { %2107 = vst [vmem:[%s2301_s25 + $0xaf8] sm:$0xff] %v1715_v56  ;;  %v1329_v5 = vadd.f32 %v3544_v60, %v930_v59  ;;  %v932_v6 = vmul.f32 %v3563_v15, %v533_v55  ;;  %v1716_v9 = vmax.f32 %v1324_v61, 0.0  ;;  %v1717_v10 = vmax.f32 %v1325_v62, 0.0 }
 0x11e   : > { %v1718_v33 = vmax.f32 %v1326_v63, 0.0  ;;  %v1330_v11 = vadd.f32 %v3544_v60, %v931_v2  ;;  %v1719_v16 = vmax.f32 %v1327_v3, 0.0  ;;  %v1720_v17 = vmax.f32 %v1328_v4, 0.0 }
 0x11f   : > { %v1721_v18 = vmax.f32 %v1329_v5, 0.0  ;;  %v1331_v19 = vadd.f32 %v3544_v60, %v932_v6  ;;  %2108 = vst [vmem:[%s2301_s25 + $0xb00] sm:$0xff] %v1716_v9  ;;  %2109 = vst [vmem:[%s2301_s25 + $0xb08] sm:$0xff] %v1717_v10  ;;  %v933_v22 = vmul.f32 %v3563_v15, %v534_v24  ;;  %v934_v23 = vmul.f32 %v3563_v15, %v535_v7  ;;  %v551_v9 = vld [vmem:[%s2273_s20 + $0xbc8] sm:$0xff]  ;;  %v552_v10 = vld [vmem:[%s2273_s20 + $0xbd0] sm:$0xff] }
 0x120   : > { %2110 = vst [vmem:[%s2301_s25 + $0xb10] sm:$0xff] %v1718_v33  ;;  %v1722_v21 = vmax.f32 %v1330_v11, 0.0  ;;  %v935_v25 = vmul.f32 %v3563_v15, %v536_v8  ;;  %2111 = vst [vmem:[%s2301_s25 + $0xb18] sm:$0xff] %v1719_v16  ;;  %v936_v26 = vmul.f32 %v3563_v15, %v537_v12  ;;  %v937_v27 = vmul.f32 %v3563_v15, %v538_v13  ;;  %v550_v8 = vld [vmem:[%s2273_s20 + $0xbc0] sm:$0xff] }
 0x121   : > { %2112 = vst [vmem:[%s2301_s25 + $0xb20] sm:$0xff] %v1720_v17  ;;  %2113 = vst [vmem:[%s2301_s25 + $0xb28] sm:$0xff] %v1721_v18  ;;  %v1723_v51 = vmax.f32 %v1331_v19, 0.0  ;;  %v938_v28 = vmul.f32 %v3563_v15, %v539_v14  ;;  %v1332_v29 = vadd.f32 %v3544_v60, %v933_v22  ;;  %v1333_v30 = vadd.f32 %v3544_v60, %v934_v23  ;;  %v553_v14 = vld [vmem:[%s2273_s20 + $0xbd8] sm:$0xff]  ;;  %v554_v16 = vld [vmem:[%s2273_s20 + $0xbe0] sm:$0xff] }
 0x122   : > { %2114 = vst [vmem:[%s2301_s25 + $0xb30] sm:$0xff] %v1722_v21  ;;  %v1334_v31 = vadd.f32 %v3544_v60, %v935_v25  ;;  %v939_v32 = vmul.f32 %v3563_v15, %v540_v20  ;;  %v1335_v34 = vadd.f32 %v3544_v60, %v936_v26  ;;  %v1336_v35 = vadd.f32 %v3544_v60, %v937_v27  ;;  %v555_v17 = vld [vmem:[%s2273_s20 + $0xbe8] sm:$0xff]  ;;  %v556_v22 = vld [vmem:[%s2273_s20 + $0xbf0] sm:$0xff]  ;;  %v557_v26 = vld [vmem:[%s2273_s20 + $0xbf8] sm:$0xff] }
 0x123   : > { %2115 = vst [vmem:[%s2301_s25 + $0xb38] sm:$0xff] %v1723_v51  ;;  %v1337_v36 = vadd.f32 %v3544_v60, %v938_v28  ;;  %v940_v37 = vmul.f32 %v3563_v15, %v541_v48  ;;  %v1724_v41 = vmax.f32 %v1332_v29, 0.0  ;;  %v1725_v42 = vmax.f32 %v1333_v30, 0.0 }
 0x124   : > { %v1726_v43 = vmax.f32 %v1334_v31, 0.0  ;;  %v1338_v44 = vadd.f32 %v3544_v60, %v939_v32  ;;  %v1727_v47 = vmax.f32 %v1335_v34, 0.0  ;;  %v1728_v49 = vmax.f32 %v1336_v35, 0.0 }
 0x125   : > { %v1729_v50 = vmax.f32 %v1337_v36, 0.0  ;;  %v1339_v1 = vadd.f32 %v3544_v60, %v940_v37  ;;  %2116 = vst [vmem:[%s2301_s25 + $0xb40] sm:$0xff] %v1724_v41  ;;  %2117 = vst [vmem:[%s2301_s25 + $0xb48] sm:$0xff] %v1725_v42  ;;  %v941_v54 = vmul.f32 %v3563_v15, %v542_v38  ;;  %v942_v55 = vmul.f32 %v3563_v15, %v543_v39  ;;  %v559_v41 = vld [vmem:[%s2273_s20 + $0xc08] sm:$0xff]  ;;  %v560_v42 = vld [vmem:[%s2273_s20 + $0xc10] sm:$0xff] }
 0x126   : > { %2118 = vst [vmem:[%s2301_s25 + $0xb50] sm:$0xff] %v1726_v43  ;;  %v1730_v53 = vmax.f32 %v1338_v44, 0.0  ;;  %v943_v56 = vmul.f32 %v3563_v15, %v544_v40  ;;  %2119 = vst [vmem:[%s2301_s25 + $0xb58] sm:$0xff] %v1727_v47  ;;  %v944_v59 = vmul.f32 %v3563_v15, %v545_v45  ;;  %v945_v61 = vmul.f32 %v3563_v15, %v546_v46  ;;  %v558_v40 = vld [vmem:[%s2273_s20 + $0xc00] sm:$0xff] }
 0x127   : > { %2120 = vst [vmem:[%s2301_s25 + $0xb60] sm:$0xff] %v1728_v49  ;;  %2121 = vst [vmem:[%s2301_s25 + $0xb68] sm:$0xff] %v1729_v50  ;;  %v1731_v58 = vmax.f32 %v1339_v1, 0.0  ;;  %v946_v62 = vmul.f32 %v3563_v15, %v547_v0  ;;  %v1340_v63 = vadd.f32 %v3544_v60, %v941_v54  ;;  %v1341_v2 = vadd.f32 %v3544_v60, %v942_v55  ;;  %v561_v0 = vld [vmem:[%s2273_s20 + $0xc18] sm:$0xff]  ;;  %v562_v47 = vld [vmem:[%s2273_s20 + $0xc20] sm:$0xff] }
 0x128   : > { %2122 = vst [vmem:[%s2301_s25 + $0xb70] sm:$0xff] %v1730_v53  ;;  %v1342_v3 = vadd.f32 %v3544_v60, %v943_v56  ;;  %v947_v4 = vmul.f32 %v3563_v15, %v548_v52  ;;  %v1343_v5 = vadd.f32 %v3544_v60, %v944_v59  ;;  %v1344_v6 = vadd.f32 %v3544_v60, %v945_v61  ;;  %v563_v49 = vld [vmem:[%s2273_s20 + $0xc28] sm:$0xff]  ;;  %v564_v54 = vld [vmem:[%s2273_s20 + $0xc30] sm:$0xff]  ;;  %v565_v59 = vld [vmem:[%s2273_s20 + $0xc38] sm:$0xff] }
 0x129   : > { %2123 = vst [vmem:[%s2301_s25 + $0xb78] sm:$0xff] %v1731_v58  ;;  %v1345_v24 = vadd.f32 %v3544_v60, %v946_v62  ;;  %v948_v7 = vmul.f32 %v3563_v15, %v549_v57  ;;  %v1732_v33 = vmax.f32 %v1340_v63, 0.0  ;;  %v1733_v11 = vmax.f32 %v1341_v2, 0.0 }
 0x12a   : > { %v1734_v12 = vmax.f32 %v1342_v3, 0.0  ;;  %v1346_v13 = vadd.f32 %v3544_v60, %v947_v4  ;;  %v1735_v18 = vmax.f32 %v1343_v5, 0.0  ;;  %v1736_v19 = vmax.f32 %v1344_v6, 0.0 }
 0x12b   : > { %v1737_v20 = vmax.f32 %v1345_v24, 0.0  ;;  %v1347_v21 = vadd.f32 %v3544_v60, %v948_v7  ;;  %2124 = vst [vmem:[%s2301_s25 + $0xb80] sm:$0xff] %v1732_v33  ;;  %2125 = vst [vmem:[%s2301_s25 + $0xb88] sm:$0xff] %v1733_v11  ;;  %v949_v25 = vmul.f32 %v3563_v15, %v550_v8  ;;  %v950_v48 = vmul.f32 %v3563_v15, %v551_v9 }
 0x12c   : > { %2126 = vst [vmem:[%s2301_s25 + $0xb90] sm:$0xff] %v1734_v12  ;;  %v1738_v23 = vmax.f32 %v1346_v13, 0.0  ;;  %v951_v51 = vmul.f32 %v3563_v15, %v552_v10  ;;  %2127 = vst [vmem:[%s2301_s25 + $0xb98] sm:$0xff] %v1735_v18  ;;  %v952_v28 = vmul.f32 %v3563_v15, %v553_v14  ;;  %v953_v29 = vmul.f32 %v3563_v15, %v554_v16 }
 0x12d   : > { %2128 = vst [vmem:[%s2301_s25 + $0xba0] sm:$0xff] %v1736_v19  ;;  %2129 = vst [vmem:[%s2301_s25 + $0xba8] sm:$0xff] %v1737_v20  ;;  %v1739_v27 = vmax.f32 %v1347_v21, 0.0  ;;  %v954_v30 = vmul.f32 %v3563_v15, %v555_v17  ;;  %v1348_v31 = vadd.f32 %v3544_v60, %v949_v25  ;;  %v1349_v32 = vadd.f32 %v3544_v60, %v950_v48 }
 0x12e   : > { %2130 = vst [vmem:[%s2301_s25 + $0xbb0] sm:$0xff] %v1738_v23  ;;  %v1350_v34 = vadd.f32 %v3544_v60, %v951_v51  ;;  %v955_v35 = vmul.f32 %v3563_v15, %v556_v22  ;;  %v1351_v36 = vadd.f32 %v3544_v60, %v952_v28  ;;  %v1352_v37 = vadd.f32 %v3544_v60, %v953_v29 }
 0x12f   : > { %2131 = vst [vmem:[%s2301_s25 + $0xbb8] sm:$0xff] %v1739_v27  ;;  %v1353_v38 = vadd.f32 %v3544_v60, %v954_v30  ;;  %v956_v39 = vmul.f32 %v3563_v15, %v557_v26  ;;  %v1740_v43 = vmax.f32 %v1348_v31, 0.0  ;;  %v1741_v44 = vmax.f32 %v1349_v32, 0.0 }
 0x130   : > { %v1742_v45 = vmax.f32 %v1350_v34, 0.0  ;;  %v1354_v46 = vadd.f32 %v3544_v60, %v955_v35  ;;  %v1743_v50 = vmax.f32 %v1351_v36, 0.0  ;;  %v1744_v1 = vmax.f32 %v1352_v37, 0.0 }
 0x131   : > { %v1745_v52 = vmax.f32 %v1353_v38, 0.0  ;;  %v1355_v53 = vadd.f32 %v3544_v60, %v956_v39  ;;  %2132 = vst [vmem:[%s2301_s25 + $0xbc0] sm:$0xff] %v1740_v43  ;;  %2133 = vst [vmem:[%s2301_s25 + $0xbc8] sm:$0xff] %v1741_v44  ;;  %v957_v56 = vmul.f32 %v3563_v15, %v558_v40  ;;  %v958_v57 = vmul.f32 %v3563_v15, %v559_v41 }
 0x132   : > { %2134 = vst [vmem:[%s2301_s25 + $0xbd0] sm:$0xff] %v1742_v45  ;;  %v1746_v55 = vmax.f32 %v1354_v46, 0.0  ;;  %v959_v58 = vmul.f32 %v3563_v15, %v560_v42  ;;  %2135 = vst [vmem:[%s2301_s25 + $0xbd8] sm:$0xff] %v1743_v50  ;;  %v960_v62 = vmul.f32 %v3563_v15, %v561_v0  ;;  %v961_v63 = vmul.f32 %v3563_v15, %v562_v47 }
 0x133   : > { %2136 = vst [vmem:[%s2301_s25 + $0xbe0] sm:$0xff] %v1744_v1  ;;  %2137 = vst [vmem:[%s2301_s25 + $0xbe8] sm:$0xff] %v1745_v52  ;;  %v1747_v61 = vmax.f32 %v1355_v53, 0.0  ;;  %v962_v2 = vmul.f32 %v3563_v15, %v563_v49  ;;  %v1356_v3 = vadd.f32 %v3544_v60, %v957_v56  ;;  %v1357_v4 = vadd.f32 %v3544_v60, %v958_v57 }
 0x134   : > { %2138 = vst [vmem:[%s2301_s25 + $0xbf0] sm:$0xff] %v1746_v55  ;;  %v1358_v5 = vadd.f32 %v3544_v60, %v959_v58  ;;  %v963_v6 = vmul.f32 %v3563_v15, %v564_v54  ;;  %v1359_v24 = vadd.f32 %v3544_v60, %v960_v62  ;;  %v1360_v7 = vadd.f32 %v3544_v60, %v961_v63 }
 0x135   : > { %2139 = vst [vmem:[%s2301_s25 + $0xbf8] sm:$0xff] %v1747_v61  ;;  %v1361_v8 = vadd.f32 %v3544_v60, %v962_v2  ;;  %v964_v9 = vmul.f32 %v3563_v15, %v565_v59  ;;  %v1748_v10 = vmax.f32 %v1356_v3, 0.0  ;;  %v1749_v33 = vmax.f32 %v1357_v4, 0.0 }
 0x136   : > { %v1750_v11 = vmax.f32 %v1358_v5, 0.0  ;;  %v1362_v12 = vadd.f32 %v3544_v60, %v963_v6  ;;  %v1751_v13 = vmax.f32 %v1359_v24, 0.0  ;;  %v1752_v14 = vmax.f32 %v1360_v7, 0.0 }
 0x137   : > { %v1753_v16 = vmax.f32 %v1361_v8, 0.0  ;;  %v1363_v17 = vadd.f32 %v3544_v60, %v964_v9  ;;  %2140 = vst [vmem:[%s2301_s25 + $0xc00] sm:$0xff] %v1748_v10  ;;  %2141 = vst [vmem:[%s2301_s25 + $0xc08] sm:$0xff] %v1749_v33 }
 0x138   : > { %2142 = vst [vmem:[%s2301_s25 + $0xc10] sm:$0xff] %v1750_v11  ;;  %v1754_v18 = vmax.f32 %v1362_v12, 0.0  ;;  %2143 = vst [vmem:[%s2301_s25 + $0xc18] sm:$0xff] %v1751_v13 }
 0x139   : > { %2144 = vst [vmem:[%s2301_s25 + $0xc20] sm:$0xff] %v1752_v14  ;;  %2145 = vst [vmem:[%s2301_s25 + $0xc28] sm:$0xff] %v1753_v16  ;;  %v1755_v15 = vmax.f32 %v1363_v17, 0.0 }
 0x13a   : > { %2146 = vst [vmem:[%s2301_s25 + $0xc30] sm:$0xff] %v1754_v18 }
 0x13b   : > { %2147 = vst [vmem:[%s2301_s25 + $0xc38] sm:$0xff] %v1755_v15 }
 0x13c PF: > { %s13_s12 = sadd.s32 1, %s2235_s12  }
 0x13d   : > { %p10_p4 = scmp.ge.s32.totalorder %s13_s12, 6  }
 0x13f   :  { %12 = sbr.rel (!%p10_p4) target bundleno = 1 (0x1), region = 62 }

</bundles_post_ra>
